<compile_context>
chip_gen: v6e
topology: v6e:2x2x1
jax: 0.10.0
libtpu: 0.0.40
codegen_flags: <defaults>
</compile_context>

<pallas_src>
from functools import partial

import numpy as np
import jax
import jax.numpy as jnp
from jax.experimental import pallas as pl
from jax.experimental.pallas import tpu as pltpu

ENC_CH = (16, 32, 64)   # encoder stage channels
DEC_CH = (48, 24)       # decoder_features


# ----------------------------------------------------------------------------
# In-kernel helper: 3x3 "same" conv on a flattened, zero-padded spatial grid.
#
# `xflat` is a (Mpad, Cin) bf16 value holding the padded (H+2, W+2) image
# row-major plus 2 trailing zero rows (so every tap slice stays in bounds);
# each of the 9 taps is then a *contiguous* row slice -> one MXU matmul.
# Rows of `acc` live on the padded-width grid (H, W+2); columns w in {W, W+1}
# are garbage and are either masked (when fed to the next conv) or cropped by
# the wrapper.
# ----------------------------------------------------------------------------
def _accum_conv3x3(xflat, w9_ref, H, W, acc):
    L = H * (W + 2)
    for dy in range(3):
        for dx in range(3):
            off = dy * (W + 2) + dx
            tap = xflat[off:off + L, :]                       # (L, Cin) bf16
            acc = acc + jnp.dot(tap, w9_ref[dy * 3 + dx],
                                preferred_element_type=jnp.float32)
    return acc


def _interior_mask(H, W):
    col = jax.lax.broadcasted_iota(jnp.int32, (H * (W + 2), 1), 0) % (W + 2)
    return col < W


# ----------------------------------------------------------------------------
# Kernels
# ----------------------------------------------------------------------------
def _conv3x3_kernel(x_ref, w_ref, b_ref, o_ref, *, H, W):
    """Fused conv3x3 + folded-BN bias + ReLU for one batch element."""
    L = H * (W + 2)
    Cout = w_ref.shape[-1]
    acc = jnp.zeros((L, Cout), jnp.float32)
    acc = _accum_conv3x3(x_ref[0], w_ref, H, W, acc)
    acc = jnp.maximum(acc + b_ref[...], 0.0)
    o_ref[0] = acc.astype(o_ref.dtype)


def _dec_block_kernel(up_ref, sk_ref, wau_ref, was_ref, ba_ref, wb_ref, bb_ref,
                      o_ref, mid_ref, *, H, W):
    """UNet decoder block: conv-a over [upsampled | skip] (weight-split, no
    concat) -> ReLU -> conv-b -> ReLU, intermediate kept in VMEM scratch."""
    L = H * (W + 2)
    Cmid = wau_ref.shape[-1]
    Cout = wb_ref.shape[-1]
    mid_ref[...] = jnp.zeros_like(mid_ref)            # zero padding border
    interior = _interior_mask(H, W)

    acc = jnp.zeros((L, Cmid), jnp.float32)
    acc = _accum_conv3x3(up_ref[0], wau_ref, H, W, acc)
    acc = _accum_conv3x3(sk_ref[0], was_ref, H, W, acc)
    acc = jnp.maximum(acc + ba_ref[...], 0.0)
    acc = jnp.where(interior, acc, 0.0)               # keep padding zeros clean
    mid_ref[pl.ds(W + 3, L), :] = acc.astype(mid_ref.dtype)

    acc2 = jnp.zeros((L, Cout), jnp.float32)
    acc2 = _accum_conv3x3(mid_ref[...], wb_ref, H, W, acc2)
    acc2 = jnp.maximum(acc2 + bb_ref[...], 0.0)
    o_ref[0] = acc2.astype(o_ref.dtype)


def _dec_block_agl_kernel(up_ref, sk_ref, wau_ref, was_ref, ba_ref,
                          wb_ref, bb_ref, wg_ref, bg_ref,
                          agl_ref, mid_ref, d1_ref, *, H, W):
    """Last decoder block fused with the AGL head conv (Cout=1); only the AGL
    map leaves the kernel -- d1 never round-trips through HBM."""
    L = H * (W + 2)
    Cmid = wau_ref.shape[-1]
    Cd = wb_ref.shape[-1]
    mid_ref[...] = jnp.zeros_like(mid_ref)
    d1_ref[...] = jnp.zeros_like(d1_ref)
    interior = _interior_mask(H, W)

    acc = jnp.zeros((L, Cmid), jnp.float32)
    acc = _accum_conv3x3(up_ref[0], wau_ref, H, W, acc)
    acc = _accum_conv3x3(sk_ref[0], was_ref, H, W, acc)
    acc = jnp.maximum(acc + ba_ref[...], 0.0)
    acc = jnp.where(interior, acc, 0.0)
    mid_ref[pl.ds(W + 3, L), :] = acc.astype(mid_ref.dtype)

    acc2 = jnp.zeros((L, Cd), jnp.float32)
    acc2 = _accum_conv3x3(mid_ref[...], wb_ref, H, W, acc2)
    acc2 = jnp.maximum(acc2 + bb_ref[...], 0.0)
    acc2 = jnp.where(interior, acc2, 0.0)
    d1_ref[pl.ds(W + 3, L), :] = acc2.astype(d1_ref.dtype)

    acc3 = jnp.zeros((L, 1), jnp.float32)
    acc3 = _accum_conv3x3(d1_ref[...], wg_ref, H, W, acc3)
    acc3 = jnp.maximum(acc3 + bg_ref[...], 0.0)
    agl_ref[0] = acc3.astype(agl_ref.dtype)


# ----------------------------------------------------------------------------
# Wrappers around pallas_call
# ----------------------------------------------------------------------------
def _flatten_pad(x):
    """(B,H,W,C) -> (B, (H+2)*(W+2)+2, C): zero 3x3 halo, row-major flat."""
    B, H, W, C = x.shape
    xp = jnp.pad(x, ((0, 0), (1, 1), (1, 1), (0, 0)))
    xf = xp.reshape(B, (H + 2) * (W + 2), C)
    return jnp.pad(xf, ((0, 0), (0, 2), (0, 0)))


def _unflatten_crop(y, H, W):
    """(B, H*(W+2), C) -> (B, H, W, C): drop the 2 garbage columns per row."""
    B, _, C = y.shape
    return y.reshape(B, H, W + 2, C)[:, :, :W, :]


def conv3x3_bn_relu(x, w9, b):
    """x: (B,H,W,Cin) bf16, w9: (9,Cin,Cout) bf16 (BN-folded), b: (1,Cout) f32."""
    B, H, W, Cin = x.shape
    Cout = w9.shape[-1]
    Mpad = (H + 2) * (W + 2) + 2
    L = H * (W + 2)
    out = pl.pallas_call(
        partial(_conv3x3_kernel, H=H, W=W),
        out_shape=jax.ShapeDtypeStruct((B, L, Cout), jnp.bfloat16),
        grid=(B,),
        in_specs=[
            pl.BlockSpec((1, Mpad, Cin), lambda i: (i, 0, 0)),
            pl.BlockSpec((9, Cin, Cout), lambda i: (0, 0, 0)),
            pl.BlockSpec((1, Cout), lambda i: (0, 0)),
        ],
        out_specs=pl.BlockSpec((1, L, Cout), lambda i: (i, 0, 0)),
        compiler_params=pltpu.CompilerParams(dimension_semantics=("parallel",)),
    )(_flatten_pad(x), w9, b)
    return _unflatten_crop(out, H, W)


def unet_dec_block(up, skip, blk):
    wau, was, ba, wb, bb = blk
    B, H, W, Cu = up.shape
    Cs = skip.shape[-1]
    Cmid = wau.shape[-1]
    Cout = wb.shape[-1]
    Mpad = (H + 2) * (W + 2) + 2
    L = H * (W + 2)
    out = pl.pallas_call(
        partial(_dec_block_kernel, H=H, W=W),
        out_shape=jax.ShapeDtypeStruct((B, L, Cout), jnp.bfloat16),
        grid=(B,),
        in_specs=[
            pl.BlockSpec((1, Mpad, Cu), lambda i: (i, 0, 0)),
            pl.BlockSpec((1, Mpad, Cs), lambda i: (i, 0, 0)),
            pl.BlockSpec((9, Cu, Cmid), lambda i: (0, 0, 0)),
            pl.BlockSpec((9, Cs, Cmid), lambda i: (0, 0, 0)),
            pl.BlockSpec((1, Cmid), lambda i: (0, 0)),
            pl.BlockSpec((9, Cmid, Cout), lambda i: (0, 0, 0)),
            pl.BlockSpec((1, Cout), lambda i: (0, 0)),
        ],
        out_specs=pl.BlockSpec((1, L, Cout), lambda i: (i, 0, 0)),
        scratch_shapes=[pltpu.VMEM((Mpad, Cmid), jnp.bfloat16)],
        compiler_params=pltpu.CompilerParams(dimension_semantics=("parallel",)),
    )(_flatten_pad(up), _flatten_pad(skip), wau, was, ba, wb, bb)
    return _unflatten_crop(out, H, W)


def unet_dec_block_with_agl(up, skip, blk, agl_blk):
    wau, was, ba, wb, bb = blk
    wg, bg = agl_blk
    B, H, W, Cu = up.shape
    Cs = skip.shape[-1]
    Cmid = wau.shape[-1]
    Cd = wb.shape[-1]
    Mpad = (H + 2) * (W + 2) + 2
    L = H * (W + 2)
    agl = pl.pallas_call(
        partial(_dec_block_agl_kernel, H=H, W=W),
        out_shape=jax.ShapeDtypeStruct((B, L, 1), jnp.float32),
        grid=(B,),
        in_specs=[
            pl.BlockSpec((1, Mpad, Cu), lambda i: (i, 0, 0)),
            pl.BlockSpec((1, Mpad, Cs), lambda i: (i, 0, 0)),
            pl.BlockSpec((9, Cu, Cmid), lambda i: (0, 0, 0)),
            pl.BlockSpec((9, Cs, Cmid), lambda i: (0, 0, 0)),
            pl.BlockSpec((1, Cmid), lambda i: (0, 0)),
            pl.BlockSpec((9, Cmid, Cd), lambda i: (0, 0, 0)),
            pl.BlockSpec((1, Cd), lambda i: (0, 0)),
            pl.BlockSpec((9, Cd, 1), lambda i: (0, 0, 0)),
            pl.BlockSpec((1, 1), lambda i: (0, 0)),
        ],
        out_specs=pl.BlockSpec((1, L, 1), lambda i: (i, 0, 0)),
        scratch_shapes=[pltpu.VMEM((Mpad, Cmid), jnp.bfloat16),
                        pltpu.VMEM((Mpad, Cd), jnp.bfloat16)],
        compiler_params=pltpu.CompilerParams(dimension_semantics=("parallel",)),
    )(_flatten_pad(up), _flatten_pad(skip), wau, was, ba, wb, bb, wg, bg)
    return _unflatten_crop(agl, H, W)            # (B, H, W, 1) f32


# ----------------------------------------------------------------------------
# Plain-JAX glue (tiny, bandwidth-trivial at these scales)
# ----------------------------------------------------------------------------
def avgpool2x2(x):
    B, H, W, C = x.shape
    x = x.astype(jnp.float32).reshape(B, H // 2, 2, W // 2, 2, C)
    return x.mean(axis=(2, 4)).astype(jnp.bfloat16)


def _interp_matrix(n_in, n_out):
    """Bilinear interpolation matrix, align_corners=True (UpsamplingBilinear2d)."""
    m = np.zeros((n_out, n_in), np.float32)
    if n_in == 1:
        m[:, 0] = 1.0
        return jnp.asarray(m)
    src = np.arange(n_out, dtype=np.float64) * (n_in - 1) / (n_out - 1)
    lo = np.minimum(np.floor(src).astype(np.int64), n_in - 2)
    frac = src - lo
    m[np.arange(n_out), lo] += (1.0 - frac)
    m[np.arange(n_out), lo + 1] += frac
    return jnp.asarray(m)


def upsample2x(x, out_dtype=jnp.bfloat16):
    """2x bilinear upsample (align_corners=True) as two constant-matrix matmuls."""
    B, H, W, C = x.shape
    mh = _interp_matrix(H, 2 * H)
    mw = _interp_matrix(W, 2 * W)
    y = jnp.einsum('ph,bhwc->bpwc', mh, x.astype(jnp.float32))
    z = jnp.einsum('qw,bpwc->bpqc', mw, y)
    return z.astype(out_dtype)


# ----------------------------------------------------------------------------
# Parameters
# ----------------------------------------------------------------------------
def _conv_params(key, cin, cout):
    w = jax.random.normal(key, (3, 3, cin, cout), jnp.float32) * 0.1
    scale = jnp.ones((cout,), jnp.float32)          # folded-BN gamma/sqrt(var)
    bias = jnp.full((cout,), 0.01, jnp.float32)     # folded-BN beta - mean*scale
    return {"w": w, "scale": scale, "bias": bias}


def init_params(key):
    ks = jax.random.split(key, 12)
    p = {
        "enc1": _conv_params(ks[0], 3, ENC_CH[0]),
        "enc2": _conv_params(ks[1], ENC_CH[0], ENC_CH[1]),
        "enc3": _conv_params(ks[2], ENC_CH[1], ENC_CH[2]),
        "dec2a": _conv_params(ks[3], ENC_CH[2] + ENC_CH[1], DEC_CH[0]),
        "dec2b": _conv_params(ks[4], DEC_CH[0], DEC_CH[0]),
        "dec1a": _conv_params(ks[5], DEC_CH[0] + ENC_CH[0], DEC_CH[1]),
        "dec1b": _conv_params(ks[6], DEC_CH[1], DEC_CH[1]),
        "ori_w": jax.random.normal(ks[7], (ENC_CH[2], 3), jnp.float32) * 0.1,
        "ori_b": jnp.full((3,), 0.05, jnp.float32),
        "agl": _conv_params(ks[8], DEC_CH[1], 1),
    }
    return p


def _fold(p):
    """Fold BN scale into weights; return ((9,Cin,Cout) bf16, (1,Cout) f32)."""
    cin, cout = p["w"].shape[2], p["w"].shape[3]
    w = (p["w"] * p["scale"][None, None, None, :]).reshape(9, cin, cout)
    return w.astype(jnp.bfloat16), p["bias"].reshape(1, cout).astype(jnp.float32)


def prepare_params(params):
    w2a, b2a = _fold(params["dec2a"])
    w2b, b2b = _fold(params["dec2b"])
    w1a, b1a = _fold(params["dec1a"])
    w1b, b1b = _fold(params["dec1b"])
    return {
        "enc1": _fold(params["enc1"]),
        "enc2": _fold(params["enc2"]),
        "enc3": _fold(params["enc3"]),
        # first decoder conv's weight split along Cin: [upsampled | skip]
        "dec2": (w2a[:, :ENC_CH[2], :], w2a[:, ENC_CH[2]:, :], b2a, w2b, b2b),
        "dec1": (w1a[:, :DEC_CH[0], :], w1a[:, DEC_CH[0]:, :], b1a, w1b, b1b),
        "agl": _fold(params["agl"]),
        "ori_w": params["ori_w"].astype(jnp.float32),
        "ori_b": params["ori_b"].astype(jnp.float32),
    }


# ----------------------------------------------------------------------------
# GeoposeUNetModel forward
# ----------------------------------------------------------------------------
def geopose_unet_forward(prep, image_nchw, gsd):
    """image_nchw: [B, 3, H, W] float32, gsd: [B, 1] float32."""
    x = jnp.transpose(image_nchw, (0, 2, 3, 1)).astype(jnp.bfloat16)  # NHWC bf16
    B, H, W, _ = x.shape
    assert H % 8 == 0 and W % 8 == 0, "H, W must be divisible by 8 (3 pool stages)"

    # ---- encoder (strides 2, 4, 8) ----
    e1 = avgpool2x2(conv3x3_bn_relu(x, *prep["enc1"]))    # [B, H/2, W/2, 16]
    e2 = avgpool2x2(conv3x3_bn_relu(e1, *prep["enc2"]))   # [B, H/4, W/4, 32]
    e3 = avgpool2x2(conv3x3_bn_relu(e2, *prep["enc3"]))   # [B, H/8, W/8, 64]

    # ---- UNet decoder (fused blocks; concat replaced by split-weight accum) ----
    d2 = unet_dec_block(upsample2x(e3), e2, prep["dec2"])             # [B,H/4,W/4,48]
    agl_half = unet_dec_block_with_agl(upsample2x(d2), e1,
                                       prep["dec1"], prep["agl"])     # [B,H/2,W/2,1]

    # ---- orientation head (tiny; plain XLA) ----
    gap = jnp.mean(e3.astype(jnp.float32), axis=(1, 2))               # [B, 64]
    ori = gap @ prep["ori_w"] + prep["ori_b"]                         # [B, 3]
    scale = jax.nn.softplus(ori[:, :1]) * gsd                         # [B, 1]
    angle = ori[:, 1:3]
    angle = angle / (jnp.linalg.norm(angle, axis=-1, keepdims=True) + 1e-6)

    # ---- agl head (conv fused into the dec1 block above) ----
    agl = upsample2x(agl_half, out_dtype=jnp.float32)                 # [B, H, W, 1]
    agl = jnp.transpose(agl, (0, 3, 1, 2))                            # NCHW

    return {"scale": scale, "angle": angle, "agl": agl}


# ----------------------------------------------------------------------------
if __name__ == "__main__":
    key = jax.random.PRNGKey(0)
    k_img, k_gsd, k_par = jax.random.split(key, 3)

    B, C, H, W = 2, 3, 16, 16
    image = jax.random.normal(k_img, (B, C, H, W), jnp.float32)
    gsd = jax.random.uniform(k_gsd, (B, 1), jnp.float32, 0.3, 0.8)

    params = init_params(k_par)
    prep = prepare_params(params)

    fwd = jax.jit(geopose_unet_forward)
    out = fwd(prep, image, gsd)
    jax.block_until_ready(out)

    assert out["scale"].shape == (B, 1)
    assert out["angle"].shape == (B, 2)
    assert out["agl"].shape == (B, 1, H, W)
    assert all(bool(jnp.all(jnp.isfinite(v))) for v in out.values())

    print("KERNEL_OK")
</pallas_src>

<mosaic_0001>
module attributes {stable_mosaic.version = 11 : i64} {
  func.func @_conv3x3_kernel(%arg0: i32, %arg1: memref<1x326x3xbf16, #tpu.memory_space<vmem>>, %arg2: memref<9x3x16xbf16, #tpu.memory_space<vmem>>, %arg3: memref<1x16xf32, #tpu.memory_space<vmem>>, %arg4: memref<1x288x16xbf16, #tpu.memory_space<vmem>>) attributes {dimension_semantics = [#tpu.dimension_semantics<parallel>], iteration_bounds = array<i64: 2>, scalar_prefetch = 0 : i64, scratch_operands = 0 : i64, tpu.core_type = #tpu.core_type<tc>, window_params = [{transform_indices = @transform_0, window_bounds = array<i64: 1, 326, 3>}, {pipeline_mode = #tpu.pipeline_mode<synchronous>, transform_indices = @transform_1, window_bounds = array<i64: 9, 3, 16>}, {pipeline_mode = #tpu.pipeline_mode<synchronous>, transform_indices = @transform_2, window_bounds = array<i64: 1, 16>}, {transform_indices = @transform_3, window_bounds = array<i64: 1, 288, 16>}]} {
    %cst = arith.constant 0.000000e+00 : f32
    %0 = vector.broadcast %cst : f32 to vector<288x16xf32>
    %c0 = arith.constant 0 : index
    %c0_0 = arith.constant 0 : index
    %c0_1 = arith.constant 0 : index
    %1 = vector.load %arg1[%c0, %c0_0, %c0_1] : memref<1x326x3xbf16, #tpu.memory_space<vmem>>, vector<1x326x3xbf16>
    %2 = vector.shape_cast %1 : vector<1x326x3xbf16> to vector<326x3xbf16>
    %3 = vector.extract_strided_slice %2 {offsets = [0, 0], sizes = [288, 3], strides = [1, 1]} : vector<326x3xbf16> to vector<288x3xbf16>
    %c0_2 = arith.constant 0 : index
    %c0_3 = arith.constant 0 : index
    %c0_4 = arith.constant 0 : index
    %4 = vector.load %arg2[%c0_2, %c0_3, %c0_4] : memref<9x3x16xbf16, #tpu.memory_space<vmem>>, vector<1x3x16xbf16>
    %5 = vector.shape_cast %4 : vector<1x3x16xbf16> to vector<3x16xbf16>
    %cst_5 = arith.constant dense<0.000000e+00> : vector<288x16xf32>
    %6 = tpu.matmul %3, %5, %cst_5 {dimension_numbers = #tpu.dot_dimension_numbers<[1], [0], [0], [1], [0, 0, 1, 1], [], []>} : vector<288x3xbf16>, vector<3x16xbf16>, vector<288x16xf32> -> vector<288x16xf32>
    %7 = arith.addf %0, %6 : vector<288x16xf32>
    %8 = vector.extract_strided_slice %2 {offsets = [1, 0], sizes = [288, 3], strides = [1, 1]} : vector<326x3xbf16> to vector<288x3xbf16>
    %c1 = arith.constant 1 : index
    %c0_6 = arith.constant 0 : index
    %c0_7 = arith.constant 0 : index
    %9 = vector.load %arg2[%c1, %c0_6, %c0_7] : memref<9x3x16xbf16, #tpu.memory_space<vmem>>, vector<1x3x16xbf16>
    %10 = vector.shape_cast %9 : vector<1x3x16xbf16> to vector<3x16xbf16>
    %cst_8 = arith.constant dense<0.000000e+00> : vector<288x16xf32>
    %11 = tpu.matmul %8, %10, %cst_8 {dimension_numbers = #tpu.dot_dimension_numbers<[1], [0], [0], [1], [0, 0, 1, 1], [], []>} : vector<288x3xbf16>, vector<3x16xbf16>, vector<288x16xf32> -> vector<288x16xf32>
    %12 = arith.addf %7, %11 : vector<288x16xf32>
    %13 = vector.extract_strided_slice %2 {offsets = [2, 0], sizes = [288, 3], strides = [1, 1]} : vector<326x3xbf16> to vector<288x3xbf16>
    %c2 = arith.constant 2 : index
    %c0_9 = arith.constant 0 : index
    %c0_10 = arith.constant 0 : index
    %14 = vector.load %arg2[%c2, %c0_9, %c0_10] : memref<9x3x16xbf16, #tpu.memory_space<vmem>>, vector<1x3x16xbf16>
    %15 = vector.shape_cast %14 : vector<1x3x16xbf16> to vector<3x16xbf16>
    %cst_11 = arith.constant dense<0.000000e+00> : vector<288x16xf32>
    %16 = tpu.matmul %13, %15, %cst_11 {dimension_numbers = #tpu.dot_dimension_numbers<[1], [0], [0], [1], [0, 0, 1, 1], [], []>} : vector<288x3xbf16>, vector<3x16xbf16>, vector<288x16xf32> -> vector<288x16xf32>
    %17 = arith.addf %12, %16 : vector<288x16xf32>
    %18 = vector.extract_strided_slice %2 {offsets = [18, 0], sizes = [288, 3], strides = [1, 1]} : vector<326x3xbf16> to vector<288x3xbf16>
    %c3 = arith.constant 3 : index
    %c0_12 = arith.constant 0 : index
    %c0_13 = arith.constant 0 : index
    %19 = vector.load %arg2[%c3, %c0_12, %c0_13] : memref<9x3x16xbf16, #tpu.memory_space<vmem>>, vector<1x3x16xbf16>
    %20 = vector.shape_cast %19 : vector<1x3x16xbf16> to vector<3x16xbf16>
    %cst_14 = arith.constant dense<0.000000e+00> : vector<288x16xf32>
    %21 = tpu.matmul %18, %20, %cst_14 {dimension_numbers = #tpu.dot_dimension_numbers<[1], [0], [0], [1], [0, 0, 1, 1], [], []>} : vector<288x3xbf16>, vector<3x16xbf16>, vector<288x16xf32> -> vector<288x16xf32>
    %22 = arith.addf %17, %21 : vector<288x16xf32>
    %23 = vector.extract_strided_slice %2 {offsets = [19, 0], sizes = [288, 3], strides = [1, 1]} : vector<326x3xbf16> to vector<288x3xbf16>
    %c4 = arith.constant 4 : index
    %c0_15 = arith.constant 0 : index
    %c0_16 = arith.constant 0 : index
    %24 = vector.load %arg2[%c4, %c0_15, %c0_16] : memref<9x3x16xbf16, #tpu.memory_space<vmem>>, vector<1x3x16xbf16>
    %25 = vector.shape_cast %24 : vector<1x3x16xbf16> to vector<3x16xbf16>
    %cst_17 = arith.constant dense<0.000000e+00> : vector<288x16xf32>
    %26 = tpu.matmul %23, %25, %cst_17 {dimension_numbers = #tpu.dot_dimension_numbers<[1], [0], [0], [1], [0, 0, 1, 1], [], []>} : vector<288x3xbf16>, vector<3x16xbf16>, vector<288x16xf32> -> vector<288x16xf32>
    %27 = arith.addf %22, %26 : vector<288x16xf32>
    %28 = vector.extract_strided_slice %2 {offsets = [20, 0], sizes = [288, 3], strides = [1, 1]} : vector<326x3xbf16> to vector<288x3xbf16>
    %c5 = arith.constant 5 : index
    %c0_18 = arith.constant 0 : index
    %c0_19 = arith.constant 0 : index
    %29 = vector.load %arg2[%c5, %c0_18, %c0_19] : memref<9x3x16xbf16, #tpu.memory_space<vmem>>, vector<1x3x16xbf16>
    %30 = vector.shape_cast %29 : vector<1x3x16xbf16> to vector<3x16xbf16>
    %cst_20 = arith.constant dense<0.000000e+00> : vector<288x16xf32>
    %31 = tpu.matmul %28, %30, %cst_20 {dimension_numbers = #tpu.dot_dimension_numbers<[1], [0], [0], [1], [0, 0, 1, 1], [], []>} : vector<288x3xbf16>, vector<3x16xbf16>, vector<288x16xf32> -> vector<288x16xf32>
    %32 = arith.addf %27, %31 : vector<288x16xf32>
    %33 = vector.extract_strided_slice %2 {offsets = [36, 0], sizes = [288, 3], strides = [1, 1]} : vector<326x3xbf16> to vector<288x3xbf16>
    %c6 = arith.constant 6 : index
    %c0_21 = arith.constant 0 : index
    %c0_22 = arith.constant 0 : index
    %34 = vector.load %arg2[%c6, %c0_21, %c0_22] : memref<9x3x16xbf16, #tpu.memory_space<vmem>>, vector<1x3x16xbf16>
    %35 = vector.shape_cast %34 : vector<1x3x16xbf16> to vector<3x16xbf16>
    %cst_23 = arith.constant dense<0.000000e+00> : vector<288x16xf32>
    %36 = tpu.matmul %33, %35, %cst_23 {dimension_numbers = #tpu.dot_dimension_numbers<[1], [0], [0], [1], [0, 0, 1, 1], [], []>} : vector<288x3xbf16>, vector<3x16xbf16>, vector<288x16xf32> -> vector<288x16xf32>
    %37 = arith.addf %32, %36 : vector<288x16xf32>
    %38 = vector.extract_strided_slice %2 {offsets = [37, 0], sizes = [288, 3], strides = [1, 1]} : vector<326x3xbf16> to vector<288x3xbf16>
    %c7 = arith.constant 7 : index
    %c0_24 = arith.constant 0 : index
    %c0_25 = arith.constant 0 : index
    %39 = vector.load %arg2[%c7, %c0_24, %c0_25] : memref<9x3x16xbf16, #tpu.memory_space<vmem>>, vector<1x3x16xbf16>
    %40 = vector.shape_cast %39 : vector<1x3x16xbf16> to vector<3x16xbf16>
    %cst_26 = arith.constant dense<0.000000e+00> : vector<288x16xf32>
    %41 = tpu.matmul %38, %40, %cst_26 {dimension_numbers = #tpu.dot_dimension_numbers<[1], [0], [0], [1], [0, 0, 1, 1], [], []>} : vector<288x3xbf16>, vector<3x16xbf16>, vector<288x16xf32> -> vector<288x16xf32>
    %42 = arith.addf %37, %41 : vector<288x16xf32>
    %43 = vector.extract_strided_slice %2 {offsets = [38, 0], sizes = [288, 3], strides = [1, 1]} : vector<326x3xbf16> to vector<288x3xbf16>
    %c8 = arith.constant 8 : index
    %c0_27 = arith.constant 0 : index
    %c0_28 = arith.constant 0 : index
    %44 = vector.load %arg2[%c8, %c0_27, %c0_28] : memref<9x3x16xbf16, #tpu.memory_space<vmem>>, vector<1x3x16xbf16>
    %45 = vector.shape_cast %44 : vector<1x3x16xbf16> to vector<3x16xbf16>
    %cst_29 = arith.constant dense<0.000000e+00> : vector<288x16xf32>
    %46 = tpu.matmul %43, %45, %cst_29 {dimension_numbers = #tpu.dot_dimension_numbers<[1], [0], [0], [1], [0, 0, 1, 1], [], []>} : vector<288x3xbf16>, vector<3x16xbf16>, vector<288x16xf32> -> vector<288x16xf32>
    %47 = arith.addf %42, %46 : vector<288x16xf32>
    %c0_30 = arith.constant 0 : index
    %c0_31 = arith.constant 0 : index
    %48 = vector.load %arg3[%c0_30, %c0_31] : memref<1x16xf32, #tpu.memory_space<vmem>>, vector<1x16xf32>
    %49 = vector.broadcast %48 : vector<1x16xf32> to vector<288x16xf32>
    %50 = arith.addf %47, %49 : vector<288x16xf32>
    %cst_32 = arith.constant 0.000000e+00 : f32
    %51 = vector.broadcast %cst_32 : f32 to vector<288x16xf32>
    %52 = arith.maximumf %50, %51 : vector<288x16xf32>
    %53 = arith.truncf %52 : vector<288x16xf32> to vector<288x16xbf16>
    %c0_33 = arith.constant 0 : index
    %c0_34 = arith.constant 0 : index
    %c0_35 = arith.constant 0 : index
    %54 = vector.load %arg4[%c0_33, %c0_34, %c0_35] : memref<1x288x16xbf16, #tpu.memory_space<vmem>>, vector<1x288x16xbf16>
    %55 = vector.shape_cast %54 : vector<1x288x16xbf16> to vector<288x16xbf16>
    %56 = vector.shape_cast %53 : vector<288x16xbf16> to vector<1x288x16xbf16>
    tpu.vector_store %arg4[%c0_33, %c0_34, %c0_35], %56 {strides = array<i32>} : memref<1x288x16xbf16, #tpu.memory_space<vmem>>, vector<1x288x16xbf16>,
    return
  }
  func.func @transform_0(%arg0: i32) -> (i32, i32, i32) {
    %c0_i32 = arith.constant 0 : i32
    %c0_i32_0 = arith.constant 0 : i32
    %c0_i32_1 = arith.constant 0 : i32
    return %arg0, %c0_i32, %c0_i32_0 : i32, i32, i32
  }
  func.func @transform_1(%arg0: i32) -> (i32, i32, i32) {
    %c0_i32 = arith.constant 0 : i32
    %c0_i32_0 = arith.constant 0 : i32
    %c0_i32_1 = arith.constant 0 : i32
    %c0_i32_2 = arith.constant 0 : i32
    return %c0_i32, %c0_i32_0, %c0_i32_1 : i32, i32, i32
  }
  func.func @transform_2(%arg0: i32) -> (i32, i32) {
    %c0_i32 = arith.constant 0 : i32
    %c0_i32_0 = arith.constant 0 : i32
    %c0_i32_1 = arith.constant 0 : i32
    return %c0_i32, %c0_i32_0 : i32, i32
  }
  func.func @transform_3(%arg0: i32) -> (i32, i32, i32) {
    %c0_i32 = arith.constant 0 : i32
    %c0_i32_0 = arith.constant 0 : i32
    %c0_i32_1 = arith.constant 0 : i32
    return %arg0, %c0_i32, %c0_i32_0 : i32, i32, i32
  }
}

module attributes {stable_mosaic.version = 11 : i64} {
  func.func @_conv3x3_kernel(%arg0: i32, %arg1: memref<1x102x16xbf16, #tpu.memory_space<vmem>>, %arg2: memref<9x16x32xbf16, #tpu.memory_space<vmem>>, %arg3: memref<1x32xf32, #tpu.memory_space<vmem>>, %arg4: memref<1x80x32xbf16, #tpu.memory_space<vmem>>) attributes {dimension_semantics = [#tpu.dimension_semantics<parallel>], iteration_bounds = array<i64: 2>, scalar_prefetch = 0 : i64, scratch_operands = 0 : i64, tpu.core_type = #tpu.core_type<tc>, window_params = [{transform_indices = @transform_0, window_bounds = array<i64: 1, 102, 16>}, {pipeline_mode = #tpu.pipeline_mode<synchronous>, transform_indices = @transform_1, window_bounds = array<i64: 9, 16, 32>}, {pipeline_mode = #tpu.pipeline_mode<synchronous>, transform_indices = @transform_2, window_bounds = array<i64: 1, 32>}, {transform_indices = @transform_3, window_bounds = array<i64: 1, 80, 32>}]} {
    %cst = arith.constant 0.000000e+00 : f32
    %0 = vector.broadcast %cst : f32 to vector<80x32xf32>
    %c0 = arith.constant 0 : index
    %c0_0 = arith.constant 0 : index
    %c0_1 = arith.constant 0 : index
    %1 = vector.load %arg1[%c0, %c0_0, %c0_1] : memref<1x102x16xbf16, #tpu.memory_space<vmem>>, vector<1x102x16xbf16>
    %2 = vector.shape_cast %1 : vector<1x102x16xbf16> to vector<102x16xbf16>
    %3 = vector.extract_strided_slice %2 {offsets = [0, 0], sizes = [80, 16], strides = [1, 1]} : vector<102x16xbf16> to vector<80x16xbf16>
    %c0_2 = arith.constant 0 : index
    %c0_3 = arith.constant 0 : index
    %c0_4 = arith.constant 0 : index
    %4 = vector.load %arg2[%c0_2, %c0_3, %c0_4] : memref<9x16x32xbf16, #tpu.memory_space<vmem>>, vector<1x16x32xbf16>
    %5 = vector.shape_cast %4 : vector<1x16x32xbf16> to vector<16x32xbf16>
    %cst_5 = arith.constant dense<0.000000e+00> : vector<80x32xf32>
    %6 = tpu.matmul %3, %5, %cst_5 {dimension_numbers = #tpu.dot_dimension_numbers<[1], [0], [0], [1], [0, 0, 1, 1], [], []>} : vector<80x16xbf16>, vector<16x32xbf16>, vector<80x32xf32> -> vector<80x32xf32>
    %7 = arith.addf %0, %6 : vector<80x32xf32>
    %8 = vector.extract_strided_slice %2 {offsets = [1, 0], sizes = [80, 16], strides = [1, 1]} : vector<102x16xbf16> to vector<80x16xbf16>
    %c1 = arith.constant 1 : index
    %c0_6 = arith.constant 0 : index
    %c0_7 = arith.constant 0 : index
    %9 = vector.load %arg2[%c1, %c0_6, %c0_7] : memref<9x16x32xbf16, #tpu.memory_space<vmem>>, vector<1x16x32xbf16>
    %10 = vector.shape_cast %9 : vector<1x16x32xbf16> to vector<16x32xbf16>
    %cst_8 = arith.constant dense<0.000000e+00> : vector<80x32xf32>
    %11 = tpu.matmul %8, %10, %cst_8 {dimension_numbers = #tpu.dot_dimension_numbers<[1], [0], [0], [1], [0, 0, 1, 1], [], []>} : vector<80x16xbf16>, vector<16x32xbf16>, vector<80x32xf32> -> vector<80x32xf32>
    %12 = arith.addf %7, %11 : vector<80x32xf32>
    %13 = vector.extract_strided_slice %2 {offsets = [2, 0], sizes = [80, 16], strides = [1, 1]} : vector<102x16xbf16> to vector<80x16xbf16>
    %c2 = arith.constant 2 : index
    %c0_9 = arith.constant 0 : index
    %c0_10 = arith.constant 0 : index
    %14 = vector.load %arg2[%c2, %c0_9, %c0_10] : memref<9x16x32xbf16, #tpu.memory_space<vmem>>, vector<1x16x32xbf16>
    %15 = vector.shape_cast %14 : vector<1x16x32xbf16> to vector<16x32xbf16>
    %cst_11 = arith.constant dense<0.000000e+00> : vector<80x32xf32>
    %16 = tpu.matmul %13, %15, %cst_11 {dimension_numbers = #tpu.dot_dimension_numbers<[1], [0], [0], [1], [0, 0, 1, 1], [], []>} : vector<80x16xbf16>, vector<16x32xbf16>, vector<80x32xf32> -> vector<80x32xf32>
    %17 = arith.addf %12, %16 : vector<80x32xf32>
    %18 = vector.extract_strided_slice %2 {offsets = [10, 0], sizes = [80, 16], strides = [1, 1]} : vector<102x16xbf16> to vector<80x16xbf16>
    %c3 = arith.constant 3 : index
    %c0_12 = arith.constant 0 : index
    %c0_13 = arith.constant 0 : index
    %19 = vector.load %arg2[%c3, %c0_12, %c0_13] : memref<9x16x32xbf16, #tpu.memory_space<vmem>>, vector<1x16x32xbf16>
    %20 = vector.shape_cast %19 : vector<1x16x32xbf16> to vector<16x32xbf16>
    %cst_14 = arith.constant dense<0.000000e+00> : vector<80x32xf32>
    %21 = tpu.matmul %18, %20, %cst_14 {dimension_numbers = #tpu.dot_dimension_numbers<[1], [0], [0], [1], [0, 0, 1, 1], [], []>} : vector<80x16xbf16>, vector<16x32xbf16>, vector<80x32xf32> -> vector<80x32xf32>
    %22 = arith.addf %17, %21 : vector<80x32xf32>
    %23 = vector.extract_strided_slice %2 {offsets = [11, 0], sizes = [80, 16], strides = [1, 1]} : vector<102x16xbf16> to vector<80x16xbf16>
    %c4 = arith.constant 4 : index
    %c0_15 = arith.constant 0 : index
    %c0_16 = arith.constant 0 : index
    %24 = vector.load %arg2[%c4, %c0_15, %c0_16] : memref<9x16x32xbf16, #tpu.memory_space<vmem>>, vector<1x16x32xbf16>
    %25 = vector.shape_cast %24 : vector<1x16x32xbf16> to vector<16x32xbf16>
    %cst_17 = arith.constant dense<0.000000e+00> : vector<80x32xf32>
    %26 = tpu.matmul %23, %25, %cst_17 {dimension_numbers = #tpu.dot_dimension_numbers<[1], [0], [0], [1], [0, 0, 1, 1], [], []>} : vector<80x16xbf16>, vector<16x32xbf16>, vector<80x32xf32> -> vector<80x32xf32>
    %27 = arith.addf %22, %26 : vector<80x32xf32>
    %28 = vector.extract_strided_slice %2 {offsets = [12, 0], sizes = [80, 16], strides = [1, 1]} : vector<102x16xbf16> to vector<80x16xbf16>
    %c5 = arith.constant 5 : index
    %c0_18 = arith.constant 0 : index
    %c0_19 = arith.constant 0 : index
    %29 = vector.load %arg2[%c5, %c0_18, %c0_19] : memref<9x16x32xbf16, #tpu.memory_space<vmem>>, vector<1x16x32xbf16>
    %30 = vector.shape_cast %29 : vector<1x16x32xbf16> to vector<16x32xbf16>
    %cst_20 = arith.constant dense<0.000000e+00> : vector<80x32xf32>
    %31 = tpu.matmul %28, %30, %cst_20 {dimension_numbers = #tpu.dot_dimension_numbers<[1], [0], [0], [1], [0, 0, 1, 1], [], []>} : vector<80x16xbf16>, vector<16x32xbf16>, vector<80x32xf32> -> vector<80x32xf32>
    %32 = arith.addf %27, %31 : vector<80x32xf32>
    %33 = vector.extract_strided_slice %2 {offsets = [20, 0], sizes = [80, 16], strides = [1, 1]} : vector<102x16xbf16> to vector<80x16xbf16>
    %c6 = arith.constant 6 : index
    %c0_21 = arith.constant 0 : index
    %c0_22 = arith.constant 0 : index
    %34 = vector.load %arg2[%c6, %c0_21, %c0_22] : memref<9x16x32xbf16, #tpu.memory_space<vmem>>, vector<1x16x32xbf16>
    %35 = vector.shape_cast %34 : vector<1x16x32xbf16> to vector<16x32xbf16>
    %cst_23 = arith.constant dense<0.000000e+00> : vector<80x32xf32>
    %36 = tpu.matmul %33, %35, %cst_23 {dimension_numbers = #tpu.dot_dimension_numbers<[1], [0], [0], [1], [0, 0, 1, 1], [], []>} : vector<80x16xbf16>, vector<16x32xbf16>, vector<80x32xf32> -> vector<80x32xf32>
    %37 = arith.addf %32, %36 : vector<80x32xf32>
    %38 = vector.extract_strided_slice %2 {offsets = [21, 0], sizes = [80, 16], strides = [1, 1]} : vector<102x16xbf16> to vector<80x16xbf16>
    %c7 = arith.constant 7 : index
    %c0_24 = arith.constant 0 : index
    %c0_25 = arith.constant 0 : index
    %39 = vector.load %arg2[%c7, %c0_24, %c0_25] : memref<9x16x32xbf16, #tpu.memory_space<vmem>>, vector<1x16x32xbf16>
    %40 = vector.shape_cast %39 : vector<1x16x32xbf16> to vector<16x32xbf16>
    %cst_26 = arith.constant dense<0.000000e+00> : vector<80x32xf32>
    %41 = tpu.matmul %38, %40, %cst_26 {dimension_numbers = #tpu.dot_dimension_numbers<[1], [0], [0], [1], [0, 0, 1, 1], [], []>} : vector<80x16xbf16>, vector<16x32xbf16>, vector<80x32xf32> -> vector<80x32xf32>
    %42 = arith.addf %37, %41 : vector<80x32xf32>
    %43 = vector.extract_strided_slice %2 {offsets = [22, 0], sizes = [80, 16], strides = [1, 1]} : vector<102x16xbf16> to vector<80x16xbf16>
    %c8 = arith.constant 8 : index
    %c0_27 = arith.constant 0 : index
    %c0_28 = arith.constant 0 : index
    %44 = vector.load %arg2[%c8, %c0_27, %c0_28] : memref<9x16x32xbf16, #tpu.memory_space<vmem>>, vector<1x16x32xbf16>
    %45 = vector.shape_cast %44 : vector<1x16x32xbf16> to vector<16x32xbf16>
    %cst_29 = arith.constant dense<0.000000e+00> : vector<80x32xf32>
    %46 = tpu.matmul %43, %45, %cst_29 {dimension_numbers = #tpu.dot_dimension_numbers<[1], [0], [0], [1], [0, 0, 1, 1], [], []>} : vector<80x16xbf16>, vector<16x32xbf16>, vector<80x32xf32> -> vector<80x32xf32>
    %47 = arith.addf %42, %46 : vector<80x32xf32>
    %c0_30 = arith.constant 0 : index
    %c0_31 = arith.constant 0 : index
    %48 = vector.load %arg3[%c0_30, %c0_31] : memref<1x32xf32, #tpu.memory_space<vmem>>, vector<1x32xf32>
    %49 = vector.broadcast %48 : vector<1x32xf32> to vector<80x32xf32>
    %50 = arith.addf %47, %49 : vector<80x32xf32>
    %cst_32 = arith.constant 0.000000e+00 : f32
    %51 = vector.broadcast %cst_32 : f32 to vector<80x32xf32>
    %52 = arith.maximumf %50, %51 : vector<80x32xf32>
    %53 = arith.truncf %52 : vector<80x32xf32> to vector<80x32xbf16>
    %c0_33 = arith.constant 0 : index
    %c0_34 = arith.constant 0 : index
    %c0_35 = arith.constant 0 : index
    %54 = vector.load %arg4[%c0_33, %c0_34, %c0_35] : memref<1x80x32xbf16, #tpu.memory_space<vmem>>, vector<1x80x32xbf16>
    %55 = vector.shape_cast %54 : vector<1x80x32xbf16> to vector<80x32xbf16>
    %56 = vector.shape_cast %53 : vector<80x32xbf16> to vector<1x80x32xbf16>
    tpu.vector_store %arg4[%c0_33, %c0_34, %c0_35], %56 {strides = array<i32>} : memref<1x80x32xbf16, #tpu.memory_space<vmem>>, vector<1x80x32xbf16>,
    return
  }
  func.func @transform_0(%arg0: i32) -> (i32, i32, i32) {
    %c0_i32 = arith.constant 0 : i32
    %c0_i32_0 = arith.constant 0 : i32
    %c0_i32_1 = arith.constant 0 : i32
    return %arg0, %c0_i32, %c0_i32_0 : i32, i32, i32
  }
  func.func @transform_1(%arg0: i32) -> (i32, i32, i32) {
    %c0_i32 = arith.constant 0 : i32
    %c0_i32_0 = arith.constant 0 : i32
    %c0_i32_1 = arith.constant 0 : i32
    %c0_i32_2 = arith.constant 0 : i32
    return %c0_i32, %c0_i32_0, %c0_i32_1 : i32, i32, i32
  }
  func.func @transform_2(%arg0: i32) -> (i32, i32) {
    %c0_i32 = arith.constant 0 : i32
    %c0_i32_0 = arith.constant 0 : i32
    %c0_i32_1 = arith.constant 0 : i32
    return %c0_i32, %c0_i32_0 : i32, i32
  }
  func.func @transform_3(%arg0: i32) -> (i32, i32, i32) {
    %c0_i32 = arith.constant 0 : i32
    %c0_i32_0 = arith.constant 0 : i32
    %c0_i32_1 = arith.constant 0 : i32
    return %arg0, %c0_i32, %c0_i32_0 : i32, i32, i32
  }
}

module attributes {stable_mosaic.version = 11 : i64} {
  func.func @_conv3x3_kernel(%arg0: i32, %arg1: memref<1x38x32xbf16, #tpu.memory_space<vmem>>, %arg2: memref<9x32x64xbf16, #tpu.memory_space<vmem>>, %arg3: memref<1x64xf32, #tpu.memory_space<vmem>>, %arg4: memref<1x24x64xbf16, #tpu.memory_space<vmem>>) attributes {dimension_semantics = [#tpu.dimension_semantics<parallel>], iteration_bounds = array<i64: 2>, scalar_prefetch = 0 : i64, scratch_operands = 0 : i64, tpu.core_type = #tpu.core_type<tc>, window_params = [{transform_indices = @transform_0, window_bounds = array<i64: 1, 38, 32>}, {pipeline_mode = #tpu.pipeline_mode<synchronous>, transform_indices = @transform_1, window_bounds = array<i64: 9, 32, 64>}, {pipeline_mode = #tpu.pipeline_mode<synchronous>, transform_indices = @transform_2, window_bounds = array<i64: 1, 64>}, {transform_indices = @transform_3, window_bounds = array<i64: 1, 24, 64>}]} {
    %cst = arith.constant 0.000000e+00 : f32
    %0 = vector.broadcast %cst : f32 to vector<24x64xf32>
    %c0 = arith.constant 0 : index
    %c0_0 = arith.constant 0 : index
    %c0_1 = arith.constant 0 : index
    %1 = vector.load %arg1[%c0, %c0_0, %c0_1] : memref<1x38x32xbf16, #tpu.memory_space<vmem>>, vector<1x38x32xbf16>
    %2 = vector.shape_cast %1 : vector<1x38x32xbf16> to vector<38x32xbf16>
    %3 = vector.extract_strided_slice %2 {offsets = [0, 0], sizes = [24, 32], strides = [1, 1]} : vector<38x32xbf16> to vector<24x32xbf16>
    %c0_2 = arith.constant 0 : index
    %c0_3 = arith.constant 0 : index
    %c0_4 = arith.constant 0 : index
    %4 = vector.load %arg2[%c0_2, %c0_3, %c0_4] : memref<9x32x64xbf16, #tpu.memory_space<vmem>>, vector<1x32x64xbf16>
    %5 = vector.shape_cast %4 : vector<1x32x64xbf16> to vector<32x64xbf16>
    %cst_5 = arith.constant dense<0.000000e+00> : vector<24x64xf32>
    %6 = tpu.matmul %3, %5, %cst_5 {dimension_numbers = #tpu.dot_dimension_numbers<[1], [0], [0], [1], [0, 0, 1, 1], [], []>} : vector<24x32xbf16>, vector<32x64xbf16>, vector<24x64xf32> -> vector<24x64xf32>
    %7 = arith.addf %0, %6 : vector<24x64xf32>
    %8 = vector.extract_strided_slice %2 {offsets = [1, 0], sizes = [24, 32], strides = [1, 1]} : vector<38x32xbf16> to vector<24x32xbf16>
    %c1 = arith.constant 1 : index
    %c0_6 = arith.constant 0 : index
    %c0_7 = arith.constant 0 : index
    %9 = vector.load %arg2[%c1, %c0_6, %c0_7] : memref<9x32x64xbf16, #tpu.memory_space<vmem>>, vector<1x32x64xbf16>
    %10 = vector.shape_cast %9 : vector<1x32x64xbf16> to vector<32x64xbf16>
    %cst_8 = arith.constant dense<0.000000e+00> : vector<24x64xf32>
    %11 = tpu.matmul %8, %10, %cst_8 {dimension_numbers = #tpu.dot_dimension_numbers<[1], [0], [0], [1], [0, 0, 1, 1], [], []>} : vector<24x32xbf16>, vector<32x64xbf16>, vector<24x64xf32> -> vector<24x64xf32>
    %12 = arith.addf %7, %11 : vector<24x64xf32>
    %13 = vector.extract_strided_slice %2 {offsets = [2, 0], sizes = [24, 32], strides = [1, 1]} : vector<38x32xbf16> to vector<24x32xbf16>
    %c2 = arith.constant 2 : index
    %c0_9 = arith.constant 0 : index
    %c0_10 = arith.constant 0 : index
    %14 = vector.load %arg2[%c2, %c0_9, %c0_10] : memref<9x32x64xbf16, #tpu.memory_space<vmem>>, vector<1x32x64xbf16>
    %15 = vector.shape_cast %14 : vector<1x32x64xbf16> to vector<32x64xbf16>
    %cst_11 = arith.constant dense<0.000000e+00> : vector<24x64xf32>
    %16 = tpu.matmul %13, %15, %cst_11 {dimension_numbers = #tpu.dot_dimension_numbers<[1], [0], [0], [1], [0, 0, 1, 1], [], []>} : vector<24x32xbf16>, vector<32x64xbf16>, vector<24x64xf32> -> vector<24x64xf32>
    %17 = arith.addf %12, %16 : vector<24x64xf32>
    %18 = vector.extract_strided_slice %2 {offsets = [6, 0], sizes = [24, 32], strides = [1, 1]} : vector<38x32xbf16> to vector<24x32xbf16>
    %c3 = arith.constant 3 : index
    %c0_12 = arith.constant 0 : index
    %c0_13 = arith.constant 0 : index
    %19 = vector.load %arg2[%c3, %c0_12, %c0_13] : memref<9x32x64xbf16, #tpu.memory_space<vmem>>, vector<1x32x64xbf16>
    %20 = vector.shape_cast %19 : vector<1x32x64xbf16> to vector<32x64xbf16>
    %cst_14 = arith.constant dense<0.000000e+00> : vector<24x64xf32>
    %21 = tpu.matmul %18, %20, %cst_14 {dimension_numbers = #tpu.dot_dimension_numbers<[1], [0], [0], [1], [0, 0, 1, 1], [], []>} : vector<24x32xbf16>, vector<32x64xbf16>, vector<24x64xf32> -> vector<24x64xf32>
    %22 = arith.addf %17, %21 : vector<24x64xf32>
    %23 = vector.extract_strided_slice %2 {offsets = [7, 0], sizes = [24, 32], strides = [1, 1]} : vector<38x32xbf16> to vector<24x32xbf16>
    %c4 = arith.constant 4 : index
    %c0_15 = arith.constant 0 : index
    %c0_16 = arith.constant 0 : index
    %24 = vector.load %arg2[%c4, %c0_15, %c0_16] : memref<9x32x64xbf16, #tpu.memory_space<vmem>>, vector<1x32x64xbf16>
    %25 = vector.shape_cast %24 : vector<1x32x64xbf16> to vector<32x64xbf16>
    %cst_17 = arith.constant dense<0.000000e+00> : vector<24x64xf32>
    %26 = tpu.matmul %23, %25, %cst_17 {dimension_numbers = #tpu.dot_dimension_numbers<[1], [0], [0], [1], [0, 0, 1, 1], [], []>} : vector<24x32xbf16>, vector<32x64xbf16>, vector<24x64xf32> -> vector<24x64xf32>
    %27 = arith.addf %22, %26 : vector<24x64xf32>
    %28 = vector.extract_strided_slice %2 {offsets = [8, 0], sizes = [24, 32], strides = [1, 1]} : vector<38x32xbf16> to vector<24x32xbf16>
    %c5 = arith.constant 5 : index
    %c0_18 = arith.constant 0 : index
    %c0_19 = arith.constant 0 : index
    %29 = vector.load %arg2[%c5, %c0_18, %c0_19] : memref<9x32x64xbf16, #tpu.memory_space<vmem>>, vector<1x32x64xbf16>
    %30 = vector.shape_cast %29 : vector<1x32x64xbf16> to vector<32x64xbf16>
    %cst_20 = arith.constant dense<0.000000e+00> : vector<24x64xf32>
    %31 = tpu.matmul %28, %30, %cst_20 {dimension_numbers = #tpu.dot_dimension_numbers<[1], [0], [0], [1], [0, 0, 1, 1], [], []>} : vector<24x32xbf16>, vector<32x64xbf16>, vector<24x64xf32> -> vector<24x64xf32>
    %32 = arith.addf %27, %31 : vector<24x64xf32>
    %33 = vector.extract_strided_slice %2 {offsets = [12, 0], sizes = [24, 32], strides = [1, 1]} : vector<38x32xbf16> to vector<24x32xbf16>
    %c6 = arith.constant 6 : index
    %c0_21 = arith.constant 0 : index
    %c0_22 = arith.constant 0 : index
    %34 = vector.load %arg2[%c6, %c0_21, %c0_22] : memref<9x32x64xbf16, #tpu.memory_space<vmem>>, vector<1x32x64xbf16>
    %35 = vector.shape_cast %34 : vector<1x32x64xbf16> to vector<32x64xbf16>
    %cst_23 = arith.constant dense<0.000000e+00> : vector<24x64xf32>
    %36 = tpu.matmul %33, %35, %cst_23 {dimension_numbers = #tpu.dot_dimension_numbers<[1], [0], [0], [1], [0, 0, 1, 1], [], []>} : vector<24x32xbf16>, vector<32x64xbf16>, vector<24x64xf32> -> vector<24x64xf32>
    %37 = arith.addf %32, %36 : vector<24x64xf32>
    %38 = vector.extract_strided_slice %2 {offsets = [13, 0], sizes = [24, 32], strides = [1, 1]} : vector<38x32xbf16> to vector<24x32xbf16>
    %c7 = arith.constant 7 : index
    %c0_24 = arith.constant 0 : index
    %c0_25 = arith.constant 0 : index
    %39 = vector.load %arg2[%c7, %c0_24, %c0_25] : memref<9x32x64xbf16, #tpu.memory_space<vmem>>, vector<1x32x64xbf16>
    %40 = vector.shape_cast %39 : vector<1x32x64xbf16> to vector<32x64xbf16>
    %cst_26 = arith.constant dense<0.000000e+00> : vector<24x64xf32>
    %41 = tpu.matmul %38, %40, %cst_26 {dimension_numbers = #tpu.dot_dimension_numbers<[1], [0], [0], [1], [0, 0, 1, 1], [], []>} : vector<24x32xbf16>, vector<32x64xbf16>, vector<24x64xf32> -> vector<24x64xf32>
    %42 = arith.addf %37, %41 : vector<24x64xf32>
    %43 = vector.extract_strided_slice %2 {offsets = [14, 0], sizes = [24, 32], strides = [1, 1]} : vector<38x32xbf16> to vector<24x32xbf16>
    %c8 = arith.constant 8 : index
    %c0_27 = arith.constant 0 : index
    %c0_28 = arith.constant 0 : index
    %44 = vector.load %arg2[%c8, %c0_27, %c0_28] : memref<9x32x64xbf16, #tpu.memory_space<vmem>>, vector<1x32x64xbf16>
    %45 = vector.shape_cast %44 : vector<1x32x64xbf16> to vector<32x64xbf16>
    %cst_29 = arith.constant dense<0.000000e+00> : vector<24x64xf32>
    %46 = tpu.matmul %43, %45, %cst_29 {dimension_numbers = #tpu.dot_dimension_numbers<[1], [0], [0], [1], [0, 0, 1, 1], [], []>} : vector<24x32xbf16>, vector<32x64xbf16>, vector<24x64xf32> -> vector<24x64xf32>
    %47 = arith.addf %42, %46 : vector<24x64xf32>
    %c0_30 = arith.constant 0 : index
    %c0_31 = arith.constant 0 : index
    %48 = vector.load %arg3[%c0_30, %c0_31] : memref<1x64xf32, #tpu.memory_space<vmem>>, vector<1x64xf32>
    %49 = vector.broadcast %48 : vector<1x64xf32> to vector<24x64xf32>
    %50 = arith.addf %47, %49 : vector<24x64xf32>
    %cst_32 = arith.constant 0.000000e+00 : f32
    %51 = vector.broadcast %cst_32 : f32 to vector<24x64xf32>
    %52 = arith.maximumf %50, %51 : vector<24x64xf32>
    %53 = arith.truncf %52 : vector<24x64xf32> to vector<24x64xbf16>
    %c0_33 = arith.constant 0 : index
    %c0_34 = arith.constant 0 : index
    %c0_35 = arith.constant 0 : index
    %54 = vector.load %arg4[%c0_33, %c0_34, %c0_35] : memref<1x24x64xbf16, #tpu.memory_space<vmem>>, vector<1x24x64xbf16>
    %55 = vector.shape_cast %54 : vector<1x24x64xbf16> to vector<24x64xbf16>
    %56 = vector.shape_cast %53 : vector<24x64xbf16> to vector<1x24x64xbf16>
    tpu.vector_store %arg4[%c0_33, %c0_34, %c0_35], %56 {strides = array<i32>} : memref<1x24x64xbf16, #tpu.memory_space<vmem>>, vector<1x24x64xbf16>,
    return
  }
  func.func @transform_0(%arg0: i32) -> (i32, i32, i32) {
    %c0_i32 = arith.constant 0 : i32
    %c0_i32_0 = arith.constant 0 : i32
    %c0_i32_1 = arith.constant 0 : i32
    return %arg0, %c0_i32, %c0_i32_0 : i32, i32, i32
  }
  func.func @transform_1(%arg0: i32) -> (i32, i32, i32) {
    %c0_i32 = arith.constant 0 : i32
    %c0_i32_0 = arith.constant 0 : i32
    %c0_i32_1 = arith.constant 0 : i32
    %c0_i32_2 = arith.constant 0 : i32
    return %c0_i32, %c0_i32_0, %c0_i32_1 : i32, i32, i32
  }
  func.func @transform_2(%arg0: i32) -> (i32, i32) {
    %c0_i32 = arith.constant 0 : i32
    %c0_i32_0 = arith.constant 0 : i32
    %c0_i32_1 = arith.constant 0 : i32
    return %c0_i32, %c0_i32_0 : i32, i32
  }
  func.func @transform_3(%arg0: i32) -> (i32, i32, i32) {
    %c0_i32 = arith.constant 0 : i32
    %c0_i32_0 = arith.constant 0 : i32
    %c0_i32_1 = arith.constant 0 : i32
    return %arg0, %c0_i32, %c0_i32_0 : i32, i32, i32
  }
}

module attributes {stable_mosaic.version = 11 : i64} {
  func.func @_dec_block_kernel(%arg0: i32, %arg1: memref<1x38x64xbf16, #tpu.memory_space<vmem>>, %arg2: memref<1x38x32xbf16, #tpu.memory_space<vmem>>, %arg3: memref<9x64x48xbf16, #tpu.memory_space<vmem>>, %arg4: memref<9x32x48xbf16, #tpu.memory_space<vmem>>, %arg5: memref<1x48xf32, #tpu.memory_space<vmem>>, %arg6: memref<9x48x48xbf16, #tpu.memory_space<vmem>>, %arg7: memref<1x48xf32, #tpu.memory_space<vmem>>, %arg8: memref<1x24x48xbf16, #tpu.memory_space<vmem>>, %arg9: memref<38x48xbf16, #tpu.memory_space<vmem>>) attributes {dimension_semantics = [#tpu.dimension_semantics<parallel>], iteration_bounds = array<i64: 2>, scalar_prefetch = 0 : i64, scratch_operands = 1 : i64, tpu.core_type = #tpu.core_type<tc>, window_params = [{transform_indices = @transform_0, window_bounds = array<i64: 1, 38, 64>}, {transform_indices = @transform_1, window_bounds = array<i64: 1, 38, 32>}, {pipeline_mode = #tpu.pipeline_mode<synchronous>, transform_indices = @transform_2, window_bounds = array<i64: 9, 64, 48>}, {pipeline_mode = #tpu.pipeline_mode<synchronous>, transform_indices = @transform_3, window_bounds = array<i64: 9, 32, 48>}, {pipeline_mode = #tpu.pipeline_mode<synchronous>, transform_indices = @transform_4, window_bounds = array<i64: 1, 48>}, {pipeline_mode = #tpu.pipeline_mode<synchronous>, transform_indices = @transform_5, window_bounds = array<i64: 9, 48, 48>}, {pipeline_mode = #tpu.pipeline_mode<synchronous>, transform_indices = @transform_6, window_bounds = array<i64: 1, 48>}, {transform_indices = @transform_7, window_bounds = array<i64: 1, 24, 48>}]} {
    %cst = arith.constant 0.000000e+00 : bf16
    %0 = vector.broadcast %cst : bf16 to vector<38x48xbf16>
    %c0 = arith.constant 0 : index
    %c0_0 = arith.constant 0 : index
    %1 = vector.load %arg9[%c0, %c0_0] : memref<38x48xbf16, #tpu.memory_space<vmem>>, vector<38x48xbf16>
    tpu.vector_store %arg9[%c0, %c0_0], %0 {strides = array<i32>} : memref<38x48xbf16, #tpu.memory_space<vmem>>, vector<38x48xbf16>,
    %2 = tpu.iota {dimensions = array<i32: 0>} : vector<24x1xi32>
    %c6_i32 = arith.constant 6 : i32
    %c0_i32 = arith.constant 0 : i32
    %3 = arith.cmpi eq, %c6_i32, %c0_i32 : i32
    %c1_i32 = arith.constant 1 : i32
    %4 = arith.select %3, %c1_i32, %c6_i32 : i32
    %5 = vector.broadcast %4 : i32 to vector<24x1xi32>
    %6 = arith.remsi %2, %5 : vector<24x1xi32>
    %c0_i32_1 = arith.constant 0 : i32
    %7 = vector.broadcast %c0_i32_1 : i32 to vector<24x1xi32>
    %8 = arith.cmpi ne, %6, %7 : vector<24x1xi32>
    %c0_i32_2 = arith.constant 0 : i32
    %9 = vector.broadcast %c0_i32_2 : i32 to vector<24x1xi32>
    %10 = arith.cmpi slt, %6, %9 : vector<24x1xi32>
    %c0_i32_3 = arith.constant 0 : i32
    %11 = arith.cmpi slt, %4, %c0_i32_3 : i32
    %12 = vector.broadcast %11 : i1 to vector<24x1xi1>
    %13 = vector.broadcast %12 : vector<24x1xi1> to vector<24x1xi1>
    %14 = arith.xori %10, %13 : vector<24x1xi1>
    %15 = arith.andi %14, %8 : vector<24x1xi1>
    %16 = vector.broadcast %4 : i32 to vector<24x1xi32>
    %17 = arith.addi %6, %16 : vector<24x1xi32>
    %18 = arith.select %15, %17, %6 : vector<24x1xi1>, vector<24x1xi32>
    %c4_i32 = arith.constant 4 : i32
    %19 = vector.broadcast %c4_i32 : i32 to vector<24x1xi32>
    %20 = arith.cmpi slt, %18, %19 : vector<24x1xi32>
    %cst_4 = arith.constant 0.000000e+00 : f32
    %21 = vector.broadcast %cst_4 : f32 to vector<24x48xf32>
    %c0_5 = arith.constant 0 : index
    %c0_6 = arith.constant 0 : index
    %c0_7 = arith.constant 0 : index
    %22 = vector.load %arg1[%c0_5, %c0_6, %c0_7] : memref<1x38x64xbf16, #tpu.memory_space<vmem>>, vector<1x38x64xbf16>
    %23 = vector.shape_cast %22 : vector<1x38x64xbf16> to vector<38x64xbf16>
    %24 = vector.extract_strided_slice %23 {offsets = [0, 0], sizes = [24, 64], strides = [1, 1]} : vector<38x64xbf16> to vector<24x64xbf16>
    %c0_8 = arith.constant 0 : index
    %c0_9 = arith.constant 0 : index
    %c0_10 = arith.constant 0 : index
    %25 = vector.load %arg3[%c0_8, %c0_9, %c0_10] : memref<9x64x48xbf16, #tpu.memory_space<vmem>>, vector<1x64x48xbf16>
    %26 = vector.shape_cast %25 : vector<1x64x48xbf16> to vector<64x48xbf16>
    %cst_11 = arith.constant dense<0.000000e+00> : vector<24x48xf32>
    %27 = tpu.matmul %24, %26, %cst_11 {dimension_numbers = #tpu.dot_dimension_numbers<[1], [0], [0], [1], [0, 0, 1, 1], [], []>} : vector<24x64xbf16>, vector<64x48xbf16>, vector<24x48xf32> -> vector<24x48xf32>
    %28 = arith.addf %21, %27 : vector<24x48xf32>
    %29 = vector.extract_strided_slice %23 {offsets = [1, 0], sizes = [24, 64], strides = [1, 1]} : vector<38x64xbf16> to vector<24x64xbf16>
    %c1 = arith.constant 1 : index
    %c0_12 = arith.constant 0 : index
    %c0_13 = arith.constant 0 : index
    %30 = vector.load %arg3[%c1, %c0_12, %c0_13] : memref<9x64x48xbf16, #tpu.memory_space<vmem>>, vector<1x64x48xbf16>
    %31 = vector.shape_cast %30 : vector<1x64x48xbf16> to vector<64x48xbf16>
    %cst_14 = arith.constant dense<0.000000e+00> : vector<24x48xf32>
    %32 = tpu.matmul %29, %31, %cst_14 {dimension_numbers = #tpu.dot_dimension_numbers<[1], [0], [0], [1], [0, 0, 1, 1], [], []>} : vector<24x64xbf16>, vector<64x48xbf16>, vector<24x48xf32> -> vector<24x48xf32>
    %33 = arith.addf %28, %32 : vector<24x48xf32>
    %34 = vector.extract_strided_slice %23 {offsets = [2, 0], sizes = [24, 64], strides = [1, 1]} : vector<38x64xbf16> to vector<24x64xbf16>
    %c2 = arith.constant 2 : index
    %c0_15 = arith.constant 0 : index
    %c0_16 = arith.constant 0 : index
    %35 = vector.load %arg3[%c2, %c0_15, %c0_16] : memref<9x64x48xbf16, #tpu.memory_space<vmem>>, vector<1x64x48xbf16>
    %36 = vector.shape_cast %35 : vector<1x64x48xbf16> to vector<64x48xbf16>
    %cst_17 = arith.constant dense<0.000000e+00> : vector<24x48xf32>
    %37 = tpu.matmul %34, %36, %cst_17 {dimension_numbers = #tpu.dot_dimension_numbers<[1], [0], [0], [1], [0, 0, 1, 1], [], []>} : vector<24x64xbf16>, vector<64x48xbf16>, vector<24x48xf32> -> vector<24x48xf32>
    %38 = arith.addf %33, %37 : vector<24x48xf32>
    %39 = vector.extract_strided_slice %23 {offsets = [6, 0], sizes = [24, 64], strides = [1, 1]} : vector<38x64xbf16> to vector<24x64xbf16>
    %c3 = arith.constant 3 : index
    %c0_18 = arith.constant 0 : index
    %c0_19 = arith.constant 0 : index
    %40 = vector.load %arg3[%c3, %c0_18, %c0_19] : memref<9x64x48xbf16, #tpu.memory_space<vmem>>, vector<1x64x48xbf16>
    %41 = vector.shape_cast %40 : vector<1x64x48xbf16> to vector<64x48xbf16>
    %cst_20 = arith.constant dense<0.000000e+00> : vector<24x48xf32>
    %42 = tpu.matmul %39, %41, %cst_20 {dimension_numbers = #tpu.dot_dimension_numbers<[1], [0], [0], [1], [0, 0, 1, 1], [], []>} : vector<24x64xbf16>, vector<64x48xbf16>, vector<24x48xf32> -> vector<24x48xf32>
    %43 = arith.addf %38, %42 : vector<24x48xf32>
    %44 = vector.extract_strided_slice %23 {offsets = [7, 0], sizes = [24, 64], strides = [1, 1]} : vector<38x64xbf16> to vector<24x64xbf16>
    %c4 = arith.constant 4 : index
    %c0_21 = arith.constant 0 : index
    %c0_22 = arith.constant 0 : index
    %45 = vector.load %arg3[%c4, %c0_21, %c0_22] : memref<9x64x48xbf16, #tpu.memory_space<vmem>>, vector<1x64x48xbf16>
    %46 = vector.shape_cast %45 : vector<1x64x48xbf16> to vector<64x48xbf16>
    %cst_23 = arith.constant dense<0.000000e+00> : vector<24x48xf32>
    %47 = tpu.matmul %44, %46, %cst_23 {dimension_numbers = #tpu.dot_dimension_numbers<[1], [0], [0], [1], [0, 0, 1, 1], [], []>} : vector<24x64xbf16>, vector<64x48xbf16>, vector<24x48xf32> -> vector<24x48xf32>
    %48 = arith.addf %43, %47 : vector<24x48xf32>
    %49 = vector.extract_strided_slice %23 {offsets = [8, 0], sizes = [24, 64], strides = [1, 1]} : vector<38x64xbf16> to vector<24x64xbf16>
    %c5 = arith.constant 5 : index
    %c0_24 = arith.constant 0 : index
    %c0_25 = arith.constant 0 : index
    %50 = vector.load %arg3[%c5, %c0_24, %c0_25] : memref<9x64x48xbf16, #tpu.memory_space<vmem>>, vector<1x64x48xbf16>
    %51 = vector.shape_cast %50 : vector<1x64x48xbf16> to vector<64x48xbf16>
    %cst_26 = arith.constant dense<0.000000e+00> : vector<24x48xf32>
    %52 = tpu.matmul %49, %51, %cst_26 {dimension_numbers = #tpu.dot_dimension_numbers<[1], [0], [0], [1], [0, 0, 1, 1], [], []>} : vector<24x64xbf16>, vector<64x48xbf16>, vector<24x48xf32> -> vector<24x48xf32>
    %53 = arith.addf %48, %52 : vector<24x48xf32>
    %54 = vector.extract_strided_slice %23 {offsets = [12, 0], sizes = [24, 64], strides = [1, 1]} : vector<38x64xbf16> to vector<24x64xbf16>
    %c6 = arith.constant 6 : index
    %c0_27 = arith.constant 0 : index
    %c0_28 = arith.constant 0 : index
    %55 = vector.load %arg3[%c6, %c0_27, %c0_28] : memref<9x64x48xbf16, #tpu.memory_space<vmem>>, vector<1x64x48xbf16>
    %56 = vector.shape_cast %55 : vector<1x64x48xbf16> to vector<64x48xbf16>
    %cst_29 = arith.constant dense<0.000000e+00> : vector<24x48xf32>
    %57 = tpu.matmul %54, %56, %cst_29 {dimension_numbers = #tpu.dot_dimension_numbers<[1], [0], [0], [1], [0, 0, 1, 1], [], []>} : vector<24x64xbf16>, vector<64x48xbf16>, vector<24x48xf32> -> vector<24x48xf32>
    %58 = arith.addf %53, %57 : vector<24x48xf32>
    %59 = vector.extract_strided_slice %23 {offsets = [13, 0], sizes = [24, 64], strides = [1, 1]} : vector<38x64xbf16> to vector<24x64xbf16>
    %c7 = arith.constant 7 : index
    %c0_30 = arith.constant 0 : index
    %c0_31 = arith.constant 0 : index
    %60 = vector.load %arg3[%c7, %c0_30, %c0_31] : memref<9x64x48xbf16, #tpu.memory_space<vmem>>, vector<1x64x48xbf16>
    %61 = vector.shape_cast %60 : vector<1x64x48xbf16> to vector<64x48xbf16>
    %cst_32 = arith.constant dense<0.000000e+00> : vector<24x48xf32>
    %62 = tpu.matmul %59, %61, %cst_32 {dimension_numbers = #tpu.dot_dimension_numbers<[1], [0], [0], [1], [0, 0, 1, 1], [], []>} : vector<24x64xbf16>, vector<64x48xbf16>, vector<24x48xf32> -> vector<24x48xf32>
    %63 = arith.addf %58, %62 : vector<24x48xf32>
    %64 = vector.extract_strided_slice %23 {offsets = [14, 0], sizes = [24, 64], strides = [1, 1]} : vector<38x64xbf16> to vector<24x64xbf16>
    %c8 = arith.constant 8 : index
    %c0_33 = arith.constant 0 : index
    %c0_34 = arith.constant 0 : index
    %65 = vector.load %arg3[%c8, %c0_33, %c0_34] : memref<9x64x48xbf16, #tpu.memory_space<vmem>>, vector<1x64x48xbf16>
    %66 = vector.shape_cast %65 : vector<1x64x48xbf16> to vector<64x48xbf16>
    %cst_35 = arith.constant dense<0.000000e+00> : vector<24x48xf32>
    %67 = tpu.matmul %64, %66, %cst_35 {dimension_numbers = #tpu.dot_dimension_numbers<[1], [0], [0], [1], [0, 0, 1, 1], [], []>} : vector<24x64xbf16>, vector<64x48xbf16>, vector<24x48xf32> -> vector<24x48xf32>
    %68 = arith.addf %63, %67 : vector<24x48xf32>
    %c0_36 = arith.constant 0 : index
    %c0_37 = arith.constant 0 : index
    %c0_38 = arith.constant 0 : index
    %69 = vector.load %arg2[%c0_36, %c0_37, %c0_38] : memref<1x38x32xbf16, #tpu.memory_space<vmem>>, vector<1x38x32xbf16>
    %70 = vector.shape_cast %69 : vector<1x38x32xbf16> to vector<38x32xbf16>
    %71 = vector.extract_strided_slice %70 {offsets = [0, 0], sizes = [24, 32], strides = [1, 1]} : vector<38x32xbf16> to vector<24x32xbf16>
    %c0_39 = arith.constant 0 : index
    %c0_40 = arith.constant 0 : index
    %c0_41 = arith.constant 0 : index
    %72 = vector.load %arg4[%c0_39, %c0_40, %c0_41] : memref<9x32x48xbf16, #tpu.memory_space<vmem>>, vector<1x32x48xbf16>
    %73 = vector.shape_cast %72 : vector<1x32x48xbf16> to vector<32x48xbf16>
    %cst_42 = arith.constant dense<0.000000e+00> : vector<24x48xf32>
    %74 = tpu.matmul %71, %73, %cst_42 {dimension_numbers = #tpu.dot_dimension_numbers<[1], [0], [0], [1], [0, 0, 1, 1], [], []>} : vector<24x32xbf16>, vector<32x48xbf16>, vector<24x48xf32> -> vector<24x48xf32>
    %75 = arith.addf %68, %74 : vector<24x48xf32>
    %76 = vector.extract_strided_slice %70 {offsets = [1, 0], sizes = [24, 32], strides = [1, 1]} : vector<38x32xbf16> to vector<24x32xbf16>
    %c1_43 = arith.constant 1 : index
    %c0_44 = arith.constant 0 : index
    %c0_45 = arith.constant 0 : index
    %77 = vector.load %arg4[%c1_43, %c0_44, %c0_45] : memref<9x32x48xbf16, #tpu.memory_space<vmem>>, vector<1x32x48xbf16>
    %78 = vector.shape_cast %77 : vector<1x32x48xbf16> to vector<32x48xbf16>
    %cst_46 = arith.constant dense<0.000000e+00> : vector<24x48xf32>
    %79 = tpu.matmul %76, %78, %cst_46 {dimension_numbers = #tpu.dot_dimension_numbers<[1], [0], [0], [1], [0, 0, 1, 1], [], []>} : vector<24x32xbf16>, vector<32x48xbf16>, vector<24x48xf32> -> vector<24x48xf32>
    %80 = arith.addf %75, %79 : vector<24x48xf32>
    %81 = vector.extract_strided_slice %70 {offsets = [2, 0], sizes = [24, 32], strides = [1, 1]} : vector<38x32xbf16> to vector<24x32xbf16>
    %c2_47 = arith.constant 2 : index
    %c0_48 = arith.constant 0 : index
    %c0_49 = arith.constant 0 : index
    %82 = vector.load %arg4[%c2_47, %c0_48, %c0_49] : memref<9x32x48xbf16, #tpu.memory_space<vmem>>, vector<1x32x48xbf16>
    %83 = vector.shape_cast %82 : vector<1x32x48xbf16> to vector<32x48xbf16>
    %cst_50 = arith.constant dense<0.000000e+00> : vector<24x48xf32>
    %84 = tpu.matmul %81, %83, %cst_50 {dimension_numbers = #tpu.dot_dimension_numbers<[1], [0], [0], [1], [0, 0, 1, 1], [], []>} : vector<24x32xbf16>, vector<32x48xbf16>, vector<24x48xf32> -> vector<24x48xf32>
    %85 = arith.addf %80, %84 : vector<24x48xf32>
    %86 = vector.extract_strided_slice %70 {offsets = [6, 0], sizes = [24, 32], strides = [1, 1]} : vector<38x32xbf16> to vector<24x32xbf16>
    %c3_51 = arith.constant 3 : index
    %c0_52 = arith.constant 0 : index
    %c0_53 = arith.constant 0 : index
    %87 = vector.load %arg4[%c3_51, %c0_52, %c0_53] : memref<9x32x48xbf16, #tpu.memory_space<vmem>>, vector<1x32x48xbf16>
    %88 = vector.shape_cast %87 : vector<1x32x48xbf16> to vector<32x48xbf16>
    %cst_54 = arith.constant dense<0.000000e+00> : vector<24x48xf32>
    %89 = tpu.matmul %86, %88, %cst_54 {dimension_numbers = #tpu.dot_dimension_numbers<[1], [0], [0], [1], [0, 0, 1, 1], [], []>} : vector<24x32xbf16>, vector<32x48xbf16>, vector<24x48xf32> -> vector<24x48xf32>
    %90 = arith.addf %85, %89 : vector<24x48xf32>
    %91 = vector.extract_strided_slice %70 {offsets = [7, 0], sizes = [24, 32], strides = [1, 1]} : vector<38x32xbf16> to vector<24x32xbf16>
    %c4_55 = arith.constant 4 : index
    %c0_56 = arith.constant 0 : index
    %c0_57 = arith.constant 0 : index
    %92 = vector.load %arg4[%c4_55, %c0_56, %c0_57] : memref<9x32x48xbf16, #tpu.memory_space<vmem>>, vector<1x32x48xbf16>
    %93 = vector.shape_cast %92 : vector<1x32x48xbf16> to vector<32x48xbf16>
    %cst_58 = arith.constant dense<0.000000e+00> : vector<24x48xf32>
    %94 = tpu.matmul %91, %93, %cst_58 {dimension_numbers = #tpu.dot_dimension_numbers<[1], [0], [0], [1], [0, 0, 1, 1], [], []>} : vector<24x32xbf16>, vector<32x48xbf16>, vector<24x48xf32> -> vector<24x48xf32>
    %95 = arith.addf %90, %94 : vector<24x48xf32>
    %96 = vector.extract_strided_slice %70 {offsets = [8, 0], sizes = [24, 32], strides = [1, 1]} : vector<38x32xbf16> to vector<24x32xbf16>
    %c5_59 = arith.constant 5 : index
    %c0_60 = arith.constant 0 : index
    %c0_61 = arith.constant 0 : index
    %97 = vector.load %arg4[%c5_59, %c0_60, %c0_61] : memref<9x32x48xbf16, #tpu.memory_space<vmem>>, vector<1x32x48xbf16>
    %98 = vector.shape_cast %97 : vector<1x32x48xbf16> to vector<32x48xbf16>
    %cst_62 = arith.constant dense<0.000000e+00> : vector<24x48xf32>
    %99 = tpu.matmul %96, %98, %cst_62 {dimension_numbers = #tpu.dot_dimension_numbers<[1], [0], [0], [1], [0, 0, 1, 1], [], []>} : vector<24x32xbf16>, vector<32x48xbf16>, vector<24x48xf32> -> vector<24x48xf32>
    %100 = arith.addf %95, %99 : vector<24x48xf32>
    %101 = vector.extract_strided_slice %70 {offsets = [12, 0], sizes = [24, 32], strides = [1, 1]} : vector<38x32xbf16> to vector<24x32xbf16>
    %c6_63 = arith.constant 6 : index
    %c0_64 = arith.constant 0 : index
    %c0_65 = arith.constant 0 : index
    %102 = vector.load %arg4[%c6_63, %c0_64, %c0_65] : memref<9x32x48xbf16, #tpu.memory_space<vmem>>, vector<1x32x48xbf16>
    %103 = vector.shape_cast %102 : vector<1x32x48xbf16> to vector<32x48xbf16>
    %cst_66 = arith.constant dense<0.000000e+00> : vector<24x48xf32>
    %104 = tpu.matmul %101, %103, %cst_66 {dimension_numbers = #tpu.dot_dimension_numbers<[1], [0], [0], [1], [0, 0, 1, 1], [], []>} : vector<24x32xbf16>, vector<32x48xbf16>, vector<24x48xf32> -> vector<24x48xf32>
    %105 = arith.addf %100, %104 : vector<24x48xf32>
    %106 = vector.extract_strided_slice %70 {offsets = [13, 0], sizes = [24, 32], strides = [1, 1]} : vector<38x32xbf16> to vector<24x32xbf16>
    %c7_67 = arith.constant 7 : index
    %c0_68 = arith.constant 0 : index
    %c0_69 = arith.constant 0 : index
    %107 = vector.load %arg4[%c7_67, %c0_68, %c0_69] : memref<9x32x48xbf16, #tpu.memory_space<vmem>>, vector<1x32x48xbf16>
    %108 = vector.shape_cast %107 : vector<1x32x48xbf16> to vector<32x48xbf16>
    %cst_70 = arith.constant dense<0.000000e+00> : vector<24x48xf32>
    %109 = tpu.matmul %106, %108, %cst_70 {dimension_numbers = #tpu.dot_dimension_numbers<[1], [0], [0], [1], [0, 0, 1, 1], [], []>} : vector<24x32xbf16>, vector<32x48xbf16>, vector<24x48xf32> -> vector<24x48xf32>
    %110 = arith.addf %105, %109 : vector<24x48xf32>
    %111 = vector.extract_strided_slice %70 {offsets = [14, 0], sizes = [24, 32], strides = [1, 1]} : vector<38x32xbf16> to vector<24x32xbf16>
    %c8_71 = arith.constant 8 : index
    %c0_72 = arith.constant 0 : index
    %c0_73 = arith.constant 0 : index
    %112 = vector.load %arg4[%c8_71, %c0_72, %c0_73] : memref<9x32x48xbf16, #tpu.memory_space<vmem>>, vector<1x32x48xbf16>
    %113 = vector.shape_cast %112 : vector<1x32x48xbf16> to vector<32x48xbf16>
    %cst_74 = arith.constant dense<0.000000e+00> : vector<24x48xf32>
    %114 = tpu.matmul %111, %113, %cst_74 {dimension_numbers = #tpu.dot_dimension_numbers<[1], [0], [0], [1], [0, 0, 1, 1], [], []>} : vector<24x32xbf16>, vector<32x48xbf16>, vector<24x48xf32> -> vector<24x48xf32>
    %115 = arith.addf %110, %114 : vector<24x48xf32>
    %c0_75 = arith.constant 0 : index
    %c0_76 = arith.constant 0 : index
    %116 = vector.load %arg5[%c0_75, %c0_76] : memref<1x48xf32, #tpu.memory_space<vmem>>, vector<1x48xf32>
    %117 = vector.broadcast %116 : vector<1x48xf32> to vector<24x48xf32>
    %118 = arith.addf %115, %117 : vector<24x48xf32>
    %cst_77 = arith.constant 0.000000e+00 : f32
    %119 = vector.broadcast %cst_77 : f32 to vector<24x48xf32>
    %120 = arith.maximumf %118, %119 : vector<24x48xf32>
    %cst_78 = arith.constant 0.000000e+00 : f32
    %121 = vector.shape_cast %20 : vector<24x1xi1> to vector<24x1xi1>
    %122 = vector.broadcast %121 : vector<24x1xi1> to vector<24x48xi1>
    %123 = vector.broadcast %cst_78 : f32 to vector<24x48xf32>
    %124 = arith.select %122, %120, %123 : vector<24x48xi1>, vector<24x48xf32>
    %125 = arith.truncf %124 : vector<24x48xf32> to vector<24x48xbf16>
    %c7_79 = arith.constant 7 : index
    %c0_80 = arith.constant 0 : index
    %126 = vector.load %arg9[%c7_79, %c0_80] : memref<38x48xbf16, #tpu.memory_space<vmem>>, vector<24x48xbf16>
    tpu.vector_store %arg9[%c7_79, %c0_80], %125 {strides = array<i32>} : memref<38x48xbf16, #tpu.memory_space<vmem>>, vector<24x48xbf16>,
    %cst_81 = arith.constant 0.000000e+00 : f32
    %127 = vector.broadcast %cst_81 : f32 to vector<24x48xf32>
    %c0_82 = arith.constant 0 : index
    %c0_83 = arith.constant 0 : index
    %128 = vector.load %arg9[%c0_82, %c0_83] : memref<38x48xbf16, #tpu.memory_space<vmem>>, vector<38x48xbf16>
    %129 = vector.extract_strided_slice %128 {offsets = [0, 0], sizes = [24, 48], strides = [1, 1]} : vector<38x48xbf16> to vector<24x48xbf16>
    %c0_84 = arith.constant 0 : index
    %c0_85 = arith.constant 0 : index
    %c0_86 = arith.constant 0 : index
    %130 = vector.load %arg6[%c0_84, %c0_85, %c0_86] : memref<9x48x48xbf16, #tpu.memory_space<vmem>>, vector<1x48x48xbf16>
    %131 = vector.shape_cast %130 : vector<1x48x48xbf16> to vector<48x48xbf16>
    %cst_87 = arith.constant dense<0.000000e+00> : vector<24x48xf32>
    %132 = tpu.matmul %129, %131, %cst_87 {dimension_numbers = #tpu.dot_dimension_numbers<[1], [0], [0], [1], [0, 0, 1, 1], [], []>} : vector<24x48xbf16>, vector<48x48xbf16>, vector<24x48xf32> -> vector<24x48xf32>
    %133 = arith.addf %127, %132 : vector<24x48xf32>
    %134 = vector.extract_strided_slice %128 {offsets = [1, 0], sizes = [24, 48], strides = [1, 1]} : vector<38x48xbf16> to vector<24x48xbf16>
    %c1_88 = arith.constant 1 : index
    %c0_89 = arith.constant 0 : index
    %c0_90 = arith.constant 0 : index
    %135 = vector.load %arg6[%c1_88, %c0_89, %c0_90] : memref<9x48x48xbf16, #tpu.memory_space<vmem>>, vector<1x48x48xbf16>
    %136 = vector.shape_cast %135 : vector<1x48x48xbf16> to vector<48x48xbf16>
    %cst_91 = arith.constant dense<0.000000e+00> : vector<24x48xf32>
    %137 = tpu.matmul %134, %136, %cst_91 {dimension_numbers = #tpu.dot_dimension_numbers<[1], [0], [0], [1], [0, 0, 1, 1], [], []>} : vector<24x48xbf16>, vector<48x48xbf16>, vector<24x48xf32> -> vector<24x48xf32>
    %138 = arith.addf %133, %137 : vector<24x48xf32>
    %139 = vector.extract_strided_slice %128 {offsets = [2, 0], sizes = [24, 48], strides = [1, 1]} : vector<38x48xbf16> to vector<24x48xbf16>
    %c2_92 = arith.constant 2 : index
    %c0_93 = arith.constant 0 : index
    %c0_94 = arith.constant 0 : index
    %140 = vector.load %arg6[%c2_92, %c0_93, %c0_94] : memref<9x48x48xbf16, #tpu.memory_space<vmem>>, vector<1x48x48xbf16>
    %141 = vector.shape_cast %140 : vector<1x48x48xbf16> to vector<48x48xbf16>
    %cst_95 = arith.constant dense<0.000000e+00> : vector<24x48xf32>
    %142 = tpu.matmul %139, %141, %cst_95 {dimension_numbers = #tpu.dot_dimension_numbers<[1], [0], [0], [1], [0, 0, 1, 1], [], []>} : vector<24x48xbf16>, vector<48x48xbf16>, vector<24x48xf32> -> vector<24x48xf32>
    %143 = arith.addf %138, %142 : vector<24x48xf32>
    %144 = vector.extract_strided_slice %128 {offsets = [6, 0], sizes = [24, 48], strides = [1, 1]} : vector<38x48xbf16> to vector<24x48xbf16>
    %c3_96 = arith.constant 3 : index
    %c0_97 = arith.constant 0 : index
    %c0_98 = arith.constant 0 : index
    %145 = vector.load %arg6[%c3_96, %c0_97, %c0_98] : memref<9x48x48xbf16, #tpu.memory_space<vmem>>, vector<1x48x48xbf16>
    %146 = vector.shape_cast %145 : vector<1x48x48xbf16> to vector<48x48xbf16>
    %cst_99 = arith.constant dense<0.000000e+00> : vector<24x48xf32>
    %147 = tpu.matmul %144, %146, %cst_99 {dimension_numbers = #tpu.dot_dimension_numbers<[1], [0], [0], [1], [0, 0, 1, 1], [], []>} : vector<24x48xbf16>, vector<48x48xbf16>, vector<24x48xf32> -> vector<24x48xf32>
    %148 = arith.addf %143, %147 : vector<24x48xf32>
    %149 = vector.extract_strided_slice %128 {offsets = [7, 0], sizes = [24, 48], strides = [1, 1]} : vector<38x48xbf16> to vector<24x48xbf16>
    %c4_100 = arith.constant 4 : index
    %c0_101 = arith.constant 0 : index
    %c0_102 = arith.constant 0 : index
    %150 = vector.load %arg6[%c4_100, %c0_101, %c0_102] : memref<9x48x48xbf16, #tpu.memory_space<vmem>>, vector<1x48x48xbf16>
    %151 = vector.shape_cast %150 : vector<1x48x48xbf16> to vector<48x48xbf16>
    %cst_103 = arith.constant dense<0.000000e+00> : vector<24x48xf32>
    %152 = tpu.matmul %149, %151, %cst_103 {dimension_numbers = #tpu.dot_dimension_numbers<[1], [0], [0], [1], [0, 0, 1, 1], [], []>} : vector<24x48xbf16>, vector<48x48xbf16>, vector<24x48xf32> -> vector<24x48xf32>
    %153 = arith.addf %148, %152 : vector<24x48xf32>
    %154 = vector.extract_strided_slice %128 {offsets = [8, 0], sizes = [24, 48], strides = [1, 1]} : vector<38x48xbf16> to vector<24x48xbf16>
    %c5_104 = arith.constant 5 : index
    %c0_105 = arith.constant 0 : index
    %c0_106 = arith.constant 0 : index
    %155 = vector.load %arg6[%c5_104, %c0_105, %c0_106] : memref<9x48x48xbf16, #tpu.memory_space<vmem>>, vector<1x48x48xbf16>
    %156 = vector.shape_cast %155 : vector<1x48x48xbf16> to vector<48x48xbf16>
    %cst_107 = arith.constant dense<0.000000e+00> : vector<24x48xf32>
    %157 = tpu.matmul %154, %156, %cst_107 {dimension_numbers = #tpu.dot_dimension_numbers<[1], [0], [0], [1], [0, 0, 1, 1], [], []>} : vector<24x48xbf16>, vector<48x48xbf16>, vector<24x48xf32> -> vector<24x48xf32>
    %158 = arith.addf %153, %157 : vector<24x48xf32>
    %159 = vector.extract_strided_slice %128 {offsets = [12, 0], sizes = [24, 48], strides = [1, 1]} : vector<38x48xbf16> to vector<24x48xbf16>
    %c6_108 = arith.constant 6 : index
    %c0_109 = arith.constant 0 : index
    %c0_110 = arith.constant 0 : index
    %160 = vector.load %arg6[%c6_108, %c0_109, %c0_110] : memref<9x48x48xbf16, #tpu.memory_space<vmem>>, vector<1x48x48xbf16>
    %161 = vector.shape_cast %160 : vector<1x48x48xbf16> to vector<48x48xbf16>
    %cst_111 = arith.constant dense<0.000000e+00> : vector<24x48xf32>
    %162 = tpu.matmul %159, %161, %cst_111 {dimension_numbers = #tpu.dot_dimension_numbers<[1], [0], [0], [1], [0, 0, 1, 1], [], []>} : vector<24x48xbf16>, vector<48x48xbf16>, vector<24x48xf32> -> vector<24x48xf32>
    %163 = arith.addf %158, %162 : vector<24x48xf32>
    %164 = vector.extract_strided_slice %128 {offsets = [13, 0], sizes = [24, 48], strides = [1, 1]} : vector<38x48xbf16> to vector<24x48xbf16>
    %c7_112 = arith.constant 7 : index
    %c0_113 = arith.constant 0 : index
    %c0_114 = arith.constant 0 : index
    %165 = vector.load %arg6[%c7_112, %c0_113, %c0_114] : memref<9x48x48xbf16, #tpu.memory_space<vmem>>, vector<1x48x48xbf16>
    %166 = vector.shape_cast %165 : vector<1x48x48xbf16> to vector<48x48xbf16>
    %cst_115 = arith.constant dense<0.000000e+00> : vector<24x48xf32>
    %167 = tpu.matmul %164, %166, %cst_115 {dimension_numbers = #tpu.dot_dimension_numbers<[1], [0], [0], [1], [0, 0, 1, 1], [], []>} : vector<24x48xbf16>, vector<48x48xbf16>, vector<24x48xf32> -> vector<24x48xf32>
    %168 = arith.addf %163, %167 : vector<24x48xf32>
    %169 = vector.extract_strided_slice %128 {offsets = [14, 0], sizes = [24, 48], strides = [1, 1]} : vector<38x48xbf16> to vector<24x48xbf16>
    %c8_116 = arith.constant 8 : index
    %c0_117 = arith.constant 0 : index
    %c0_118 = arith.constant 0 : index
    %170 = vector.load %arg6[%c8_116, %c0_117, %c0_118] : memref<9x48x48xbf16, #tpu.memory_space<vmem>>, vector<1x48x48xbf16>
    %171 = vector.shape_cast %170 : vector<1x48x48xbf16> to vector<48x48xbf16>
    %cst_119 = arith.constant dense<0.000000e+00> : vector<24x48xf32>
    %172 = tpu.matmul %169, %171, %cst_119 {dimension_numbers = #tpu.dot_dimension_numbers<[1], [0], [0], [1], [0, 0, 1, 1], [], []>} : vector<24x48xbf16>, vector<48x48xbf16>, vector<24x48xf32> -> vector<24x48xf32>
    %173 = arith.addf %168, %172 : vector<24x48xf32>
    %c0_120 = arith.constant 0 : index
    %c0_121 = arith.constant 0 : index
    %174 = vector.load %arg7[%c0_120, %c0_121] : memref<1x48xf32, #tpu.memory_space<vmem>>, vector<1x48xf32>
    %175 = vector.broadcast %174 : vector<1x48xf32> to vector<24x48xf32>
    %176 = arith.addf %173, %175 : vector<24x48xf32>
    %cst_122 = arith.constant 0.000000e+00 : f32
    %177 = vector.broadcast %cst_122 : f32 to vector<24x48xf32>
    %178 = arith.maximumf %176, %177 : vector<24x48xf32>
    %179 = arith.truncf %178 : vector<24x48xf32> to vector<24x48xbf16>
    %c0_123 = arith.constant 0 : index
    %c0_124 = arith.constant 0 : index
    %c0_125 = arith.constant 0 : index
    %180 = vector.load %arg8[%c0_123, %c0_124, %c0_125] : memref<1x24x48xbf16, #tpu.memory_space<vmem>>, vector<1x24x48xbf16>
    %181 = vector.shape_cast %180 : vector<1x24x48xbf16> to vector<24x48xbf16>
    %182 = vector.shape_cast %179 : vector<24x48xbf16> to vector<1x24x48xbf16>
    tpu.vector_store %arg8[%c0_123, %c0_124, %c0_125], %182 {strides = array<i32>} : memref<1x24x48xbf16, #tpu.memory_space<vmem>>, vector<1x24x48xbf16>,
    return
  }
  func.func @transform_0(%arg0: i32) -> (i32, i32, i32) {
    %c0_i32 = arith.constant 0 : i32
    %c0_i32_0 = arith.constant 0 : i32
    %c0_i32_1 = arith.constant 0 : i32
    return %arg0, %c0_i32, %c0_i32_0 : i32, i32, i32
  }
  func.func @transform_1(%arg0: i32) -> (i32, i32, i32) {
    %c0_i32 = arith.constant 0 : i32
    %c0_i32_0 = arith.constant 0 : i32
    %c0_i32_1 = arith.constant 0 : i32
    return %arg0, %c0_i32, %c0_i32_0 : i32, i32, i32
  }
  func.func @transform_2(%arg0: i32) -> (i32, i32, i32) {
    %c0_i32 = arith.constant 0 : i32
    %c0_i32_0 = arith.constant 0 : i32
    %c0_i32_1 = arith.constant 0 : i32
    %c0_i32_2 = arith.constant 0 : i32
    return %c0_i32, %c0_i32_0, %c0_i32_1 : i32, i32, i32
  }
  func.func @transform_3(%arg0: i32) -> (i32, i32, i32) {
    %c0_i32 = arith.constant 0 : i32
    %c0_i32_0 = arith.constant 0 : i32
    %c0_i32_1 = arith.constant 0 : i32
    %c0_i32_2 = arith.constant 0 : i32
    return %c0_i32, %c0_i32_0, %c0_i32_1 : i32, i32, i32
  }
  func.func @transform_4(%arg0: i32) -> (i32, i32) {
    %c0_i32 = arith.constant 0 : i32
    %c0_i32_0 = arith.constant 0 : i32
    %c0_i32_1 = arith.constant 0 : i32
    return %c0_i32, %c0_i32_0 : i32, i32
  }
  func.func @transform_5(%arg0: i32) -> (i32, i32, i32) {
    %c0_i32 = arith.constant 0 : i32
    %c0_i32_0 = arith.constant 0 : i32
    %c0_i32_1 = arith.constant 0 : i32
    %c0_i32_2 = arith.constant 0 : i32
    return %c0_i32, %c0_i32_0, %c0_i32_1 : i32, i32, i32
  }
  func.func @transform_6(%arg0: i32) -> (i32, i32) {
    %c0_i32 = arith.constant 0 : i32
    %c0_i32_0 = arith.constant 0 : i32
    %c0_i32_1 = arith.constant 0 : i32
    return %c0_i32, %c0_i32_0 : i32, i32
  }
  func.func @transform_7(%arg0: i32) -> (i32, i32, i32) {
    %c0_i32 = arith.constant 0 : i32
    %c0_i32_0 = arith.constant 0 : i32
    %c0_i32_1 = arith.constant 0 : i32
    return %arg0, %c0_i32, %c0_i32_0 : i32, i32, i32
  }
}

module attributes {stable_mosaic.version = 11 : i64} {
  func.func @_dec_block_agl_kernel(%arg0: i32, %arg1: memref<1x102x48xbf16, #tpu.memory_space<vmem>>, %arg2: memref<1x102x16xbf16, #tpu.memory_space<vmem>>, %arg3: memref<9x48x24xbf16, #tpu.memory_space<vmem>>, %arg4: memref<9x16x24xbf16, #tpu.memory_space<vmem>>, %arg5: memref<1x24xf32, #tpu.memory_space<vmem>>, %arg6: memref<9x24x24xbf16, #tpu.memory_space<vmem>>, %arg7: memref<1x24xf32, #tpu.memory_space<vmem>>, %arg8: memref<9x24x1xbf16, #tpu.memory_space<vmem>>, %arg9: memref<1x1xf32, #tpu.memory_space<vmem>>, %arg10: memref<1x80x1xf32, #tpu.memory_space<vmem>>, %arg11: memref<102x24xbf16, #tpu.memory_space<vmem>>, %arg12: memref<102x24xbf16, #tpu.memory_space<vmem>>) attributes {dimension_semantics = [#tpu.dimension_semantics<parallel>], iteration_bounds = array<i64: 2>, scalar_prefetch = 0 : i64, scratch_operands = 2 : i64, tpu.core_type = #tpu.core_type<tc>, window_params = [{transform_indices = @transform_0, window_bounds = array<i64: 1, 102, 48>}, {transform_indices = @transform_1, window_bounds = array<i64: 1, 102, 16>}, {pipeline_mode = #tpu.pipeline_mode<synchronous>, transform_indices = @transform_2, window_bounds = array<i64: 9, 48, 24>}, {pipeline_mode = #tpu.pipeline_mode<synchronous>, transform_indices = @transform_3, window_bounds = array<i64: 9, 16, 24>}, {pipeline_mode = #tpu.pipeline_mode<synchronous>, transform_indices = @transform_4, window_bounds = array<i64: 1, 24>}, {pipeline_mode = #tpu.pipeline_mode<synchronous>, transform_indices = @transform_5, window_bounds = array<i64: 9, 24, 24>}, {pipeline_mode = #tpu.pipeline_mode<synchronous>, transform_indices = @transform_6, window_bounds = array<i64: 1, 24>}, {pipeline_mode = #tpu.pipeline_mode<synchronous>, transform_indices = @transform_7, window_bounds = array<i64: 9, 24, 1>}, {pipeline_mode = #tpu.pipeline_mode<synchronous>, transform_indices = @transform_8, window_bounds = array<i64: 1, 1>}, {transform_indices = @transform_9, window_bounds = array<i64: 1, 80, 1>}]} {
    %cst = arith.constant 0.000000e+00 : bf16
    %0 = vector.broadcast %cst : bf16 to vector<102x24xbf16>
    %c0 = arith.constant 0 : index
    %c0_0 = arith.constant 0 : index
    %1 = vector.load %arg11[%c0, %c0_0] : memref<102x24xbf16, #tpu.memory_space<vmem>>, vector<102x24xbf16>
    tpu.vector_store %arg11[%c0, %c0_0], %0 {strides = array<i32>} : memref<102x24xbf16, #tpu.memory_space<vmem>>, vector<102x24xbf16>,
    %cst_1 = arith.constant 0.000000e+00 : bf16
    %2 = vector.broadcast %cst_1 : bf16 to vector<102x24xbf16>
    %c0_2 = arith.constant 0 : index
    %c0_3 = arith.constant 0 : index
    %3 = vector.load %arg12[%c0_2, %c0_3] : memref<102x24xbf16, #tpu.memory_space<vmem>>, vector<102x24xbf16>
    tpu.vector_store %arg12[%c0_2, %c0_3], %2 {strides = array<i32>} : memref<102x24xbf16, #tpu.memory_space<vmem>>, vector<102x24xbf16>,
    %4 = tpu.iota {dimensions = array<i32: 0>} : vector<80x1xi32>
    %c10_i32 = arith.constant 10 : i32
    %c0_i32 = arith.constant 0 : i32
    %5 = arith.cmpi eq, %c10_i32, %c0_i32 : i32
    %c1_i32 = arith.constant 1 : i32
    %6 = arith.select %5, %c1_i32, %c10_i32 : i32
    %7 = vector.broadcast %6 : i32 to vector<80x1xi32>
    %8 = arith.remsi %4, %7 : vector<80x1xi32>
    %c0_i32_4 = arith.constant 0 : i32
    %9 = vector.broadcast %c0_i32_4 : i32 to vector<80x1xi32>
    %10 = arith.cmpi ne, %8, %9 : vector<80x1xi32>
    %c0_i32_5 = arith.constant 0 : i32
    %11 = vector.broadcast %c0_i32_5 : i32 to vector<80x1xi32>
    %12 = arith.cmpi slt, %8, %11 : vector<80x1xi32>
    %c0_i32_6 = arith.constant 0 : i32
    %13 = arith.cmpi slt, %6, %c0_i32_6 : i32
    %14 = vector.broadcast %13 : i1 to vector<80x1xi1>
    %15 = vector.broadcast %14 : vector<80x1xi1> to vector<80x1xi1>
    %16 = arith.xori %12, %15 : vector<80x1xi1>
    %17 = arith.andi %16, %10 : vector<80x1xi1>
    %18 = vector.broadcast %6 : i32 to vector<80x1xi32>
    %19 = arith.addi %8, %18 : vector<80x1xi32>
    %20 = arith.select %17, %19, %8 : vector<80x1xi1>, vector<80x1xi32>
    %c8_i32 = arith.constant 8 : i32
    %21 = vector.broadcast %c8_i32 : i32 to vector<80x1xi32>
    %22 = arith.cmpi slt, %20, %21 : vector<80x1xi32>
    %cst_7 = arith.constant 0.000000e+00 : f32
    %23 = vector.broadcast %cst_7 : f32 to vector<80x24xf32>
    %c0_8 = arith.constant 0 : index
    %c0_9 = arith.constant 0 : index
    %c0_10 = arith.constant 0 : index
    %24 = vector.load %arg1[%c0_8, %c0_9, %c0_10] : memref<1x102x48xbf16, #tpu.memory_space<vmem>>, vector<1x102x48xbf16>
    %25 = vector.shape_cast %24 : vector<1x102x48xbf16> to vector<102x48xbf16>
    %26 = vector.extract_strided_slice %25 {offsets = [0, 0], sizes = [80, 48], strides = [1, 1]} : vector<102x48xbf16> to vector<80x48xbf16>
    %c0_11 = arith.constant 0 : index
    %c0_12 = arith.constant 0 : index
    %c0_13 = arith.constant 0 : index
    %27 = vector.load %arg3[%c0_11, %c0_12, %c0_13] : memref<9x48x24xbf16, #tpu.memory_space<vmem>>, vector<1x48x24xbf16>
    %28 = vector.shape_cast %27 : vector<1x48x24xbf16> to vector<48x24xbf16>
    %cst_14 = arith.constant dense<0.000000e+00> : vector<80x24xf32>
    %29 = tpu.matmul %26, %28, %cst_14 {dimension_numbers = #tpu.dot_dimension_numbers<[1], [0], [0], [1], [0, 0, 1, 1], [], []>} : vector<80x48xbf16>, vector<48x24xbf16>, vector<80x24xf32> -> vector<80x24xf32>
    %30 = arith.addf %23, %29 : vector<80x24xf32>
    %31 = vector.extract_strided_slice %25 {offsets = [1, 0], sizes = [80, 48], strides = [1, 1]} : vector<102x48xbf16> to vector<80x48xbf16>
    %c1 = arith.constant 1 : index
    %c0_15 = arith.constant 0 : index
    %c0_16 = arith.constant 0 : index
    %32 = vector.load %arg3[%c1, %c0_15, %c0_16] : memref<9x48x24xbf16, #tpu.memory_space<vmem>>, vector<1x48x24xbf16>
    %33 = vector.shape_cast %32 : vector<1x48x24xbf16> to vector<48x24xbf16>
    %cst_17 = arith.constant dense<0.000000e+00> : vector<80x24xf32>
    %34 = tpu.matmul %31, %33, %cst_17 {dimension_numbers = #tpu.dot_dimension_numbers<[1], [0], [0], [1], [0, 0, 1, 1], [], []>} : vector<80x48xbf16>, vector<48x24xbf16>, vector<80x24xf32> -> vector<80x24xf32>
    %35 = arith.addf %30, %34 : vector<80x24xf32>
    %36 = vector.extract_strided_slice %25 {offsets = [2, 0], sizes = [80, 48], strides = [1, 1]} : vector<102x48xbf16> to vector<80x48xbf16>
    %c2 = arith.constant 2 : index
    %c0_18 = arith.constant 0 : index
    %c0_19 = arith.constant 0 : index
    %37 = vector.load %arg3[%c2, %c0_18, %c0_19] : memref<9x48x24xbf16, #tpu.memory_space<vmem>>, vector<1x48x24xbf16>
    %38 = vector.shape_cast %37 : vector<1x48x24xbf16> to vector<48x24xbf16>
    %cst_20 = arith.constant dense<0.000000e+00> : vector<80x24xf32>
    %39 = tpu.matmul %36, %38, %cst_20 {dimension_numbers = #tpu.dot_dimension_numbers<[1], [0], [0], [1], [0, 0, 1, 1], [], []>} : vector<80x48xbf16>, vector<48x24xbf16>, vector<80x24xf32> -> vector<80x24xf32>
    %40 = arith.addf %35, %39 : vector<80x24xf32>
    %41 = vector.extract_strided_slice %25 {offsets = [10, 0], sizes = [80, 48], strides = [1, 1]} : vector<102x48xbf16> to vector<80x48xbf16>
    %c3 = arith.constant 3 : index
    %c0_21 = arith.constant 0 : index
    %c0_22 = arith.constant 0 : index
    %42 = vector.load %arg3[%c3, %c0_21, %c0_22] : memref<9x48x24xbf16, #tpu.memory_space<vmem>>, vector<1x48x24xbf16>
    %43 = vector.shape_cast %42 : vector<1x48x24xbf16> to vector<48x24xbf16>
    %cst_23 = arith.constant dense<0.000000e+00> : vector<80x24xf32>
    %44 = tpu.matmul %41, %43, %cst_23 {dimension_numbers = #tpu.dot_dimension_numbers<[1], [0], [0], [1], [0, 0, 1, 1], [], []>} : vector<80x48xbf16>, vector<48x24xbf16>, vector<80x24xf32> -> vector<80x24xf32>
    %45 = arith.addf %40, %44 : vector<80x24xf32>
    %46 = vector.extract_strided_slice %25 {offsets = [11, 0], sizes = [80, 48], strides = [1, 1]} : vector<102x48xbf16> to vector<80x48xbf16>
    %c4 = arith.constant 4 : index
    %c0_24 = arith.constant 0 : index
    %c0_25 = arith.constant 0 : index
    %47 = vector.load %arg3[%c4, %c0_24, %c0_25] : memref<9x48x24xbf16, #tpu.memory_space<vmem>>, vector<1x48x24xbf16>
    %48 = vector.shape_cast %47 : vector<1x48x24xbf16> to vector<48x24xbf16>
    %cst_26 = arith.constant dense<0.000000e+00> : vector<80x24xf32>
    %49 = tpu.matmul %46, %48, %cst_26 {dimension_numbers = #tpu.dot_dimension_numbers<[1], [0], [0], [1], [0, 0, 1, 1], [], []>} : vector<80x48xbf16>, vector<48x24xbf16>, vector<80x24xf32> -> vector<80x24xf32>
    %50 = arith.addf %45, %49 : vector<80x24xf32>
    %51 = vector.extract_strided_slice %25 {offsets = [12, 0], sizes = [80, 48], strides = [1, 1]} : vector<102x48xbf16> to vector<80x48xbf16>
    %c5 = arith.constant 5 : index
    %c0_27 = arith.constant 0 : index
    %c0_28 = arith.constant 0 : index
    %52 = vector.load %arg3[%c5, %c0_27, %c0_28] : memref<9x48x24xbf16, #tpu.memory_space<vmem>>, vector<1x48x24xbf16>
    %53 = vector.shape_cast %52 : vector<1x48x24xbf16> to vector<48x24xbf16>
    %cst_29 = arith.constant dense<0.000000e+00> : vector<80x24xf32>
    %54 = tpu.matmul %51, %53, %cst_29 {dimension_numbers = #tpu.dot_dimension_numbers<[1], [0], [0], [1], [0, 0, 1, 1], [], []>} : vector<80x48xbf16>, vector<48x24xbf16>, vector<80x24xf32> -> vector<80x24xf32>
    %55 = arith.addf %50, %54 : vector<80x24xf32>
    %56 = vector.extract_strided_slice %25 {offsets = [20, 0], sizes = [80, 48], strides = [1, 1]} : vector<102x48xbf16> to vector<80x48xbf16>
    %c6 = arith.constant 6 : index
    %c0_30 = arith.constant 0 : index
    %c0_31 = arith.constant 0 : index
    %57 = vector.load %arg3[%c6, %c0_30, %c0_31] : memref<9x48x24xbf16, #tpu.memory_space<vmem>>, vector<1x48x24xbf16>
    %58 = vector.shape_cast %57 : vector<1x48x24xbf16> to vector<48x24xbf16>
    %cst_32 = arith.constant dense<0.000000e+00> : vector<80x24xf32>
    %59 = tpu.matmul %56, %58, %cst_32 {dimension_numbers = #tpu.dot_dimension_numbers<[1], [0], [0], [1], [0, 0, 1, 1], [], []>} : vector<80x48xbf16>, vector<48x24xbf16>, vector<80x24xf32> -> vector<80x24xf32>
    %60 = arith.addf %55, %59 : vector<80x24xf32>
    %61 = vector.extract_strided_slice %25 {offsets = [21, 0], sizes = [80, 48], strides = [1, 1]} : vector<102x48xbf16> to vector<80x48xbf16>
    %c7 = arith.constant 7 : index
    %c0_33 = arith.constant 0 : index
    %c0_34 = arith.constant 0 : index
    %62 = vector.load %arg3[%c7, %c0_33, %c0_34] : memref<9x48x24xbf16, #tpu.memory_space<vmem>>, vector<1x48x24xbf16>
    %63 = vector.shape_cast %62 : vector<1x48x24xbf16> to vector<48x24xbf16>
    %cst_35 = arith.constant dense<0.000000e+00> : vector<80x24xf32>
    %64 = tpu.matmul %61, %63, %cst_35 {dimension_numbers = #tpu.dot_dimension_numbers<[1], [0], [0], [1], [0, 0, 1, 1], [], []>} : vector<80x48xbf16>, vector<48x24xbf16>, vector<80x24xf32> -> vector<80x24xf32>
    %65 = arith.addf %60, %64 : vector<80x24xf32>
    %66 = vector.extract_strided_slice %25 {offsets = [22, 0], sizes = [80, 48], strides = [1, 1]} : vector<102x48xbf16> to vector<80x48xbf16>
    %c8 = arith.constant 8 : index
    %c0_36 = arith.constant 0 : index
    %c0_37 = arith.constant 0 : index
    %67 = vector.load %arg3[%c8, %c0_36, %c0_37] : memref<9x48x24xbf16, #tpu.memory_space<vmem>>, vector<1x48x24xbf16>
    %68 = vector.shape_cast %67 : vector<1x48x24xbf16> to vector<48x24xbf16>
    %cst_38 = arith.constant dense<0.000000e+00> : vector<80x24xf32>
    %69 = tpu.matmul %66, %68, %cst_38 {dimension_numbers = #tpu.dot_dimension_numbers<[1], [0], [0], [1], [0, 0, 1, 1], [], []>} : vector<80x48xbf16>, vector<48x24xbf16>, vector<80x24xf32> -> vector<80x24xf32>
    %70 = arith.addf %65, %69 : vector<80x24xf32>
    %c0_39 = arith.constant 0 : index
    %c0_40 = arith.constant 0 : index
    %c0_41 = arith.constant 0 : index
    %71 = vector.load %arg2[%c0_39, %c0_40, %c0_41] : memref<1x102x16xbf16, #tpu.memory_space<vmem>>, vector<1x102x16xbf16>
    %72 = vector.shape_cast %71 : vector<1x102x16xbf16> to vector<102x16xbf16>
    %73 = vector.extract_strided_slice %72 {offsets = [0, 0], sizes = [80, 16], strides = [1, 1]} : vector<102x16xbf16> to vector<80x16xbf16>
    %c0_42 = arith.constant 0 : index
    %c0_43 = arith.constant 0 : index
    %c0_44 = arith.constant 0 : index
    %74 = vector.load %arg4[%c0_42, %c0_43, %c0_44] : memref<9x16x24xbf16, #tpu.memory_space<vmem>>, vector<1x16x24xbf16>
    %75 = vector.shape_cast %74 : vector<1x16x24xbf16> to vector<16x24xbf16>
    %cst_45 = arith.constant dense<0.000000e+00> : vector<80x24xf32>
    %76 = tpu.matmul %73, %75, %cst_45 {dimension_numbers = #tpu.dot_dimension_numbers<[1], [0], [0], [1], [0, 0, 1, 1], [], []>} : vector<80x16xbf16>, vector<16x24xbf16>, vector<80x24xf32> -> vector<80x24xf32>
    %77 = arith.addf %70, %76 : vector<80x24xf32>
    %78 = vector.extract_strided_slice %72 {offsets = [1, 0], sizes = [80, 16], strides = [1, 1]} : vector<102x16xbf16> to vector<80x16xbf16>
    %c1_46 = arith.constant 1 : index
    %c0_47 = arith.constant 0 : index
    %c0_48 = arith.constant 0 : index
    %79 = vector.load %arg4[%c1_46, %c0_47, %c0_48] : memref<9x16x24xbf16, #tpu.memory_space<vmem>>, vector<1x16x24xbf16>
    %80 = vector.shape_cast %79 : vector<1x16x24xbf16> to vector<16x24xbf16>
    %cst_49 = arith.constant dense<0.000000e+00> : vector<80x24xf32>
    %81 = tpu.matmul %78, %80, %cst_49 {dimension_numbers = #tpu.dot_dimension_numbers<[1], [0], [0], [1], [0, 0, 1, 1], [], []>} : vector<80x16xbf16>, vector<16x24xbf16>, vector<80x24xf32> -> vector<80x24xf32>
    %82 = arith.addf %77, %81 : vector<80x24xf32>
    %83 = vector.extract_strided_slice %72 {offsets = [2, 0], sizes = [80, 16], strides = [1, 1]} : vector<102x16xbf16> to vector<80x16xbf16>
    %c2_50 = arith.constant 2 : index
    %c0_51 = arith.constant 0 : index
    %c0_52 = arith.constant 0 : index
    %84 = vector.load %arg4[%c2_50, %c0_51, %c0_52] : memref<9x16x24xbf16, #tpu.memory_space<vmem>>, vector<1x16x24xbf16>
    %85 = vector.shape_cast %84 : vector<1x16x24xbf16> to vector<16x24xbf16>
    %cst_53 = arith.constant dense<0.000000e+00> : vector<80x24xf32>
    %86 = tpu.matmul %83, %85, %cst_53 {dimension_numbers = #tpu.dot_dimension_numbers<[1], [0], [0], [1], [0, 0, 1, 1], [], []>} : vector<80x16xbf16>, vector<16x24xbf16>, vector<80x24xf32> -> vector<80x24xf32>
    %87 = arith.addf %82, %86 : vector<80x24xf32>
    %88 = vector.extract_strided_slice %72 {offsets = [10, 0], sizes = [80, 16], strides = [1, 1]} : vector<102x16xbf16> to vector<80x16xbf16>
    %c3_54 = arith.constant 3 : index
    %c0_55 = arith.constant 0 : index
    %c0_56 = arith.constant 0 : index
    %89 = vector.load %arg4[%c3_54, %c0_55, %c0_56] : memref<9x16x24xbf16, #tpu.memory_space<vmem>>, vector<1x16x24xbf16>
    %90 = vector.shape_cast %89 : vector<1x16x24xbf16> to vector<16x24xbf16>
    %cst_57 = arith.constant dense<0.000000e+00> : vector<80x24xf32>
    %91 = tpu.matmul %88, %90, %cst_57 {dimension_numbers = #tpu.dot_dimension_numbers<[1], [0], [0], [1], [0, 0, 1, 1], [], []>} : vector<80x16xbf16>, vector<16x24xbf16>, vector<80x24xf32> -> vector<80x24xf32>
    %92 = arith.addf %87, %91 : vector<80x24xf32>
    %93 = vector.extract_strided_slice %72 {offsets = [11, 0], sizes = [80, 16], strides = [1, 1]} : vector<102x16xbf16> to vector<80x16xbf16>
    %c4_58 = arith.constant 4 : index
    %c0_59 = arith.constant 0 : index
    %c0_60 = arith.constant 0 : index
    %94 = vector.load %arg4[%c4_58, %c0_59, %c0_60] : memref<9x16x24xbf16, #tpu.memory_space<vmem>>, vector<1x16x24xbf16>
    %95 = vector.shape_cast %94 : vector<1x16x24xbf16> to vector<16x24xbf16>
    %cst_61 = arith.constant dense<0.000000e+00> : vector<80x24xf32>
    %96 = tpu.matmul %93, %95, %cst_61 {dimension_numbers = #tpu.dot_dimension_numbers<[1], [0], [0], [1], [0, 0, 1, 1], [], []>} : vector<80x16xbf16>, vector<16x24xbf16>, vector<80x24xf32> -> vector<80x24xf32>
    %97 = arith.addf %92, %96 : vector<80x24xf32>
    %98 = vector.extract_strided_slice %72 {offsets = [12, 0], sizes = [80, 16], strides = [1, 1]} : vector<102x16xbf16> to vector<80x16xbf16>
    %c5_62 = arith.constant 5 : index
    %c0_63 = arith.constant 0 : index
    %c0_64 = arith.constant 0 : index
    %99 = vector.load %arg4[%c5_62, %c0_63, %c0_64] : memref<9x16x24xbf16, #tpu.memory_space<vmem>>, vector<1x16x24xbf16>
    %100 = vector.shape_cast %99 : vector<1x16x24xbf16> to vector<16x24xbf16>
    %cst_65 = arith.constant dense<0.000000e+00> : vector<80x24xf32>
    %101 = tpu.matmul %98, %100, %cst_65 {dimension_numbers = #tpu.dot_dimension_numbers<[1], [0], [0], [1], [0, 0, 1, 1], [], []>} : vector<80x16xbf16>, vector<16x24xbf16>, vector<80x24xf32> -> vector<80x24xf32>
    %102 = arith.addf %97, %101 : vector<80x24xf32>
    %103 = vector.extract_strided_slice %72 {offsets = [20, 0], sizes = [80, 16], strides = [1, 1]} : vector<102x16xbf16> to vector<80x16xbf16>
    %c6_66 = arith.constant 6 : index
    %c0_67 = arith.constant 0 : index
    %c0_68 = arith.constant 0 : index
    %104 = vector.load %arg4[%c6_66, %c0_67, %c0_68] : memref<9x16x24xbf16, #tpu.memory_space<vmem>>, vector<1x16x24xbf16>
    %105 = vector.shape_cast %104 : vector<1x16x24xbf16> to vector<16x24xbf16>
    %cst_69 = arith.constant dense<0.000000e+00> : vector<80x24xf32>
    %106 = tpu.matmul %103, %105, %cst_69 {dimension_numbers = #tpu.dot_dimension_numbers<[1], [0], [0], [1], [0, 0, 1, 1], [], []>} : vector<80x16xbf16>, vector<16x24xbf16>, vector<80x24xf32> -> vector<80x24xf32>
    %107 = arith.addf %102, %106 : vector<80x24xf32>
    %108 = vector.extract_strided_slice %72 {offsets = [21, 0], sizes = [80, 16], strides = [1, 1]} : vector<102x16xbf16> to vector<80x16xbf16>
    %c7_70 = arith.constant 7 : index
    %c0_71 = arith.constant 0 : index
    %c0_72 = arith.constant 0 : index
    %109 = vector.load %arg4[%c7_70, %c0_71, %c0_72] : memref<9x16x24xbf16, #tpu.memory_space<vmem>>, vector<1x16x24xbf16>
    %110 = vector.shape_cast %109 : vector<1x16x24xbf16> to vector<16x24xbf16>
    %cst_73 = arith.constant dense<0.000000e+00> : vector<80x24xf32>
    %111 = tpu.matmul %108, %110, %cst_73 {dimension_numbers = #tpu.dot_dimension_numbers<[1], [0], [0], [1], [0, 0, 1, 1], [], []>} : vector<80x16xbf16>, vector<16x24xbf16>, vector<80x24xf32> -> vector<80x24xf32>
    %112 = arith.addf %107, %111 : vector<80x24xf32>
    %113 = vector.extract_strided_slice %72 {offsets = [22, 0], sizes = [80, 16], strides = [1, 1]} : vector<102x16xbf16> to vector<80x16xbf16>
    %c8_74 = arith.constant 8 : index
    %c0_75 = arith.constant 0 : index
    %c0_76 = arith.constant 0 : index
    %114 = vector.load %arg4[%c8_74, %c0_75, %c0_76] : memref<9x16x24xbf16, #tpu.memory_space<vmem>>, vector<1x16x24xbf16>
    %115 = vector.shape_cast %114 : vector<1x16x24xbf16> to vector<16x24xbf16>
    %cst_77 = arith.constant dense<0.000000e+00> : vector<80x24xf32>
    %116 = tpu.matmul %113, %115, %cst_77 {dimension_numbers = #tpu.dot_dimension_numbers<[1], [0], [0], [1], [0, 0, 1, 1], [], []>} : vector<80x16xbf16>, vector<16x24xbf16>, vector<80x24xf32> -> vector<80x24xf32>
    %117 = arith.addf %112, %116 : vector<80x24xf32>
    %c0_78 = arith.constant 0 : index
    %c0_79 = arith.constant 0 : index
    %118 = vector.load %arg5[%c0_78, %c0_79] : memref<1x24xf32, #tpu.memory_space<vmem>>, vector<1x24xf32>
    %119 = vector.broadcast %118 : vector<1x24xf32> to vector<80x24xf32>
    %120 = arith.addf %117, %119 : vector<80x24xf32>
    %cst_80 = arith.constant 0.000000e+00 : f32
    %121 = vector.broadcast %cst_80 : f32 to vector<80x24xf32>
    %122 = arith.maximumf %120, %121 : vector<80x24xf32>
    %cst_81 = arith.constant 0.000000e+00 : f32
    %123 = vector.shape_cast %22 : vector<80x1xi1> to vector<80x1xi1>
    %124 = vector.broadcast %123 : vector<80x1xi1> to vector<80x24xi1>
    %125 = vector.broadcast %cst_81 : f32 to vector<80x24xf32>
    %126 = arith.select %124, %122, %125 : vector<80x24xi1>, vector<80x24xf32>
    %127 = arith.truncf %126 : vector<80x24xf32> to vector<80x24xbf16>
    %c11 = arith.constant 11 : index
    %c0_82 = arith.constant 0 : index
    %128 = vector.load %arg11[%c11, %c0_82] : memref<102x24xbf16, #tpu.memory_space<vmem>>, vector<80x24xbf16>
    tpu.vector_store %arg11[%c11, %c0_82], %127 {strides = array<i32>} : memref<102x24xbf16, #tpu.memory_space<vmem>>, vector<80x24xbf16>,
    %cst_83 = arith.constant 0.000000e+00 : f32
    %129 = vector.broadcast %cst_83 : f32 to vector<80x24xf32>
    %c0_84 = arith.constant 0 : index
    %c0_85 = arith.constant 0 : index
    %130 = vector.load %arg11[%c0_84, %c0_85] : memref<102x24xbf16, #tpu.memory_space<vmem>>, vector<102x24xbf16>
    %131 = vector.extract_strided_slice %130 {offsets = [0, 0], sizes = [80, 24], strides = [1, 1]} : vector<102x24xbf16> to vector<80x24xbf16>
    %c0_86 = arith.constant 0 : index
    %c0_87 = arith.constant 0 : index
    %c0_88 = arith.constant 0 : index
    %132 = vector.load %arg6[%c0_86, %c0_87, %c0_88] : memref<9x24x24xbf16, #tpu.memory_space<vmem>>, vector<1x24x24xbf16>
    %133 = vector.shape_cast %132 : vector<1x24x24xbf16> to vector<24x24xbf16>
    %cst_89 = arith.constant dense<0.000000e+00> : vector<80x24xf32>
    %134 = tpu.matmul %131, %133, %cst_89 {dimension_numbers = #tpu.dot_dimension_numbers<[1], [0], [0], [1], [0, 0, 1, 1], [], []>} : vector<80x24xbf16>, vector<24x24xbf16>, vector<80x24xf32> -> vector<80x24xf32>
    %135 = arith.addf %129, %134 : vector<80x24xf32>
    %136 = vector.extract_strided_slice %130 {offsets = [1, 0], sizes = [80, 24], strides = [1, 1]} : vector<102x24xbf16> to vector<80x24xbf16>
    %c1_90 = arith.constant 1 : index
    %c0_91 = arith.constant 0 : index
    %c0_92 = arith.constant 0 : index
    %137 = vector.load %arg6[%c1_90, %c0_91, %c0_92] : memref<9x24x24xbf16, #tpu.memory_space<vmem>>, vector<1x24x24xbf16>
    %138 = vector.shape_cast %137 : vector<1x24x24xbf16> to vector<24x24xbf16>
    %cst_93 = arith.constant dense<0.000000e+00> : vector<80x24xf32>
    %139 = tpu.matmul %136, %138, %cst_93 {dimension_numbers = #tpu.dot_dimension_numbers<[1], [0], [0], [1], [0, 0, 1, 1], [], []>} : vector<80x24xbf16>, vector<24x24xbf16>, vector<80x24xf32> -> vector<80x24xf32>
    %140 = arith.addf %135, %139 : vector<80x24xf32>
    %141 = vector.extract_strided_slice %130 {offsets = [2, 0], sizes = [80, 24], strides = [1, 1]} : vector<102x24xbf16> to vector<80x24xbf16>
    %c2_94 = arith.constant 2 : index
    %c0_95 = arith.constant 0 : index
    %c0_96 = arith.constant 0 : index
    %142 = vector.load %arg6[%c2_94, %c0_95, %c0_96] : memref<9x24x24xbf16, #tpu.memory_space<vmem>>, vector<1x24x24xbf16>
    %143 = vector.shape_cast %142 : vector<1x24x24xbf16> to vector<24x24xbf16>
    %cst_97 = arith.constant dense<0.000000e+00> : vector<80x24xf32>
    %144 = tpu.matmul %141, %143, %cst_97 {dimension_numbers = #tpu.dot_dimension_numbers<[1], [0], [0], [1], [0, 0, 1, 1], [], []>} : vector<80x24xbf16>, vector<24x24xbf16>, vector<80x24xf32> -> vector<80x24xf32>
    %145 = arith.addf %140, %144 : vector<80x24xf32>
    %146 = vector.extract_strided_slice %130 {offsets = [10, 0], sizes = [80, 24], strides = [1, 1]} : vector<102x24xbf16> to vector<80x24xbf16>
    %c3_98 = arith.constant 3 : index
    %c0_99 = arith.constant 0 : index
    %c0_100 = arith.constant 0 : index
    %147 = vector.load %arg6[%c3_98, %c0_99, %c0_100] : memref<9x24x24xbf16, #tpu.memory_space<vmem>>, vector<1x24x24xbf16>
    %148 = vector.shape_cast %147 : vector<1x24x24xbf16> to vector<24x24xbf16>
    %cst_101 = arith.constant dense<0.000000e+00> : vector<80x24xf32>
    %149 = tpu.matmul %146, %148, %cst_101 {dimension_numbers = #tpu.dot_dimension_numbers<[1], [0], [0], [1], [0, 0, 1, 1], [], []>} : vector<80x24xbf16>, vector<24x24xbf16>, vector<80x24xf32> -> vector<80x24xf32>
    %150 = arith.addf %145, %149 : vector<80x24xf32>
    %151 = vector.extract_strided_slice %130 {offsets = [11, 0], sizes = [80, 24], strides = [1, 1]} : vector<102x24xbf16> to vector<80x24xbf16>
    %c4_102 = arith.constant 4 : index
    %c0_103 = arith.constant 0 : index
    %c0_104 = arith.constant 0 : index
    %152 = vector.load %arg6[%c4_102, %c0_103, %c0_104] : memref<9x24x24xbf16, #tpu.memory_space<vmem>>, vector<1x24x24xbf16>
    %153 = vector.shape_cast %152 : vector<1x24x24xbf16> to vector<24x24xbf16>
    %cst_105 = arith.constant dense<0.000000e+00> : vector<80x24xf32>
    %154 = tpu.matmul %151, %153, %cst_105 {dimension_numbers = #tpu.dot_dimension_numbers<[1], [0], [0], [1], [0, 0, 1, 1], [], []>} : vector<80x24xbf16>, vector<24x24xbf16>, vector<80x24xf32> -> vector<80x24xf32>
    %155 = arith.addf %150, %154 : vector<80x24xf32>
    %156 = vector.extract_strided_slice %130 {offsets = [12, 0], sizes = [80, 24], strides = [1, 1]} : vector<102x24xbf16> to vector<80x24xbf16>
    %c5_106 = arith.constant 5 : index
    %c0_107 = arith.constant 0 : index
    %c0_108 = arith.constant 0 : index
    %157 = vector.load %arg6[%c5_106, %c0_107, %c0_108] : memref<9x24x24xbf16, #tpu.memory_space<vmem>>, vector<1x24x24xbf16>
    %158 = vector.shape_cast %157 : vector<1x24x24xbf16> to vector<24x24xbf16>
    %cst_109 = arith.constant dense<0.000000e+00> : vector<80x24xf32>
    %159 = tpu.matmul %156, %158, %cst_109 {dimension_numbers = #tpu.dot_dimension_numbers<[1], [0], [0], [1], [0, 0, 1, 1], [], []>} : vector<80x24xbf16>, vector<24x24xbf16>, vector<80x24xf32> -> vector<80x24xf32>
    %160 = arith.addf %155, %159 : vector<80x24xf32>
    %161 = vector.extract_strided_slice %130 {offsets = [20, 0], sizes = [80, 24], strides = [1, 1]} : vector<102x24xbf16> to vector<80x24xbf16>
    %c6_110 = arith.constant 6 : index
    %c0_111 = arith.constant 0 : index
    %c0_112 = arith.constant 0 : index
    %162 = vector.load %arg6[%c6_110, %c0_111, %c0_112] : memref<9x24x24xbf16, #tpu.memory_space<vmem>>, vector<1x24x24xbf16>
    %163 = vector.shape_cast %162 : vector<1x24x24xbf16> to vector<24x24xbf16>
    %cst_113 = arith.constant dense<0.000000e+00> : vector<80x24xf32>
    %164 = tpu.matmul %161, %163, %cst_113 {dimension_numbers = #tpu.dot_dimension_numbers<[1], [0], [0], [1], [0, 0, 1, 1], [], []>} : vector<80x24xbf16>, vector<24x24xbf16>, vector<80x24xf32> -> vector<80x24xf32>
    %165 = arith.addf %160, %164 : vector<80x24xf32>
    %166 = vector.extract_strided_slice %130 {offsets = [21, 0], sizes = [80, 24], strides = [1, 1]} : vector<102x24xbf16> to vector<80x24xbf16>
    %c7_114 = arith.constant 7 : index
    %c0_115 = arith.constant 0 : index
    %c0_116 = arith.constant 0 : index
    %167 = vector.load %arg6[%c7_114, %c0_115, %c0_116] : memref<9x24x24xbf16, #tpu.memory_space<vmem>>, vector<1x24x24xbf16>
    %168 = vector.shape_cast %167 : vector<1x24x24xbf16> to vector<24x24xbf16>
    %cst_117 = arith.constant dense<0.000000e+00> : vector<80x24xf32>
    %169 = tpu.matmul %166, %168, %cst_117 {dimension_numbers = #tpu.dot_dimension_numbers<[1], [0], [0], [1], [0, 0, 1, 1], [], []>} : vector<80x24xbf16>, vector<24x24xbf16>, vector<80x24xf32> -> vector<80x24xf32>
    %170 = arith.addf %165, %169 : vector<80x24xf32>
    %171 = vector.extract_strided_slice %130 {offsets = [22, 0], sizes = [80, 24], strides = [1, 1]} : vector<102x24xbf16> to vector<80x24xbf16>
    %c8_118 = arith.constant 8 : index
    %c0_119 = arith.constant 0 : index
    %c0_120 = arith.constant 0 : index
    %172 = vector.load %arg6[%c8_118, %c0_119, %c0_120] : memref<9x24x24xbf16, #tpu.memory_space<vmem>>, vector<1x24x24xbf16>
    %173 = vector.shape_cast %172 : vector<1x24x24xbf16> to vector<24x24xbf16>
    %cst_121 = arith.constant dense<0.000000e+00> : vector<80x24xf32>
    %174 = tpu.matmul %171, %173, %cst_121 {dimension_numbers = #tpu.dot_dimension_numbers<[1], [0], [0], [1], [0, 0, 1, 1], [], []>} : vector<80x24xbf16>, vector<24x24xbf16>, vector<80x24xf32> -> vector<80x24xf32>
    %175 = arith.addf %170, %174 : vector<80x24xf32>
    %c0_122 = arith.constant 0 : index
    %c0_123 = arith.constant 0 : index
    %176 = vector.load %arg7[%c0_122, %c0_123] : memref<1x24xf32, #tpu.memory_space<vmem>>, vector<1x24xf32>
    %177 = vector.broadcast %176 : vector<1x24xf32> to vector<80x24xf32>
    %178 = arith.addf %175, %177 : vector<80x24xf32>
    %cst_124 = arith.constant 0.000000e+00 : f32
    %179 = vector.broadcast %cst_124 : f32 to vector<80x24xf32>
    %180 = arith.maximumf %178, %179 : vector<80x24xf32>
    %cst_125 = arith.constant 0.000000e+00 : f32
    %181 = vector.shape_cast %22 : vector<80x1xi1> to vector<80x1xi1>
    %182 = vector.broadcast %181 : vector<80x1xi1> to vector<80x24xi1>
    %183 = vector.broadcast %cst_125 : f32 to vector<80x24xf32>
    %184 = arith.select %182, %180, %183 : vector<80x24xi1>, vector<80x24xf32>
    %185 = arith.truncf %184 : vector<80x24xf32> to vector<80x24xbf16>
    %c11_126 = arith.constant 11 : index
    %c0_127 = arith.constant 0 : index
    %186 = vector.load %arg12[%c11_126, %c0_127] : memref<102x24xbf16, #tpu.memory_space<vmem>>, vector<80x24xbf16>
    tpu.vector_store %arg12[%c11_126, %c0_127], %185 {strides = array<i32>} : memref<102x24xbf16, #tpu.memory_space<vmem>>, vector<80x24xbf16>,
    %cst_128 = arith.constant 0.000000e+00 : f32
    %187 = vector.broadcast %cst_128 : f32 to vector<80x1xf32>
    %c0_129 = arith.constant 0 : index
    %c0_130 = arith.constant 0 : index
    %188 = vector.load %arg12[%c0_129, %c0_130] : memref<102x24xbf16, #tpu.memory_space<vmem>>, vector<102x24xbf16>
    %189 = vector.extract_strided_slice %188 {offsets = [0, 0], sizes = [80, 24], strides = [1, 1]} : vector<102x24xbf16> to vector<80x24xbf16>
    %c0_131 = arith.constant 0 : index
    %c0_132 = arith.constant 0 : index
    %c0_133 = arith.constant 0 : index
    %190 = vector.load %arg8[%c0_131, %c0_132, %c0_133] : memref<9x24x1xbf16, #tpu.memory_space<vmem>>, vector<1x24x1xbf16>
    %191 = vector.shape_cast %190 : vector<1x24x1xbf16> to vector<24x1xbf16>
    %cst_134 = arith.constant dense<0.000000e+00> : vector<80x1xf32>
    %192 = tpu.matmul %189, %191, %cst_134 {dimension_numbers = #tpu.dot_dimension_numbers<[1], [0], [0], [1], [0, 0, 1, 1], [], []>} : vector<80x24xbf16>, vector<24x1xbf16>, vector<80x1xf32> -> vector<80x1xf32>
    %193 = arith.addf %187, %192 : vector<80x1xf32>
    %194 = vector.extract_strided_slice %188 {offsets = [1, 0], sizes = [80, 24], strides = [1, 1]} : vector<102x24xbf16> to vector<80x24xbf16>
    %c1_135 = arith.constant 1 : index
    %c0_136 = arith.constant 0 : index
    %c0_137 = arith.constant 0 : index
    %195 = vector.load %arg8[%c1_135, %c0_136, %c0_137] : memref<9x24x1xbf16, #tpu.memory_space<vmem>>, vector<1x24x1xbf16>
    %196 = vector.shape_cast %195 : vector<1x24x1xbf16> to vector<24x1xbf16>
    %cst_138 = arith.constant dense<0.000000e+00> : vector<80x1xf32>
    %197 = tpu.matmul %194, %196, %cst_138 {dimension_numbers = #tpu.dot_dimension_numbers<[1], [0], [0], [1], [0, 0, 1, 1], [], []>} : vector<80x24xbf16>, vector<24x1xbf16>, vector<80x1xf32> -> vector<80x1xf32>
    %198 = arith.addf %193, %197 : vector<80x1xf32>
    %199 = vector.extract_strided_slice %188 {offsets = [2, 0], sizes = [80, 24], strides = [1, 1]} : vector<102x24xbf16> to vector<80x24xbf16>
    %c2_139 = arith.constant 2 : index
    %c0_140 = arith.constant 0 : index
    %c0_141 = arith.constant 0 : index
    %200 = vector.load %arg8[%c2_139, %c0_140, %c0_141] : memref<9x24x1xbf16, #tpu.memory_space<vmem>>, vector<1x24x1xbf16>
    %201 = vector.shape_cast %200 : vector<1x24x1xbf16> to vector<24x1xbf16>
    %cst_142 = arith.constant dense<0.000000e+00> : vector<80x1xf32>
    %202 = tpu.matmul %199, %201, %cst_142 {dimension_numbers = #tpu.dot_dimension_numbers<[1], [0], [0], [1], [0, 0, 1, 1], [], []>} : vector<80x24xbf16>, vector<24x1xbf16>, vector<80x1xf32> -> vector<80x1xf32>
    %203 = arith.addf %198, %202 : vector<80x1xf32>
    %204 = vector.extract_strided_slice %188 {offsets = [10, 0], sizes = [80, 24], strides = [1, 1]} : vector<102x24xbf16> to vector<80x24xbf16>
    %c3_143 = arith.constant 3 : index
    %c0_144 = arith.constant 0 : index
    %c0_145 = arith.constant 0 : index
    %205 = vector.load %arg8[%c3_143, %c0_144, %c0_145] : memref<9x24x1xbf16, #tpu.memory_space<vmem>>, vector<1x24x1xbf16>
    %206 = vector.shape_cast %205 : vector<1x24x1xbf16> to vector<24x1xbf16>
    %cst_146 = arith.constant dense<0.000000e+00> : vector<80x1xf32>
    %207 = tpu.matmul %204, %206, %cst_146 {dimension_numbers = #tpu.dot_dimension_numbers<[1], [0], [0], [1], [0, 0, 1, 1], [], []>} : vector<80x24xbf16>, vector<24x1xbf16>, vector<80x1xf32> -> vector<80x1xf32>
    %208 = arith.addf %203, %207 : vector<80x1xf32>
    %209 = vector.extract_strided_slice %188 {offsets = [11, 0], sizes = [80, 24], strides = [1, 1]} : vector<102x24xbf16> to vector<80x24xbf16>
    %c4_147 = arith.constant 4 : index
    %c0_148 = arith.constant 0 : index
    %c0_149 = arith.constant 0 : index
    %210 = vector.load %arg8[%c4_147, %c0_148, %c0_149] : memref<9x24x1xbf16, #tpu.memory_space<vmem>>, vector<1x24x1xbf16>
    %211 = vector.shape_cast %210 : vector<1x24x1xbf16> to vector<24x1xbf16>
    %cst_150 = arith.constant dense<0.000000e+00> : vector<80x1xf32>
    %212 = tpu.matmul %209, %211, %cst_150 {dimension_numbers = #tpu.dot_dimension_numbers<[1], [0], [0], [1], [0, 0, 1, 1], [], []>} : vector<80x24xbf16>, vector<24x1xbf16>, vector<80x1xf32> -> vector<80x1xf32>
    %213 = arith.addf %208, %212 : vector<80x1xf32>
    %214 = vector.extract_strided_slice %188 {offsets = [12, 0], sizes = [80, 24], strides = [1, 1]} : vector<102x24xbf16> to vector<80x24xbf16>
    %c5_151 = arith.constant 5 : index
    %c0_152 = arith.constant 0 : index
    %c0_153 = arith.constant 0 : index
    %215 = vector.load %arg8[%c5_151, %c0_152, %c0_153] : memref<9x24x1xbf16, #tpu.memory_space<vmem>>, vector<1x24x1xbf16>
    %216 = vector.shape_cast %215 : vector<1x24x1xbf16> to vector<24x1xbf16>
    %cst_154 = arith.constant dense<0.000000e+00> : vector<80x1xf32>
    %217 = tpu.matmul %214, %216, %cst_154 {dimension_numbers = #tpu.dot_dimension_numbers<[1], [0], [0], [1], [0, 0, 1, 1], [], []>} : vector<80x24xbf16>, vector<24x1xbf16>, vector<80x1xf32> -> vector<80x1xf32>
    %218 = arith.addf %213, %217 : vector<80x1xf32>
    %219 = vector.extract_strided_slice %188 {offsets = [20, 0], sizes = [80, 24], strides = [1, 1]} : vector<102x24xbf16> to vector<80x24xbf16>
    %c6_155 = arith.constant 6 : index
    %c0_156 = arith.constant 0 : index
    %c0_157 = arith.constant 0 : index
    %220 = vector.load %arg8[%c6_155, %c0_156, %c0_157] : memref<9x24x1xbf16, #tpu.memory_space<vmem>>, vector<1x24x1xbf16>
    %221 = vector.shape_cast %220 : vector<1x24x1xbf16> to vector<24x1xbf16>
    %cst_158 = arith.constant dense<0.000000e+00> : vector<80x1xf32>
    %222 = tpu.matmul %219, %221, %cst_158 {dimension_numbers = #tpu.dot_dimension_numbers<[1], [0], [0], [1], [0, 0, 1, 1], [], []>} : vector<80x24xbf16>, vector<24x1xbf16>, vector<80x1xf32> -> vector<80x1xf32>
    %223 = arith.addf %218, %222 : vector<80x1xf32>
    %224 = vector.extract_strided_slice %188 {offsets = [21, 0], sizes = [80, 24], strides = [1, 1]} : vector<102x24xbf16> to vector<80x24xbf16>
    %c7_159 = arith.constant 7 : index
    %c0_160 = arith.constant 0 : index
    %c0_161 = arith.constant 0 : index
    %225 = vector.load %arg8[%c7_159, %c0_160, %c0_161] : memref<9x24x1xbf16, #tpu.memory_space<vmem>>, vector<1x24x1xbf16>
    %226 = vector.shape_cast %225 : vector<1x24x1xbf16> to vector<24x1xbf16>
    %cst_162 = arith.constant dense<0.000000e+00> : vector<80x1xf32>
    %227 = tpu.matmul %224, %226, %cst_162 {dimension_numbers = #tpu.dot_dimension_numbers<[1], [0], [0], [1], [0, 0, 1, 1], [], []>} : vector<80x24xbf16>, vector<24x1xbf16>, vector<80x1xf32> -> vector<80x1xf32>
    %228 = arith.addf %223, %227 : vector<80x1xf32>
    %229 = vector.extract_strided_slice %188 {offsets = [22, 0], sizes = [80, 24], strides = [1, 1]} : vector<102x24xbf16> to vector<80x24xbf16>
    %c8_163 = arith.constant 8 : index
    %c0_164 = arith.constant 0 : index
    %c0_165 = arith.constant 0 : index
    %230 = vector.load %arg8[%c8_163, %c0_164, %c0_165] : memref<9x24x1xbf16, #tpu.memory_space<vmem>>, vector<1x24x1xbf16>
    %231 = vector.shape_cast %230 : vector<1x24x1xbf16> to vector<24x1xbf16>
    %cst_166 = arith.constant dense<0.000000e+00> : vector<80x1xf32>
    %232 = tpu.matmul %229, %231, %cst_166 {dimension_numbers = #tpu.dot_dimension_numbers<[1], [0], [0], [1], [0, 0, 1, 1], [], []>} : vector<80x24xbf16>, vector<24x1xbf16>, vector<80x1xf32> -> vector<80x1xf32>
    %233 = arith.addf %228, %232 : vector<80x1xf32>
    %c0_167 = arith.constant 0 : index
    %c0_168 = arith.constant 0 : index
    %234 = vector.load %arg9[%c0_167, %c0_168] : memref<1x1xf32, #tpu.memory_space<vmem>>, vector<1x1xf32>
    %235 = vector.broadcast %234 : vector<1x1xf32> to vector<80x1xf32>
    %236 = arith.addf %233, %235 : vector<80x1xf32>
    %cst_169 = arith.constant 0.000000e+00 : f32
    %237 = vector.broadcast %cst_169 : f32 to vector<80x1xf32>
    %238 = arith.maximumf %236, %237 : vector<80x1xf32>
    %c0_170 = arith.constant 0 : index
    %c0_171 = arith.constant 0 : index
    %c0_172 = arith.constant 0 : index
    %239 = vector.load %arg10[%c0_170, %c0_171, %c0_172] : memref<1x80x1xf32, #tpu.memory_space<vmem>>, vector<1x80x1xf32>
    %240 = vector.shape_cast %239 : vector<1x80x1xf32> to vector<80x1xf32>
    %241 = vector.shape_cast %238 : vector<80x1xf32> to vector<1x80x1xf32>
    tpu.vector_store %arg10[%c0_170, %c0_171, %c0_172], %241 {strides = array<i32>} : memref<1x80x1xf32, #tpu.memory_space<vmem>>, vector<1x80x1xf32>,
    return
  }
  func.func @transform_0(%arg0: i32) -> (i32, i32, i32) {
    %c0_i32 = arith.constant 0 : i32
    %c0_i32_0 = arith.constant 0 : i32
    %c0_i32_1 = arith.constant 0 : i32
    return %arg0, %c0_i32, %c0_i32_0 : i32, i32, i32
  }
  func.func @transform_1(%arg0: i32) -> (i32, i32, i32) {
    %c0_i32 = arith.constant 0 : i32
    %c0_i32_0 = arith.constant 0 : i32
    %c0_i32_1 = arith.constant 0 : i32
    return %arg0, %c0_i32, %c0_i32_0 : i32, i32, i32
  }
  func.func @transform_2(%arg0: i32) -> (i32, i32, i32) {
    %c0_i32 = arith.constant 0 : i32
    %c0_i32_0 = arith.constant 0 : i32
    %c0_i32_1 = arith.constant 0 : i32
    %c0_i32_2 = arith.constant 0 : i32
    return %c0_i32, %c0_i32_0, %c0_i32_1 : i32, i32, i32
  }
  func.func @transform_3(%arg0: i32) -> (i32, i32, i32) {
    %c0_i32 = arith.constant 0 : i32
    %c0_i32_0 = arith.constant 0 : i32
    %c0_i32_1 = arith.constant 0 : i32
    %c0_i32_2 = arith.constant 0 : i32
    return %c0_i32, %c0_i32_0, %c0_i32_1 : i32, i32, i32
  }
  func.func @transform_4(%arg0: i32) -> (i32, i32) {
    %c0_i32 = arith.constant 0 : i32
    %c0_i32_0 = arith.constant 0 : i32
    %c0_i32_1 = arith.constant 0 : i32
    return %c0_i32, %c0_i32_0 : i32, i32
  }
  func.func @transform_5(%arg0: i32) -> (i32, i32, i32) {
    %c0_i32 = arith.constant 0 : i32
    %c0_i32_0 = arith.constant 0 : i32
    %c0_i32_1 = arith.constant 0 : i32
    %c0_i32_2 = arith.constant 0 : i32
    return %c0_i32, %c0_i32_0, %c0_i32_1 : i32, i32, i32
  }
  func.func @transform_6(%arg0: i32) -> (i32, i32) {
    %c0_i32 = arith.constant 0 : i32
    %c0_i32_0 = arith.constant 0 : i32
    %c0_i32_1 = arith.constant 0 : i32
    return %c0_i32, %c0_i32_0 : i32, i32
  }
  func.func @transform_7(%arg0: i32) -> (i32, i32, i32) {
    %c0_i32 = arith.constant 0 : i32
    %c0_i32_0 = arith.constant 0 : i32
    %c0_i32_1 = arith.constant 0 : i32
    %c0_i32_2 = arith.constant 0 : i32
    return %c0_i32, %c0_i32_0, %c0_i32_1 : i32, i32, i32
  }
  func.func @transform_8(%arg0: i32) -> (i32, i32) {
    %c0_i32 = arith.constant 0 : i32
    %c0_i32_0 = arith.constant 0 : i32
    %c0_i32_1 = arith.constant 0 : i32
    return %c0_i32, %c0_i32_0 : i32, i32
  }
  func.func @transform_9(%arg0: i32) -> (i32, i32, i32) {
    %c0_i32 = arith.constant 0 : i32
    %c0_i32_0 = arith.constant 0 : i32
    %c0_i32_1 = arith.constant 0 : i32
    return %arg0, %c0_i32, %c0_i32_0 : i32, i32, i32
  }
}

</mosaic_0001>

<bundles_post_ra>
// kernel: geopose_unet_forward.5
= control target key start
LH: loop header
LB: loop body
LE: loop exit
PB: predicated region body
PF: predicated region fallthrough
CT: control target
= control target key end

     0   :  { %s4207_s12 = smov 0   ;;  %s5587_s0 = inlined_call_operand.vmem [shape: bf16[2,326,3], index: 0, kind: input, shape index: {}]   ;;  %s5588_s1 = inlined_call_operand.vmem [shape: bf16[9,3,16], index: 1, kind: input, shape index: {}]   ;;  %s5589_s2 = inlined_call_operand.vmem [shape: f32[1,16], index: 2, kind: input, shape index: {}]   ;;  %s5590_s3 = inlined_call_operand.vmem [shape: bf16[2,288,16], index: 3, kind: output, shape index: {}]  }
   0x1 LB: > { %s3342_s13 = sadd.s32 4294967295, %s4184_s12   ;;  %p3346_p0 = scmp.ge.s32.totalorder %s4184_s12, 1  ;;  %s4184_s12 = sphi %s4207_s12, %s13_s12  }
   0x2   : > { %p137_p1 = scmp.lt.s32.totalorder %s4184_s12, 3 }
   0x4   : > { %p138_p2 = pnand %p3346_p0, %p137_p1 }
   0x6   : > { %141 = sbr.rel (%p138_p2) target bundleno = 554 (0x22a), region = 32 }
   0xb   : > { %v3349_v0 = vld [vmem:[%s5588_s1 + $0x2] sm:$0x3]  ;;  %vm513_vm0 = vcmask 1040384   ;;  %vm514_vm1 = vcmask 1041408   ;;  %p161_p3 = scmp.lt.s32.totalorder %s3342_s13, 1  ;;  %v4186_v1 = vmov 65535  }
   0xc   : > { %v515_v2 = vsel %vm513_vm0, 4294967295, %v4186_v1  ;;  %v3405_v3 = vld [vmem:[%s5588_s1 + $0x4] sm:$0x3]  ;;  %v213_v5 = vld [vmem:[%s5588_s1] sm:$0x3]  ;;  %vm458_vm3 = vcmask 23552  }
   0xd   : > { %v4221_v4 = vsel %vm514_vm1, %v515_v2, 0  ;;  %s5721_s13 = smov (!%p161_p3, %s3342_s13), 1  ;;  %v3424_v15 = vld [vmem:[%s5588_s1 + $0x6] sm:$0x3]  ;;  %vm309_vm2 = vsmask.f32 7424 }
   0xe   : > { %v518_v6 = vand.u32 %v3349_v0, %v4221_v4  ;;  %v1008_v7 = vand.u32 %v3405_v3, %v4221_v4  ;;  %v4231_v8 = vand.u32 %v4221_v4, %v213_v5  ;;  %s4132_s20 = smul.u32 164, %s5721_s13  ;;  %v3445_v18 = vld [vmem:[%s5588_s1 + $0x8] sm:$0x3]  ;;  %v4296_v34 = vand.u32 %v3424_v15, %v4221_v4 }
   0xf   : > { %v4304_v38 = vand.u32 %v3445_v18, %v4221_v4  ;;  %vm915_vm4 = vcmask 1046528   ;;  %vm1459_vm5 = vsmask.f32 6400  ;;  %vm1817_vm6 = vcmask 1045504   ;;  %s4133_s11 = smul.u32 144, %s5721_s13 }
  0x10   : > { %3788 = vmatprep.subr.bf16.mxu0 %v518_v6  ;;  %4130 = vmatprep.subr.bf16.mxu1 %v518_v6  ;;  %s4237_s23 = scalar_lea.vmem %s5587_s0, %s4132_s20  ;;  %vm2361_vm7 = vsmask.f32 5376  ;;  %vm2719_vm8 = vcmask 1044480   ;;  %vm3250_vm9 = vcmask 125952  }
  0x11   : > { %3789 = vmatpush3.bf16.msra.mxu0 %v518_v6  ;;  %4131 = vmatpush3.bf16.msra.mxu1 %v518_v6  ;;  %v4241_v9 = vld [vmem:[%s4237_s23] sm:$0xff]   ;;  %v4244_v10 = vld [vmem:[%s4237_s23 + $0x8] sm:$0xff]   ;;  %v4254_v16 = vld [vmem:[%s4237_s23 + $0x50] sm:$0xff]   ;;  %s5444_s16 = scalar_lea.vmem %s5590_s3, %s4133_s11 }
  0x12   : > { %3864 = vmatprep.subr.bf16.mxu0 %v1008_v7  ;;  %3826 = vmatprep.subr.bf16.mxu1 %v4231_v8  ;;  %v311_v11 = vshrl.u32 %v4241_v9, 16  ;;  %v313_v12 = vshll.u32 %v4241_v9, 16  ;;  %v5593_v13 = vshll.u32 %v4244_v10, 16  ;;  %v5592_v14 = vshrl.u32 %v4244_v10, 16  ;;  %5629 = vst [vmem:[#allocation2_spill] sm:$0xff] %v4254_v16  ;;  %v4257_v17 = vld [vmem:[%s4237_s23 + $0x58] sm:$0xff]  }
  0x13   : > { %5630 = vst [vmem:[#allocation3_spill] sm:$0xff] %v4257_v17  ;;  %v4265_v21 = vld [vmem:[%s4237_s23 + $0x10] sm:$0xff]   ;;  %v4268_v22 = vshll.u32 %v4254_v16, 16  ;;  %v4271_v23 = vshrl.u32 %v4254_v16, 16  ;;  %v4274_v24 = vshll.u32 %v4257_v17, 16  ;;  %v4277_v25 = vshrl.u32 %v4257_v17, 16 }
  0x14   : > { %v315_v19 = vrot.slane %v313_v12, 1  ;;  %v320_v20 = vrot.slane %v5593_v13, 1  ;;  %v4282_v28 = vshll.u32 %v4265_v21, 16  ;;  %v4285_v29 = vld [vmem:[%s4237_s23 + $0x60] sm:$0xff]   ;;  %v4290_v32 = vld [vmem:[%s4237_s23 + $0x18] sm:$0xff]   ;;  %v4293_v33 = vshrl.u32 %v4265_v21, 16 }
  0x15   : > { %5632 = vst [vmem:[#allocation5_spill] sm:$0xff] %v4285_v29  ;;  %v5591_v30 = vrot.slane %v4268_v22, 1  ;;  %v400_v31 = vrot.slane %v4274_v24, 1  ;;  %v4301_v37 = vshll.u32 %v4285_v29, 16  ;;  %v4312_v41 = vshll.u32 %v4290_v32, 16  ;;  %v4315_v42 = vld [vmem:[%s4237_s23 + $0x68] sm:$0xff]  }
  0x16   : > { %v316_v26 = vor.u32 %v315_v19, %v311_v11  ;;  %v324_v27 = vor.u32 %v5592_v14, %v320_v20  ;;  %5631 = vst [vmem:[#allocation4_spill] sm:$0xff] %v4282_v28  ;;  %5633 = vst [vmem:[#allocation6_spill] sm:$0xff] %v4293_v33  ;;  %v328_v36 = vrot.slane %v4282_v28, 1  ;;  %v4318_v43 = vshrl.u32 %v4285_v29, 16  ;;  %v4321_v44 = vld [vmem:[%s4237_s23 + $0x20] sm:$0xff]   ;;  %v4339_v53 = vld [vmem:[%s4237_s23 + $0x70] sm:$0xff]  }
  0x17   : > { %v396_v39 = vor.u32 %v4271_v23, %v5591_v30  ;;  %v404_v40 = vor.u32 %v4277_v25, %v400_v31  ;;  %5634 = vst [vmem:[#allocation7_spill] sm:$0xff] %v4315_v42  ;;  %v408_v46 = vrot.slane %v4301_v37, 1  ;;  %v4327_v48 = vshrl.u32 %v4290_v32, 16  ;;  %5636 = vst [vmem:[#allocation9_spill] sm:$0xff] %v4339_v53  ;;  %v4348_v57 = vld [vmem:[%s4237_s23 + $0x28] sm:$0xff]   ;;  %v4368_v1 = vld [vmem:[%s4237_s23 + $0x78] sm:$0xff]  }
  0x18   : > { %v321_v35 = vsel %vm309_vm2, %v316_v26, %v320_v20  ;;  %v329_v45 = vsel %vm309_vm2, %v324_v27, %v328_v36  ;;  %v332_v47 = vor.u32 %v4293_v33, %v328_v36  ;;  %v336_v50 = vrot.slane %v4312_v41, 1  ;;  %v4371_v2 = vld [vmem:[%s4237_s23 + $0x30] sm:$0xff]   ;;  %v4388_v18 = vld [vmem:[%s4237_s23 + $0x38] sm:$0xff]  }
  0x19   : > { %3790 = vmatprep.mubr.msk.bf16.mxu0 %vm458_vm3, %v321_v35  ;;  %v401_v49 = vsel %vm309_vm2, %v396_v39, %v400_v31  ;;  %v4333_v51 = vshll.u32 %v4315_v42, 16  ;;  %v4336_v52 = vshll.u32 %v4321_v44, 16  ;;  %v409_v54 = vsel %vm309_vm2, %v404_v40, %v408_v46  ;;  %5639 = vst [vmem:[#allocation12_spill] sm:$0xff] %v4371_v2  ;;  %5642 = vst [vmem:[#allocation15_spill] sm:$0xff] %v4388_v18  ;;  %v4409_v40 = vld [vmem:[%s4237_s23 + $0x88] sm:$0xff]  }
  0x1a   : > { %3791 = vmatmul.mubr.msk.bf16.vlgmr.msra.gmra.mxu0 %vm458_vm3, %v329_v45  ;;  %3810 = vmatprep.mubr.msk.bf16.mxu1 %vm458_vm3, %v401_v49  ;;  %v412_v55 = vor.u32 %v4318_v43, %v408_v46  ;;  %v4345_v56 = vshrl.u32 %v4315_v42, 16  ;;  %v337_v58 = vsel %vm309_vm2, %v332_v47, %v336_v50  ;;  %v340_v60 = vor.u32 %v4327_v48, %v336_v50  ;;  %v4419_v50 = vld [vmem:[%s4237_s23 + $0x40] sm:$0xff]  }
  0x1b   : > { %5635 = vst [vmem:[#allocation8_spill] sm:$0xff] %v4333_v51  ;;  %3865 = vmatpush3.bf16.msra.mxu0 %v1008_v7  ;;  %3811 = vmatmul.mubr.msk.bf16.vlgmr.msra.gmra.mxu1 %vm458_vm3, %v409_v54  ;;  %v416_v59 = vrot.slane %v4333_v51, 1  ;;  %v344_v61 = vrot.slane %v4336_v52, 1  ;;  %v4359_v62 = vshll.u32 %v4339_v53, 16  ;;  %v4362_v63 = vshrl.u32 %v4321_v44, 16  ;;  %v4379_v7 = vld [vmem:[%s4237_s23 + $0x80] sm:$0xff]  }
  0x1c   : > { %5637 = vst [vmem:[#allocation10_spill] sm:$0xff] %v4345_v56  ;;  %3940 = vmatprep.subr.bf16.mxu0 %v4304_v38  ;;  %3827 = vmatpush3.bf16.msra.mxu1 %v4231_v8  ;;  %v4365_v0 = vshll.u32 %v4348_v57, 16  ;;  %v4376_v6 = vshrl.u32 %v4339_v53, 16  ;;  %5641 = vst [vmem:[#allocation14_spill] sm:$0xff] %v4379_v7  ;;  %v4391_v19 = vshll.u32 %v4368_v1, 16  ;;  %v4394_v20 = vshrl.u32 %v4348_v57, 16 }
  0x1d   : > { %3794 = vmatprep.mubr.msk.bf16.mxu0 %vm458_vm3, %v337_v58  ;;  %5638 = vst [vmem:[#allocation11_spill] sm:$0xff] %v4359_v62  ;;  %v417_v3 = vsel %vm309_vm2, %v412_v55, %v416_v59  ;;  %v420_v5 = vor.u32 %v4345_v56, %v416_v59  ;;  %3902 = vmatprep.subr.bf16.mxu1 %v4296_v34  ;;  %v424_v11 = vrot.slane %v4359_v62, 1  ;;  %v4397_v26 = vshll.u32 %v4371_v2, 16 }
  0x1e   : > { %5640 = vst [vmem:[#allocation13_spill] sm:$0xff] %v4376_v6  ;;  %3814 = vmatprep.mubr.msk.bf16.mxu1 %vm458_vm3, %v417_v3  ;;  %v345_v8 = vsel %vm309_vm2, %v340_v60, %v344_v61  ;;  %v348_v12 = vor.u32 %v4362_v63, %v344_v61  ;;  %v352_v15 = vrot.slane %v4365_v0, 1  ;;  %5643 = vst [vmem:[#allocation16_spill] sm:$0xff] %v4391_v19  ;;  %v4400_v27 = vshrl.u32 %v4368_v1, 16  ;;  %v208_v3 = vld [vmem:[%s4237_s23 + $0x90] sm:$0xf] }
  0x1f   : > { %v425_v31 = vsel %vm309_vm2, %v420_v5, %v424_v11  ;;  %v428_v36 = vor.u32 %v4376_v6, %v424_v11  ;;  %v4406_v39 = vshll.u32 %v4379_v7, 16  ;;  %v432_v45 = vrot.slane %v4391_v19, 1  ;;  %5646 = vst [vmem:[#allocation19_spill] sm:$0xff] %v4419_v50  ;;  %v4440_v11 = vld [vmem:[%s4237_s23 + $0x48] sm:$0xff]  }
  0x20   : > { %5644 = vst [vmem:[#allocation17_spill] sm:$0xff] %v4400_v27  ;;  %v353_v35 = vsel %vm309_vm2, %v348_v12, %v352_v15  ;;  %v356_v46 = vor.u32 %v4394_v20, %v352_v15  ;;  %v360_v47 = vrot.slane %v4397_v26, 1  ;;  %v4416_v49 = vshrl.u32 %v4371_v2, 16  ;;  %5649 = vst [vmem:[#allocation22_spill] sm:$0xff] %v4440_v11 }
  0x21   : > { %5645 = vst [vmem:[#allocation18_spill] sm:$0xff] %v4406_v39  ;;  %v440_v54 = vrot.slane %v4406_v39, 1  ;;  %v4424_v55 = vshll.u32 %v4388_v18, 16  ;;  %v4427_v58 = vshrl.u32 %v4379_v7, 16  ;;  %v4430_v59 = vshll.u32 %v4409_v40, 16 }
  0x22   : > { %3795 = vmatmul.mubr.msk.bf16.gmra.mxu0 %vm458_vm3, %v345_v8  ;;  %v433_v60 = vsel %vm309_vm2, %v428_v36, %v432_v45  ;;  %v364_v61 = vor.u32 %v4416_v49, %v360_v47  ;;  %v436_v5 = vor.u32 %v4400_v27, %v432_v45  ;;  %v361_v36 = vsel %vm309_vm2, %v356_v46, %v360_v47 }
  0x23   : > { %3798 = vmatprep.mubr.msk.bf16.mxu0 %vm458_vm3, %v353_v35  ;;  %5647 = vst [vmem:[#allocation20_spill] sm:$0xff] %v4427_v58  ;;  %5648 = vst [vmem:[#allocation21_spill] sm:$0xff] %v4430_v59  ;;  %3815 = vmatmul.mubr.msk.bf16.gmra.mxu1 %vm458_vm3, %v425_v31  ;;  %v368_v8 = vrot.slane %v4424_v55, 1  ;;  %v444_v12 = vor.u32 %v4427_v58, %v440_v54  ;;  %v448_v15 = vrot.slane %v4430_v59, 1  ;;  %v4445_v35 = vshll.u32 %v4419_v50, 16 }
  0x24   : > { %3818 = vmatprep.mubr.msk.bf16.mxu1 %vm458_vm3, %v433_v60  ;;  %v3368_v31 = vcombine.low %v208_v3, %v208_v3  ;;  %v4449_v30 = vshrl.u32 %v4388_v18, 16  ;;  %v4453_v45 = vshrl.u32 %v4419_v50, 16  ;;  %v441_v14 = vsel %vm309_vm2, %v436_v5, %v440_v54 }
  0x25   : > { %v369_v60 = vsel %vm309_vm2, %v364_v61, %v368_v8  ;;  %v4457_v13 = vshrl.u32 %v4409_v40, 16  ;;  %v4460_v39 = vshll.u32 %v4440_v11, 16  ;;  %v449_v46 = vsel %vm309_vm2, %v444_v12, %v448_v15 }
  0x26   : > { %v454_v59 = vshll.u32 %v3368_v31, 16  ;;  %v376_v47 = vrot.slane %v4445_v35, 1  ;;  %v372_v61 = vor.u32 %v4449_v30, %v368_v8  ;;  %v4474_v12 = vshrl.u32 %v4440_v11, 16 }
  0x27   : > { %5650 = vst [vmem:[#allocation23_spill] sm:$0xff] %v4457_v13  ;;  %v384_v5 = vrot.slane %v4460_v39, 1  ;;  %v452_v58 = vor.u32 %v4457_v13, %v448_v15  ;;  %v5651_v8 = vshll.u32 %v4244_v10, 16  ;;  %v951_v15 = vrot.slane %v3368_v31, 1 }
  0x28   : > { %v380_v54 = vor.u32 %v4453_v45, %v376_v47  ;;  %v456_v19 = vrot.slane %v454_v59, 1  ;;  %v919_v13 = vrot.slane %v4265_v21, 1 }
  0x29   : > { %v4479_v27 = vrot.slane %v5651_v8, 2  ;;  %v388_v59 = vor.u32 %v4474_v12, %v384_v5 }
  0x2a   : > { %3799 = vmatmul.mubr.msk.bf16.gmra.mxu0 %vm458_vm3, %v361_v36  ;;  %v377_v36 = vsel %vm309_vm2, %v372_v61, %v376_v47  ;;  %v5652_v47 = vshrl.u32 %v4244_v10, 16 }
  0x2b   : > { %3802 = vmatprep.mubr.msk.bf16.mxu0 %vm458_vm3, %v369_v60  ;;  %3819 = vmatmul.mubr.msk.bf16.gmra.mxu1 %vm458_vm3, %v441_v14  ;;  %v385_v60 = vsel %vm309_vm2, %v380_v54, %v384_v5  ;;  %v457_v14 = vsel %vm309_vm2, %v452_v58, %v456_v19  ;;  %v916_v19 = vrot.slane %v4241_v9, 1  ;;  %v917_v58 = vrot.slane %v4244_v10, 1 }
  0x2c   : > { %3822 = vmatprep.mubr.msk.bf16.mxu1 %vm458_vm3, %v449_v46  ;;  %v4484_v46 = vrot.slane %v4409_v40, 1  ;;  %v4490_v61 = vrot.slane %v5652_v47, 1  ;;  %v1471_v5 = vrot.slane %v4362_v63, 1 }
  0x2d   : > { %v918_v47 = vsel %vm915_vm4, %v916_v19, %v917_v58  ;;  %v3483_v19 = vld [vmem:[%s5588_s1 + $0xc] sm:$0x3] }
  0x2e   : > { %v4497_v54 = vsel %vm915_vm4, %v4484_v46, %v951_v15 }
  0x32   : > { %3803 = vmatmul.mubr.msk.bf16.gmra.mxu0 %vm458_vm3, %v377_v36  ;;  %v1472_v36 = vrot.slane %v4336_v52, 2 }
  0x33   : > { %3806 = vmatprep.mubr.msk.bf16.mxu0 %vm458_vm3, %v385_v60  ;;  %3823 = vmatmul.mubr.msk.bf16.gmra.mxu1 %vm458_vm3, %v457_v14  ;;  %v5653_v60 = vrot.slane %v4268_v22, 1  ;;  %v3464_v14 = vld [vmem:[%s5588_s1 + $0xa] sm:$0x3] }
  0x34   : > { %3828 = vmatprep.mubr.msk.bf16.mxu1 %vm458_vm3, %v4241_v9  ;;  %v4511_v15 = vor.u32 %v1472_v36, %v1471_v5  ;;  %v209_v9 = vld [vmem:[%s4237_s23 + $0x94] sm:$0xf]  ;;  %v4517_v31 = vand.u32 %v3464_v14, %v4221_v4  ;;  %v4534_v5 = vsel %vm915_vm4, %v917_v58, %v919_v13  ;;  %v925_v58 = vrot.slane %v4348_v57, 1 }
  0x35   : > { %v393_v8 = vsel %vm309_vm2, %v388_v59, %v5653_v60  ;;  %v921_v59 = vrot.slane %v4290_v32, 1  ;;  %v4524_v60 = vcombine.low %v208_v3, %v209_v9  ;;  %v4540_v3 = vand.u32 %v3483_v19, %v4221_v4 }
  0x36   : > { %v929_v9 = vrot.slane %v4388_v18, 1 }
  0x37   : > { %5654 = vst [vmem:[#allocation24_spill] sm:$0xff] %v4524_v60  ;;  %v4537_v36 = vsel %vm915_vm4, %v919_v13, %v921_v59 }
  0x3a   : > { %3807 = vmatmul.mubr.msk.bf16.gmra.mxu0 %vm458_vm3, %v393_v8  ;;  %v923_v8 = vrot.slane %v4321_v44, 1 }
  0x3b   : > { %3866 = vmatprep.mubr.msk.bf16.mxu0 %vm458_vm3, %v918_v47  ;;  %3829 = vmatmul.mubr.msk.bf16.vlgmr.msra.gmra.mxu1 %vm458_vm3, %v4244_v10  ;;  %v927_v47 = vrot.slane %v4371_v2, 1 }
  0x3c   : > { %3903 = vmatpush3.bf16.msra.mxu1 %v4296_v34  ;;  %3832 = vmatprep.mubr.msk.bf16.mxu1 %vm458_vm3, %v4265_v21  ;;  %v5606_v34 = vrot.slane %v4524_v60, 1  ;;  %v4565_v14 = vsel %vm915_vm4, %v923_v8, %v925_v58 }
  0x3d   : > { %3978 = vmatprep.subr.bf16.mxu1 %v4517_v31  ;;  %v4581_v19 = vsel %vm915_vm4, %v927_v47, %v929_v9 }
  0x3e   : > { %v4553_v13 = vsel %vm915_vm4, %v4484_v46, %v5606_v34  ;;  %v933_v34 = vrot.slane %v4440_v11, 1 }
  0x42   : > { %3867 = vmatmul.mubr.msk.bf16.vlgmr.msra.gmra.mxu0 %vm458_vm3, %v4534_v5 }
  0x43   : > { %3941 = vmatpush3.bf16.msra.mxu0 %v4304_v38  ;;  %3870 = vmatprep.mubr.msk.bf16.mxu0 %vm458_vm3, %v4537_v36  ;;  %v4562_v38 = vsel %vm915_vm4, %v921_v59, %v923_v8  ;;  %v4578_v59 = vsel %vm915_vm4, %v925_v58, %v927_v47  ;;  %v931_v8 = vrot.slane %v4419_v50, 1 }
  0x44   : > { %3833 = vmatmul.mubr.msk.bf16.gmra.mxu1 %vm458_vm3, %v4290_v32  ;;  %4016 = vmatprep.subr.bf16.mxu0 %v4540_v3 }
  0x45   : > { %3836 = vmatprep.mubr.msk.bf16.mxu1 %vm458_vm3, %v4321_v44  ;;  %v4594_v58 = vsel %vm915_vm4, %v929_v9, %v931_v8  ;;  %v4597_v47 = vsel %vm915_vm4, %v931_v8, %v933_v34 }
  0x4a   : > { %3871 = vmatmul.mubr.msk.bf16.gmra.mxu0 %vm458_vm3, %v4562_v38 }
  0x4b   : > { %3874 = vmatprep.mubr.msk.bf16.mxu0 %vm458_vm3, %v4565_v14 }
  0x4c   : > { %3837 = vmatmul.mubr.msk.bf16.gmra.mxu1 %vm458_vm3, %v4348_v57 }
  0x4d   : > { %3840 = vmatprep.mubr.msk.bf16.mxu1 %vm458_vm3, %v4371_v2  ;;  %v935_v2 = vrot.slane %v4254_v16, 1 }
  0x4f   : > { %v4610_v9 = vsel %vm915_vm4, %v933_v34, %v935_v2 }
  0x52   : > { %3875 = vmatmul.mubr.msk.bf16.gmra.mxu0 %vm458_vm3, %v4578_v59 }
  0x53   : > { %3878 = vmatprep.mubr.msk.bf16.mxu0 %vm458_vm3, %v4581_v19 }
  0x54   : > { %3841 = vmatmul.mubr.msk.bf16.gmra.mxu1 %vm458_vm3, %v4388_v18  ;;  %v937_v18 = vrot.slane %v4257_v17, 1 }
  0x55   : > { %3844 = vmatprep.mubr.msk.bf16.mxu1 %vm458_vm3, %v4419_v50  ;;  %v939_v50 = vrot.slane %v4285_v29, 1 }
  0x56   : > { %v4613_v8 = vsel %vm915_vm4, %v935_v2, %v937_v18 }
  0x57   : > { %v4626_v34 = vsel %vm915_vm4, %v937_v18, %v939_v50 }
  0x5a   : > { %3879 = vmatmul.mubr.msk.bf16.gmra.mxu0 %vm458_vm3, %v4594_v58 }
  0x5b   : > { %3882 = vmatprep.mubr.msk.bf16.mxu0 %vm458_vm3, %v4597_v47 }
  0x5c   : > { %3845 = vmatmul.mubr.msk.bf16.gmra.mxu1 %vm458_vm3, %v4440_v11  ;;  %v941_v11 = vrot.slane %v4315_v42, 1 }
  0x5d   : > { %3848 = vmatprep.mubr.msk.bf16.mxu1 %vm458_vm3, %v4254_v16  ;;  %v943_v16 = vrot.slane %v4339_v53, 1 }
  0x5e   : > { %v4629_v2 = vsel %vm915_vm4, %v939_v50, %v941_v11 }
  0x5f   : > { %v4642_v18 = vsel %vm915_vm4, %v941_v11, %v943_v16 }
  0x62   : > { %3883 = vmatmul.mubr.msk.bf16.gmra.mxu0 %vm458_vm3, %v4610_v9 }
  0x63   : > { %3886 = vmatprep.mubr.msk.bf16.mxu0 %vm458_vm3, %v4613_v8 }
  0x64   : > { %3849 = vmatmul.mubr.msk.bf16.gmra.mxu1 %vm458_vm3, %v4257_v17  ;;  %v945_v17 = vrot.slane %v4368_v1, 1 }
  0x65   : > { %3852 = vmatprep.mubr.msk.bf16.mxu1 %vm458_vm3, %v4285_v29  ;;  %v947_v29 = vrot.slane %v4379_v7, 1 }
  0x66   : > { %v4645_v50 = vsel %vm915_vm4, %v943_v16, %v945_v17 }
  0x67   : > { %v4657_v11 = vsel %vm915_vm4, %v945_v17, %v947_v29  ;;  %v4661_v16 = vsel %vm915_vm4, %v947_v29, %v4484_v46  ;;  %v1467_v17 = vrot.slane %v4327_v48, 1  ;;  %v1468_v29 = vrot.slane %v4312_v41, 2  ;;  %v3504_v46 = vld [vmem:[%s5588_s1 + $0xe] sm:$0x3] }
  0x6a   : > { %3887 = vmatmul.mubr.msk.bf16.gmra.mxu0 %vm458_vm3, %v4626_v34 }
  0x6b   : > { %3890 = vmatprep.mubr.msk.bf16.mxu0 %vm458_vm3, %v4629_v2 }
  0x6c   : > { %3853 = vmatmul.mubr.msk.bf16.gmra.mxu1 %vm458_vm3, %v4315_v42  ;;  %v1464_v42 = vrot.slane %v4282_v28, 2  ;;  %v5655_v28 = vor.u32 %v4479_v27, %v4490_v61  ;;  %v1475_v61 = vrot.slane %v4394_v20, 1 }
  0x6d   : > { %3856 = vmatprep.mubr.msk.bf16.mxu1 %vm458_vm3, %v4339_v53  ;;  %v1463_v53 = vrot.slane %v4293_v33, 1 }
  0x72   : > { %3891 = vmatmul.mubr.msk.bf16.gmra.mxu0 %vm458_vm3, %v4642_v18 }
  0x73   : > { %3894 = vmatprep.mubr.msk.bf16.mxu0 %vm458_vm3, %v4645_v50 }
  0x74   : > { %3857 = vmatmul.mubr.msk.bf16.gmra.mxu1 %vm458_vm3, %v4368_v1 }
  0x75   : > { %3860 = vmatprep.mubr.msk.bf16.mxu1 %vm458_vm3, %v4379_v7  ;;  %v1465_v7 = vor.u32 %v1464_v42, %v1463_v53  ;;  %v4685_v42 = vand.u32 %v3504_v46, %v4221_v4  ;;  %v1469_v53 = vor.u32 %v1468_v29, %v1467_v17  ;;  %v2370_v17 = vrot.slane %v4336_v52, 3 }
  0x76   : > { %v2369_v29 = vrot.slane %v4362_v63, 2  ;;  %v1484_v46 = vrot.slane %v4424_v55, 2 }
  0x77   : > { %v1466_v33 = vsel %vm1459_vm5, %v5655_v28, %v1465_v7  ;;  %v3523_v28 = vld [vmem:[%s5588_s1 + $0x10] sm:$0x3]  ;;  %v1470_v27 = vsel %vm1459_vm5, %v1465_v7, %v1469_v53 }
  0x7a   : > { %3895 = vmatmul.mubr.msk.bf16.gmra.mxu0 %vm458_vm3, %v4657_v11 }
  0x7b   : > { %3898 = vmatprep.mubr.msk.bf16.mxu0 %vm458_vm3, %v4661_v16 }
  0x7c   : > { %3861 = vmatmul.mubr.msk.bf16.gmra.mxu1 %vm458_vm3, %v4409_v40 }
  0x7d   : > { %3904 = vmatprep.mubr.msk.bf16.mxu1 %vm458_vm3, %v4534_v5  ;;  %v1480_v5 = vrot.slane %v4397_v26, 2 }
  0x82   : > { %3899 = vmatmul.mubr.msk.bf16.gmra.mxu0 %vm458_vm3, %v4497_v54  ;;  %v1474_v54 = vsel %vm1459_vm5, %v1469_v53, %v4511_v15 }
  0x83   : > { %3942 = vmatprep.mubr.msk.bf16.mxu0 %vm458_vm3, %v1466_v33  ;;  %v1476_v33 = vrot.slane %v4365_v0, 2 }
  0x84   : > { %3905 = vmatmul.mubr.msk.bf16.vlgmr.msra.gmra.mxu1 %vm458_vm3, %v4537_v36  ;;  %v4705_v36 = vand.u32 %v3523_v28, %v4221_v4  ;;  %v1488_v28 = vrot.slane %v4445_v35, 2 }
  0x85   : > { %3979 = vmatpush3.bf16.msra.mxu1 %v4517_v31  ;;  %3908 = vmatprep.mubr.msk.bf16.mxu1 %vm458_vm3, %v4562_v38  ;;  %v1479_v31 = vrot.slane %v4416_v49, 1  ;;  %v1477_v7 = vor.u32 %v1476_v33, %v1475_v61  ;;  %v1492_v61 = vrot.slane %v4460_v39, 2 }
  0x86   : > { %4054 = vmatprep.subr.bf16.mxu1 %v4685_v42 }
  0x87   : > { %v1481_v38 = vor.u32 %v1480_v5, %v1479_v31  ;;  %v1478_v4 = vsel %vm1459_vm5, %v4511_v15, %v1477_v7  ;;  %v1496_v31 = vrot.slane %v4268_v22, 2 }
  0x89   : > { %v1482_v53 = vsel %vm1459_vm5, %v1477_v7, %v1481_v38  ;;  %v1499_v7 = vrot.slane %v4277_v25, 1 }
  0x8a   : > { %3943 = vmatmul.mubr.msk.bf16.vlgmr.msra.gmra.mxu0 %vm458_vm3, %v1470_v27  ;;  %v4724_v27 = vor.u32 %v2370_v17, %v2369_v29  ;;  %v1503_v29 = vrot.slane %v4318_v43, 1 }
  0x8b   : > { %4017 = vmatpush3.bf16.msra.mxu0 %v4540_v3  ;;  %3946 = vmatprep.mubr.msk.bf16.mxu0 %vm458_vm3, %v1474_v54  ;;  %v1483_v3 = vrot.slane %v4449_v30, 1  ;;  %v1495_v54 = vrot.slane %v4271_v23, 1 }
  0x8c   : > { %3909 = vmatmul.mubr.msk.bf16.gmra.mxu1 %vm458_vm3, %v4565_v14  ;;  %4092 = vmatprep.subr.bf16.mxu0 %v4705_v36  ;;  %v1487_v14 = vrot.slane %v4453_v45, 1 }
  0x8d   : > { %3912 = vmatprep.mubr.msk.bf16.mxu1 %vm458_vm3, %v4578_v59  ;;  %v1485_v52 = vor.u32 %v1484_v46, %v1483_v3  ;;  %v1491_v59 = vrot.slane %v4474_v12, 1  ;;  %v1507_v46 = vrot.slane %v4345_v56, 1  ;;  %v2366_v56 = vrot.slane %v4312_v41, 3 }
  0x8e   : > { %v1489_v63 = vor.u32 %v1488_v28, %v1487_v14  ;;  %v1511_v28 = vrot.slane %v4376_v6, 1 }
  0x8f   : > { %v1486_v15 = vsel %vm1459_vm5, %v1481_v38, %v1485_v52  ;;  %v1500_v38 = vrot.slane %v4274_v24, 2 }
  0x90   : > { %v1490_v33 = vsel %vm1459_vm5, %v1485_v52, %v1489_v63  ;;  %v1512_v52 = vrot.slane %v4359_v62, 2 }
  0x92   : > { %3947 = vmatmul.mubr.msk.bf16.gmra.mxu0 %vm458_vm3, %v1478_v4  ;;  %v1504_v4 = vrot.slane %v4301_v37, 2 }
  0x93   : > { %3950 = vmatprep.mubr.msk.bf16.mxu0 %vm458_vm3, %v1482_v53  ;;  %v1508_v53 = vrot.slane %v4333_v51, 2  ;;  %v5689_v51 = vld [vmem:[#allocation4_spill] sm:$0xff] }
  0x94   : > { %3913 = vmatmul.mubr.msk.bf16.gmra.mxu1 %vm458_vm3, %v4581_v19  ;;  %v1493_v19 = vor.u32 %v1492_v61, %v1491_v59  ;;  %v5657_v61 = vld [vmem:[#allocation16_spill] sm:$0xff] }
  0x95   : > { %3916 = vmatprep.mubr.msk.bf16.mxu1 %vm458_vm3, %v4594_v58  ;;  %v1497_v58 = vor.u32 %v1496_v31, %v1495_v54  ;;  %v5658_v31 = vld [vmem:[#allocation20_spill] sm:$0xff] }
  0x96   : > { %v1494_v5 = vsel %vm1459_vm5, %v1489_v63, %v1493_v19 }
  0x97   : > { %v1498_v17 = vsel %vm1459_vm5, %v1493_v19, %v1497_v58  ;;  %v1519_v19 = vrot.slane %v5658_v31, 1 }
  0x9a   : > { %3951 = vmatmul.mubr.msk.bf16.gmra.mxu0 %vm458_vm3, %v1486_v15  ;;  %v5656_v15 = vld [vmem:[#allocation17_spill] sm:$0xff] }
  0x9b   : > { %3954 = vmatprep.mubr.msk.bf16.mxu0 %vm458_vm3, %v1490_v33  ;;  %v1515_v59 = vrot.slane %v5656_v15, 1  ;;  %v1516_v33 = vrot.slane %v5657_v61, 2  ;;  %v211_v15 = vld [vmem:[%s4237_s23 + $0x9c] sm:$0xf] }
  0x9c   : > { %3917 = vmatmul.mubr.msk.bf16.gmra.mxu1 %vm458_vm3, %v4597_v47  ;;  %v1501_v47 = vor.u32 %v1500_v38, %v1499_v7  ;;  %v5622_v7 = vshrl.u32 %v4524_v60, 16  ;;  %v5621_v38 = vshll.u32 %v4524_v60, 16 }
  0x9d   : > { %3920 = vmatprep.mubr.msk.bf16.mxu1 %vm458_vm3, %v4610_v9  ;;  %v1505_v9 = vor.u32 %v1504_v4, %v1503_v29  ;;  %v5660_v4 = vld [vmem:[#allocation23_spill] sm:$0xff] }
  0x9e   : > { %v1502_v3 = vsel %vm1459_vm5, %v1497_v58, %v1501_v47  ;;  %v5659_v58 = vld [vmem:[#allocation18_spill] sm:$0xff] }
  0x9f   : > { %v1506_v14 = vsel %vm1459_vm5, %v1501_v47, %v1505_v9  ;;  %v1523_v47 = vrot.slane %v5660_v4, 1 }
  0xa2   : > { %3955 = vmatmul.mubr.msk.bf16.gmra.mxu0 %vm458_vm3, %v1494_v5  ;;  %v1520_v5 = vrot.slane %v5659_v58, 2  ;;  %v5680_v58 = vld [vmem:[#allocation9_spill] sm:$0xff] }
  0xa3   : > { %3958 = vmatprep.mubr.msk.bf16.mxu0 %vm458_vm3, %v1498_v17  ;;  %v4783_v17 = vld [vmem:[%s4237_s23 + $0x98] sm:$0xf] }
  0xa4   : > { %3921 = vmatmul.mubr.msk.bf16.gmra.mxu1 %vm458_vm3, %v4613_v8  ;;  %v1509_v8 = vor.u32 %v1508_v53, %v1507_v46  ;;  %v1533_v53 = vrot.slane %v5621_v38, 2 }
  0xa5   : > { %3924 = vmatprep.mubr.msk.bf16.mxu1 %vm458_vm3, %v4626_v34  ;;  %v1513_v34 = vor.u32 %v1512_v52, %v1511_v28 }
  0xa6   : > { %v1510_v63 = vsel %vm1459_vm5, %v1505_v9, %v1509_v8  ;;  %v5661_v9 = vld [vmem:[#allocation21_spill] sm:$0xff] }
  0xa7   : > { %v1514_v54 = vsel %vm1459_vm5, %v1509_v8, %v1513_v34 }
  0xaa   : > { %3959 = vmatmul.mubr.msk.bf16.gmra.mxu0 %vm458_vm3, %v1502_v3  ;;  %v1524_v3 = vrot.slane %v5661_v9, 2 }
  0xab   : > { %3962 = vmatprep.mubr.msk.bf16.mxu0 %vm458_vm3, %v1506_v14  ;;  %v4795_v14 = vcombine.low %v4783_v17, %v4783_v17 }
  0xac   : > { %3925 = vmatmul.mubr.msk.bf16.gmra.mxu1 %vm458_vm3, %v4629_v2  ;;  %v1517_v2 = vor.u32 %v1516_v33, %v1515_v59  ;;  %v1819_v59 = vrot.slane %v4265_v21, 2  ;;  %v1821_v21 = vrot.slane %v4290_v32, 2 }
  0xad   : > { %3928 = vmatprep.mubr.msk.bf16.mxu1 %vm458_vm3, %v4642_v18  ;;  %v1521_v18 = vor.u32 %v1520_v5, %v1519_v19  ;;  %v1537_v28 = vshrl.u32 %v4795_v14, 16  ;;  %v1540_v52 = vshll.u32 %v4795_v14, 16  ;;  %v1853_v41 = vrot.slane %v4795_v14, 2 }
  0xae   : > { %v1518_v29 = vsel %vm1459_vm5, %v1513_v34, %v1517_v2  ;;  %v1233_v34 = vrot.slane %v4795_v14, 1 }
  0xaf   : > { %v1522_v46 = vsel %vm1459_vm5, %v1517_v2, %v1521_v18  ;;  %v1542_v19 = vrot.slane %v1540_v52, 2  ;;  %v5662_v2 = vrot.slane %v4524_v60, 1  ;;  %v5665_v52 = vld [vmem:[#allocation19_spill] sm:$0xff] }
  0xb2   : > { %3963 = vmatmul.mubr.msk.bf16.gmra.mxu0 %vm458_vm3, %v1510_v63  ;;  %v1818_v63 = vrot.slane %v4244_v10, 2 }
  0xb3   : > { %3966 = vmatprep.mubr.msk.bf16.mxu0 %vm458_vm3, %v1514_v54  ;;  %v1539_v54 = vrot.slane %v1537_v28, 1 }
  0xb4   : > { %3929 = vmatmul.mubr.msk.bf16.gmra.mxu1 %vm458_vm3, %v4645_v50  ;;  %v1530_v50 = vrot.slane %v5622_v7, 1  ;;  %v5678_v7 = vld [vmem:[#allocation7_spill] sm:$0xff] }
  0xb5   : > { %3932 = vmatprep.mubr.msk.bf16.mxu1 %vm458_vm3, %v4657_v11  ;;  %v1525_v11 = vor.u32 %v1524_v3, %v1523_v47  ;;  %v1543_v10 = vor.u32 %v1542_v19, %v1539_v54  ;;  %v1822_v47 = vsel %vm1817_vm6, %v1819_v59, %v1821_v21  ;;  %v5666_v54 = vld [vmem:[#allocation22_spill] sm:$0xff] }
  0xb6   : > { %v1534_v8 = vor.u32 %v1533_v53, %v1530_v50  ;;  %v5663_v50 = vld [vmem:[#allocation12_spill] sm:$0xff]  ;;  %v1833_v19 = vrot.slane %v5666_v54, 2 }
  0xb7   : > { %v1526_v33 = vsel %vm1459_vm5, %v1521_v18, %v1525_v11  ;;  %v1823_v18 = vrot.slane %v4321_v44, 2  ;;  %v1827_v44 = vrot.slane %v5663_v50, 2 }
  0xb8   : > { %v1535_v5 = vsel %vm1459_vm5, %v1525_v11, %v1534_v8 }
  0xb9   : > { %v1824_v3 = vsel %vm1817_vm6, %v1821_v21, %v1823_v18 }
  0xba   : > { %3967 = vmatmul.mubr.msk.bf16.gmra.mxu0 %vm458_vm3, %v1518_v29  ;;  %v1544_v29 = vsel %vm1459_vm5, %v1534_v8, %v1543_v10  ;;  %v1831_v8 = vrot.slane %v5665_v52, 2  ;;  %v5674_v52 = vld [vmem:[#allocation5_spill] sm:$0xff] }
  0xbb   : > { %3970 = vmatprep.mubr.msk.bf16.mxu0 %vm458_vm3, %v1522_v46  ;;  %v1825_v46 = vrot.slane %v4348_v57, 2 }
  0xbc   : > { %3933 = vmatmul.mubr.msk.bf16.gmra.mxu1 %vm458_vm3, %v4661_v16  ;;  %v1234_v16 = vsel %vm915_vm4, %v5662_v2, %v1233_v34 }
  0xbd   : > { %3936 = vmatprep.mubr.msk.bf16.mxu1 %vm458_vm3, %v4553_v13  ;;  %v1820_v13 = vsel %vm1817_vm6, %v1818_v63, %v1819_v59  ;;  %v1826_v53 = vsel %vm1817_vm6, %v1823_v18, %v1825_v46  ;;  %v1828_v11 = vsel %vm1817_vm6, %v1825_v46, %v1827_v44  ;;  %v1834_v18 = vsel %vm1817_vm6, %v1831_v8, %v1833_v19 }
  0xc2   : > { %3971 = vmatmul.mubr.msk.bf16.gmra.mxu0 %vm458_vm3, %v1526_v33 }
  0xc3   : > { %3974 = vmatprep.mubr.msk.bf16.mxu0 %vm458_vm3, %v1535_v5 }
  0xc4   : > { %3937 = vmatmul.mubr.msk.bf16.gmra.mxu1 %vm458_vm3, %v1234_v16  ;;  %v5668_v16 = vld [vmem:[#allocation2_spill] sm:$0xff] }
  0xc5   : > { %3980 = vmatprep.mubr.msk.bf16.mxu1 %vm458_vm3, %v1820_v13  ;;  %v1835_v13 = vrot.slane %v5668_v16, 2 }
  0xca   : > { %3975 = vmatmul.mubr.msk.bf16.gmra.mxu0 %vm458_vm3, %v1544_v29 }
  0xcb   : > { %4018 = vmatprep.mubr.msk.bf16.mxu0 %vm458_vm3, %v1822_v47 }
  0xcc   : > { %3981 = vmatmul.mubr.msk.bf16.vlgmr.msra.gmra.mxu1 %vm458_vm3, %v1822_v47 }
  0xcd   : > { %4055 = vmatpush3.bf16.msra.mxu1 %v4685_v42  ;;  %3984 = vmatprep.mubr.msk.bf16.mxu1 %vm458_vm3, %v1824_v3  ;;  %v5664_v42 = vld [vmem:[#allocation15_spill] sm:$0xff] }
  0xce   : > { %v1829_v28 = vrot.slane %v5664_v42, 2 }
  0xd0   : > { %v1830_v34 = vsel %vm1817_vm6, %v1827_v44, %v1829_v28  ;;  %v1832_v59 = vsel %vm1817_vm6, %v1829_v28, %v1831_v8  ;;  %v5672_v44 = vld [vmem:[#allocation3_spill] sm:$0xff]  ;;  %v1839_v8 = vrot.slane %v5674_v52, 2 }
  0xd2   : > { %4019 = vmatmul.mubr.msk.bf16.vlgmr.msra.gmra.mxu0 %vm458_vm3, %v1824_v3  ;;  %v1836_v3 = vsel %vm1817_vm6, %v1833_v19, %v1835_v13 }
  0xd3   : > { %4093 = vmatpush3.bf16.msra.mxu0 %v4705_v36  ;;  %4022 = vmatprep.mubr.msk.bf16.mxu0 %vm458_vm3, %v1826_v53 }
  0xd4   : > { %3985 = vmatmul.mubr.msk.bf16.gmra.mxu1 %vm458_vm3, %v1826_v53  ;;  %v1837_v53 = vrot.slane %v5672_v44, 2 }
  0xd5   : > { %3988 = vmatprep.mubr.msk.bf16.mxu1 %vm458_vm3, %v1828_v11 }
  0xd6   : > { %v1838_v19 = vsel %vm1817_vm6, %v1835_v13, %v1837_v53  ;;  %v1840_v44 = vsel %vm1817_vm6, %v1837_v53, %v1839_v8  ;;  %v1841_v13 = vrot.slane %v5678_v7, 2 }
  0xda   : > { %v4840_v63 = vpop.f32.mrf.mxu0  ;;  %4023 = vmatmul.mubr.msk.bf16.gmra.mxu0 %vm458_vm3, %v1828_v11 }
  0xdb   : > { %4026 = vmatprep.mubr.msk.bf16.mxu0 %vm458_vm3, %v1830_v34  ;;  %v4845_v36 = vpop.f32.mrf.mxu1 }
  0xdc   : > { %3989 = vmatmul.mubr.msk.bf16.gmra.mxu1 %vm458_vm3, %v1830_v34  ;;  %v4848_v33 = vpop.f32.mrf.mxu0 }
  0xdd   : > { %3992 = vmatprep.mubr.msk.bf16.mxu1 %vm458_vm3, %v1832_v59  ;;  %v4852_v5 = vpop.f32.mrf.mxu1 }
  0xde   : > { %5667 = vst [vmem:[#allocation12_spill] sm:$0xff] %v4852_v5  ;;  %v4854_v2 = vpop.f32.mrf.mxu0 }
  0xdf   : > { %v4857_v10 = vpop.f32.mrf.mxu1 }
  0xe0   : > { %5669 = vst [vmem:[#allocation15_spill] sm:$0xff] %v4857_v10  ;;  %v4859_v21 = vpop.f32.mrf.mxu0  ;;  %v5688_v10 = vld [vmem:[#allocation6_spill] sm:$0xff] }
  0xe1   : > { %v4862_v29 = vpop.f32.mrf.mxu1  ;;  %v2362_v5 = vrot.slane %v5688_v10, 2 }
  0xe2   : > { %5670 = vst [vmem:[#allocation19_spill] sm:$0xff] %v4862_v29  ;;  %v4864_v47 = vpop.f32.mrf.mxu0  ;;  %4027 = vmatmul.mubr.msk.bf16.gmra.mxu0 %vm458_vm3, %v1832_v59 }
  0xe3   : > { %4030 = vmatprep.mubr.msk.bf16.mxu0 %vm458_vm3, %v1834_v18  ;;  %v4869_v46 = vpop.f32.mrf.mxu1 }
  0xe4   : > { %5671 = vst [vmem:[#allocation22_spill] sm:$0xff] %v4869_v46  ;;  %3993 = vmatmul.mubr.msk.bf16.gmra.mxu1 %vm458_vm3, %v1834_v18  ;;  %v4872_v50 = vpop.f32.mrf.mxu0 }
  0xe5   : > { %3996 = vmatprep.mubr.msk.bf16.mxu1 %vm458_vm3, %v1836_v3  ;;  %v4876_v11 = vpop.f32.mrf.mxu1 }
  0xe6   : > { %5673 = vst [vmem:[#allocation2_spill] sm:$0xff] %v4876_v11  ;;  %v4878_v28 = vpop.f32.mrf.mxu0 }
  0xe7   : > { %v4881_v34 = vpop.f32.mrf.mxu1 }
  0xe8   : > { %5675 = vst [vmem:[#allocation3_spill] sm:$0xff] %v4881_v34  ;;  %v4883_v59 = vpop.f32.mrf.mxu0  ;;  %v5685_v34 = vld [vmem:[#allocation14_spill] sm:$0xff] }
  0xe9   : > { %v4886_v16 = vpop.f32.mrf.mxu1 }
  0xea   : > { %5676 = vst [vmem:[#allocation5_spill] sm:$0xff] %v4886_v16  ;;  %v4888_v18 = vpop.f32.mrf.mxu0  ;;  %4031 = vmatmul.mubr.msk.bf16.gmra.mxu0 %vm458_vm3, %v1836_v3  ;;  %v1843_v3 = vrot.slane %v5680_v58, 2 }
  0xeb   : > { %4034 = vmatprep.mubr.msk.bf16.mxu0 %vm458_vm3, %v1838_v19  ;;  %v4893_v38 = vpop.f32.mrf.mxu1 }
  0xec   : > { %5677 = vst [vmem:[#allocation25_spill] sm:$0xff] %v4893_v38  ;;  %3997 = vmatmul.mubr.msk.bf16.gmra.mxu1 %vm458_vm3, %v1838_v19  ;;  %v4896_v52 = vpop.f32.mrf.mxu0  ;;  %v1842_v38 = vsel %vm1817_vm6, %v1839_v8, %v1841_v13  ;;  %v1844_v7 = vsel %vm1817_vm6, %v1841_v13, %v1843_v3  ;;  %v1845_v8 = vrot.slane %v4368_v1, 2 }
  0xed   : > { %4000 = vmatprep.mubr.msk.bf16.mxu1 %vm458_vm3, %v1840_v44  ;;  %v4900_v9 = vpop.f32.mrf.mxu1 }
  0xee   : > { %5679 = vst [vmem:[#allocation7_spill] sm:$0xff] %v4900_v9  ;;  %v4902_v4 = vpop.f32.mrf.mxu0 }
  0xef   : > { %v4905_v31 = vpop.f32.mrf.mxu1 }
  0xf0   : > { %5681 = vst [vmem:[#allocation9_spill] sm:$0xff] %v4905_v31  ;;  %v4907_v53 = vpop.f32.mrf.mxu0 }
  0xf1   : > { %v4910_v16 = vpop.f32.mrf.mxu1 }
  0xf2   : > { %5682 = vst [vmem:[#allocation26_spill] sm:$0xff] %v4910_v16  ;;  %v4912_v19 = vpop.f32.mrf.mxu0  ;;  %4035 = vmatmul.mubr.msk.bf16.gmra.mxu0 %vm458_vm3, %v1840_v44  ;;  %v1847_v44 = vrot.slane %v5685_v34, 2 }
  0xf3   : > { %4038 = vmatprep.mubr.msk.bf16.mxu0 %vm458_vm3, %v1842_v38  ;;  %v4917_v9 = vpop.f32.mrf.mxu1 }
  0xf4   : > { %5683 = vst [vmem:[#allocation27_spill] sm:$0xff] %v4917_v9  ;;  %4001 = vmatmul.mubr.msk.bf16.gmra.mxu1 %vm458_vm3, %v1842_v38  ;;  %v4920_v58 = vpop.f32.mrf.mxu0  ;;  %v1846_v9 = vsel %vm1817_vm6, %v1843_v3, %v1845_v8  ;;  %v1848_v1 = vsel %vm1817_vm6, %v1845_v8, %v1847_v44  ;;  %v1849_v3 = vrot.slane %v4409_v40, 2 }
  0xf5   : > { %4004 = vmatprep.mubr.msk.bf16.mxu1 %vm458_vm3, %v1844_v7  ;;  %v4924_v31 = vpop.f32.mrf.mxu1 }
  0xf6   : > { %5684 = vst [vmem:[#allocation28_spill] sm:$0xff] %v4924_v31  ;;  %v4926_v16 = vpop.f32.mrf.mxu0 }
  0xf7   : > { %v4929_v13 = vpop.f32.mrf.mxu1 }
  0xf8   : > { %5686 = vst [vmem:[#allocation14_spill] sm:$0xff] %v4929_v13  ;;  %v4931_v11 = vpop.f32.mrf.mxu0 }
  0xf9   : > { %v4934_v38 = vpop.f32.mrf.mxu1 }
  0xfa   : > { %5687 = vst [vmem:[#allocation29_spill] sm:$0xff] %v4934_v38  ;;  %v4936_v61 = vpop.f32.mrf.mxu0  ;;  %4039 = vmatmul.mubr.msk.bf16.gmra.mxu0 %vm458_vm3, %v1844_v7  ;;  %v1851_v38 = vrot.slane %v4524_v60, 2 }
  0xfb   : > { %4042 = vmatprep.mubr.msk.bf16.mxu0 %vm458_vm3, %v1846_v9  ;;  %v3830_v31 = vpop.f32.mrf.mxu1 }
  0xfc   : > { %4005 = vmatmul.mubr.msk.bf16.gmra.mxu1 %vm458_vm3, %v1846_v9  ;;  %v4942_v34 = vpop.f32.mrf.mxu0  ;;  %v779_v13 = vadd.f32 %v3830_v31, %v4840_v63  ;;  %v4955_v9 = vcombine.low %v4783_v17, %v211_v15  ;;  %v1850_v63 = vsel %vm1817_vm6, %v1847_v44, %v1849_v3  ;;  %v1852_v40 = vsel %vm1817_vm6, %v1849_v3, %v1851_v38  ;;  %v4980_v3 = vld [vmem:[%s4237_s23 + $0xa0] ss:$0 sps:$4 sm:$0x77]  }
  0xfd   : > { %4008 = vmatprep.mubr.msk.bf16.mxu1 %vm458_vm3, %v1848_v1  ;;  %v770_v46 = vpop.f32.mrf.mxu1  ;;  %v1854_v14 = vsel %vm1817_vm6, %v1851_v38, %v1853_v41  ;;  %v2721_v41 = vrot.slane %v4290_v32, 3 }
  0xfe   : > { %v4949_v7 = vpop.f32.mrf.mxu0  ;;  %v771_v8 = vadd.f32 %v770_v46, %v4848_v33  ;;  %v2363_v33 = vrot.slane %v5689_v51, 3  ;;  %v2365_v46 = vrot.slane %v4327_v48, 2  ;;  %v2133_v44 = vrot.slane %v4955_v9, 2 }
  0xff   : > { %v3831_v62 = vpop.f32.mrf.mxu1 }
 0x100   : > { %v4952_v6 = vpop.f32.mrf.mxu0  ;;  %v782_v31 = vadd.f32 %v3831_v62, %v4854_v2 }
 0x101   : > { %v773_v29 = vpop.f32.mrf.mxu1 }
 0x102   : > { %v3868_v60 = vpop.f32.mrf.mxu0  ;;  %4043 = vmatmul.mubr.msk.bf16.gmra.mxu0 %vm458_vm3, %v1848_v1  ;;  %v774_v15 = vadd.f32 %v773_v29, %v4859_v21  ;;  %v2364_v21 = vor.u32 %v2363_v33, %v2362_v5  ;;  %v2367_v29 = vor.u32 %v2366_v56, %v2365_v46  ;;  %v2374_v33 = vrot.slane %v4365_v0, 3 }
 0x103   : > { %v4966_v17 = vadd.f32 %v3868_v60, %v779_v13  ;;  %4046 = vmatprep.mubr.msk.bf16.mxu0 %vm458_vm3, %v1850_v63 }
 0x104   : > { %v3834_v62 = vpop.f32.mrf.mxu1  ;;  %4009 = vmatmul.mubr.msk.bf16.gmra.mxu1 %vm458_vm3, %v1850_v63  ;;  %v1044_v2 = vpop.f32.mrf.mxu0 }
 0x105   : > { %5690 = vst [vmem:[#allocation6_spill] sm:$0xff] %v4966_v17  ;;  %v795_v10 = vadd.f32 %v3834_v62, %v4864_v47  ;;  %v4972_v51 = vadd.f32 %v1044_v2, %v771_v8  ;;  %4012 = vmatprep.mubr.msk.bf16.mxu1 %vm458_vm3, %v1852_v40  ;;  %v2134_v47 = vsel %vm1817_vm6, %v1851_v38, %v2133_v44 }
 0x106   : > { %v786_v48 = vpop.f32.mrf.mxu1  ;;  %v3869_v60 = vpop.f32.mrf.mxu0 }
 0x107   : > { %v787_v13 = vadd.f32 %v786_v48, %v4872_v50  ;;  %v4977_v1 = vadd.f32 %v3869_v60, %v782_v31  ;;  %v2368_v50 = vsel %vm2361_vm7, %v2364_v21, %v2367_v29  ;;  %v2373_v31 = vrot.slane %v4394_v20, 2 }
 0x108   : > { %v3835_v63 = vpop.f32.mrf.mxu1  ;;  %v1047_v17 = vpop.f32.mrf.mxu0 }
 0x109   : > { %v798_v8 = vadd.f32 %v3835_v63, %v4878_v28  ;;  %v4984_v62 = vadd.f32 %v1047_v17, %v774_v15  ;;  %v2135_v28 = vrot.slane %v4980_v3, 2  ;;  %v4166_v17 = vld [vmem:[%s4237_s23 + $0x10] sm:$0xff]  }
 0x10a   : > { %v789_v5 = vpop.f32.mrf.mxu1  ;;  %v3872_v56 = vpop.f32.mrf.mxu0  ;;  %4047 = vmatmul.mubr.msk.bf16.gmra.mxu0 %vm458_vm3, %v1852_v40  ;;  %v2720_v40 = vrot.slane %v4166_v17, 3 }
 0x10b   : > { %v790_v46 = vadd.f32 %v789_v5, %v4883_v59  ;;  %v4992_v2 = vadd.f32 %v3872_v56, %v795_v10  ;;  %4050 = vmatprep.mubr.msk.bf16.mxu0 %vm458_vm3, %v2134_v47  ;;  %v2375_v10 = vor.u32 %v2374_v33, %v2373_v31  ;;  %v2136_v63 = vsel %vm1817_vm6, %v2133_v44, %v2135_v28 }
 0x10c   : > { %v3838_v15 = vpop.f32.mrf.mxu1  ;;  %4013 = vmatmul.mubr.msk.bf16.gmra.mxu1 %vm458_vm3, %v1854_v14  ;;  %v1060_v38 = vpop.f32.mrf.mxu0  ;;  %v2722_v32 = vsel %vm2719_vm8, %v2720_v40, %v2721_v41  ;;  %v2381_v31 = vrot.slane %v4449_v30, 2 }
 0x10d   : > { %v811_v20 = vadd.f32 %v3838_v15, %v4888_v18  ;;  %v5000_v48 = vadd.f32 %v1060_v38, %v787_v13  ;;  %4056 = vmatprep.mubr.msk.bf16.mxu1 %vm458_vm3, %v2368_v50  ;;  %v2377_v18 = vrot.slane %v4416_v49, 2  ;;  %v2378_v13 = vrot.slane %v4397_v26, 3 }
 0x10e   : > { %v802_v0 = vpop.f32.mrf.mxu1  ;;  %v3873_v59 = vpop.f32.mrf.mxu0  ;;  %v2376_v44 = vsel %vm2361_vm7, %v4724_v27, %v2375_v10  ;;  %v2382_v49 = vrot.slane %v4424_v55, 3  ;;  %v2725_v38 = vrot.slane %v4348_v57, 3 }
 0x10f   : > { %v803_v60 = vadd.f32 %v802_v0, %v4896_v52  ;;  %v5004_v21 = vadd.f32 %v3873_v59, %v798_v8  ;;  %v2372_v52 = vsel %vm2361_vm7, %v2367_v29, %v4724_v27  ;;  %v2379_v15 = vor.u32 %v2378_v13, %v2377_v18 }
 0x110   : > { %v3839_v47 = vpop.f32.mrf.mxu1  ;;  %v1063_v14 = vpop.f32.mrf.mxu0  ;;  %v2383_v17 = vor.u32 %v2382_v49, %v2381_v31  ;;  %v2389_v13 = vrot.slane %v4474_v12, 2 }
 0x111   : > { %v814_v5 = vadd.f32 %v3839_v47, %v4902_v4  ;;  %v5011_v56 = vadd.f32 %v1063_v14, %v790_v46  ;;  %v4167_v4 = vld [vmem:[%s4237_s23 + $0x20] sm:$0xff]   ;;  %v2380_v57 = vsel %vm2361_vm7, %v2375_v10, %v2379_v15  ;;  %v2385_v14 = vrot.slane %v4453_v45, 2 }
 0x112   : > { %v805_v8 = vpop.f32.mrf.mxu1  ;;  %v3876_v50 = vpop.f32.mrf.mxu0  ;;  %4051 = vmatmul.mubr.msk.bf16.gmra.mxu0 %vm458_vm3, %v2136_v63  ;;  %v2723_v46 = vrot.slane %v4167_v4, 3  ;;  %v2390_v10 = vrot.slane %v4460_v39, 3 }
 0x113   : > { %v806_v26 = vadd.f32 %v805_v8, %v4907_v53  ;;  %v5021_v33 = vadd.f32 %v3876_v50, %v811_v20  ;;  %4094 = vmatprep.mubr.msk.bf16.mxu0 %vm458_vm3, %v2722_v32  ;;  %v2386_v32 = vrot.slane %v4445_v35, 3  ;;  %v2729_v50 = vrot.slane %v5664_v42, 3 }
 0x114   : > { %v3842_v29 = vpop.f32.mrf.mxu1  ;;  %4057 = vmatmul.mubr.msk.bf16.vlgmr.msra.gmra.mxu1 %vm458_vm3, %v2372_v52  ;;  %v1076_v28 = vpop.f32.mrf.mxu0  ;;  %v2724_v0 = vsel %vm2719_vm8, %v2721_v41, %v2723_v46  ;;  %v2384_v41 = vsel %vm2361_vm7, %v2379_v15, %v2383_v17  ;;  %v2391_v49 = vor.u32 %v2390_v10, %v2389_v13  ;;  %v2394_v15 = vrot.slane %v4268_v22, 3  ;;  %v4169_v22 = vld [vmem:[%s4237_s23 + $0x40] sm:$0xff]  }
 0x115   : > { %v827_v27 = vadd.f32 %v3842_v29, %v4912_v19  ;;  %v5028_v30 = vadd.f32 %v1076_v28, %v803_v60  ;;  %4060 = vmatprep.mubr.msk.bf16.mxu1 %vm458_vm3, %v2376_v44  ;;  %v2726_v19 = vsel %vm2719_vm8, %v2723_v46, %v2725_v38  ;;  %v2387_v39 = vor.u32 %v2386_v32, %v2385_v14 }
 0x116   : > { %v818_v55 = vpop.f32.mrf.mxu1  ;;  %v3877_v53 = vpop.f32.mrf.mxu0 }
 0x117   : > { %v819_v40 = vadd.f32 %v818_v55, %v4920_v58  ;;  %v5032_v20 = vadd.f32 %v3877_v53, %v814_v5  ;;  %v2388_v53 = vsel %vm2361_vm7, %v2383_v17, %v2387_v39 }
 0x118   : > { %v3843_v59 = vpop.f32.mrf.mxu1  ;;  %v1079_v63 = vpop.f32.mrf.mxu0 }
 0x119   : > { %v830_v60 = vadd.f32 %v3843_v59, %v4926_v16  ;;  %v5038_v47 = vadd.f32 %v1079_v63, %v806_v26  ;;  %v4168_v16 = vld [vmem:[%s4237_s23 + $0x30] sm:$0xff]   ;;  %v2398_v59 = vrot.slane %v4274_v24, 3 }
 0x11a   : > { %v821_v58 = vpop.f32.mrf.mxu1  ;;  %v3880_v18 = vpop.f32.mrf.mxu0  ;;  %4095 = vmatmul.mubr.msk.bf16.vlgmr.msra.gmra.mxu0 %vm458_vm3, %v2724_v0  ;;  %v2727_v45 = vrot.slane %v4168_v16, 3  ;;  %v2397_v0 = vrot.slane %v4277_v25, 2  ;;  %v2401_v16 = vrot.slane %v4318_v43, 2  ;;  %v4170_v43 = vld [vmem:[%s4237_s23 + $0x50] sm:$0xff]  }
 0x11b   : > { %v822_v5 = vadd.f32 %v821_v58, %v4931_v11  ;;  %v5047_v52 = vadd.f32 %v3880_v18, %v827_v27  ;;  %4098 = vmatprep.mubr.msk.bf16.mxu0 %vm458_vm3, %v2726_v19 }
 0x11c   : > { %v3846_v8 = vpop.f32.mrf.mxu1  ;;  %4061 = vmatmul.mubr.msk.bf16.gmra.mxu1 %vm458_vm3, %v2380_v57  ;;  %v1092_v35 = vpop.f32.mrf.mxu0  ;;  %v2728_v46 = vsel %vm2719_vm8, %v2725_v38, %v2727_v45  ;;  %v2730_v42 = vsel %vm2719_vm8, %v2727_v45, %v2729_v50  ;;  %v2392_v38 = vsel %vm2361_vm7, %v2387_v39, %v2391_v49  ;;  %v2402_v45 = vrot.slane %v4301_v37, 3 }
 0x11d   : > { %v843_v44 = vadd.f32 %v3846_v8, %v4936_v61  ;;  %v5054_v31 = vadd.f32 %v1092_v35, %v819_v40  ;;  %4064 = vmatprep.mubr.msk.bf16.mxu1 %vm458_vm3, %v2384_v41  ;;  %v2393_v61 = vrot.slane %v4271_v23, 2 }
 0x11e   : > { %v834_v12 = vpop.f32.mrf.mxu1  ;;  %v3881_v11 = vpop.f32.mrf.mxu0 }
 0x11f   : > { %v835_v26 = vadd.f32 %v834_v12, %v4942_v34  ;;  %v5058_v4 = vadd.f32 %v3881_v11, %v830_v60  ;;  %v2395_v19 = vor.u32 %v2394_v15, %v2393_v61  ;;  %v2733_v60 = vrot.slane %v5666_v54, 3  ;;  %v5692_v12 = vld [vmem:[#allocation8_spill] sm:$0xff]  ;;  %v5694_v61 = vld [vmem:[#allocation15_spill] sm:$0xff] }
 0x120   : > { %v3847_v29 = vpop.f32.mrf.mxu1  ;;  %v1095_v28 = vpop.f32.mrf.mxu0  ;;  %v2406_v11 = vrot.slane %v5692_v12, 3 }
 0x121   : > { %v846_v27 = vadd.f32 %v3847_v29, %v4949_v7  ;;  %v5065_v55 = vadd.f32 %v1095_v28, %v822_v5  ;;  %v2731_v7 = vrot.slane %v4169_v22, 3  ;;  %v2396_v13 = vsel %vm2361_vm7, %v2391_v49, %v2395_v19  ;;  %v5693_v49 = vld [vmem:[#allocation12_spill] sm:$0xff]  ;;  %v4171_v28 = vld [vmem:[%s4237_s23 + $0x58] sm:$0xff]  }
 0x122   : > { %v837_v34 = vpop.f32.mrf.mxu1  ;;  %v3884_v40 = vpop.f32.mrf.mxu0  ;;  %4099 = vmatmul.mubr.msk.bf16.gmra.mxu0 %vm458_vm3, %v2728_v46  ;;  %v2735_v46 = vrot.slane %v4170_v43, 3 }
 0x123   : > { %v838_v23 = vadd.f32 %v837_v34, %v4952_v6  ;;  %v5073_v63 = vadd.f32 %v3884_v40, %v843_v44  ;;  %4102 = vmatprep.mubr.msk.bf16.mxu0 %vm458_vm3, %v2730_v42  ;;  %v2399_v6 = vor.u32 %v2398_v59, %v2397_v0  ;;  %v2732_v58 = vsel %vm2719_vm8, %v2729_v50, %v2731_v7  ;;  %v5691_v44 = vld [vmem:[#allocation10_spill] sm:$0xff]  ;;  %v5695_v0 = vld [vmem:[#allocation19_spill] sm:$0xff] }
 0x124   : > { %v3850_v57 = vpop.f32.mrf.mxu1  ;;  %4065 = vmatmul.mubr.msk.bf16.gmra.mxu1 %vm458_vm3, %v2388_v53  ;;  %v1108_v17 = vpop.f32.mrf.mxu0  ;;  %v2734_v10 = vsel %vm2719_vm8, %v2731_v7, %v2733_v60  ;;  %v2405_v39 = vrot.slane %v5691_v44, 2  ;;  %v2737_v42 = vrot.slane %v4171_v28, 3  ;;  %v2403_v53 = vor.u32 %v2402_v45, %v2401_v16  ;;  %v5699_v45 = vld [vmem:[#allocation17_spill] sm:$0xff]  ;;  %v5701_v44 = vld [vmem:[#allocation2_spill] sm:$0xff] }
 0x125   : > { %v5079_v14 = vadd.f32 %v1108_v17, %v835_v26  ;;  %4068 = vmatprep.mubr.msk.bf16.mxu1 %vm458_vm3, %v2392_v38  ;;  %v859_v54 = vadd.f32 %v3850_v57, %v4845_v36  ;;  %v2400_v50 = vsel %vm2361_vm7, %v2395_v19, %v2399_v6  ;;  %v2736_v22 = vsel %vm2719_vm8, %v2733_v60, %v2735_v46  ;;  %v5696_v19 = vld [vmem:[#allocation13_spill] sm:$0xff] }
 0x126   : > { %v850_v24 = vpop.f32.mrf.mxu1  ;;  %v3885_v25 = vpop.f32.mrf.mxu0  ;;  %v2407_v38 = vor.u32 %v2406_v11, %v2405_v39  ;;  %v2738_v17 = vsel %vm2719_vm8, %v2735_v46, %v2737_v42  ;;  %v4172_v11 = vld [vmem:[%s4237_s23 + $0x60] sm:$0xff]   ;;  %v4173_v46 = vld [vmem:[%s4237_s23 + $0x68] sm:$0xff]  }
 0x127   : > { %v5082_v32 = vadd.f32 %v3885_v25, %v846_v27  ;;  %v851_v26 = vadd.f32 %v850_v24, %v5693_v49  ;;  %v2409_v24 = vrot.slane %v5696_v19, 2  ;;  %v5697_v25 = vld [vmem:[#allocation11_spill] sm:$0xff]  ;;  %v2739_v49 = vrot.slane %v4172_v11, 3  ;;  %v4174_v11 = vld [vmem:[%s4237_s23 + $0x70] sm:$0xff]  }
 0x128   : > { %v3851_v18 = vpop.f32.mrf.mxu1  ;;  %v1111_v41 = vpop.f32.mrf.mxu0  ;;  %v2408_v60 = vsel %vm2361_vm7, %v2403_v53, %v2407_v38 }
 0x129   : > { %v5088_v5 = vadd.f32 %v1111_v41, %v838_v23  ;;  %v862_v15 = vadd.f32 %v3851_v18, %v5694_v61  ;;  %v5698_v18 = vld [vmem:[#allocation22_spill] sm:$0xff] }
 0x12a   : > { %v853_v8 = vpop.f32.mrf.mxu1  ;;  %v3888_v35 = vpop.f32.mrf.mxu0  ;;  %4103 = vmatmul.mubr.msk.bf16.gmra.mxu0 %vm458_vm3, %v2732_v58  ;;  %v2410_v58 = vrot.slane %v5697_v25, 3 }
 0x12b   : > { %v5097_v36 = vadd.f32 %v3888_v35, %v859_v54  ;;  %4106 = vmatprep.mubr.msk.bf16.mxu0 %vm458_vm3, %v2734_v10  ;;  %v854_v59 = vadd.f32 %v853_v8, %v5695_v0  ;;  %v2404_v10 = vsel %vm2361_vm7, %v2399_v6, %v2403_v53  ;;  %v2413_v8 = vrot.slane %v5699_v45, 2  ;;  %v5700_v35 = vld [vmem:[#allocation16_spill] sm:$0xff]  ;;  %v5707_v45 = vld [vmem:[#allocation23_spill] sm:$0xff] }
 0x12c   : > { %v3854_v29 = vpop.f32.mrf.mxu1  ;;  %4069 = vmatmul.mubr.msk.bf16.gmra.mxu1 %vm458_vm3, %v2396_v13  ;;  %v1124_v37 = vpop.f32.mrf.mxu0  ;;  %v2411_v43 = vor.u32 %v2410_v58, %v2409_v24  ;;  %v5704_v24 = vld [vmem:[#allocation25_spill] sm:$0xff] }
 0x12d   : > { %v5104_v27 = vadd.f32 %v1124_v37, %v851_v26  ;;  %4072 = vmatprep.mubr.msk.bf16.mxu1 %vm458_vm3, %v2400_v50  ;;  %v875_v41 = vadd.f32 %v3854_v29, %v5698_v18  ;;  %v2414_v50 = vrot.slane %v5700_v35, 3  ;;  %v2741_v29 = vrot.slane %v4173_v46, 3  ;;  %v5702_v37 = vld [vmem:[#allocation3_spill] sm:$0xff]  ;;  %v5705_v18 = vld [vmem:[#allocation20_spill] sm:$0xff]  ;;  %v4175_v46 = vld [vmem:[%s4237_s23 + $0x78] sm:$0xff]  }
 0x12e   : > { %v866_v34 = vpop.f32.mrf.mxu1  ;;  %v3889_v40 = vpop.f32.mrf.mxu0  ;;  %v2412_v19 = vsel %vm2361_vm7, %v2407_v38, %v2411_v43  ;;  %v5708_v38 = vld [vmem:[#allocation21_spill] sm:$0xff] }
 0x12f   : > { %v5108_v23 = vadd.f32 %v3889_v40, %v862_v15  ;;  %v867_v39 = vadd.f32 %v866_v34, %v5701_v44  ;;  %v2415_v34 = vor.u32 %v2414_v50, %v2413_v8  ;;  %v5703_v40 = vld [vmem:[#allocation5_spill] sm:$0xff]  ;;  %v2421_v8 = vrot.slane %v5707_v45, 2  ;;  %v5709_v50 = vld [vmem:[#allocation7_spill] sm:$0xff] }
 0x130   : > { %v3855_v7 = vpop.f32.mrf.mxu1  ;;  %v1127_v57 = vpop.f32.mrf.mxu0  ;;  %v2422_v35 = vrot.slane %v5708_v38, 3  ;;  %v5715_v38 = vld [vmem:[#allocation27_spill] sm:$0xff] }
 0x131   : > { %v5115_v13 = vadd.f32 %v1127_v57, %v854_v59  ;;  %v878_v28 = vadd.f32 %v3855_v7, %v5702_v37  ;;  %v2742_v7 = vsel %vm2719_vm8, %v2739_v49, %v2741_v29  ;;  %v2745_v37 = vrot.slane %v4175_v46, 3  ;;  %v5716_v46 = vld [vmem:[#allocation28_spill] sm:$0xff] }
 0x132   : > { %v869_v54 = vpop.f32.mrf.mxu1  ;;  %v3892_v16 = vpop.f32.mrf.mxu0  ;;  %4107 = vmatmul.mubr.msk.bf16.gmra.mxu0 %vm458_vm3, %v2736_v22  ;;  %v2740_v22 = vsel %vm2719_vm8, %v2737_v42, %v2739_v49  ;;  %v2416_v42 = vsel %vm2361_vm7, %v2411_v43, %v2415_v34  ;;  %v2743_v49 = vrot.slane %v4174_v11, 3 }
 0x133   : > { %v5123_v12 = vadd.f32 %v3892_v16, %v875_v41  ;;  %4110 = vmatprep.mubr.msk.bf16.mxu0 %vm458_vm3, %v2738_v17  ;;  %v870_v0 = vadd.f32 %v869_v54, %v5703_v40  ;;  %v2417_v41 = vrot.slane %v5705_v18, 2 }
 0x134   : > { %v3858_v6 = vpop.f32.mrf.mxu1  ;;  %4073 = vmatmul.mubr.msk.bf16.gmra.mxu1 %vm458_vm3, %v2404_v10  ;;  %v1140_v26 = vpop.f32.mrf.mxu0  ;;  %v5706_v10 = vld [vmem:[#allocation18_spill] sm:$0xff]  ;;  %v2744_v18 = vsel %vm2719_vm8, %v2741_v29, %v2743_v49 }
 0x135   : > { %v5130_v61 = vadd.f32 %v1140_v26, %v867_v39  ;;  %4076 = vmatprep.mubr.msk.bf16.mxu1 %vm458_vm3, %v2408_v60  ;;  %v891_v25 = vadd.f32 %v3858_v6, %v5704_v24  ;;  %v2418_v54 = vrot.slane %v5706_v10, 3  ;;  %v5711_v24 = vld [vmem:[#allocation26_spill] sm:$0xff] }
 0x136   : > { %v882_v15 = vpop.f32.mrf.mxu1  ;;  %v3893_v53 = vpop.f32.mrf.mxu0 }
 0x137   : > { %v5134_v59 = vadd.f32 %v3893_v53, %v878_v28  ;;  %v883_v44 = vadd.f32 %v882_v15, %v5709_v50  ;;  %v5710_v28 = vld [vmem:[#allocation9_spill] sm:$0xff]  ;;  %v2419_v40 = vor.u32 %v2418_v54, %v2417_v41 }
 0x138   : > { %v3859_v57 = vpop.f32.mrf.mxu1  ;;  %v1143_v17 = vpop.f32.mrf.mxu0 }
 0x139   : > { %v5140_v58 = vadd.f32 %v1143_v17, %v870_v0  ;;  %v894_v43 = vadd.f32 %v3859_v57, %v5710_v28  ;;  %v2430_v17 = vshrl.u32 %v4955_v9, 16 }
 0x13a   : > { %v885_v16 = vpop.f32.mrf.mxu1  ;;  %v3896_v60 = vpop.f32.mrf.mxu0  ;;  %4111 = vmatmul.mubr.msk.bf16.gmra.mxu0 %vm458_vm3, %v2740_v22  ;;  %v2423_v22 = vor.u32 %v2422_v35, %v2421_v8 }
 0x13b   : > { %v5149_v39 = vadd.f32 %v3896_v60, %v891_v25  ;;  %4114 = vmatprep.mubr.msk.bf16.mxu0 %vm458_vm3, %v2742_v7  ;;  %v2433_v7 = vshll.u32 %v4955_v9, 16  ;;  %v886_v25 = vadd.f32 %v885_v16, %v5711_v24  ;;  %v2746_v60 = vsel %vm2719_vm8, %v2743_v49, %v2745_v37 }
 0x13c   : > { %v3862_v6 = vpop.f32.mrf.mxu1  ;;  %4077 = vmatmul.mubr.msk.bf16.gmra.mxu1 %vm458_vm3, %v2412_v19  ;;  %v1156_v26 = vpop.f32.mrf.mxu0  ;;  %v2420_v16 = vsel %vm2361_vm7, %v2415_v34, %v2419_v40  ;;  %v2424_v11 = vsel %vm2361_vm7, %v2419_v40, %v2423_v22  ;;  %v2432_v49 = vrot.slane %v2430_v17, 2  ;;  %v5717_v40 = vld [vmem:[#allocation14_spill] sm:$0xff] }
 0x13d   : > { %v5156_v53 = vadd.f32 %v1156_v26, %v883_v44  ;;  %4080 = vmatprep.mubr.msk.bf16.mxu1 %vm458_vm3, %v2416_v42  ;;  %v5712_v42 = vld [vmem:[#allocation24_spill] sm:$0xff]  ;;  %v907_v35 = vadd.f32 %v3862_v6, %v5715_v38  ;;  %v2435_v26 = vrot.slane %v2433_v7, 3  ;;  %v4176_v6 = vld [vmem:[%s4237_s23 + $0x80] sm:$0xff]  }
 0x13e   : > { %v898_v15 = vpop.f32.mrf.mxu1  ;;  %v3897_v0 = vpop.f32.mrf.mxu0  ;;  %v5713_v41 = vshrl.u32 %v5712_v42, 16  ;;  %v5714_v45 = vshll.u32 %v5712_v42, 16  ;;  %v5718_v7 = vld [vmem:[#allocation6_spill] sm:$0xff] }
 0x13f   : > { %v5162_v19 = vadd.f32 %v3897_v0, %v894_v43  ;;  %v899_v28 = vadd.f32 %v898_v15, %v5716_v46  ;;  %v2747_v0 = vrot.slane %v4176_v6, 3 }
 0x140   : > { %v3863_v10 = vpop.f32.mrf.mxu1  ;;  %v1159_v57 = vpop.f32.mrf.mxu0  ;;  %v2425_v54 = vrot.slane %v5713_v41, 2  ;;  %v2426_v8 = vrot.slane %v5714_v45, 3 }
 0x141   : > { %v5171_v50 = vadd.f32 %v1159_v57, %v886_v25  ;;  %v4177_v57 = vld [vmem:[%s4237_s23 + $0x88] sm:$0xff]   ;;  %v910_v17 = vadd.f32 %v3863_v10, %v5717_v40  ;;  %v2748_v6 = vsel %vm2719_vm8, %v2745_v37, %v2747_v0 }
 0x142   : > { %v901_v44 = vpop.f32.mrf.mxu1  ;;  %v3900_v29 = vpop.f32.mrf.mxu0  ;;  %4115 = vmatmul.mubr.msk.bf16.gmra.mxu0 %vm458_vm3, %v2744_v18  ;;  %v2427_v25 = vor.u32 %v2426_v8, %v2425_v54  ;;  %v2749_v41 = vrot.slane %v4177_v57, 3  ;;  %v2439_v18 = vshrl.u32 %v4980_v3, 16 }
 0x143   : > { %v5177_v43 = vadd.f32 %v3900_v29, %v907_v35  ;;  %4118 = vmatprep.mubr.msk.bf16.mxu0 %vm458_vm3, %v2746_v60  ;;  %v2442_v60 = vshll.u32 %v4980_v3, 16  ;;  %v2436_v29 = vor.u32 %v2435_v26, %v2432_v49 }
 0x144   : > { %v3906_v24 = vpop.f32.mrf.mxu1  ;;  %4081 = vmatmul.mubr.msk.bf16.gmra.mxu1 %vm458_vm3, %v2420_v16  ;;  %v1172_v34 = vpop.f32.mrf.mxu0  ;;  %v5719_v16 = vld [vmem:[#allocation29_spill] sm:$0xff]  ;;  %v2441_v40 = vrot.slane %v2439_v18, 2  ;;  %v2753_v18 = vrot.slane %v4955_v9, 3 }
 0x145   : > { %v1423_v45 = vadd.f32 %v3906_v24, %v5718_v7  ;;  %v5186_v15 = vadd.f32 %v1172_v34, %v899_v28  ;;  %4084 = vmatprep.mubr.msk.bf16.mxu1 %vm458_vm3, %v2424_v11  ;;  %v902_v46 = vadd.f32 %v901_v44, %v5719_v16  ;;  %v2428_v28 = vsel %vm2361_vm7, %v2423_v22, %v2427_v25 }
 0x146   : > { %v1278_v38 = vpop.f32.mrf.mxu1  ;;  %v3901_v35 = vpop.f32.mrf.mxu0  ;;  %v2750_v24 = vsel %vm2719_vm8, %v2747_v0, %v2749_v41  ;;  %v2444_v49 = vrot.slane %v2442_v60, 3  ;;  %v2751_v22 = vrot.slane %v5712_v42, 3 }
 0x147   : > { %v1421_v54 = vadd.f32 %v1278_v38, %v4972_v51  ;;  %v5192_v8 = vadd.f32 %v3901_v35, %v910_v17  ;;  %v2437_v51 = vsel %vm2361_vm7, %v2427_v25, %v2436_v29 }
 0x148   : > { %v3907_v10 = vpop.f32.mrf.mxu1  ;;  %v1175_v57 = vpop.f32.mrf.mxu0  ;;  %v2445_v25 = vor.u32 %v2444_v49, %v2441_v40  ;;  %v2752_v42 = vsel %vm2719_vm8, %v2749_v41, %v2751_v22  ;;  %v2755_v41 = vrot.slane %v4980_v3, 3 }
 0x149   : > { %v1424_v11 = vadd.f32 %v3907_v10, %v4977_v1  ;;  %v5198_v34 = vadd.f32 %v1175_v57, %v902_v46 }
 0x14a   : > { %v1281_v26 = vpop.f32.mrf.mxu1  ;;  %v3944_v44 = vpop.f32.mrf.mxu0  ;;  %4119 = vmatmul.mubr.msk.bf16.gmra.mxu0 %vm458_vm3, %v2748_v6  ;;  %v2754_v6 = vsel %vm2719_vm8, %v2751_v22, %v2753_v18 }
 0x14b   : > { %v1422_v37 = vadd.f32 %v1281_v26, %v4984_v62  ;;  %v5203_v17 = vadd.f32 %v3944_v44, %v1423_v45  ;;  %4122 = vmatprep.mubr.msk.bf16.mxu0 %vm458_vm3, %v2750_v24 }
 0x14c   : > { %v3910_v0 = vpop.f32.mrf.mxu1  ;;  %4085 = vmatmul.mubr.msk.bf16.gmra.mxu1 %vm458_vm3, %v2428_v28  ;;  %v1636_v1 = vpop.f32.mrf.mxu0 }
 0x14d   : > { %v1427_v7 = vadd.f32 %v3910_v0, %v4992_v2  ;;  %v5210_v60 = vadd.f32 %v1636_v1, %v1421_v54  ;;  %4088 = vmatprep.mubr.msk.bf16.mxu1 %vm458_vm3, %v2437_v51  ;;  %v2446_v54 = vsel %vm2361_vm7, %v2436_v29, %v2445_v25 }
 0x14e   : > { %v1294_v62 = vpop.f32.mrf.mxu1  ;;  %v3945_v45 = vpop.f32.mrf.mxu0 }
 0x14f   : > { %v1425_v38 = vadd.f32 %v1294_v62, %v5000_v48  ;;  %v5214_v35 = vadd.f32 %v3945_v45, %v1424_v11 }
 0x150   : > { %v3911_v16 = vpop.f32.mrf.mxu1  ;;  %v1639_v46 = vpop.f32.mrf.mxu0 }
 0x151   : > { %v1428_v9 = vadd.f32 %v3911_v16, %v5004_v21  ;;  %v5219_v2 = vadd.f32 %v1639_v46, %v1422_v37 }
 0x152   : > { %v1297_v10 = vpop.f32.mrf.mxu1  ;;  %v3948_v57 = vpop.f32.mrf.mxu0  ;;  %4123 = vmatmul.mubr.msk.bf16.gmra.mxu0 %vm458_vm3, %v2752_v42 }
 0x153   : > { %v1426_v48 = vadd.f32 %v1297_v10, %v5011_v56  ;;  %v5224_v28 = vadd.f32 %v3948_v57, %v1427_v7  ;;  %4126 = vmatprep.mubr.msk.bf16.mxu0 %vm458_vm3, %v2754_v6  ;;  %v2756_v56 = vsel %vm2719_vm8, %v2753_v18, %v2755_v41 }
 0x154   : > { %v3914_v24 = vpop.f32.mrf.mxu1  ;;  %4089 = vmatmul.mubr.msk.bf16.gmra.mxu1 %vm458_vm3, %v2446_v54  ;;  %v1652_v21 = vpop.f32.mrf.mxu0 }
 0x155   : > { %v1431_v11 = vadd.f32 %v3914_v24, %v5021_v33  ;;  %v5230_v40 = vadd.f32 %v1652_v21, %v1425_v38 }
 0x156   : > { %v1310_v29 = vpop.f32.mrf.mxu1  ;;  %v3949_v49 = vpop.f32.mrf.mxu0 }
 0x157   : > { %v1429_v26 = vadd.f32 %v1310_v29, %v5028_v30  ;;  %v5233_v44 = vadd.f32 %v3949_v49, %v1428_v9 }
 0x158   : > { %v3915_v51 = vpop.f32.mrf.mxu1  ;;  %v1655_v37 = vpop.f32.mrf.mxu0 }
 0x159   : > { %v1432_v3 = vadd.f32 %v3915_v51, %v5032_v20  ;;  %v5237_v22 = vadd.f32 %v1655_v37, %v1426_v48 }
 0x15a   : > { %v1313_v0 = vpop.f32.mrf.mxu1  ;;  %v3952_v1 = vpop.f32.mrf.mxu0  ;;  %4127 = vmatmul.mubr.msk.bf16.gmra.mxu0 %vm458_vm3, %v2756_v56 }
 0x15b   : > { %v1430_v33 = vadd.f32 %v1313_v0, %v5038_v47  ;;  %v5241_v7 = vadd.f32 %v3952_v1, %v1431_v11 }
 0x15c   : > { %v3918_v25 = vpop.f32.mrf.mxu1  ;;  %v1668_v30 = vpop.f32.mrf.mxu0 }
 0x15d   : > { %v1435_v62 = vadd.f32 %v3918_v25, %v5047_v52  ;;  %v5244_v45 = vadd.f32 %v1668_v30, %v1429_v26 }
 0x15e   : > { %v1326_v18 = vpop.f32.mrf.mxu1  ;;  %v3953_v38 = vpop.f32.mrf.mxu0 }
 0x15f   : > { %v1433_v20 = vadd.f32 %v1326_v18, %v5054_v31  ;;  %v5247_v42 = vadd.f32 %v3953_v38, %v1432_v3 }
 0x160   : > { %v3919_v16 = vpop.f32.mrf.mxu1  ;;  %v1671_v46 = vpop.f32.mrf.mxu0 }
 0x161   : > { %v1436_v6 = vadd.f32 %v3919_v16, %v5058_v4  ;;  %v5250_v9 = vadd.f32 %v1671_v46, %v1430_v33 }
 0x162   : > { %v1329_v47 = vpop.f32.mrf.mxu1  ;;  %v3956_v54 = vpop.f32.mrf.mxu0 }
 0x163   : > { %v1434_v10 = vadd.f32 %v1329_v47, %v5065_v55  ;;  %v5253_v57 = vadd.f32 %v3956_v54, %v1435_v62 }
 0x164   : > { %v3922_v52 = vpop.f32.mrf.mxu1  ;;  %v1684_v48 = vpop.f32.mrf.mxu0 }
 0x165   : > { %v1439_v41 = vadd.f32 %v3922_v52, %v5073_v63  ;;  %v5256_v24 = vadd.f32 %v1684_v48, %v1433_v20 }
 0x166   : > { %v1342_v31 = vpop.f32.mrf.mxu1  ;;  %v3957_v21 = vpop.f32.mrf.mxu0 }
 0x167   : > { %v1437_v11 = vadd.f32 %v1342_v31, %v5079_v14  ;;  %v5259_v29 = vadd.f32 %v3957_v21, %v1436_v6 }
 0x168   : > { %v3923_v4 = vpop.f32.mrf.mxu1  ;;  %v1687_v49 = vpop.f32.mrf.mxu0 }
 0x169   : > { %v1440_v26 = vadd.f32 %v3923_v4, %v5082_v32  ;;  %v5262_v56 = vadd.f32 %v1687_v49, %v1434_v10 }
 0x16a   : > { %v1345_v55 = vpop.f32.mrf.mxu1  ;;  %v3960_v51 = vpop.f32.mrf.mxu0 }
 0x16b   : > { %v1438_v37 = vadd.f32 %v1345_v55, %v5088_v5  ;;  %v5265_v3 = vadd.f32 %v3960_v51, %v1439_v41 }
 0x16c   : > { %v3926_v63 = vpop.f32.mrf.mxu1  ;;  %v1700_v0 = vpop.f32.mrf.mxu0 }
 0x16d   : > { %v1443_v1 = vadd.f32 %v3926_v63, %v5097_v36  ;;  %v5268_v33 = vadd.f32 %v1700_v0, %v1437_v11 }
 0x16e   : > { %v1358_v14 = vpop.f32.mrf.mxu1  ;;  %v3961_v25 = vpop.f32.mrf.mxu0 }
 0x16f   : > { %v1441_v30 = vadd.f32 %v1358_v14, %v5104_v27  ;;  %v5271_v62 = vadd.f32 %v3961_v25, %v1440_v26 }
 0x170   : > { %v3927_v32 = vpop.f32.mrf.mxu1  ;;  %v1703_v18 = vpop.f32.mrf.mxu0 }
 0x171   : > { %v1444_v38 = vadd.f32 %v3927_v32, %v5108_v23  ;;  %v5274_v20 = vadd.f32 %v1703_v18, %v1438_v37 }
 0x172   : > { %v1361_v5 = vpop.f32.mrf.mxu1  ;;  %v3964_v16 = vpop.f32.mrf.mxu0 }
 0x173   : > { %v1442_v46 = vadd.f32 %v1361_v5, %v5115_v13  ;;  %v5277_v6 = vadd.f32 %v3964_v16, %v1443_v1 }
 0x174   : > { %v3930_v36 = vpop.f32.mrf.mxu1  ;;  %v1716_v47 = vpop.f32.mrf.mxu0 }
 0x175   : > { %v1447_v54 = vadd.f32 %v3930_v36, %v5123_v12  ;;  %v5280_v10 = vadd.f32 %v1716_v47, %v1441_v30 }
 0x176   : > { %v1374_v27 = vpop.f32.mrf.mxu1  ;;  %v3965_v52 = vpop.f32.mrf.mxu0 }
 0x177   : > { %v1445_v48 = vadd.f32 %v1374_v27, %v5130_v61  ;;  %v5283_v41 = vadd.f32 %v3965_v52, %v1444_v38 }
 0x178   : > { %v3931_v23 = vpop.f32.mrf.mxu1  ;;  %v1719_v31 = vpop.f32.mrf.mxu0 }
 0x179   : > { %v1448_v21 = vadd.f32 %v3931_v23, %v5134_v59  ;;  %v5286_v11 = vadd.f32 %v1719_v31, %v1442_v46 }
 0x17a   : > { %v1377_v13 = vpop.f32.mrf.mxu1  ;;  %v3968_v4 = vpop.f32.mrf.mxu0 }
 0x17b   : > { %v1446_v49 = vadd.f32 %v1377_v13, %v5140_v58  ;;  %v5289_v26 = vadd.f32 %v3968_v4, %v1447_v54 }
 0x17c   : > { %v3934_v12 = vpop.f32.mrf.mxu1  ;;  %v1732_v55 = vpop.f32.mrf.mxu0 }
 0x17d   : > { %v1451_v51 = vadd.f32 %v3934_v12, %v5149_v39  ;;  %v5292_v37 = vadd.f32 %v1732_v55, %v1445_v48 }
 0x17e   : > { %v1390_v61 = vpop.f32.mrf.mxu1  ;;  %v3969_v63 = vpop.f32.mrf.mxu0 }
 0x17f   : > { %v1449_v0 = vadd.f32 %v1390_v61, %v5156_v53  ;;  %v5295_v1 = vadd.f32 %v3969_v63, %v1448_v21 }
 0x180   : > { %v3935_v59 = vpop.f32.mrf.mxu1  ;;  %v1735_v14 = vpop.f32.mrf.mxu0 }
 0x181   : > { %v1452_v25 = vadd.f32 %v3935_v59, %v5162_v19  ;;  %v5298_v30 = vadd.f32 %v1735_v14, %v1446_v49 }
 0x182   : > { %v1393_v58 = vpop.f32.mrf.mxu1  ;;  %v3972_v32 = vpop.f32.mrf.mxu0 }
 0x183   : > { %v1450_v18 = vadd.f32 %v1393_v58, %v5171_v50  ;;  %v5301_v38 = vadd.f32 %v3972_v32, %v1451_v51 }
 0x184   : > { %v3938_v39 = vpop.f32.mrf.mxu1  ;;  %v1748_v5 = vpop.f32.mrf.mxu0 }
 0x185   : > { %v1455_v16 = vadd.f32 %v3938_v39, %v5177_v43  ;;  %v5304_v46 = vadd.f32 %v1748_v5, %v1449_v0 }
 0x186   : > { %v1406_v53 = vpop.f32.mrf.mxu1  ;;  %v3973_v36 = vpop.f32.mrf.mxu0 }
 0x187   : > { %v1453_v47 = vadd.f32 %v1406_v53, %v5186_v15  ;;  %v5307_v54 = vadd.f32 %v3973_v36, %v1452_v25 }
 0x188   : > { %v3939_v19 = vpop.f32.mrf.mxu1  ;;  %v1751_v27 = vpop.f32.mrf.mxu0 }
 0x189   : > { %v1456_v52 = vadd.f32 %v3939_v19, %v5192_v8  ;;  %v5310_v48 = vadd.f32 %v1751_v27, %v1450_v18 }
 0x18a   : > { %v1409_v50 = vpop.f32.mrf.mxu1  ;;  %v3976_v23 = vpop.f32.mrf.mxu0 }
 0x18b   : > { %v1454_v31 = vadd.f32 %v1409_v50, %v5198_v34  ;;  %v5313_v21 = vadd.f32 %v3976_v23, %v1455_v16 }
 0x18c   : > { %v3982_v43 = vpop.f32.mrf.mxu1  ;;  %v1764_v13 = vpop.f32.mrf.mxu0 }
 0x18d   : > { %v2091_v4 = vadd.f32 %v3982_v43, %v5203_v17  ;;  %v5316_v49 = vadd.f32 %v1764_v13, %v1453_v47 }
 0x18e   : > { %v1946_v15 = vpop.f32.mrf.mxu1  ;;  %v3977_v12 = vpop.f32.mrf.mxu0 }
 0x18f   : > { %v2089_v55 = vadd.f32 %v1946_v15, %v5210_v60  ;;  %v5319_v51 = vadd.f32 %v3977_v12, %v1456_v52 }
 0x190   : > { %v3983_v8 = vpop.f32.mrf.mxu1  ;;  %v1767_v61 = vpop.f32.mrf.mxu0 }
 0x191   : > { %v2092_v63 = vadd.f32 %v3983_v8, %v5214_v35  ;;  %v5322_v0 = vadd.f32 %v1767_v61, %v1454_v31 }
 0x192   : > { %v1949_v34 = vpop.f32.mrf.mxu1  ;;  %v4020_v59 = vpop.f32.mrf.mxu0 }
 0x193   : > { %v2090_v14 = vadd.f32 %v1949_v34, %v5219_v2  ;;  %v5325_v25 = vadd.f32 %v4020_v59, %v2091_v4 }
 0x194   : > { %v3986_v17 = vpop.f32.mrf.mxu1  ;;  %v2180_v58 = vpop.f32.mrf.mxu0 }
 0x195   : > { %v2095_v32 = vadd.f32 %v3986_v17, %v5224_v28  ;;  %v5328_v18 = vadd.f32 %v2180_v58, %v2089_v55 }
 0x196   : > { %v1962_v60 = vpop.f32.mrf.mxu1  ;;  %v4021_v39 = vpop.f32.mrf.mxu0 }
 0x197   : > { %v2093_v5 = vadd.f32 %v1962_v60, %v5230_v40  ;;  %v5331_v16 = vadd.f32 %v4021_v39, %v2092_v63 }
 0x198   : > { %v3987_v35 = vpop.f32.mrf.mxu1  ;;  %v2183_v53 = vpop.f32.mrf.mxu0 }
 0x199   : > { %v2096_v36 = vadd.f32 %v3987_v35, %v5233_v44  ;;  %v5334_v47 = vadd.f32 %v2183_v53, %v2090_v14 }
 0x19a   : > { %v1965_v2 = vpop.f32.mrf.mxu1  ;;  %v4024_v19 = vpop.f32.mrf.mxu0 }
 0x19b   : > { %v2094_v27 = vadd.f32 %v1965_v2, %v5237_v22  ;;  %v5337_v52 = vadd.f32 %v4024_v19, %v2095_v32 }
 0x19c   : > { %v3990_v28 = vpop.f32.mrf.mxu1  ;;  %v2196_v50 = vpop.f32.mrf.mxu0 }
 0x19d   : > { %v2099_v23 = vadd.f32 %v3990_v28, %v5241_v7  ;;  %v5340_v31 = vadd.f32 %v2196_v50, %v2093_v5 }
 0x19e   : > { %v1978_v40 = vpop.f32.mrf.mxu1  ;;  %v4025_v43 = vpop.f32.mrf.mxu0 }
 0x19f   : > { %v2097_v13 = vadd.f32 %v1978_v40, %v5244_v45  ;;  %v5343_v4 = vadd.f32 %v4025_v43, %v2096_v36 }
 0x1a0   : > { %v3991_v44 = vpop.f32.mrf.mxu1  ;;  %v2199_v15 = vpop.f32.mrf.mxu0 }
 0x1a1   : > { %v2100_v12 = vadd.f32 %v3991_v44, %v5247_v42  ;;  %v5346_v55 = vadd.f32 %v2199_v15, %v2094_v27 }
 0x1a2   : > { %v1981_v22 = vpop.f32.mrf.mxu1  ;;  %v4028_v8 = vpop.f32.mrf.mxu0 }
 0x1a3   : > { %v2098_v61 = vadd.f32 %v1981_v22, %v5250_v9  ;;  %v5349_v63 = vadd.f32 %v4028_v8, %v2099_v23 }
 0x1a4   : > { %v3994_v7 = vpop.f32.mrf.mxu1  ;;  %v2212_v34 = vpop.f32.mrf.mxu0 }
 0x1a5   : > { %v2103_v59 = vadd.f32 %v3994_v7, %v5253_v57  ;;  %v5352_v14 = vadd.f32 %v2212_v34, %v2097_v13 }
 0x1a6   : > { %v1994_v45 = vpop.f32.mrf.mxu1  ;;  %v4029_v17 = vpop.f32.mrf.mxu0 }
 0x1a7   : > { %v2101_v58 = vadd.f32 %v1994_v45, %v5256_v24  ;;  %v5355_v32 = vadd.f32 %v4029_v17, %v2100_v12 }
 0x1a8   : > { %v3995_v42 = vpop.f32.mrf.mxu1  ;;  %v2215_v60 = vpop.f32.mrf.mxu0 }
 0x1a9   : > { %v2104_v39 = vadd.f32 %v3995_v42, %v5259_v29  ;;  %v5358_v5 = vadd.f32 %v2215_v60, %v2098_v61 }
 0x1aa   : > { %v1997_v9 = vpop.f32.mrf.mxu1  ;;  %v4032_v35 = vpop.f32.mrf.mxu0 }
 0x1ab   : > { %v2102_v53 = vadd.f32 %v1997_v9, %v5262_v56  ;;  %v5361_v36 = vadd.f32 %v4032_v35, %v2103_v59 }
 0x1ac   : > { %v3998_v57 = vpop.f32.mrf.mxu1  ;;  %v2228_v2 = vpop.f32.mrf.mxu0 }
 0x1ad   : > { %v2107_v19 = vadd.f32 %v3998_v57, %v5265_v3  ;;  %v5364_v27 = vadd.f32 %v2228_v2, %v2101_v58 }
 0x1ae   : > { %v2010_v24 = vpop.f32.mrf.mxu1  ;;  %v4033_v28 = vpop.f32.mrf.mxu0 }
 0x1af   : > { %v2105_v50 = vadd.f32 %v2010_v24, %v5268_v33  ;;  %v5367_v23 = vadd.f32 %v4033_v28, %v2104_v39 }
 0x1b0   : > { %v3999_v29 = vpop.f32.mrf.mxu1  ;;  %v2231_v40 = vpop.f32.mrf.mxu0 }
 0x1b1   : > { %v2108_v43 = vadd.f32 %v3999_v29, %v5271_v62  ;;  %v5370_v13 = vadd.f32 %v2231_v40, %v2102_v53 }
 0x1b2   : > { %v2013_v56 = vpop.f32.mrf.mxu1  ;;  %v4036_v44 = vpop.f32.mrf.mxu0 }
 0x1b3   : > { %v2106_v15 = vadd.f32 %v2013_v56, %v5274_v20  ;;  %v5373_v12 = vadd.f32 %v4036_v44, %v2107_v19 }
 0x1b4   : > { %v4002_v3 = vpop.f32.mrf.mxu1  ;;  %v2244_v22 = vpop.f32.mrf.mxu0 }
 0x1b5   : > { %v2111_v8 = vadd.f32 %v4002_v3, %v5277_v6  ;;  %v5376_v61 = vadd.f32 %v2244_v22, %v2105_v50 }
 0x1b6   : > { %v2026_v33 = vpop.f32.mrf.mxu1  ;;  %v4037_v7 = vpop.f32.mrf.mxu0 }
 0x1b7   : > { %v2109_v34 = vadd.f32 %v2026_v33, %v5280_v10  ;;  %v5379_v59 = vadd.f32 %v4037_v7, %v2108_v43 }
 0x1b8   : > { %v4003_v62 = vpop.f32.mrf.mxu1  ;;  %v2247_v45 = vpop.f32.mrf.mxu0 }
 0x1b9   : > { %v2112_v17 = vadd.f32 %v4003_v62, %v5283_v41  ;;  %v5382_v58 = vadd.f32 %v2247_v45, %v2106_v15 }
 0x1ba   : > { %v2029_v20 = vpop.f32.mrf.mxu1  ;;  %v4040_v42 = vpop.f32.mrf.mxu0 }
 0x1bb   : > { %v2110_v60 = vadd.f32 %v2029_v20, %v5286_v11  ;;  %v5385_v39 = vadd.f32 %v4040_v42, %v2111_v8 }
 0x1bc   : > { %v4006_v6 = vpop.f32.mrf.mxu1  ;;  %v2260_v9 = vpop.f32.mrf.mxu0 }
 0x1bd   : > { %v2115_v35 = vadd.f32 %v4006_v6, %v5289_v26  ;;  %v5388_v53 = vadd.f32 %v2260_v9, %v2109_v34 }
 0x1be   : > { %v2042_v10 = vpop.f32.mrf.mxu1  ;;  %v4041_v57 = vpop.f32.mrf.mxu0 }
 0x1bf   : > { %v2113_v2 = vadd.f32 %v2042_v10, %v5292_v37  ;;  %v5391_v19 = vadd.f32 %v4041_v57, %v2112_v17 }
 0x1c0   : > { %v4007_v41 = vpop.f32.mrf.mxu1  ;;  %v2263_v24 = vpop.f32.mrf.mxu0 }
 0x1c1   : > { %v2116_v28 = vadd.f32 %v4007_v41, %v5295_v1  ;;  %v5394_v50 = vadd.f32 %v2263_v24, %v2110_v60 }
 0x1c2   : > { %v2045_v11 = vpop.f32.mrf.mxu1  ;;  %v4044_v29 = vpop.f32.mrf.mxu0 }
 0x1c3   : > { %v2114_v40 = vadd.f32 %v2045_v11, %v5298_v30  ;;  %v5397_v43 = vadd.f32 %v4044_v29, %v2115_v35 }
 0x1c4   : > { %v4010_v26 = vpop.f32.mrf.mxu1  ;;  %v2276_v56 = vpop.f32.mrf.mxu0 }
 0x1c5   : > { %v2119_v44 = vadd.f32 %v4010_v26, %v5301_v38  ;;  %v5400_v15 = vadd.f32 %v2276_v56, %v2113_v2 }
 0x1c6   : > { %v2058_v37 = vpop.f32.mrf.mxu1  ;;  %v4045_v3 = vpop.f32.mrf.mxu0 }
 0x1c7   : > { %v2117_v22 = vadd.f32 %v2058_v37, %v5304_v46  ;;  %v5403_v8 = vadd.f32 %v4045_v3, %v2116_v28 }
 0x1c8   : > { %v4011_v1 = vpop.f32.mrf.mxu1  ;;  %v2279_v33 = vpop.f32.mrf.mxu0 }
 0x1c9   : > { %v2120_v7 = vadd.f32 %v4011_v1, %v5307_v54  ;;  %v5406_v34 = vadd.f32 %v2279_v33, %v2114_v40 }
 0x1ca   : > { %v2061_v30 = vpop.f32.mrf.mxu1  ;;  %v4048_v62 = vpop.f32.mrf.mxu0 }
 0x1cb   : > { %v2118_v45 = vadd.f32 %v2061_v30, %v5310_v48  ;;  %v5409_v17 = vadd.f32 %v4048_v62, %v2119_v44 }
 0x1cc   : > { %v4014_v38 = vpop.f32.mrf.mxu1  ;;  %v2292_v20 = vpop.f32.mrf.mxu0 }
 0x1cd   : > { %v2123_v42 = vadd.f32 %v4014_v38, %v5313_v21  ;;  %v5412_v60 = vadd.f32 %v2292_v20, %v2117_v22 }
 0x1ce   : > { %v2074_v46 = vpop.f32.mrf.mxu1  ;;  %v4049_v6 = vpop.f32.mrf.mxu0 }
 0x1cf   : > { %v2121_v9 = vadd.f32 %v2074_v46, %v5316_v49  ;;  %v5415_v35 = vadd.f32 %v4049_v6, %v2120_v7 }
 0x1d0   : > { %v4015_v54 = vpop.f32.mrf.mxu1  ;;  %v2295_v10 = vpop.f32.mrf.mxu0 }
 0x1d1   : > { %v2124_v57 = vadd.f32 %v4015_v54, %v5319_v51  ;;  %v5418_v2 = vadd.f32 %v2295_v10, %v2118_v45 }
 0x1d2   : > { %v2077_v48 = vpop.f32.mrf.mxu1  ;;  %v4052_v41 = vpop.f32.mrf.mxu0 }
 0x1d3   : > { %v2122_v24 = vadd.f32 %v2077_v48, %v5322_v0  ;;  %v5421_v28 = vadd.f32 %v4052_v41, %v2123_v42  ;;  %v5433_v0 = vld [vmem:[%s5589_s2] ss:$0 sm:$0xff] }
 0x1d4   : > { %v4058_v21 = vpop.f32.mrf.mxu1  ;;  %v2308_v11 = vpop.f32.mrf.mxu0 }
 0x1d5   : > { %v5423_v29 = vadd.f32 %v2308_v11, %v2121_v9  ;;  %v2683_v51 = vadd.f32 %v4058_v21, %v5325_v25 }
 0x1d6   : > { %v2538_v49 = vpop.f32.mrf.mxu1  ;;  %v4053_v40 = vpop.f32.mrf.mxu0 }
 0x1d7   : > { %v5425_v26 = vadd.f32 %v4053_v40, %v2124_v57  ;;  %v2681_v1 = vadd.f32 %v2538_v49, %v5328_v18 }
 0x1d8   : > { %v4059_v56 = vpop.f32.mrf.mxu1  ;;  %v2311_v44 = vpop.f32.mrf.mxu0 }
 0x1d9   : > { %v5428_v37 = vadd.f32 %v2311_v44, %v2122_v24  ;;  %v2684_v62 = vadd.f32 %v4059_v56, %v5331_v16 }
 0x1da   : > { %v2541_v3 = vpop.f32.mrf.mxu1  ;;  %v4096_v22 = vpop.f32.mrf.mxu0 }
 0x1db   : > { %v2993_v33 = vadd.f32 %v4096_v22, %v2683_v51  ;;  %v2682_v9 = vadd.f32 %v2541_v3, %v5334_v47 }
 0x1dc   : > { %v4062_v7 = vpop.f32.mrf.mxu1  ;;  %v2848_v30 = vpop.f32.mrf.mxu0 }
 0x1dd   : > { %v3036_v45 = vadd.f32 %v5433_v0, %v2993_v33  ;;  %v2991_v25 = vadd.f32 %v2848_v30, %v2681_v1  ;;  %v2687_v54 = vadd.f32 %v4062_v7, %v5337_v52 }
 0x1de   : > { %v2554_v38 = vpop.f32.mrf.mxu1  ;;  %v4097_v20 = vpop.f32.mrf.mxu0 }
 0x1df   : > { %v3072_v42 = vmax.f32 %v3036_v45, 0.0  ;;  %v3034_v46 = vadd.f32 %v5433_v0, %v2991_v25  ;;  %v2994_v6 = vadd.f32 %v4097_v20, %v2684_v62  ;;  %v2685_v47 = vadd.f32 %v2554_v38, %v5340_v31 }
 0x1e0   : > { %v4063_v18 = vpop.f32.mrf.mxu1  ;;  %v2851_v16 = vpop.f32.mrf.mxu0 }
 0x1e1   : > { %v3583_v10 = vpack.c.bf16 %v3072_v42, %v3072_v42  ;;  %v3070_v57 = vmax.f32 %v3034_v46, 0.0  ;;  %v3037_v48 = vadd.f32 %v5433_v0, %v2994_v6  ;;  %v2992_v24 = vadd.f32 %v2851_v16, %v2682_v9 }
 0x1e2   : > { %v2557_v41 = vpop.f32.mrf.mxu1  ;;  %v4100_v21 = vpop.f32.mrf.mxu0  ;;  %v2688_v52 = vadd.f32 %v4063_v18, %v5343_v4 }
 0x1e3   : > { %3253 = vst.msk [vmem:[%s5444_s16 + $0x8] sm:$0xf] %vm3250_vm9, %v3583_v10  ;;  %v3581_v11 = vpack.c.bf16 %v3070_v57, %v3070_v57  ;;  %v3073_v49 = vmax.f32 %v3037_v48, 0.0  ;;  %v2997_v40 = vadd.f32 %v4100_v21, %v2687_v54  ;;  %v3035_v56 = vadd.f32 %v5433_v0, %v2992_v24 }
 0x1e4   : > { %v4066_v44 = vpop.f32.mrf.mxu1  ;;  %v2864_v51 = vpop.f32.mrf.mxu0  ;;  %v2686_v25 = vadd.f32 %v2557_v41, %v5346_v55 }
 0x1e5   : > { %3251 = vst.msk [vmem:[%s5444_s16] sm:$0xf] %vm3250_vm9, %v3581_v11  ;;  %v3584_v3 = vpack.c.bf16 %v3073_v49, %v3073_v49  ;;  %v3040_v22 = vadd.f32 %v5433_v0, %v2997_v40  ;;  %v2995_v1 = vadd.f32 %v2864_v51, %v2685_v47  ;;  %v3071_v33 = vmax.f32 %v3035_v56, 0.0 }
 0x1e6   : > { %v2570_v7 = vpop.f32.mrf.mxu1  ;;  %v4101_v30 = vpop.f32.mrf.mxu0  ;;  %v2691_v42 = vadd.f32 %v4066_v44, %v5349_v63 }
 0x1e7   : > { %3254 = vst.msk [vmem:[%s5444_s16 + $0xc] sm:$0xf] %vm3250_vm9, %v3584_v3  ;;  %v3076_v31 = vmax.f32 %v3040_v22, 0.0  ;;  %v3038_v62 = vadd.f32 %v5433_v0, %v2995_v1  ;;  %v2998_v45 = vadd.f32 %v4101_v30, %v2688_v52  ;;  %v3582_v38 = vpack.c.bf16 %v3071_v33, %v3071_v33 }
 0x1e8   : > { %v4067_v20 = vpop.f32.mrf.mxu1  ;;  %v2867_v4 = vpop.f32.mrf.mxu0  ;;  %v2689_v55 = vadd.f32 %v2570_v7, %v5352_v14 }
 0x1e9   : > { %v3587_v46 = vpack.c.bf16 %v3076_v31, %v3076_v31  ;;  %v3074_v6 = vmax.f32 %v3038_v62, 0.0  ;;  %v3041_v9 = vadd.f32 %v5433_v0, %v2998_v45  ;;  %3252 = vst.msk [vmem:[%s5444_s16 + $0x4] sm:$0xf] %vm3250_vm9, %v3582_v38  ;;  %v2996_v16 = vadd.f32 %v2867_v4, %v2686_v25 }
 0x1ea   : > { %v2573_v18 = vpop.f32.mrf.mxu1  ;;  %v4104_v54 = vpop.f32.mrf.mxu0  ;;  %v2692_v21 = vadd.f32 %v4067_v20, %v5355_v32 }
 0x1eb   : > { %3257 = vst.msk [vmem:[%s5444_s16 + $0x18] sm:$0xf] %vm3250_vm9, %v3587_v46  ;;  %v3585_v10 = vpack.c.bf16 %v3074_v6, %v3074_v6  ;;  %v3077_v57 = vmax.f32 %v3041_v9, 0.0  ;;  %v3001_v48 = vadd.f32 %v4104_v54, %v2691_v42  ;;  %v3039_v63 = vadd.f32 %v5433_v0, %v2996_v16 }
 0x1ec   : > { %v4070_v41 = vpop.f32.mrf.mxu1  ;;  %v2880_v24 = vpop.f32.mrf.mxu0  ;;  %v2690_v3 = vadd.f32 %v2573_v18, %v5358_v5 }
 0x1ed   : > { %3255 = vst.msk [vmem:[%s5444_s16 + $0x10] sm:$0xf] %vm3250_vm9, %v3585_v10  ;;  %v3588_v47 = vpack.c.bf16 %v3077_v57, %v3077_v57  ;;  %v3044_v11 = vadd.f32 %v5433_v0, %v3001_v48  ;;  %v2999_v49 = vadd.f32 %v2880_v24, %v2689_v55  ;;  %v3075_v40 = vmax.f32 %v3039_v63, 0.0 }
 0x1ee   : > { %v2586_v56 = vpop.f32.mrf.mxu1  ;;  %v4105_v44 = vpop.f32.mrf.mxu0  ;;  %v2695_v33 = vadd.f32 %v4070_v41, %v5361_v36 }
 0x1ef   : > { %3258 = vst.msk [vmem:[%s5444_s16 + $0x1c] sm:$0xf] %vm3250_vm9, %v3588_v47  ;;  %v3080_v14 = vmax.f32 %v3044_v11, 0.0  ;;  %v3042_v51 = vadd.f32 %v5433_v0, %v2999_v49  ;;  %v3002_v52 = vadd.f32 %v4105_v44, %v2692_v21  ;;  %v3586_v22 = vpack.c.bf16 %v3075_v40, %v3075_v40 }
 0x1f0   : > { %v4071_v1 = vpop.f32.mrf.mxu1  ;;  %v2883_v32 = vpop.f32.mrf.mxu0  ;;  %v2693_v5 = vadd.f32 %v2586_v56, %v5364_v27 }
 0x1f1   : > { %v3591_v7 = vpack.c.bf16 %v3080_v14, %v3080_v14  ;;  %v3078_v30 = vmax.f32 %v3042_v51, 0.0  ;;  %v3045_v31 = vadd.f32 %v5433_v0, %v3002_v52  ;;  %3256 = vst.msk [vmem:[%s5444_s16 + $0x14] sm:$0xf] %vm3250_vm9, %v3586_v22  ;;  %v3000_v45 = vadd.f32 %v2883_v32, %v2690_v3 }
 0x1f2   : > { %v2589_v62 = vpop.f32.mrf.mxu1  ;;  %v4108_v25 = vpop.f32.mrf.mxu0  ;;  %v2696_v6 = vadd.f32 %v4071_v1, %v5367_v23 }
 0x1f3   : > { %3261 = vst.msk [vmem:[%s5444_s16 + $0x28] sm:$0xf] %vm3250_vm9, %v3591_v7  ;;  %v3589_v38 = vpack.c.bf16 %v3078_v30, %v3078_v30  ;;  %v3081_v20 = vmax.f32 %v3045_v31, 0.0  ;;  %v3005_v4 = vadd.f32 %v4108_v25, %v2695_v33  ;;  %v3043_v36 = vadd.f32 %v5433_v0, %v3000_v45 }
 0x1f4   : > { %v4074_v42 = vpop.f32.mrf.mxu1  ;;  %v2896_v46 = vpop.f32.mrf.mxu0  ;;  %v2694_v63 = vadd.f32 %v2589_v62, %v5370_v13 }
 0x1f5   : > { %3259 = vst.msk [vmem:[%s5444_s16 + $0x20] sm:$0xf] %vm3250_vm9, %v3589_v38  ;;  %v3592_v9 = vpack.c.bf16 %v3081_v20, %v3081_v20  ;;  %v3048_v18 = vadd.f32 %v5433_v0, %v3005_v4  ;;  %v3003_v16 = vadd.f32 %v2896_v46, %v2693_v5  ;;  %v3079_v54 = vmax.f32 %v3043_v36, 0.0 }
 0x1f6   : > { %v2602_v55 = vpop.f32.mrf.mxu1  ;;  %v4109_v10 = vpop.f32.mrf.mxu0  ;;  %v2699_v21 = vadd.f32 %v4074_v42, %v5373_v12 }
 0x1f7   : > { %3262 = vst.msk [vmem:[%s5444_s16 + $0x2c] sm:$0xf] %vm3250_vm9, %v3592_v9  ;;  %v3084_v27 = vmax.f32 %v3048_v18, 0.0  ;;  %v3046_v57 = vadd.f32 %v5433_v0, %v3003_v16  ;;  %v3006_v48 = vadd.f32 %v4109_v10, %v2696_v6  ;;  %v3590_v41 = vpack.c.bf16 %v3079_v54, %v3079_v54 }
 0x1f8   : > { %v4075_v24 = vpop.f32.mrf.mxu1  ;;  %v2899_v23 = vpop.f32.mrf.mxu0  ;;  %v2697_v13 = vadd.f32 %v2602_v55, %v5376_v61 }
 0x1f9   : > { %v3595_v47 = vpack.c.bf16 %v3084_v27, %v3084_v27  ;;  %v3082_v11 = vmax.f32 %v3046_v57, 0.0  ;;  %v3049_v49 = vadd.f32 %v5433_v0, %v3006_v48  ;;  %3260 = vst.msk [vmem:[%s5444_s16 + $0x24] sm:$0xf] %vm3250_vm9, %v3590_v41  ;;  %v3004_v56 = vadd.f32 %v2899_v23, %v2694_v63 }
 0x1fa   : > { %v2605_v40 = vpop.f32.mrf.mxu1  ;;  %v4112_v44 = vpop.f32.mrf.mxu0  ;;  %v2700_v1 = vadd.f32 %v4075_v24, %v5379_v59 }
 0x1fb   : > { %3265 = vst.msk [vmem:[%s5444_s16 + $0x38] sm:$0xf] %vm3250_vm9, %v3595_v47  ;;  %v3593_v14 = vpack.c.bf16 %v3082_v11, %v3082_v11  ;;  %v3085_v51 = vmax.f32 %v3049_v49, 0.0  ;;  %v3009_v52 = vadd.f32 %v4112_v44, %v2699_v21  ;;  %v3047_v12 = vadd.f32 %v5433_v0, %v3004_v56 }
 0x1fc   : > { %v4078_v3 = vpop.f32.mrf.mxu1  ;;  %v2912_v22 = vpop.f32.mrf.mxu0  ;;  %v2698_v5 = vadd.f32 %v2605_v40, %v5382_v58 }
 0x1fd   : > { %3263 = vst.msk [vmem:[%s5444_s16 + $0x30] sm:$0xf] %vm3250_vm9, %v3593_v14  ;;  %v3596_v32 = vpack.c.bf16 %v3085_v51, %v3085_v51  ;;  %v3052_v33 = vadd.f32 %v5433_v0, %v3009_v52  ;;  %v3007_v7 = vadd.f32 %v2912_v22, %v2697_v13  ;;  %v3083_v30 = vmax.f32 %v3047_v12, 0.0 }
 0x1fe   : > { %v2618_v31 = vpop.f32.mrf.mxu1  ;;  %v4113_v62 = vpop.f32.mrf.mxu0  ;;  %v2703_v4 = vadd.f32 %v4078_v3, %v5385_v39 }
 0x1ff   : > { %3266 = vst.msk [vmem:[%s5444_s16 + $0x3c] sm:$0xf] %vm3250_vm9, %v3596_v32  ;;  %v3088_v61 = vmax.f32 %v3052_v33, 0.0  ;;  %v3050_v45 = vadd.f32 %v5433_v0, %v3007_v7  ;;  %v3010_v25 = vadd.f32 %v4113_v62, %v2700_v1  ;;  %v3594_v38 = vpack.c.bf16 %v3083_v30, %v3083_v30 }
 0x200   : > { %v4079_v20 = vpop.f32.mrf.mxu1  ;;  %v2915_v59 = vpop.f32.mrf.mxu0  ;;  %v2701_v58 = vadd.f32 %v2618_v31, %v5388_v53 }
 0x201   : > { %v3599_v36 = vpack.c.bf16 %v3088_v61, %v3088_v61  ;;  %v3086_v42 = vmax.f32 %v3050_v45, 0.0  ;;  %v3053_v46 = vadd.f32 %v5433_v0, %v3010_v25  ;;  %3264 = vst.msk [vmem:[%s5444_s16 + $0x34] sm:$0xf] %vm3250_vm9, %v3594_v38  ;;  %v3008_v9 = vadd.f32 %v2915_v59, %v2698_v5 }
 0x202   : > { %v2621_v6 = vpop.f32.mrf.mxu1  ;;  %v4116_v18 = vpop.f32.mrf.mxu0  ;;  %v2704_v57 = vadd.f32 %v4079_v20, %v5391_v19 }
 0x203   : > { %3269 = vst.msk [vmem:[%s5444_s16 + $0x48] sm:$0xf] %vm3250_vm9, %v3599_v36  ;;  %v3597_v16 = vpack.c.bf16 %v3086_v42, %v3086_v42  ;;  %v3089_v54 = vmax.f32 %v3053_v46, 0.0  ;;  %v3013_v55 = vadd.f32 %v4116_v18, %v2703_v4  ;;  %v3051_v39 = vadd.f32 %v5433_v0, %v3008_v9 }
 0x204   : > { %v4082_v10 = vpop.f32.mrf.mxu1  ;;  %v2928_v27 = vpop.f32.mrf.mxu0  ;;  %v2702_v49 = vadd.f32 %v2621_v6, %v5394_v50 }
 0x205   : > { %3267 = vst.msk [vmem:[%s5444_s16 + $0x40] sm:$0xf] %vm3250_vm9, %v3597_v16  ;;  %v3600_v48 = vpack.c.bf16 %v3089_v54, %v3089_v54  ;;  %v3056_v63 = vadd.f32 %v5433_v0, %v3013_v55  ;;  %v3011_v41 = vadd.f32 %v2928_v27, %v2701_v58  ;;  %v3087_v24 = vmax.f32 %v3051_v39, 0.0 }
 0x206   : > { %v2634_v23 = vpop.f32.mrf.mxu1  ;;  %v4117_v21 = vpop.f32.mrf.mxu0  ;;  %v2707_v44 = vadd.f32 %v4082_v10, %v5397_v43 }
 0x207   : > { %3270 = vst.msk [vmem:[%s5444_s16 + $0x4c] sm:$0xf] %vm3250_vm9, %v3600_v48  ;;  %v3092_v53 = vmax.f32 %v3056_v63, 0.0  ;;  %v3054_v47 = vadd.f32 %v5433_v0, %v3011_v41  ;;  %v3014_v11 = vadd.f32 %v4117_v21, %v2704_v57  ;;  %v3598_v40 = vpack.c.bf16 %v3087_v24, %v3087_v24 }
 0x208   : > { %v4083_v56 = vpop.f32.mrf.mxu1  ;;  %v2931_v19 = vpop.f32.mrf.mxu0  ;;  %v2705_v50 = vadd.f32 %v2634_v23, %v5400_v15 }
 0x209   : > { %v3603_v13 = vpack.c.bf16 %v3092_v53, %v3092_v53  ;;  %v3090_v14 = vmax.f32 %v3054_v47, 0.0  ;;  %v3057_v51 = vadd.f32 %v5433_v0, %v3014_v11  ;;  %3268 = vst.msk [vmem:[%s5444_s16 + $0x44] sm:$0xf] %vm3250_vm9, %v3598_v40  ;;  %v3012_v12 = vadd.f32 %v2931_v19, %v2702_v49 }
 0x20a   : > { %v2637_v52 = vpop.f32.mrf.mxu1  ;;  %v4120_v3 = vpop.f32.mrf.mxu0  ;;  %v2708_v30 = vadd.f32 %v4083_v56, %v5403_v8 }
 0x20b   : > { %3273 = vst.msk [vmem:[%s5444_s16 + $0x58] sm:$0xf] %vm3250_vm9, %v3603_v13  ;;  %v3601_v22 = vpack.c.bf16 %v3090_v14, %v3090_v14  ;;  %v3093_v1 = vmax.f32 %v3057_v51, 0.0  ;;  %v3017_v32 = vadd.f32 %v4120_v3, %v2707_v44  ;;  %v3055_v43 = vadd.f32 %v5433_v0, %v3012_v12 }
 0x20c   : > { %v4086_v33 = vpop.f32.mrf.mxu1  ;;  %v2944_v7 = vpop.f32.mrf.mxu0  ;;  %v2706_v59 = vadd.f32 %v2637_v52, %v5406_v34 }
 0x20d   : > { %3271 = vst.msk [vmem:[%s5444_s16 + $0x50] sm:$0xf] %vm3250_vm9, %v3601_v22  ;;  %v3604_v31 = vpack.c.bf16 %v3093_v1, %v3093_v1  ;;  %v3060_v62 = vadd.f32 %v5433_v0, %v3017_v32  ;;  %v3015_v61 = vadd.f32 %v2944_v7, %v2705_v50  ;;  %v3091_v45 = vmax.f32 %v3055_v43, 0.0 }
 0x20e   : > { %v2650_v25 = vpop.f32.mrf.mxu1  ;;  %v4121_v5 = vpop.f32.mrf.mxu0  ;;  %v2711_v42 = vadd.f32 %v4086_v33, %v5409_v17 }
 0x20f   : > { %3274 = vst.msk [vmem:[%s5444_s16 + $0x5c] sm:$0xf] %vm3250_vm9, %v3604_v31  ;;  %v3096_v15 = vmax.f32 %v3060_v62, 0.0  ;;  %v3058_v38 = vadd.f32 %v5433_v0, %v3015_v61  ;;  %v3018_v20 = vadd.f32 %v4121_v5, %v2708_v30  ;;  %v3602_v4 = vpack.c.bf16 %v3091_v45, %v3091_v45 }
 0x210   : > { %v4087_v36 = vpop.f32.mrf.mxu1  ;;  %v2947_v8 = vpop.f32.mrf.mxu0  ;;  %v2709_v34 = vadd.f32 %v2650_v25, %v5412_v60 }
 0x211   : > { %v3607_v46 = vpack.c.bf16 %v3096_v15, %v3096_v15  ;;  %v3094_v6 = vmax.f32 %v3058_v38, 0.0  ;;  %v3061_v9 = vadd.f32 %v5433_v0, %v3018_v20  ;;  %3272 = vst.msk [vmem:[%s5444_s16 + $0x54] sm:$0xf] %vm3250_vm9, %v3602_v4  ;;  %v3016_v58 = vadd.f32 %v2947_v8, %v2706_v59 }
 0x212   : > { %v2653_v18 = vpop.f32.mrf.mxu1  ;;  %v4124_v16 = vpop.f32.mrf.mxu0  ;;  %v2712_v57 = vadd.f32 %v4087_v36, %v5415_v35 }
 0x213   : > { %3277 = vst.msk [vmem:[%s5444_s16 + $0x68] sm:$0xf] %vm3250_vm9, %v3607_v46  ;;  %v3605_v54 = vpack.c.bf16 %v3094_v6, %v3094_v6  ;;  %v3097_v55 = vmax.f32 %v3061_v9, 0.0  ;;  %v3021_v39 = vadd.f32 %v4124_v16, %v2711_v42  ;;  %v3059_v17 = vadd.f32 %v5433_v0, %v3016_v58 }
 0x214   : > { %v4090_v10 = vpop.f32.mrf.mxu1  ;;  %v2960_v27 = vpop.f32.mrf.mxu0  ;;  %v2710_v11 = vadd.f32 %v2653_v18, %v5418_v2 }
 0x215   : > { %3275 = vst.msk [vmem:[%s5444_s16 + $0x60] sm:$0xf] %vm3250_vm9, %v3605_v54  ;;  %v3608_v48 = vpack.c.bf16 %v3097_v55, %v3097_v55  ;;  %v3064_v63 = vadd.f32 %v5433_v0, %v3021_v39  ;;  %v3019_v41 = vadd.f32 %v2960_v27, %v2709_v34  ;;  %v3095_v24 = vmax.f32 %v3059_v17, 0.0 }
 0x216   : > { %v2666_v23 = vpop.f32.mrf.mxu1  ;;  %v4125_v21 = vpop.f32.mrf.mxu0  ;;  %v2715_v56 = vadd.f32 %v4090_v10, %v5421_v28 }
 0x217   : > { %3278 = vst.msk [vmem:[%s5444_s16 + $0x6c] sm:$0xf] %vm3250_vm9, %v3608_v48  ;;  %v3100_v60 = vmax.f32 %v3064_v63, 0.0  ;;  %v3062_v53 = vadd.f32 %v5433_v0, %v3019_v41  ;;  %v3022_v47 = vadd.f32 %v4125_v21, %v2712_v57  ;;  %v3606_v49 = vpack.c.bf16 %v3095_v24, %v3095_v24 }
 0x218   : > { %v4091_v40 = vpop.f32.mrf.mxu1  ;;  %v2963_v35 = vpop.f32.mrf.mxu0  ;;  %v2713_v52 = vadd.f32 %v2666_v23, %v5423_v29 }
 0x219   : > { %v3611_v19 = vpack.c.bf16 %v3100_v60, %v3100_v60  ;;  %v3098_v44 = vmax.f32 %v3062_v53, 0.0  ;;  %v3065_v13 = vadd.f32 %v5433_v0, %v3022_v47  ;;  %3276 = vst.msk [vmem:[%s5444_s16 + $0x64] sm:$0xf] %vm3250_vm9, %v3606_v49  ;;  %v3020_v14 = vadd.f32 %v2963_v35, %v2710_v11 }
 0x21a   : > { %v4128_v51 = vpop.f32.mrf.mxu0  ;;  %v2669_v50 = vpop.f32.mrf.mxu1  ;;  %v2716_v1 = vadd.f32 %v4091_v40, %v5425_v26 }
 0x21b   : > { %3281 = vst.msk [vmem:[%s5444_s16 + $0x78] sm:$0xf] %vm3250_vm9, %v3611_v19  ;;  %v3609_v2 = vpack.c.bf16 %v3098_v44, %v3098_v44  ;;  %v3101_v12 = vmax.f32 %v3065_v13, 0.0  ;;  %v3025_v3 = vadd.f32 %v4128_v51, %v2715_v56  ;;  %v3063_v22 = vadd.f32 %v5433_v0, %v3020_v14 }
 0x21c   : > { %v2976_v28 = vpop.f32.mrf.mxu0  ;;  %v2714_v29 = vadd.f32 %v2669_v50, %v5428_v37 }
 0x21d   : > { %3279 = vst.msk [vmem:[%s5444_s16 + $0x70] sm:$0xf] %vm3250_vm9, %v3609_v2  ;;  %v3612_v32 = vpack.c.bf16 %v3101_v12, %v3101_v12  ;;  %v3068_v43 = vadd.f32 %v5433_v0, %v3025_v3  ;;  %v3023_v33 = vadd.f32 %v2976_v28, %v2713_v52  ;;  %v3099_v7 = vmax.f32 %v3063_v22, 0.0 }
 0x21e   : > { %v4129_v30 = vpop.f32.mrf.mxu0 }
 0x21f   : > { %3282 = vst.msk [vmem:[%s5444_s16 + $0x7c] sm:$0xf] %vm3250_vm9, %v3612_v32  ;;  %v3104_v31 = vmax.f32 %v3068_v43, 0.0  ;;  %v3066_v62 = vadd.f32 %v5433_v0, %v3023_v33  ;;  %v3026_v61 = vadd.f32 %v4129_v30, %v2716_v1  ;;  %v3610_v45 = vpack.c.bf16 %v3099_v7, %v3099_v7 }
 0x220   : > { %v2979_v26 = vpop.f32.mrf.mxu0 }
 0x221   : > { %v3615_v25 = vpack.c.bf16 %v3104_v31, %v3104_v31  ;;  %v3102_v5 = vmax.f32 %v3066_v62, 0.0  ;;  %v3069_v15 = vadd.f32 %v5433_v0, %v3026_v61  ;;  %v3024_v38 = vadd.f32 %v2979_v26, %v2714_v29  ;;  %3280 = vst.msk [vmem:[%s5444_s16 + $0x74] sm:$0xf] %vm3250_vm9, %v3610_v45 }
 0x223   : > { %3285 = vst.msk [vmem:[%s5444_s16 + $0x88] sm:$0xf] %vm3250_vm9, %v3615_v25  ;;  %v3613_v20 = vpack.c.bf16 %v3102_v5, %v3102_v5  ;;  %v3105_v59 = vmax.f32 %v3069_v15, 0.0  ;;  %v3067_v37 = vadd.f32 %v5433_v0, %v3024_v38 }
 0x225   : > { %3283 = vst.msk [vmem:[%s5444_s16 + $0x80] sm:$0xf] %vm3250_vm9, %v3613_v20  ;;  %v3616_v4 = vpack.c.bf16 %v3105_v59, %v3105_v59  ;;  %v3103_v36 = vmax.f32 %v3067_v37, 0.0 }
 0x227   : > { %3286 = vst.msk [vmem:[%s5444_s16 + $0x8c] sm:$0xf] %vm3250_vm9, %v3616_v4  ;;  %v3614_v8 = vpack.c.bf16 %v3103_v36, %v3103_v36 }
 0x229   : > { %3284 = vst.msk [vmem:[%s5444_s16 + $0x84] sm:$0xf] %vm3250_vm9, %v3614_v8 }
 0x22a PF: > { %s13_s12 = sadd.s32 1, %s4184_s12  }
 0x22b   : > { %p10_p4 = scmp.ge.s32.totalorder %s13_s12, 4  }
 0x22d   :  { %12 = sbr.rel (!%p10_p4) target bundleno = 1 (0x1), region = 70 }

// kernel: geopose_unet_forward.6
= control target key start
LH: loop header
LB: loop body
LE: loop exit
PB: predicated region body
PF: predicated region fallthrough
CT: control target
= control target key end

     0   :  { %s1920_s12 = smov 0   ;;  %s2473_s0 = inlined_call_operand.vmem [shape: bf16[2,102,16], index: 0, kind: input, shape index: {}]   ;;  %s2474_s1 = inlined_call_operand.vmem [shape: bf16[9,16,32], index: 1, kind: input, shape index: {}]   ;;  %s2475_s2 = inlined_call_operand.vmem [shape: f32[1,32], index: 2, kind: input, shape index: {}]   ;;  %s2476_s3 = inlined_call_operand.vmem [shape: bf16[2,80,32], index: 3, kind: output, shape index: {}]  }
   0x1 LB: > { %s1487_s13 = sadd.s32 4294967295, %s1896_s12   ;;  %p1491_p0 = scmp.ge.s32.totalorder %s1896_s12, 1  ;;  %s1896_s12 = sphi %s1920_s12, %s13_s12  }
   0x2   : > { %p137_p1 = scmp.lt.s32.totalorder %s1896_s12, 3 }
   0x4   : > { %p138_p2 = pnand %p1491_p0, %p137_p1 }
   0x5   : > { %p161_p3 = scmp.lt.s32.totalorder (!%p138_p2), %s1487_s13, 1 }
   0x6   : > { %141 = sbr.rel (%p138_p2) target bundleno = 407 (0x197), region = 32 }
   0xb   : > { %v1867_v0 = vld [vmem:[%s2474_s1 + $0x8] sm:$0xff]   ;;  %v1898_v1 = vmov 0.0   ;;  %vm1899_vm0 = vmmov 0   ;;  %s2478_s13 = smov (!%p161_p3, %s1487_s13), 1  ;;  %vm218_vm1 = vsmask.f32 7424 }
   0xc   : > { %1655 = vmatprep.subr.bf16.mxu0 %v1898_v1  ;;  %1853 = vmatprep.subr.bf16.mxu1 %v1898_v1  ;;  %s1855_s16 = smul.u32 52, %s2478_s13  ;;  %vm269_vm2 = vcmask 130048   ;;  %v1873_v30 = vld [vmem:[%s2474_s1 + $0x10] sm:$0xff]   ;;  %v1874_v34 = vld [vmem:[%s2474_s1] sm:$0xff]   ;;  %vm450_vm3 = vcmask 1046528   ;;  %vm856_vm5 = vcmask 1045504  }
   0xd   : > { %1656 = vmatpush3.bf16.msra.mxu0 %v1867_v0  ;;  %1854 = vmatpush3.bf16.msra.mxu1 %v1867_v0  ;;  %vm695_vm4 = vsmask.f32 6400  ;;  %vm1097_vm6 = vsmask.f32 5376  ;;  %vm1238_vm7 = vcmask 1044480   ;;  %s1856_s11 = smul.u32 40, %s2478_s13 }
   0xe   : > { %1657 = vmatprep.mubr.msk.bf16.mxu0 %vm1899_vm0, %v1898_v1  ;;  %1669 = vmatprep.mubr.msk.bf16.mxu1 %vm1899_vm0, %v1898_v1  ;;  %s1945_s19 = scalar_lea.vmem %s2473_s0, %s1855_s16  ;;  %vm1421_vm8 = vcmask 257024  }
   0xf   : > { %1699 = vmatprep.subr.bf16.mxu0 %v1898_v1  ;;  %1677 = vmatprep.subr.bf16.mxu1 %v1898_v1  ;;  %v172_v2 = vld [vmem:[%s1945_s19] sm:$0xf]  ;;  %v1949_v3 = vld [vmem:[%s1945_s19 + $0x4] sm:$0xf]  ;;  %v1952_v4 = vld [vmem:[%s1945_s19 + $0x8] sm:$0xf]  ;;  %s2420_s16 = scalar_lea.vmem %s2476_s3, %s1856_s11 }
  0x10   : > { %v1955_v5 = vld [vmem:[%s1945_s19 + $0xc] sm:$0xf]  ;;  %v1958_v6 = vcombine.low %v172_v2, %v1949_v3  ;;  %v178_v7 = vld [vmem:[%s1945_s19 + $0x18] sm:$0xf]  ;;  %v179_v8 = vld [vmem:[%s1945_s19 + $0x1c] sm:$0xf] }
  0x11   : > { %v1964_v9 = vcombine.low %v1952_v4, %v1955_v5  ;;  %v180_v10 = vld [vmem:[%s1945_s19 + $0x20] sm:$0xf]  ;;  %v181_v11 = vld [vmem:[%s1945_s19 + $0x24] sm:$0xf]  ;;  %v1968_v12 = vcombine.low %v178_v7, %v179_v8  ;;  %v1971_v13 = vld [vmem:[%s1945_s19 + $0x10] sm:$0xf] }
  0x12   : > { %v220_v14 = vshrl.u32 %v1958_v6, 16  ;;  %v222_v15 = vshll.u32 %v1958_v6, 16  ;;  %v1975_v16 = vcombine.low %v180_v10, %v181_v11  ;;  %v177_v17 = vld [vmem:[%s1945_s19 + $0x14] sm:$0xf]  ;;  %v182_v18 = vld [vmem:[%s1945_s19 + $0x28] sm:$0xf]  ;;  %v2026_v50 = vcombine.low %v179_v8, %v180_v10 }
  0x13   : > { %v227_v19 = vshll.u32 %v1964_v9, 16  ;;  %v243_v20 = vshll.u32 %v1968_v12, 16  ;;  %v247_v21 = vshrl.u32 %v1968_v12, 16  ;;  %v1983_v22 = vcombine.low %v1971_v13, %v177_v17  ;;  %v183_v37 = vld [vmem:[%s1945_s19 + $0x2c] sm:$0xf] }
  0x14   : > { %v224_v23 = vrot.slane %v222_v15, 1  ;;  %v251_v24 = vshll.u32 %v1975_v16, 16  ;;  %v1986_v25 = vcombine.low %v182_v18, %v182_v18  ;;  %v231_v31 = vshrl.u32 %v1964_v9, 16 }
  0x15   : > { %v229_v26 = vrot.slane %v227_v19, 1  ;;  %v245_v27 = vrot.slane %v243_v20, 1  ;;  %v235_v32 = vshll.u32 %v1983_v22, 16  ;;  %v255_v35 = vshrl.u32 %v1975_v16, 16 }
  0x16   : > { %v225_v28 = vor.u32 %v224_v23, %v220_v14  ;;  %v253_v29 = vrot.slane %v251_v24, 1  ;;  %v259_v38 = vshll.u32 %v1986_v25, 16  ;;  %v2006_v39 = vcombine.low %v181_v11, %v182_v18  ;;  %v1879_v23 = vld [vmem:[%s2474_s1 + $0x18] sm:$0xff]  }
  0x17   : > { %v249_v33 = vor.u32 %v247_v21, %v245_v27  ;;  %v2010_v41 = vcombine.low %v182_v18, %v183_v37  ;;  %v233_v42 = vor.u32 %v231_v31, %v229_v26  ;;  %v237_v43 = vrot.slane %v235_v32, 1 }
  0x18   : > { %v230_v36 = vsel %vm218_vm1, %v225_v28, %v229_v26  ;;  %v257_v44 = vor.u32 %v255_v35, %v253_v29  ;;  %v261_v45 = vrot.slane %v259_v38, 1  ;;  %v239_v47 = vshrl.u32 %v1983_v22, 16 }
  0x19   : > { %1658 = vmatmul.mubr.msk.bf16.vlgmr.msra.gmra.mxu0 %vm269_vm2, %v230_v36  ;;  %v254_v40 = vsel %vm218_vm1, %v249_v33, %v253_v29  ;;  %v238_v46 = vsel %vm218_vm1, %v233_v42, %v237_v43  ;;  %v2023_v48 = vcombine.low %v177_v17, %v178_v7  ;;  %v2029_v52 = vrot.slane %v227_v19, 3 }
  0x1a   : > { %1670 = vmatmul.mubr.msk.bf16.vlgmr.msra.gmra.mxu1 %vm269_vm2, %v254_v40  ;;  %1700 = vmatpush3.bf16.msra.mxu0 %v1873_v30  ;;  %v262_v49 = vsel %vm218_vm1, %v257_v44, %v261_v45  ;;  %v582_v54 = vrot.slane %v2026_v50, 1  ;;  %v2034_v55 = vrot.slane %v231_v31, 2  ;;  %v241_v56 = vor.u32 %v239_v47, %v237_v43  ;;  %v2081_v45 = vld [vmem:[%s1945_s19 + $0x30] ss:$0 sps:$4 sm:$0x77]  }
  0x1b   : > { %1678 = vmatpush3.bf16.msra.mxu1 %v1874_v34  ;;  %1661 = vmatprep.mubr.msk.bf16.mxu0 %vm1899_vm0, %v1898_v1  ;;  %v714_v51 = vshrl.u32 %v2023_v48, 16  ;;  %v580_v53 = vrot.slane %v2023_v48, 1  ;;  %v717_v57 = vshll.u32 %v2023_v48, 16  ;;  %v584_v58 = vrot.slane %v2006_v39, 1 }
  0x1c   : > { %1673 = vmatprep.mubr.msk.bf16.mxu1 %vm1899_vm0, %v1898_v1  ;;  %1721 = vmatprep.subr.bf16.mxu1 %v1898_v1  ;;  %v1102_v59 = vrot.slane %v235_v32, 3  ;;  %v723_v62 = vshrl.u32 %v2026_v50, 16  ;;  %v726_v2 = vshll.u32 %v2026_v50, 16  ;;  %v1529_v7 = vcombine.low %v183_v37, %v183_v37 }
  0x1d   : > { %1743 = vmatprep.subr.bf16.mxu0 %v1898_v1  ;;  %v2046_v60 = vsel %vm450_vm3, %v580_v53, %v582_v54  ;;  %v716_v61 = vrot.slane %v714_v51, 1  ;;  %v719_v63 = vrot.slane %v717_v57, 2  ;;  %v2050_v0 = vsel %vm450_vm3, %v582_v54, %v584_v58 }
  0x1e   : > { %v451_v8 = vrot.slane %v1958_v6, 1  ;;  %v725_v10 = vrot.slane %v723_v62, 1  ;;  %v732_v11 = vshrl.u32 %v2006_v39, 16  ;;  %v735_v14 = vshll.u32 %v2006_v39, 16 }
  0x1f   : > { %v246_v15 = vsel %vm218_vm1, %v241_v56, %v245_v27  ;;  %v728_v17 = vrot.slane %v726_v2, 2  ;;  %v586_v18 = vrot.slane %v1529_v7, 1  ;;  %v741_v19 = vshrl.u32 %v1529_v7, 16 }
  0x20   : > { %v452_v26 = vrot.slane %v1964_v9, 1  ;;  %v734_v28 = vrot.slane %v732_v11, 1  ;;  %v737_v29 = vrot.slane %v735_v14, 2  ;;  %v744_v30 = vshll.u32 %v1529_v7, 16 }
  0x21   : > { %1662 = vmatmul.mubr.msk.bf16.gmra.mxu0 %vm269_vm2, %v238_v46  ;;  %v2061_v31 = vor.u32 %v719_v63, %v716_v61  ;;  %v729_v32 = vor.u32 %v728_v17, %v725_v10  ;;  %v2064_v33 = vsel %vm450_vm3, %v584_v58, %v586_v18  ;;  %v743_v27 = vrot.slane %v741_v19, 1  ;;  %v1880_v63 = vld [vmem:[%s2474_s1 + $0x20] sm:$0xff]  }
  0x22   : > { %1674 = vmatmul.mubr.msk.bf16.gmra.mxu1 %vm269_vm2, %v262_v49  ;;  %1665 = vmatprep.mubr.msk.bf16.mxu0 %vm1899_vm0, %v1898_v1  ;;  %v454_v34 = vrot.slane %v1983_v22, 1  ;;  %v738_v36 = vor.u32 %v737_v29, %v734_v28  ;;  %v746_v37 = vrot.slane %v744_v30, 2  ;;  %v860_v38 = vrot.slane %v2023_v48, 2 }
  0x23   : > { %1679 = vmatprep.mubr.msk.bf16.mxu1 %vm1899_vm0, %v1898_v1  ;;  %v2075_v40 = vsel %vm695_vm4, %v2061_v31, %v729_v32  ;;  %v979_v42 = vrot.slane %v1964_v9, 2  ;;  %v980_v43 = vrot.slane %v1983_v22, 2  ;;  %v862_v44 = vrot.slane %v2026_v50, 2 }
  0x24   : > { %v1101_v46 = vrot.slane %v239_v47, 2  ;;  %v747_v49 = vor.u32 %v746_v37, %v743_v27  ;;  %v982_v51 = vrot.slane %v1968_v12, 2  ;;  %v453_v54 = vsel %vm450_vm3, %v451_v8, %v452_v26 }
  0x25   : > { %v2094_v50 = vsel %vm856_vm5, %v979_v42, %v980_v43  ;;  %v2099_v47 = vsel %vm856_vm5, %v860_v38, %v862_v44  ;;  %v864_v56 = vrot.slane %v2006_v39, 2  ;;  %v984_v61 = vrot.slane %v1975_v16, 2 }
  0x26   : > { %v2103_v57 = vsel %vm695_vm4, %v738_v36, %v747_v49  ;;  %v2106_v58 = vsel %vm856_vm5, %v980_v43, %v982_v51  ;;  %v866_v62 = vrot.slane %v1529_v7, 2  ;;  %v986_v8 = vrot.slane %v2010_v41, 2 }
  0x27   : > { %v2113_v2 = vsel %vm856_vm5, %v862_v44, %v864_v56  ;;  %v988_v39 = vrot.slane %v2081_v45, 2  ;;  %v2118_v10 = vsel %vm856_vm5, %v982_v51, %v984_v61  ;;  %v1100_v7 = vor.u32 %v2029_v52, %v2034_v55 }
  0x28   : > { %v2121_v11 = vsel %vm856_vm5, %v864_v56, %v866_v62  ;;  %v1103_v14 = vor.u32 %v1102_v59, %v1101_v46  ;;  %v1105_v18 = vrot.slane %v247_v21, 2  ;;  %v1106_v19 = vrot.slane %v243_v20, 3 }
  0x29   : > { %1666 = vmatmul.mubr.msk.bf16.gmra.mxu0 %vm269_vm2, %v246_v15  ;;  %v2126_v15 = vsel %vm856_vm5, %v984_v61, %v986_v8  ;;  %v2129_v17 = vsel %vm856_vm5, %v986_v8, %v988_v39  ;;  %v1239_v52 = vrot.slane %v1964_v9, 3  ;;  %v1240_v55 = vrot.slane %v1983_v22, 3 }
  0x2a   : > { %1680 = vmatmul.mubr.msk.bf16.vlgmr.msra.gmra.mxu1 %vm269_vm2, %v1958_v6  ;;  %1701 = vmatprep.mubr.msk.bf16.mxu0 %vm1899_vm0, %v1898_v1  ;;  %v2086_v6 = vsel %vm695_vm4, %v729_v32, %v738_v36  ;;  %v1107_v59 = vor.u32 %v1106_v19, %v1105_v18  ;;  %v1109_v21 = vrot.slane %v255_v35, 2  ;;  %v1110_v20 = vrot.slane %v251_v24, 3 }
  0x2b   : > { %1722 = vmatpush3.bf16.msra.mxu1 %v1879_v23  ;;  %1683 = vmatprep.mubr.msk.bf16.mxu1 %vm1899_vm0, %v1898_v1  ;;  %v2137_v23 = vsel %vm1097_vm6, %v1100_v7, %v1103_v14  ;;  %v1242_v28 = vrot.slane %v1968_v12, 3  ;;  %v2153_v29 = vsel %vm1238_vm7, %v1239_v52, %v1240_v55  ;;  %v1114_v30 = vshrl.u32 %v2010_v41, 16 }
  0x2c   : > { %1765 = vmatprep.subr.bf16.mxu1 %v1898_v1  ;;  %v1117_v32 = vshll.u32 %v2010_v41, 16  ;;  %v2159_v35 = vsel %vm1097_vm6, %v1103_v14, %v1107_v59  ;;  %v1111_v24 = vor.u32 %v1110_v20, %v1109_v21  ;;  %v455_v42 = vsel %vm450_vm3, %v452_v26, %v454_v34 }
  0x2d   : > { %v2162_v27 = vsel %vm1238_vm7, %v1240_v55, %v1242_v28  ;;  %v1116_v36 = vrot.slane %v1114_v30, 2  ;;  %v1244_v46 = vrot.slane %v1975_v16, 3  ;;  %v1123_v26 = vshrl.u32 %v2081_v45, 16 }
  0x2e   : > { %v1119_v37 = vrot.slane %v1117_v32, 3  ;;  %v2170_v43 = vsel %vm1097_vm6, %v1107_v59, %v1111_v24  ;;  %v1246_v8 = vrot.slane %v2010_v41, 3  ;;  %v1524_v18 = vcombine.low %v1949_v3, %v1952_v4 }
  0x2f   : > { %v2178_v51 = vsel %vm1238_vm7, %v1242_v28, %v1244_v46  ;;  %v1125_v56 = vrot.slane %v1123_v26, 2  ;;  %v460_v19 = vrot.slane %v1986_v25, 1  ;;  %v1882_v28 = vld [vmem:[%s2474_s1 + $0x28] sm:$0xff]  }
  0x30   : > { %v1120_v44 = vor.u32 %v1119_v37, %v1116_v36  ;;  %v2198_v7 = vsel %vm1238_vm7, %v1244_v46, %v1246_v8  ;;  %v700_v52 = vshll.u32 %v1524_v18, 16  ;;  %v577_v3 = vrot.slane %v1524_v18, 1  ;;  %v1884_v36 = vld [vmem:[%s2474_s1 + $0x30] sm:$0xff]  }
  0x31   : > { %1702 = vmatmul.mubr.msk.bf16.vlgmr.msra.gmra.mxu0 %vm269_vm2, %v453_v54  ;;  %v1126_v54 = vshll.u32 %v2081_v45, 16 }
  0x32   : > { %1684 = vmatmul.mubr.msk.bf16.gmra.mxu1 %vm269_vm2, %v1964_v9  ;;  %1744 = vmatpush3.bf16.msra.mxu0 %v1880_v63  ;;  %v2175_v49 = vsel %vm1097_vm6, %v1111_v24, %v1120_v44  ;;  %v456_v9 = vrot.slane %v1968_v12, 1  ;;  %v702_v21 = vrot.slane %v700_v52, 2 }
  0x33   : > { %1687 = vmatprep.mubr.msk.bf16.mxu1 %vm1899_vm0, %v1898_v1  ;;  %1705 = vmatprep.mubr.msk.bf16.mxu0 %vm1899_vm0, %v1898_v1  ;;  %v1128_v61 = vrot.slane %v1126_v54, 3 }
  0x34   : > { %1787 = vmatprep.subr.bf16.mxu0 %v1898_v1  ;;  %v457_v62 = vsel %vm450_vm3, %v454_v34, %v456_v9  ;;  %v1248_v34 = vrot.slane %v2081_v45, 3  ;;  %v697_v45 = vshrl.u32 %v1524_v18, 16 }
  0x35   : > { %v1129_v63 = vor.u32 %v1128_v61, %v1125_v56 }
  0x36   : > { %v2209_v41 = vsel %vm1238_vm7, %v1246_v8, %v1248_v34 }
  0x37   : > { %v2195_v39 = vsel %vm1097_vm6, %v1120_v44, %v1129_v63 }
  0x39   : > { %1706 = vmatmul.mubr.msk.bf16.gmra.mxu0 %vm269_vm2, %v455_v42 }
  0x3a   : > { %1688 = vmatmul.mubr.msk.bf16.gmra.mxu1 %vm269_vm2, %v1983_v22  ;;  %1709 = vmatprep.mubr.msk.bf16.mxu0 %vm1899_vm0, %v1898_v1  ;;  %v458_v22 = vrot.slane %v1975_v16, 1 }
  0x3b   : > { %1691 = vmatprep.mubr.msk.bf16.mxu1 %vm1899_vm0, %v1898_v1 }
  0x3c   : > { %v459_v14 = vsel %vm450_vm3, %v456_v9, %v458_v22 }
  0x41   : > { %1710 = vmatmul.mubr.msk.bf16.gmra.mxu0 %vm269_vm2, %v457_v62 }
  0x42   : > { %1692 = vmatmul.mubr.msk.bf16.gmra.mxu1 %vm269_vm2, %v1968_v12  ;;  %1713 = vmatprep.mubr.msk.bf16.mxu0 %vm1899_vm0, %v1898_v1  ;;  %v1525_v12 = vcombine.low %v1955_v5, %v1971_v13  ;;  %v461_v5 = vsel %vm450_vm3, %v458_v22, %v460_v19  ;;  %v699_v13 = vrot.slane %v697_v45, 1 }
  0x43   : > { %1695 = vmatprep.mubr.msk.bf16.mxu1 %vm1899_vm0, %v1898_v1 }
  0x44   : > { %v705_v55 = vshrl.u32 %v1525_v12, 16  ;;  %v708_v59 = vshll.u32 %v1525_v12, 16  ;;  %v578_v4 = vrot.slane %v1525_v12, 1  ;;  %v703_v30 = vor.u32 %v702_v21, %v699_v13 }
  0x46   : > { %v707_v25 = vrot.slane %v705_v55, 1  ;;  %v710_v20 = vrot.slane %v708_v59, 2  ;;  %v581_v37 = vsel %vm450_vm3, %v578_v4, %v580_v53  ;;  %v857_v53 = vrot.slane %v1524_v18, 2 }
  0x48   : > { %v711_v32 = vor.u32 %v710_v20, %v707_v25 }
  0x49   : > { %1714 = vmatmul.mubr.msk.bf16.gmra.mxu0 %vm269_vm2, %v459_v14 }
  0x4a   : > { %1696 = vmatmul.mubr.msk.bf16.gmra.mxu1 %vm269_vm2, %v1975_v16  ;;  %1717 = vmatprep.mubr.msk.bf16.mxu0 %vm1899_vm0, %v1898_v1  ;;  %v579_v16 = vsel %vm450_vm3, %v577_v3, %v578_v4  ;;  %v712_v24 = vsel %vm695_vm4, %v703_v30, %v711_v32  ;;  %v721_v42 = vsel %vm695_vm4, %v711_v32, %v2061_v31  ;;  %v1887_v31 = vld [vmem:[%s2474_s1 + $0x38] sm:$0xff]  }
  0x4b   : > { %1723 = vmatprep.mubr.msk.bf16.mxu1 %vm1899_vm0, %v1898_v1 }
  0x51   : > { %1718 = vmatmul.mubr.msk.bf16.gmra.mxu0 %vm269_vm2, %v461_v5 }
  0x52   : > { %1724 = vmatmul.mubr.msk.bf16.vlgmr.msra.gmra.mxu1 %vm269_vm2, %v579_v16  ;;  %1745 = vmatprep.mubr.msk.bf16.mxu0 %vm1899_vm0, %v1898_v1 }
  0x53   : > { %1766 = vmatpush3.bf16.msra.mxu1 %v1882_v28  ;;  %1727 = vmatprep.mubr.msk.bf16.mxu1 %vm1899_vm0, %v1898_v1 }
  0x54   : > { %1809 = vmatprep.subr.bf16.mxu1 %v1898_v1 }
  0x59   : > { %1746 = vmatmul.mubr.msk.bf16.vlgmr.msra.gmra.mxu0 %vm269_vm2, %v712_v24 }
  0x5a   : > { %1728 = vmatmul.mubr.msk.bf16.gmra.mxu1 %vm269_vm2, %v581_v37  ;;  %1788 = vmatpush3.bf16.msra.mxu0 %v1884_v36 }
  0x5b   : > { %1731 = vmatprep.mubr.msk.bf16.mxu1 %vm1899_vm0, %v1898_v1  ;;  %1749 = vmatprep.mubr.msk.bf16.mxu0 %vm1899_vm0, %v1898_v1 }
  0x5c   : > { %1831 = vmatprep.subr.bf16.mxu0 %v1898_v1 }
  0x61   : > { %1750 = vmatmul.mubr.msk.bf16.gmra.mxu0 %vm269_vm2, %v721_v42 }
  0x62   : > { %1732 = vmatmul.mubr.msk.bf16.gmra.mxu1 %vm269_vm2, %v2046_v60  ;;  %1753 = vmatprep.mubr.msk.bf16.mxu0 %vm1899_vm0, %v1898_v1  ;;  %v858_v60 = vrot.slane %v1525_v12, 2 }
  0x63   : > { %1735 = vmatprep.mubr.msk.bf16.mxu1 %vm1899_vm0, %v1898_v1 }
  0x69   : > { %1754 = vmatmul.mubr.msk.bf16.gmra.mxu0 %vm269_vm2, %v2075_v40  ;;  %v861_v40 = vsel %vm856_vm5, %v858_v60, %v860_v38 }
  0x6a   : > { %1736 = vmatmul.mubr.msk.bf16.gmra.mxu1 %vm269_vm2, %v2050_v0  ;;  %1757 = vmatprep.mubr.msk.bf16.mxu0 %vm1899_vm0, %v1898_v1  ;;  %v859_v0 = vsel %vm856_vm5, %v857_v53, %v858_v60 }
  0x6b   : > { %1739 = vmatprep.mubr.msk.bf16.mxu1 %vm1899_vm0, %v1898_v1 }
  0x71   : > { %1758 = vmatmul.mubr.msk.bf16.gmra.mxu0 %vm269_vm2, %v2086_v6 }
  0x72   : > { %1740 = vmatmul.mubr.msk.bf16.gmra.mxu1 %vm269_vm2, %v2064_v33  ;;  %1761 = vmatprep.mubr.msk.bf16.mxu0 %vm1899_vm0, %v1898_v1  ;;  %v1888_v33 = vld [vmem:[%s2474_s1 + $0x40] sm:$0xff]  }
  0x73   : > { %1767 = vmatprep.mubr.msk.bf16.mxu1 %vm1899_vm0, %v1898_v1 }
  0x79   : > { %1762 = vmatmul.mubr.msk.bf16.gmra.mxu0 %vm269_vm2, %v2103_v57 }
  0x7a   : > { %1768 = vmatmul.mubr.msk.bf16.vlgmr.msra.gmra.mxu1 %vm269_vm2, %v859_v0  ;;  %1789 = vmatprep.mubr.msk.bf16.mxu0 %vm1899_vm0, %v1898_v1 }
  0x7b   : > { %1810 = vmatpush3.bf16.msra.mxu1 %v1887_v31  ;;  %1771 = vmatprep.mubr.msk.bf16.mxu1 %vm1899_vm0, %v1898_v1 }
  0x81   : > { %1790 = vmatmul.mubr.msk.bf16.vlgmr.msra.gmra.mxu0 %vm269_vm2, %v2094_v50 }
  0x82   : > { %1772 = vmatmul.mubr.msk.bf16.gmra.mxu1 %vm269_vm2, %v861_v40  ;;  %1832 = vmatpush3.bf16.msra.mxu0 %v1888_v33 }
  0x83   : > { %1775 = vmatprep.mubr.msk.bf16.mxu1 %vm1899_vm0, %v1898_v1  ;;  %1793 = vmatprep.mubr.msk.bf16.mxu0 %vm1899_vm0, %v1898_v1 }
  0x89   : > { %1794 = vmatmul.mubr.msk.bf16.gmra.mxu0 %vm269_vm2, %v2106_v58 }
  0x8a   : > { %1776 = vmatmul.mubr.msk.bf16.gmra.mxu1 %vm269_vm2, %v2099_v47  ;;  %1797 = vmatprep.mubr.msk.bf16.mxu0 %vm1899_vm0, %v1898_v1 }
  0x8b   : > { %1779 = vmatprep.mubr.msk.bf16.mxu1 %vm1899_vm0, %v1898_v1 }
  0x91   : > { %1798 = vmatmul.mubr.msk.bf16.gmra.mxu0 %vm269_vm2, %v2118_v10 }
  0x92   : > { %1780 = vmatmul.mubr.msk.bf16.gmra.mxu1 %vm269_vm2, %v2113_v2  ;;  %1801 = vmatprep.mubr.msk.bf16.mxu0 %vm1899_vm0, %v1898_v1 }
  0x93   : > { %1783 = vmatprep.mubr.msk.bf16.mxu1 %vm1899_vm0, %v1898_v1 }
  0x99   : > { %1802 = vmatmul.mubr.msk.bf16.gmra.mxu0 %vm269_vm2, %v2126_v15 }
  0x9a   : > { %1784 = vmatmul.mubr.msk.bf16.gmra.mxu1 %vm269_vm2, %v2121_v11  ;;  %1805 = vmatprep.mubr.msk.bf16.mxu0 %vm1899_vm0, %v1898_v1 }
  0x9b   : > { %1811 = vmatprep.mubr.msk.bf16.mxu1 %vm1899_vm0, %v1898_v1 }
  0xa1   : > { %1806 = vmatmul.mubr.msk.bf16.gmra.mxu0 %vm269_vm2, %v2129_v17 }
  0xa2   : > { %1812 = vmatmul.mubr.msk.bf16.vlgmr.msra.gmra.mxu1 %vm269_vm2, %v2137_v23  ;;  %1833 = vmatprep.mubr.msk.bf16.mxu0 %vm1899_vm0, %v1898_v1 }
  0xa3   : > { %1815 = vmatprep.mubr.msk.bf16.mxu1 %vm1899_vm0, %v1898_v1 }
  0xa9   : > { %1834 = vmatmul.mubr.msk.bf16.vlgmr.msra.gmra.mxu0 %vm269_vm2, %v2153_v29 }
  0xaa   : > { %1816 = vmatmul.mubr.msk.bf16.gmra.mxu1 %vm269_vm2, %v2159_v35  ;;  %1837 = vmatprep.mubr.msk.bf16.mxu0 %vm1899_vm0, %v1898_v1 }
  0xab   : > { %1819 = vmatprep.mubr.msk.bf16.mxu1 %vm1899_vm0, %v1898_v1 }
  0xb1   : > { %1838 = vmatmul.mubr.msk.bf16.gmra.mxu0 %vm269_vm2, %v2162_v27 }
  0xb2   : > { %1820 = vmatmul.mubr.msk.bf16.gmra.mxu1 %vm269_vm2, %v2170_v43  ;;  %1841 = vmatprep.mubr.msk.bf16.mxu0 %vm1899_vm0, %v1898_v1 }
  0xb3   : > { %1823 = vmatprep.mubr.msk.bf16.mxu1 %vm1899_vm0, %v1898_v1 }
  0xb9   : > { %1842 = vmatmul.mubr.msk.bf16.gmra.mxu0 %vm269_vm2, %v2178_v51 }
  0xba   : > { %1824 = vmatmul.mubr.msk.bf16.gmra.mxu1 %vm269_vm2, %v2175_v49  ;;  %1845 = vmatprep.mubr.msk.bf16.mxu0 %vm1899_vm0, %v1898_v1 }
  0xbb   : > { %1827 = vmatprep.mubr.msk.bf16.mxu1 %vm1899_vm0, %v1898_v1 }
  0xc1   : > { %1846 = vmatmul.mubr.msk.bf16.gmra.mxu0 %vm269_vm2, %v2198_v7 }
  0xc2   : > { %1828 = vmatmul.mubr.msk.bf16.gmra.mxu1 %vm269_vm2, %v2195_v39  ;;  %1849 = vmatprep.mubr.msk.bf16.mxu0 %vm1899_vm0, %v1898_v1 }
  0xc9   : > { %1850 = vmatmul.mubr.msk.bf16.gmra.mxu0 %vm269_vm2, %v2209_v41 }
  0xd9   : > { %v319_v48 = vpop.f32.mrf.mxu0 }
  0xda   : > { %v343_v38 = vpop.f32.mrf.mxu1 }
  0xdb   : > { %v1659_v6 = vpop.f32.mrf.mxu0 }
  0xdc   : > { %v1671_v50 = vpop.f32.mrf.mxu1 }
  0xdd   : > { %v322_v47 = vpop.f32.mrf.mxu0 }
  0xde   : > { %v346_v57 = vpop.f32.mrf.mxu1 }
  0xdf   : > { %v1660_v58 = vpop.f32.mrf.mxu0 }
  0xe0   : > { %v1672_v2 = vpop.f32.mrf.mxu1 }
  0xe1   : > { %v327_v10 = vpop.f32.mrf.mxu0 }
  0xe2   : > { %v351_v11 = vpop.f32.mrf.mxu1 }
  0xe3   : > { %v1663_v15 = vpop.f32.mrf.mxu0 }
  0xe4   : > { %v1675_v17 = vpop.f32.mrf.mxu1 }
  0xe5   : > { %v330_v23 = vpop.f32.mrf.mxu0 }
  0xe6   : > { %v354_v29 = vpop.f32.mrf.mxu1 }
  0xe7   : > { %v1664_v35 = vpop.f32.mrf.mxu0 }
  0xe8   : > { %v1676_v27 = vpop.f32.mrf.mxu1 }
  0xe9   : > { %v335_v1 = vpop.f32.mrf.mxu0 }
  0xea   : > { %v408_v43 = vpop.f32.mrf.mxu1 }
  0xeb   : > { %v409_v44 = vadd.f32 %v408_v43, %v319_v48  ;;  %v1667_v46 = vpop.f32.mrf.mxu0 }
  0xec   : > { %v1681_v49 = vpop.f32.mrf.mxu1 }
  0xed   : > { %v338_v51 = vpop.f32.mrf.mxu0 }
  0xee   : > { %v411_v9 = vpop.f32.mrf.mxu1 }
  0xef   : > { %v412_v26 = vadd.f32 %v411_v9, %v322_v47  ;;  %v1668_v54 = vpop.f32.mrf.mxu0 }
  0xf0   : > { %v1682_v56 = vpop.f32.mrf.mxu1 }
  0xf1   : > { %v517_v61 = vpop.f32.mrf.mxu0 }
  0xf2   : > { %v416_v62 = vpop.f32.mrf.mxu1  ;;  %v556_v63 = vadd.f32 %v517_v61, %v409_v44 }
  0xf3   : > { %v417_v8 = vadd.f32 %v416_v62, %v327_v10  ;;  %v1703_v39 = vpop.f32.mrf.mxu0 }
  0xf4   : > { %v1685_v7 = vpop.f32.mrf.mxu1 }
  0xf5   : > { %v520_v22 = vpop.f32.mrf.mxu0 }
  0xf6   : > { %v419_v34 = vpop.f32.mrf.mxu1  ;;  %v557_v41 = vadd.f32 %v520_v22, %v412_v26 }
  0xf7   : > { %v420_v14 = vadd.f32 %v419_v34, %v330_v23  ;;  %v1704_v18 = vpop.f32.mrf.mxu0 }
  0xf8   : > { %v1686_v12 = vpop.f32.mrf.mxu1 }
  0xf9   : > { %v525_v19 = vpop.f32.mrf.mxu0 }
  0xfa   : > { %v424_v45 = vpop.f32.mrf.mxu1  ;;  %v558_v52 = vadd.f32 %v525_v19, %v417_v8 }
  0xfb   : > { %v425_v55 = vadd.f32 %v424_v45, %v335_v1  ;;  %v1707_v59 = vpop.f32.mrf.mxu0 }
  0xfc   : > { %v1689_v3 = vpop.f32.mrf.mxu1 }
  0xfd   : > { %v528_v4 = vpop.f32.mrf.mxu0 }
  0xfe   : > { %v427_v5 = vpop.f32.mrf.mxu1  ;;  %v559_v13 = vadd.f32 %v528_v4, %v420_v14 }
  0xff   : > { %v428_v21 = vadd.f32 %v427_v5, %v338_v51  ;;  %v1708_v25 = vpop.f32.mrf.mxu0 }
 0x100   : > { %v1690_v20 = vpop.f32.mrf.mxu1 }
 0x101   : > { %v533_v16 = vpop.f32.mrf.mxu0 }
 0x102   : > { %v432_v28 = vpop.f32.mrf.mxu1  ;;  %v560_v30 = vadd.f32 %v533_v16, %v425_v55 }
 0x103   : > { %v433_v32 = vadd.f32 %v432_v28, %v343_v38  ;;  %v1711_v24 = vpop.f32.mrf.mxu0 }
 0x104   : > { %v1693_v36 = vpop.f32.mrf.mxu1 }
 0x105   : > { %v536_v37 = vpop.f32.mrf.mxu0 }
 0x106   : > { %v435_v42 = vpop.f32.mrf.mxu1  ;;  %v561_v53 = vadd.f32 %v536_v37, %v428_v21 }
 0x107   : > { %v436_v60 = vadd.f32 %v435_v42, %v346_v57  ;;  %v1712_v0 = vpop.f32.mrf.mxu0 }
 0x108   : > { %v1694_v31 = vpop.f32.mrf.mxu1 }
 0x109   : > { %v541_v33 = vpop.f32.mrf.mxu0 }
 0x10a   : > { %v440_v40 = vpop.f32.mrf.mxu1  ;;  %v562_v48 = vadd.f32 %v541_v33, %v433_v32 }
 0x10b   : > { %v441_v6 = vadd.f32 %v440_v40, %v351_v11  ;;  %v1715_v50 = vpop.f32.mrf.mxu0 }
 0x10c   : > { %v1697_v47 = vpop.f32.mrf.mxu1 }
 0x10d   : > { %v544_v58 = vpop.f32.mrf.mxu0 }
 0x10e   : > { %v443_v2 = vpop.f32.mrf.mxu1  ;;  %v563_v10 = vadd.f32 %v544_v58, %v436_v60 }
 0x10f   : > { %v444_v15 = vadd.f32 %v443_v2, %v354_v29  ;;  %v1716_v17 = vpop.f32.mrf.mxu0 }
 0x110   : > { %v1698_v38 = vpop.f32.mrf.mxu1 }
 0x111   : > { %v549_v23 = vpop.f32.mrf.mxu0 }
 0x112   : > { %v564_v35 = vadd.f32 %v549_v23, %v441_v6  ;;  %v643_v27 = vpop.f32.mrf.mxu1 }
 0x113   : > { %v682_v1 = vadd.f32 %v643_v27, %v556_v63  ;;  %v1719_v43 = vpop.f32.mrf.mxu0 }
 0x114   : > { %v1725_v57 = vpop.f32.mrf.mxu1 }
 0x115   : > { %v552_v44 = vpop.f32.mrf.mxu0 }
 0x116   : > { %v565_v46 = vadd.f32 %v552_v44, %v444_v15  ;;  %v646_v49 = vpop.f32.mrf.mxu1 }
 0x117   : > { %v683_v51 = vadd.f32 %v646_v49, %v557_v41  ;;  %v1720_v9 = vpop.f32.mrf.mxu0 }
 0x118   : > { %v1726_v11 = vpop.f32.mrf.mxu1 }
 0x119   : > { %v804_v26 = vpop.f32.mrf.mxu0 }
 0x11a   : > { %v651_v54 = vpop.f32.mrf.mxu1  ;;  %v2363_v56 = vadd.f32 %v804_v26, %v682_v1 }
 0x11b   : > { %v684_v61 = vadd.f32 %v651_v54, %v558_v52  ;;  %v1747_v29 = vpop.f32.mrf.mxu0 }
 0x11c   : > { %v1729_v62 = vpop.f32.mrf.mxu1 }
 0x11d   : > { %v807_v8 = vpop.f32.mrf.mxu0 }
 0x11e   : > { %v654_v39 = vpop.f32.mrf.mxu1  ;;  %v2365_v7 = vadd.f32 %v807_v8, %v683_v51 }
 0x11f   : > { %v685_v63 = vadd.f32 %v654_v39, %v559_v13  ;;  %v1748_v22 = vpop.f32.mrf.mxu0 }
 0x120   : > { %v1730_v34 = vpop.f32.mrf.mxu1 }
 0x121   : > { %v812_v14 = vpop.f32.mrf.mxu0 }
 0x122   : > { %v659_v18 = vpop.f32.mrf.mxu1  ;;  %v2367_v12 = vadd.f32 %v812_v14, %v684_v61 }
 0x123   : > { %v686_v41 = vadd.f32 %v659_v18, %v560_v30  ;;  %v1751_v19 = vpop.f32.mrf.mxu0 }
 0x124   : > { %v1733_v45 = vpop.f32.mrf.mxu1 }
 0x125   : > { %v815_v55 = vpop.f32.mrf.mxu0 }
 0x126   : > { %v662_v59 = vpop.f32.mrf.mxu1  ;;  %v2369_v3 = vadd.f32 %v815_v55, %v685_v63 }
 0x127   : > { %v687_v52 = vadd.f32 %v662_v59, %v561_v53  ;;  %v1752_v4 = vpop.f32.mrf.mxu0 }
 0x128   : > { %v1734_v5 = vpop.f32.mrf.mxu1 }
 0x129   : > { %v820_v21 = vpop.f32.mrf.mxu0 }
 0x12a   : > { %v667_v25 = vpop.f32.mrf.mxu1  ;;  %v2371_v20 = vadd.f32 %v820_v21, %v686_v41 }
 0x12b   : > { %v688_v13 = vadd.f32 %v667_v25, %v562_v48  ;;  %v1755_v16 = vpop.f32.mrf.mxu0 }
 0x12c   : > { %v1737_v28 = vpop.f32.mrf.mxu1 }
 0x12d   : > { %v823_v32 = vpop.f32.mrf.mxu0 }
 0x12e   : > { %v670_v24 = vpop.f32.mrf.mxu1  ;;  %v2373_v36 = vadd.f32 %v823_v32, %v687_v52 }
 0x12f   : > { %v689_v30 = vadd.f32 %v670_v24, %v563_v10  ;;  %v1756_v37 = vpop.f32.mrf.mxu0 }
 0x130   : > { %v1738_v42 = vpop.f32.mrf.mxu1 }
 0x131   : > { %v828_v60 = vpop.f32.mrf.mxu0 }
 0x132   : > { %v675_v0 = vpop.f32.mrf.mxu1  ;;  %v2375_v31 = vadd.f32 %v828_v60, %v688_v13 }
 0x133   : > { %v690_v53 = vadd.f32 %v675_v0, %v564_v35  ;;  %v1759_v33 = vpop.f32.mrf.mxu0 }
 0x134   : > { %v1741_v40 = vpop.f32.mrf.mxu1 }
 0x135   : > { %v831_v6 = vpop.f32.mrf.mxu0 }
 0x136   : > { %v678_v50 = vpop.f32.mrf.mxu1  ;;  %v2377_v47 = vadd.f32 %v831_v6, %v689_v30 }
 0x137   : > { %v691_v48 = vadd.f32 %v678_v50, %v565_v46  ;;  %v1760_v58 = vpop.f32.mrf.mxu0 }
 0x138   : > { %v1742_v2 = vpop.f32.mrf.mxu1 }
 0x139   : > { %v836_v15 = vpop.f32.mrf.mxu0  ;;  %v2412_v2 = vld [vmem:[%s2475_s2] ss:$0 sm:$0xff] }
 0x13a   : > { %v2379_v17 = vadd.f32 %v836_v15, %v690_v53  ;;  %v923_v10 = vpop.f32.mrf.mxu1 }
 0x13b   : > { %v1763_v38 = vpop.f32.mrf.mxu0  ;;  %v962_v42 = vadd.f32 %v923_v10, %v2363_v56 }
 0x13c   : > { %v1769_v23 = vpop.f32.mrf.mxu1 }
 0x13d   : > { %v839_v27 = vpop.f32.mrf.mxu0 }
 0x13e   : > { %v2381_v1 = vadd.f32 %v839_v27, %v691_v48  ;;  %v926_v43 = vpop.f32.mrf.mxu1 }
 0x13f   : > { %v1764_v35 = vpop.f32.mrf.mxu0  ;;  %v963_v6 = vadd.f32 %v926_v43, %v2365_v7 }
 0x140   : > { %v1770_v57 = vpop.f32.mrf.mxu1 }
 0x141   : > { %v1045_v44 = vpop.f32.mrf.mxu0 }
 0x142   : > { %v931_v49 = vpop.f32.mrf.mxu1  ;;  %v1084_v53 = vadd.f32 %v1045_v44, %v962_v42 }
 0x143   : > { %v1791_v51 = vpop.f32.mrf.mxu0  ;;  %v964_v10 = vadd.f32 %v931_v49, %v2367_v12 }
 0x144   : > { %v1773_v9 = vpop.f32.mrf.mxu1 }
 0x145   : > { %v1048_v11 = vpop.f32.mrf.mxu0 }
 0x146   : > { %v934_v46 = vpop.f32.mrf.mxu1  ;;  %v1085_v15 = vadd.f32 %v1048_v11, %v963_v6 }
 0x147   : > { %v1792_v26 = vpop.f32.mrf.mxu0 }
 0x148   : > { %v1774_v54 = vpop.f32.mrf.mxu1  ;;  %v965_v26 = vadd.f32 %v934_v46, %v2369_v3 }
 0x149   : > { %v1053_v61 = vpop.f32.mrf.mxu0 }
 0x14a   : > { %v2383_v29 = vpop.f32.mrf.mxu1  ;;  %v1086_v43 = vadd.f32 %v1053_v61, %v964_v10 }
 0x14b   : > { %v1795_v62 = vpop.f32.mrf.mxu0 }
 0x14c   : > { %v1777_v8 = vpop.f32.mrf.mxu1 }
 0x14d   : > { %v1056_v39 = vpop.f32.mrf.mxu0 }
 0x14e   : > { %v2385_v63 = vpop.f32.mrf.mxu1  ;;  %v1087_v8 = vadd.f32 %v1056_v39, %v965_v26 }
 0x14f   : > { %v1796_v22 = vpop.f32.mrf.mxu0  ;;  %v967_v42 = vadd.f32 %v2385_v63, %v2373_v36 }
 0x150   : > { %v1778_v34 = vpop.f32.mrf.mxu1 }
 0x151   : > { %v2387_v14 = vpop.f32.mrf.mxu0 }
 0x152   : > { %v2389_v18 = vpop.f32.mrf.mxu1 }
 0x153   : > { %v1799_v41 = vpop.f32.mrf.mxu0 }
 0x154   : > { %v1781_v19 = vpop.f32.mrf.mxu1 }
 0x155   : > { %v2391_v45 = vpop.f32.mrf.mxu0 }
 0x156   : > { %v2393_v55 = vpop.f32.mrf.mxu1 }
 0x157   : > { %v1800_v59 = vpop.f32.mrf.mxu0 }
 0x158   : > { %v1782_v52 = vpop.f32.mrf.mxu1  ;;  %v966_v59 = vadd.f32 %v2383_v29, %v2371_v20 }
 0x159   : > { %v2395_v4 = vpop.f32.mrf.mxu0 }
 0x15a   : > { %v2397_v5 = vpop.f32.mrf.mxu1 }
 0x15b   : > { %v1803_v21 = vpop.f32.mrf.mxu0 }
 0x15c   : > { %v1785_v25 = vpop.f32.mrf.mxu1 }
 0x15d   : > { %v2399_v13 = vpop.f32.mrf.mxu0 }
 0x15e   : > { %v2401_v16 = vpop.f32.mrf.mxu1 }
 0x15f   : > { %v1804_v28 = vpop.f32.mrf.mxu0 }
 0x160   : > { %v1786_v32 = vpop.f32.mrf.mxu1  ;;  %v1088_v28 = vadd.f32 %v2387_v14, %v966_v59 }
 0x161   : > { %v2403_v24 = vpop.f32.mrf.mxu0 }
 0x162   : > { %v1186_v30 = vpop.f32.mrf.mxu1 }
 0x163   : > { %v1807_v37 = vpop.f32.mrf.mxu0  ;;  %v1225_v50 = vadd.f32 %v1186_v30, %v1084_v53 }
 0x164   : > { %v1813_v60 = vpop.f32.mrf.mxu1 }
 0x165   : > { %v2406_v0 = vpop.f32.mrf.mxu0 }
 0x166   : > { %v1189_v33 = vpop.f32.mrf.mxu1 }
 0x167   : > { %v1808_v40 = vpop.f32.mrf.mxu0  ;;  %v1226_v27 = vadd.f32 %v1189_v33, %v1085_v15 }
 0x168   : > { %v1814_v48 = vpop.f32.mrf.mxu1  ;;  %v1089_v40 = vadd.f32 %v2391_v45, %v967_v42 }
 0x169   : > { %v1305_v58 = vpop.f32.mrf.mxu0 }
 0x16a   : > { %v1194_v38 = vpop.f32.mrf.mxu1  ;;  %v1344_v23 = vadd.f32 %v1305_v58, %v1225_v50  ;;  %v968_v58 = vadd.f32 %v2389_v18, %v2375_v31 }
 0x16b   : > { %v1835_v56 = vpop.f32.mrf.mxu0  ;;  %v1227_v12 = vadd.f32 %v1194_v38, %v1086_v43 }
 0x16c   : > { %v1361_v35 = vadd.f32 %v2412_v2, %v1344_v23  ;;  %v1817_v57 = vpop.f32.mrf.mxu1  ;;  %v1090_v56 = vadd.f32 %v2395_v4, %v968_v58 }
 0x16d   : > { %v1308_v7 = vpop.f32.mrf.mxu0  ;;  %v969_v57 = vadd.f32 %v2393_v55, %v2377_v47 }
 0x16e   : > { %v1371_v44 = vmax.f32 %v1361_v35, 0.0  ;;  %v1197_v51 = vpop.f32.mrf.mxu1  ;;  %v1345_v9 = vadd.f32 %v1308_v7, %v1226_v27 }
 0x16f   : > { %v1836_v11 = vpop.f32.mrf.mxu0  ;;  %v1228_v52 = vadd.f32 %v1197_v51, %v1087_v8  ;;  %v1091_v51 = vadd.f32 %v2399_v13, %v969_v57 }
 0x170   : > { %v1591_v49 = vpack.c.bf16 %v1371_v44, %v1371_v44  ;;  %v1362_v54 = vadd.f32 %v2412_v2, %v1345_v9  ;;  %v1818_v62 = vpop.f32.mrf.mxu1 }
 0x171   : > { %v1313_v61 = vpop.f32.mrf.mxu0 }
 0x172   : > { %1422 = vst.msk [vmem:[%s2420_s16] sm:$0xf] %vm1421_vm8, %v1591_v49  ;;  %v1372_v22 = vmax.f32 %v1362_v54, 0.0  ;;  %v1202_v34 = vpop.f32.mrf.mxu1  ;;  %v1346_v41 = vadd.f32 %v1313_v61, %v1227_v12  ;;  %v970_v12 = vadd.f32 %v2397_v5, %v2379_v17 }
 0x173   : > { %v1839_v19 = vpop.f32.mrf.mxu0  ;;  %v1229_v60 = vadd.f32 %v1202_v34, %v1088_v28 }
 0x174   : > { %v1592_v21 = vpack.c.bf16 %v1372_v22, %v1372_v22  ;;  %v1363_v3 = vadd.f32 %v2412_v2, %v1346_v41  ;;  %v1821_v46 = vpop.f32.mrf.mxu1  ;;  %v1092_v61 = vadd.f32 %v2403_v24, %v970_v12  ;;  %v971_v41 = vadd.f32 %v2401_v16, %v2381_v1 }
 0x175   : > { %v1316_v25 = vpop.f32.mrf.mxu0 }
 0x176   : > { %1423 = vst.msk [vmem:[%s2420_s16 + $0x4] sm:$0xf] %vm1421_vm8, %v1592_v21  ;;  %v1373_v39 = vmax.f32 %v1363_v3, 0.0  ;;  %v1205_v32 = vpop.f32.mrf.mxu1  ;;  %v1347_v30 = vadd.f32 %v1316_v25, %v1228_v52  ;;  %v1093_v21 = vadd.f32 %v2406_v0, %v971_v41 }
 0x177   : > { %v1840_v37 = vpop.f32.mrf.mxu0  ;;  %v1230_v15 = vadd.f32 %v1205_v32, %v1089_v40 }
 0x178   : > { %v1593_v20 = vpack.c.bf16 %v1373_v39, %v1373_v39  ;;  %v1364_v29 = vadd.f32 %v2412_v2, %v1347_v30  ;;  %v1822_v53 = vpop.f32.mrf.mxu1 }
 0x179   : > { %v1321_v33 = vpop.f32.mrf.mxu0 }
 0x17a   : > { %1424 = vst.msk [vmem:[%s2420_s16 + $0x8] sm:$0xf] %vm1421_vm8, %v1593_v20  ;;  %v1374_v14 = vmax.f32 %v1364_v29, 0.0  ;;  %v1210_v6 = vpop.f32.mrf.mxu1  ;;  %v1348_v50 = vadd.f32 %v1321_v33, %v1229_v60 }
 0x17b   : > { %v1843_v48 = vpop.f32.mrf.mxu0  ;;  %v1231_v7 = vadd.f32 %v1210_v6, %v1090_v56 }
 0x17c   : > { %v1594_v36 = vpack.c.bf16 %v1374_v14, %v1374_v14  ;;  %v1365_v63 = vadd.f32 %v2412_v2, %v1348_v50  ;;  %v1825_v38 = vpop.f32.mrf.mxu1 }
 0x17d   : > { %v1324_v23 = vpop.f32.mrf.mxu0 }
 0x17e   : > { %1425 = vst.msk [vmem:[%s2420_s16 + $0xc] sm:$0xf] %vm1421_vm8, %v1594_v36  ;;  %v1375_v45 = vmax.f32 %v1365_v63, 0.0  ;;  %v1213_v10 = vpop.f32.mrf.mxu1  ;;  %v1349_v27 = vadd.f32 %v1324_v23, %v1230_v15 }
 0x17f   : > { %v1844_v35 = vpop.f32.mrf.mxu0  ;;  %v1232_v49 = vadd.f32 %v1213_v10, %v1091_v51 }
 0x180   : > { %v1595_v31 = vpack.c.bf16 %v1375_v45, %v1375_v45  ;;  %v1366_v18 = vadd.f32 %v2412_v2, %v1349_v27  ;;  %v1826_v43 = vpop.f32.mrf.mxu1 }
 0x181   : > { %v1329_v44 = vpop.f32.mrf.mxu0 }
 0x182   : > { %1426 = vst.msk [vmem:[%s2420_s16 + $0x10] sm:$0xf] %vm1421_vm8, %v1595_v31  ;;  %v1376_v4 = vmax.f32 %v1366_v18, 0.0  ;;  %v1218_v9 = vpop.f32.mrf.mxu1  ;;  %v1350_v11 = vadd.f32 %v1329_v44, %v1231_v7 }
 0x183   : > { %v1847_v26 = vpop.f32.mrf.mxu0  ;;  %v1233_v17 = vadd.f32 %v1218_v9, %v1092_v61 }
 0x184   : > { %v1596_v47 = vpack.c.bf16 %v1376_v4, %v1376_v4  ;;  %v1367_v55 = vadd.f32 %v2412_v2, %v1350_v11  ;;  %v1829_v54 = vpop.f32.mrf.mxu1 }
 0x185   : > { %v1332_v62 = vpop.f32.mrf.mxu0 }
 0x186   : > { %1427 = vst.msk [vmem:[%s2420_s16 + $0x14] sm:$0xf] %vm1421_vm8, %v1596_v47  ;;  %v1377_v13 = vmax.f32 %v1367_v55, 0.0  ;;  %v1221_v8 = vpop.f32.mrf.mxu1  ;;  %v1351_v22 = vadd.f32 %v1332_v62, %v1232_v49 }
 0x187   : > { %v1848_v34 = vpop.f32.mrf.mxu0  ;;  %v1234_v25 = vadd.f32 %v1221_v8, %v1093_v21 }
 0x188   : > { %v1597_v5 = vpack.c.bf16 %v1377_v13, %v1377_v13  ;;  %v1368_v19 = vadd.f32 %v2412_v2, %v1351_v22  ;;  %v1830_v59 = vpop.f32.mrf.mxu1 }
 0x189   : > { %v1337_v52 = vpop.f32.mrf.mxu0 }
 0x18a   : > { %1428 = vst.msk [vmem:[%s2420_s16 + $0x18] sm:$0xf] %vm1421_vm8, %v1597_v5  ;;  %v1378_v24 = vmax.f32 %v1368_v19, 0.0  ;;  %v1352_v3 = vadd.f32 %v1337_v52, %v1233_v17 }
 0x18b   : > { %v1851_v46 = vpop.f32.mrf.mxu0 }
 0x18c   : > { %v1598_v28 = vpack.c.bf16 %v1378_v24, %v1378_v24  ;;  %v1369_v39 = vadd.f32 %v2412_v2, %v1352_v3 }
 0x18d   : > { %v1340_v1 = vpop.f32.mrf.mxu0 }
 0x18e   : > { %1429 = vst.msk [vmem:[%s2420_s16 + $0x1c] sm:$0xf] %vm1421_vm8, %v1598_v28  ;;  %v1379_v16 = vmax.f32 %v1369_v39, 0.0  ;;  %v1353_v32 = vadd.f32 %v1340_v1, %v1234_v25 }
 0x18f   : > { %v1852_v30 = vpop.f32.mrf.mxu0 }
 0x190   : > { %v1599_v37 = vpack.c.bf16 %v1379_v16, %v1379_v16  ;;  %v1370_v42 = vadd.f32 %v2412_v2, %v1353_v32 }
 0x192   : > { %1430 = vst.msk [vmem:[%s2420_s16 + $0x20] sm:$0xf] %vm1421_vm8, %v1599_v37  ;;  %v1380_v0 = vmax.f32 %v1370_v42, 0.0 }
 0x194   : > { %v1600_v60 = vpack.c.bf16 %v1380_v0, %v1380_v0 }
 0x196   : > { %1431 = vst.msk [vmem:[%s2420_s16 + $0x24] sm:$0xf] %vm1421_vm8, %v1600_v60 }
 0x197 PF: > { %s13_s12 = sadd.s32 1, %s1896_s12  }
 0x198   : > { %p10_p4 = scmp.ge.s32.totalorder %s13_s12, 4  }
 0x19a   :  { %12 = sbr.rel (!%p10_p4) target bundleno = 1 (0x1), region = 70 }

// kernel: geopose_unet_forward.7
= control target key start
LH: loop header
LB: loop body
LE: loop exit
PB: predicated region body
PF: predicated region fallthrough
CT: control target
= control target key end

     0   :  { %s1253_s12 = smov 0   ;;  %s1380_s0 = inlined_call_operand.vmem [shape: bf16[2,38,32], index: 0, kind: input, shape index: {}]   ;;  %s1381_s1 = inlined_call_operand.vmem [shape: bf16[9,32,64], index: 1, kind: input, shape index: {}]   ;;  %s1382_s2 = inlined_call_operand.vmem [shape: f32[1,64], index: 2, kind: input, shape index: {}]   ;;  %s1383_s3 = inlined_call_operand.vmem [shape: bf16[2,24,64], index: 3, kind: output, shape index: {}]  }
   0x1 LB: > { %s993_s13 = sadd.s32 4294967295, %s1231_s12   ;;  %p997_p0 = scmp.ge.s32.totalorder %s1231_s12, 1  ;;  %s1231_s12 = sphi %s1253_s12, %s13_s12  }
   0x2   : > { %p137_p1 = scmp.lt.s32.totalorder %s1231_s12, 3 }
   0x4   : > { %p138_p2 = pnand %p997_p0, %p137_p1 }
   0x5   : > { %p161_p3 = scmp.lt.s32.totalorder (!%p138_p2), %s993_s13, 1 }
   0x6   : > { %141 = sbr.rel (%p138_p2) target bundleno = 266 (0x10a), region = 32 }
   0xb   : > { %v1201_v0 = vld [vmem:[%s1381_s1 + $0x18] sm:$0xff]   ;;  %v1202_v1 = vld [vmem:[%s1381_s1 + $0x8] sm:$0xff]   ;;  %v1203_v2 = vld [vmem:[%s1381_s1 + $0x10] sm:$0xff]   ;;  %s1385_s13 = smov (!%p161_p3, %s993_s13), 1  ;;  %vm224_vm0 = vcmask 261120   ;;  %vm350_vm2 = vcmask 1046528  }
   0xc   : > { %1119 = vmatprep.subr.bf16.mxu0 %v1201_v0  ;;  %1127 = vmatprep.subr.bf16.mxu1 %v1202_v1  ;;  %v1204_v3 = vld [vmem:[%s1381_s1] sm:$0xff]   ;;  %s1191_s22 = smul.u32 20, %s1385_s13  ;;  %v1207_v4 = vld [vmem:[%s1381_s1 + $0x28] sm:$0xff]   ;;  %v1209_v5 = vld [vmem:[%s1381_s1 + $0x38] sm:$0xff]   ;;  %vm196_vm1 = vsmask.f32 7424 }
   0xd   : > { %1120 = vmatpush3.bf16.msra.mxu0 %v1201_v0  ;;  %1128 = vmatpush3.bf16.msra.mxu1 %v1202_v1  ;;  %v1211_v13 = vld [vmem:[%s1381_s1 + $0x30] sm:$0xff]   ;;  %vm428_vm3 = vcmask 1044480   ;;  %v1213_v25 = vld [vmem:[%s1381_s1 + $0x58] sm:$0xff]   ;;  %v1210_v30 = vld [vmem:[%s1381_s1 + $0x20] sm:$0xff]   ;;  %vm506_vm4 = vsmask.f32 4352 }
   0xe   : > { %1121 = vmatprep.subr.bf16.mxu0 %v1203_v2  ;;  %1129 = vmatprep.subr.bf16.mxu1 %v1204_v3  ;;  %s1282_s27 = scalar_lea.vmem %s1380_s0, %s1191_s22  ;;  %v1215_v37 = vld [vmem:[%s1381_s1 + $0x50] sm:$0xff]   ;;  %v1212_v41 = vld [vmem:[%s1381_s1 + $0x48] sm:$0xff]   ;;  %v1219_v46 = vld [vmem:[%s1381_s1 + $0x78] sm:$0xff]   ;;  %vm745_vm5 = vsmask.f32 5376  ;;  %vm667_vm6 = vcmask 1045504  }
   0xf   : > { %v172_v6 = vld [vmem:[%s1282_s27] sm:$0xf]  ;;  %v173_v7 = vld [vmem:[%s1282_s27 + $0x4] sm:$0xf]  ;;  %v174_v8 = vld [vmem:[%s1282_s27 + $0x8] sm:$0xf] }
  0x10   : > { %v1291_v9 = vld [vmem:[%s1282_s27 + $0xc] sm:$0xf]  ;;  %v1004_v10 = vcombine.low %v172_v6, %v173_v7  ;;  %v1010_v11 = vcombine.low %v174_v8, %v174_v8  ;;  %v1309_v26 = vcombine.low %v173_v7, %v174_v8  ;;  %v176_v40 = vld [vmem:[%s1282_s27 + $0x10] sm:$0x7]  ;;  %v1214_v50 = vld [vmem:[%s1381_s1 + $0x40] sm:$0xff]   ;;  %s1192_s4 = smul.u32 12, %s1385_s13 }
  0x11   : > { %1122 = vmatpush3.bf16.msra.mxu0 %v1203_v2  ;;  %1130 = vmatpush3.bf16.msra.mxu1 %v1204_v3  ;;  %v1294_v12 = vcombine.low %v174_v8, %v1291_v9  ;;  %v1053_v43 = vcombine.low %v1291_v9, %v176_v40  ;;  %v1044_v49 = vcombine.low %v1291_v9, %v1291_v9  ;;  %v1221_v55 = vld [vmem:[%s1381_s1 + $0x70] sm:$0xff]   ;;  %v1217_v57 = vld [vmem:[%s1381_s1 + $0x68] sm:$0xff]   ;;  %v1220_v61 = vld [vmem:[%s1381_s1 + $0x60] sm:$0xff]   ;;  %vm934_vm7 = vcmask 519168  }
  0x12   : > { %1135 = vmatprep.subr.bf16.mxu0 %v1207_v4  ;;  %1143 = vmatprep.subr.bf16.mxu1 %v1209_v5  ;;  %v198_v14 = vshrl.u32 %v1004_v10, 16  ;;  %v200_v15 = vshll.u32 %v1004_v10, 16  ;;  %v429_v16 = vrot.slane %v1004_v10, 3  ;;  %v351_v19 = vrot.slane %v1004_v10, 1  ;;  %v1223_v63 = vld [vmem:[%s1381_s1 + $0x88] sm:$0xff]   ;;  %v1224_v2 = vld [vmem:[%s1381_s1 + $0x80] sm:$0xff]   ;;  %s170_s7 = scalar_lea.vmem %s1383_s3, %s1192_s4 }
  0x13   : > { %1131 = vmatprep.mubr.msk.bf16.mxu1 %vm224_vm0, %v1004_v10  ;;  %v205_v17 = vshll.u32 %v1294_v12, 16  ;;  %v209_v18 = vshrl.u32 %v1294_v12, 16  ;;  %v430_v20 = vrot.slane %v1294_v12, 3  ;;  %v352_v22 = vrot.slane %v1294_v12, 1 }
  0x14   : > { %1132 = vmatmul.mubr.msk.bf16.vlgmr.msra.gmra.mxu1 %vm224_vm0, %v1010_v11  ;;  %v202_v21 = vrot.slane %v200_v15, 1  ;;  %v507_v29 = vrot.slane %v198_v14, 3  ;;  %v508_v31 = vrot.slane %v200_v15, 4  ;;  %v746_v36 = vshrl.u32 %v1309_v26, 16 }
  0x15   : > { %1144 = vmatpush3.bf16.msra.mxu1 %v1209_v5  ;;  %v207_v23 = vrot.slane %v205_v17, 1  ;;  %v431_v24 = vsel %vm428_vm3, %v429_v16, %v430_v20  ;;  %v511_v33 = vrot.slane %v205_v17, 4  ;;  %v353_v34 = vsel %vm350_vm2, %v351_v19, %v352_v22 }
  0x16   : > { %1145 = vmatprep.subr.bf16.mxu1 %v1211_v13  ;;  %v203_v27 = vor.u32 %v202_v21, %v198_v14  ;;  %1147 = vmatprep.mubr.msk.bf16.mxu1 %vm224_vm0, %v431_v24  ;;  %v510_v35 = vrot.slane %v209_v18, 3  ;;  %v749_v38 = vshll.u32 %v1309_v26, 16  ;;  %v509_v39 = vor.u32 %v508_v31, %v507_v29 }
  0x17   : > { %v211_v28 = vor.u32 %v209_v18, %v207_v23  ;;  %v748_v44 = vrot.slane %v746_v36, 2  ;;  %v754_v47 = vshrl.u32 %v1053_v43, 16  ;;  %v757_v48 = vshll.u32 %v1053_v43, 16 }
  0x18   : > { %v208_v32 = vsel %vm196_vm1, %v203_v27, %v207_v23  ;;  %v512_v42 = vor.u32 %v511_v33, %v510_v35  ;;  %v751_v45 = vrot.slane %v749_v38, 3  ;;  %v668_v58 = vrot.slane %v1309_v26, 2 }
  0x19   : > { %1146 = vmatpush3.bf16.msra.mxu1 %v1211_v13  ;;  %1123 = vmatprep.mubr.msk.bf16.mxu0 %vm224_vm0, %v208_v32  ;;  %v756_v53 = vrot.slane %v754_v47, 2  ;;  %v759_v54 = vrot.slane %v757_v48, 3  ;;  %v669_v59 = vrot.slane %v1053_v43, 2  ;;  %v836_v0 = vrot.slane %v1309_v26, 3 }
  0x1a   : > { %1159 = vmatprep.subr.bf16.mxu1 %v1213_v25  ;;  %1124 = vmatmul.mubr.msk.bf16.vlgmr.msra.gmra.mxu0 %vm224_vm0, %v211_v28  ;;  %v513_v51 = vsel %vm506_vm4, %v509_v39, %v512_v42  ;;  %v752_v52 = vor.u32 %v751_v45, %v748_v44  ;;  %v837_v1 = vrot.slane %v1053_v43, 3 }
  0x1b   : > { %1136 = vmatpush3.bf16.msra.mxu0 %v1207_v4  ;;  %1139 = vmatprep.mubr.msk.bf16.mxu0 %vm224_vm0, %v353_v34  ;;  %v760_v56 = vor.u32 %v759_v54, %v756_v53  ;;  %v670_v62 = vsel %vm667_vm6, %v668_v58, %v669_v59  ;;  %v1074_v54 = vld [vmem:[%s1382_s2] ss:$0 sm:$0xff] }
  0x1c   : > { %1137 = vmatprep.subr.bf16.mxu0 %v1210_v30  ;;  %1148 = vmatmul.mubr.msk.bf16.vlgmr.msra.gmra.mxu1 %vm224_vm0, %v430_v20  ;;  %v838_v3 = vsel %vm428_vm3, %v836_v0, %v837_v1 }
  0x1d   : > { %1160 = vmatpush3.bf16.msra.mxu1 %v1213_v25  ;;  %1163 = vmatprep.mubr.msk.bf16.mxu1 %vm224_vm0, %v1309_v26  ;;  %v761_v60 = vsel %vm745_vm5, %v752_v52, %v760_v56 }
  0x1e   : > { %1161 = vmatprep.subr.bf16.mxu1 %v1215_v37 }
  0x1f   : > { %1138 = vmatpush3.bf16.msra.mxu0 %v1210_v30 }
  0x20   : > { %1151 = vmatprep.subr.bf16.mxu0 %v1212_v41 }
  0x21   : > { %1162 = vmatpush3.bf16.msra.mxu1 %v1215_v37 }
  0x22   : > { %1140 = vmatmul.mubr.msk.bf16.vlgmr.msra.gmra.mxu0 %vm224_vm0, %v352_v22  ;;  %1175 = vmatprep.subr.bf16.mxu1 %v1219_v46 }
  0x23   : > { %1152 = vmatpush3.bf16.msra.mxu0 %v1212_v41  ;;  %1155 = vmatprep.mubr.msk.bf16.mxu0 %vm224_vm0, %v513_v51 }
  0x24   : > { %1153 = vmatprep.subr.bf16.mxu0 %v1214_v50  ;;  %1164 = vmatmul.mubr.msk.bf16.vlgmr.msra.gmra.mxu1 %vm224_vm0, %v1044_v49 }
  0x25   : > { %1176 = vmatpush3.bf16.msra.mxu1 %v1219_v46  ;;  %1179 = vmatprep.mubr.msk.bf16.mxu1 %vm224_vm0, %v761_v60 }
  0x26   : > { %1177 = vmatprep.subr.bf16.mxu1 %v1221_v55 }
  0x27   : > { %1154 = vmatpush3.bf16.msra.mxu0 %v1214_v50 }
  0x28   : > { %1167 = vmatprep.subr.bf16.mxu0 %v1217_v57 }
  0x29   : > { %1178 = vmatpush3.bf16.msra.mxu1 %v1221_v55 }
  0x2a   : > { %1156 = vmatmul.mubr.msk.bf16.vlgmr.msra.gmra.mxu0 %vm224_vm0, %v512_v42 }
  0x2b   : > { %1168 = vmatpush3.bf16.msra.mxu0 %v1217_v57  ;;  %1171 = vmatprep.mubr.msk.bf16.mxu0 %vm224_vm0, %v670_v62 }
  0x2c   : > { %1169 = vmatprep.subr.bf16.mxu0 %v1220_v61  ;;  %1180 = vmatmul.mubr.msk.bf16.vlgmr.msra.gmra.mxu1 %vm224_vm0, %v760_v56 }
  0x2f   : > { %1170 = vmatpush3.bf16.msra.mxu0 %v1220_v61 }
  0x30   : > { %1183 = vmatprep.subr.bf16.mxu0 %v1223_v63 }
  0x32   : > { %1172 = vmatmul.mubr.msk.bf16.vlgmr.msra.gmra.mxu0 %vm224_vm0, %v669_v59 }
  0x33   : > { %1184 = vmatpush3.bf16.msra.mxu0 %v1223_v63  ;;  %1187 = vmatprep.mubr.msk.bf16.mxu0 %vm224_vm0, %v838_v3 }
  0x34   : > { %1185 = vmatprep.subr.bf16.mxu0 %v1224_v2 }
  0x37   : > { %1186 = vmatpush3.bf16.msra.mxu0 %v1224_v2 }
  0x3a   : > { %1188 = vmatmul.mubr.msk.bf16.vlgmr.msra.gmra.mxu0 %vm224_vm0, %v837_v1 }
  0xd4   : > { %v1133_v4 = vpop.f32.mrf.mxu1 }
  0xd6   : > { %v331_v5 = vpop.f32.mrf.mxu1 }
  0xd8   : > { %v1134_v6 = vpop.f32.mrf.mxu1 }
  0xda   : > { %v334_v7 = vpop.f32.mrf.mxu1  ;;  %v1125_v8 = vpop.f32.mrf.mxu0 }
  0xdb   : > { %v340_v21 = vadd.f32 %v1133_v4, %v1125_v8 }
  0xdc   : > { %v265_v9 = vpop.f32.mrf.mxu0  ;;  %v1149_v10 = vpop.f32.mrf.mxu1 }
  0xdd   : > { %v332_v24 = vadd.f32 %v331_v5, %v265_v9 }
  0xde   : > { %v1126_v11 = vpop.f32.mrf.mxu0  ;;  %v484_v12 = vpop.f32.mrf.mxu1 }
  0xe0   : > { %v268_v13 = vpop.f32.mrf.mxu0  ;;  %v1150_v14 = vpop.f32.mrf.mxu1 }
  0xe1   : > { %v335_v31 = vadd.f32 %v334_v7, %v268_v13 }
  0xe2   : > { %v1141_v15 = vpop.f32.mrf.mxu0  ;;  %v487_v16 = vpop.f32.mrf.mxu1 }
  0xe3   : > { %v422_v25 = vadd.f32 %v1141_v15, %v340_v21 }
  0xe4   : > { %v406_v17 = vpop.f32.mrf.mxu0  ;;  %v1165_v18 = vpop.f32.mrf.mxu1 }
  0xe5   : > { %v420_v28 = vadd.f32 %v406_v17, %v332_v24  ;;  %v500_v32 = vadd.f32 %v1149_v10, %v422_v25 }
  0xe6   : > { %v1142_v19 = vpop.f32.mrf.mxu0  ;;  %v642_v20 = vpop.f32.mrf.mxu1 }
  0xe7   : > { %v498_v35 = vadd.f32 %v484_v12, %v420_v28 }
  0xe8   : > { %v409_v22 = vpop.f32.mrf.mxu0  ;;  %v1166_v23 = vpop.f32.mrf.mxu1 }
  0xe9   : > { %v421_v36 = vadd.f32 %v409_v22, %v335_v31 }
  0xea   : > { %v1157_v26 = vpop.f32.mrf.mxu0  ;;  %v645_v27 = vpop.f32.mrf.mxu1 }
  0xeb   : > { %v582_v37 = vadd.f32 %v1157_v26, %v500_v32  ;;  %v499_v42 = vadd.f32 %v487_v16, %v421_v36 }
  0xec   : > { %v566_v29 = vpop.f32.mrf.mxu0  ;;  %v1181_v30 = vpop.f32.mrf.mxu1 }
  0xed   : > { %v580_v40 = vadd.f32 %v566_v29, %v498_v35  ;;  %v658_v43 = vadd.f32 %v1165_v18, %v582_v37 }
  0xee   : > { %v1158_v33 = vpop.f32.mrf.mxu0  ;;  %v814_v34 = vpop.f32.mrf.mxu1 }
  0xef   : > { %v656_v45 = vadd.f32 %v642_v20, %v580_v40 }
  0xf0   : > { %v569_v38 = vpop.f32.mrf.mxu0  ;;  %v1182_v39 = vpop.f32.mrf.mxu1 }
  0xf1   : > { %v581_v46 = vadd.f32 %v569_v38, %v499_v42 }
  0xf2   : > { %v1173_v41 = vpop.f32.mrf.mxu0  ;;  %v817_v61 = vpop.f32.mrf.mxu1 }
  0xf3   : > { %v739_v47 = vadd.f32 %v1173_v41, %v658_v43  ;;  %v657_v51 = vadd.f32 %v645_v27, %v581_v46 }
  0xf4   : > { %v723_v44 = vpop.f32.mrf.mxu0 }
  0xf5   : > { %v737_v49 = vadd.f32 %v723_v44, %v656_v45  ;;  %v830_v52 = vadd.f32 %v1181_v30, %v739_v47 }
  0xf6   : > { %v1174_v48 = vpop.f32.mrf.mxu0 }
  0xf7   : > { %v828_v55 = vadd.f32 %v814_v34, %v737_v49 }
  0xf8   : > { %v726_v50 = vpop.f32.mrf.mxu0 }
  0xf9   : > { %v738_v56 = vadd.f32 %v726_v50, %v657_v51 }
  0xfa   : > { %v1189_v53 = vpop.f32.mrf.mxu0 }
  0xfb   : > { %v907_v57 = vadd.f32 %v1189_v53, %v830_v52  ;;  %v829_v63 = vadd.f32 %v817_v61, %v738_v56 }
  0xfc   : > { %v891_v58 = vpop.f32.mrf.mxu0 }
  0xfd   : > { %v917_v59 = vadd.f32 %v1074_v54, %v907_v57  ;;  %v905_v60 = vadd.f32 %v891_v58, %v828_v55 }
  0xfe   : > { %v1190_v62 = vpop.f32.mrf.mxu0 }
  0xff   : > { %v920_v0 = vmax.f32 %v917_v59, 0.0  ;;  %v915_v1 = vadd.f32 %v1074_v54, %v905_v60 }
 0x100   : > { %v894_v2 = vpop.f32.mrf.mxu0 }
 0x101   : > { %v1082_v3 = vpack.c.bf16 %v920_v0, %v920_v0  ;;  %v918_v4 = vmax.f32 %v915_v1, 0.0  ;;  %v906_v5 = vadd.f32 %v894_v2, %v829_v63 }
 0x103   : > { %937 = vst.msk [vmem:[%s170_s7 + $0x8] sm:$0xf] %vm934_vm7, %v1082_v3  ;;  %v1080_v6 = vpack.c.bf16 %v918_v4, %v918_v4  ;;  %v916_v7 = vadd.f32 %v1074_v54, %v906_v5 }
 0x105   : > { %935 = vst.msk [vmem:[%s170_s7] sm:$0xf] %vm934_vm7, %v1080_v6  ;;  %v919_v8 = vmax.f32 %v916_v7, 0.0 }
 0x107   : > { %v1081_v9 = vpack.c.bf16 %v919_v8, %v919_v8 }
 0x109   : > { %936 = vst.msk [vmem:[%s170_s7 + $0x4] sm:$0xf] %vm934_vm7, %v1081_v9 }
 0x10a PF: > { %s13_s12 = sadd.s32 1, %s1231_s12  }
 0x10b   : > { %p10_p4 = scmp.ge.s32.totalorder %s13_s12, 4  }
 0x10d   :  { %12 = sbr.rel (!%p10_p4) target bundleno = 1 (0x1), region = 70 }

// kernel: geopose_unet_forward.8
= control target key start
LH: loop header
LB: loop body
LE: loop exit
PB: predicated region body
PF: predicated region fallthrough
CT: control target
= control target key end

     0   :  { %s3848_s24 = smov 0   ;;  %s4370_s0 = inlined_call_operand.vmem [shape: bf16[2,38,64], index: 0, kind: input, shape index: {}]   ;;  %s4371_s1 = inlined_call_operand.vmem [shape: bf16[2,38,32], index: 1, kind: input, shape index: {}]   ;;  %s4372_s2 = inlined_call_operand.vmem [shape: bf16[9,64,48], index: 2, kind: input, shape index: {}]   ;;  %s4373_s3 = inlined_call_operand.vmem [shape: bf16[9,32,48], index: 3, kind: input, shape index: {}]   ;;  %s4374_s4 = inlined_call_operand.vmem [shape: f32[1,48], index: 4, kind: input, shape index: {}]   ;;  %s4375_s5 = inlined_call_operand.vmem [shape: bf16[9,48,48], index: 5, kind: input, shape index: {}]   ;;  %s4376_s6 = inlined_call_operand.vmem [shape: f32[1,48], index: 6, kind: input, shape index: {}]   ;;  %s4377_s7 = inlined_call_operand.vmem [shape: bf16[2,24,48], index: 7, kind: output, shape index: {}]  }
   0x1 LB: > { %s2957_s25 = sadd.s32 4294967295, %s3805_s24   ;;  %p2961_p0 = scmp.ge.s32.totalorder %s3805_s24, 1  ;;  %s3805_s24 = sphi %s3848_s24, %s17_s24  }
   0x2   : > { %p247_p1 = scmp.lt.s32.totalorder %s3805_s24, 3 }
   0x4   : > { %p248_p2 = pnand %p2961_p0, %p247_p1 }
   0x5   : > { %p284_p3 = scmp.lt.s32.totalorder (!%p248_p2), %s2957_s25, 1 }
   0x6   : > { %251 = sbr.rel (%p248_p2) target bundleno = 614 (0x266), region = 48 }
   0xb   : > { %v3700_v0 = vld [vmem:[%s4372_s2 + $0x38] sm:$0xff]   ;;  %v3702_v2 = vld [vmem:[%s4372_s2 + $0x30] sm:$0xff]   ;;  %s4385_s25 = smov (!%p284_p3, %s2957_s25), 1  ;;  %v3704_v4 = vld [vmem:[%s4372_s2 + $0x28] sm:$0xff]   ;;  %vm434_vm0 = vcmask 523264   ;;  %vm576_vm1 = vcmask 1046528  }
   0xc   : > { %v3701_v1 = vld [vmem:[%s4372_s2 + $0x18] sm:$0xff]   ;;  %3413 = vmatprep.subr.bf16.mxu0 %v3700_v0  ;;  %v3703_v3 = vld [vmem:[%s4372_s2 + $0x10] sm:$0xff]   ;;  %s3683_s13 = smul.u32 20, %s4385_s25  ;;  %v3705_v5 = vld [vmem:[%s4372_s2 + $0x8] sm:$0xff]   ;;  %vm394_vm2 = vsmask.f32 7424 }
   0xd   : > { %3425 = vmatprep.subr.bf16.mxu1 %v3701_v1  ;;  %3414 = vmatpush3.bf16.msra.mxu0 %v3700_v0  ;;  %v3706_v6 = vld [vmem:[%s4372_s2 + $0x20] sm:$0xff]   ;;  %v3711_v16 = vld [vmem:[%s4372_s2 + $0x58] sm:$0xff]   ;;  %vm670_vm3 = vcmask 1044480   ;;  %v3713_v25 = vld [vmem:[%s4372_s2 + $0x50] sm:$0xff]   ;;  %vm764_vm4 = vsmask.f32 4352 }
   0xe   : > { %3426 = vmatpush3.bf16.msra.mxu1 %v3701_v1  ;;  %3415 = vmatprep.subr.bf16.mxu0 %v3702_v2  ;;  %s3882_s18 = scalar_lea.vmem %s4370_s0, %s3683_s13  ;;  %v3707_v10 = vld [vmem:[%s4372_s2] sm:$0xff]   ;;  %v3712_v20 = vld [vmem:[%s4372_s2 + $0x78] sm:$0xff]   ;;  %v3714_v28 = vld [vmem:[%s4372_s2 + $0x70] sm:$0xff]   ;;  %vm957_vm5 = vcmask 1045504   ;;  %s3998_s22 = scalar_lea.vmem %s4371_s1, %s3683_s13  ;;  %vm1051_vm6 = vsmask.f32 5376 }
   0xf   : > { %3427 = vmatprep.subr.bf16.mxu1 %v3703_v3  ;;  %v362_v7 = vld [vmem:[%s3882_s18] sm:$0xf]  ;;  %v3889_v8 = vld [vmem:[%s3882_s18 + $0x4] sm:$0xf]  ;;  %v3892_v9 = vld [vmem:[%s3882_s18 + $0x8] sm:$0xf] }
  0x10   : > { %v3898_v11 = vld [vmem:[%s3882_s18 + $0xc] sm:$0xf]  ;;  %v2973_v12 = vcombine.low %v362_v7, %v3889_v8  ;;  %v2981_v23 = vcombine.low %v3892_v9, %v3892_v9  ;;  %v3717_v36 = vld [vmem:[%s4372_s2 + $0x40] sm:$0xff]   ;;  %v3719_v42 = vld [vmem:[%s4372_s2 + $0x98] sm:$0xff]   ;;  %v3958_v48 = vcombine.low %v3889_v8, %v3892_v9  ;;  %vm1271_vm7 = vcmask 261120  }
  0x11   : > { %3416 = vmatpush3.bf16.msra.mxu0 %v3702_v2  ;;  %v3903_v13 = vcombine.low %v3892_v9, %v3898_v11  ;;  %v3715_v33 = vld [vmem:[%s4372_s2 + $0x48] sm:$0xff]   ;;  %v3718_v37 = vld [vmem:[%s4372_s2 + $0x60] sm:$0xff]   ;;  %v3720_v43 = vld [vmem:[%s4372_s2 + $0xb8] sm:$0xff]   ;;  %vm300_vm8 = vcmask 388096   ;;  %vm305_vm9 = vcmask 387072  }
  0x12   : > { %3428 = vmatpush3.bf16.msra.mxu1 %v3703_v3  ;;  %3417 = vmatprep.subr.bf16.mxu0 %v3704_v4  ;;  %v396_v14 = vshrl.u32 %v2973_v12, 16  ;;  %v398_v15 = vshll.u32 %v2973_v12, 16  ;;  %v577_v26 = vrot.slane %v2973_v12, 1  ;;  %v671_v30 = vrot.slane %v2973_v12, 3  ;;  %v3716_v35 = vld [vmem:[%s4372_s2 + $0x68] sm:$0xff]   ;;  %v3721_v44 = vld [vmem:[%s4372_s2 + $0x90] sm:$0xff]  }
  0x13   : > { %3429 = vmatprep.subr.bf16.mxu1 %v3705_v5  ;;  %3433 = vmatprep.mubr.msk.bf16.mxu1 %vm434_vm0, %v2973_v12  ;;  %v403_v17 = vshll.u32 %v3903_v13, 16  ;;  %v407_v18 = vshrl.u32 %v3903_v13, 16  ;;  %v578_v29 = vrot.slane %v3903_v13, 1  ;;  %v672_v31 = vrot.slane %v3903_v13, 3  ;;  %v3722_v47 = vld [vmem:[%s4372_s2 + $0xb0] sm:$0xff]   ;;  %v3723_v52 = vld [vmem:[%s4372_s2 + $0x88] sm:$0xff]  }
  0x14   : > { %v400_v19 = vrot.slane %v398_v15, 1  ;;  %v765_v38 = vrot.slane %v396_v14, 3  ;;  %v766_v40 = vrot.slane %v398_v15, 4  ;;  %v366_v49 = vld [vmem:[%s3882_s18 + $0x10] sm:$0x7]  ;;  %v3724_v53 = vld [vmem:[%s4372_s2 + $0xa8] sm:$0xff]   ;;  %v3039_v3 = vcombine.low %v3898_v11, %v3898_v11 }
  0x15   : > { %3418 = vmatpush3.bf16.msra.mxu0 %v3704_v4  ;;  %v405_v21 = vrot.slane %v403_v17, 1  ;;  %v579_v32 = vsel %vm576_vm1, %v577_v26, %v578_v29  ;;  %v673_v34 = vsel %vm670_vm3, %v671_v30, %v672_v31  ;;  %v769_v39 = vrot.slane %v403_v17, 4  ;;  %v3725_v58 = vld [vmem:[%s4372_s2 + $0x80] sm:$0xff]   ;;  %v3728_v0 = vld [vmem:[%s4372_s2 + $0xd8] sm:$0xff]   ;;  %v3731_v4 = vld [vmem:[%s4372_s2 + $0xd0] sm:$0xff]   ;;  %s3684_s18 = smul.u32 12, %s4385_s25 }
  0x16   : > { %3430 = vmatpush3.bf16.msra.mxu1 %v3705_v5  ;;  %3419 = vmatprep.subr.bf16.mxu0 %v3706_v6  ;;  %v401_v22 = vor.u32 %v400_v19, %v396_v14  ;;  %v768_v41 = vrot.slane %v407_v18, 3  ;;  %v767_v45 = vor.u32 %v766_v40, %v765_v38  ;;  %v3965_v51 = vcombine.low %v3898_v11, %v366_v49  ;;  %v3726_v59 = vld [vmem:[%s4372_s2 + $0xa0] sm:$0xff]   ;;  %v3730_v1 = vld [vmem:[%s4372_s2 + $0xf8] sm:$0xff]   ;;  %v3732_v5 = vld [vmem:[%s4372_s2 + $0xf0] sm:$0xff]  }
  0x17   : > { %3431 = vmatprep.subr.bf16.mxu1 %v3707_v10  ;;  %v409_v24 = vor.u32 %v407_v18, %v405_v21  ;;  %v1052_v54 = vshrl.u32 %v3958_v48, 16  ;;  %v1055_v55 = vshll.u32 %v3958_v48, 16  ;;  %v958_v2 = vrot.slane %v3958_v48, 2  ;;  %v1242_v9 = vld [vmem:[%s3998_s22] sm:$0xf]  ;;  %v3733_v11 = vld [vmem:[%s4372_s2 + $0xc8] sm:$0xff]   ;;  %s298_s14 = scalar_lea.vmem %s4377_s7, %s3684_s18 }
  0x18   : > { %v406_v27 = vsel %vm394_vm2, %v401_v22, %v405_v21  ;;  %v770_v46 = vor.u32 %v769_v39, %v768_v41  ;;  %v1060_v56 = vshrl.u32 %v3965_v51, 16  ;;  %v1063_v57 = vshll.u32 %v3965_v51, 16  ;;  %v4021_v14 = vld [vmem:[%s3998_s22 + $0xc] sm:$0xf]  ;;  %v3735_v19 = vld [vmem:[%s4372_s2 + $0xc0] sm:$0xff]   ;;  %v3748_v39 = vld [vmem:[%s4373_s3 + $0x10] sm:$0xff]  }
  0x19   : > { %3420 = vmatpush3.bf16.msra.mxu0 %v3706_v6  ;;  %3421 = vmatprep.mubr.msk.bf16.mxu0 %vm434_vm0, %v406_v27  ;;  %v1054_v60 = vrot.slane %v1052_v54, 2  ;;  %v1057_v61 = vrot.slane %v1055_v55, 3  ;;  %v959_v6 = vrot.slane %v3965_v51, 2  ;;  %v3734_v15 = vld [vmem:[%s4372_s2 + $0xe8] sm:$0xff]   ;;  %v1159_v26 = vrot.slane %v3965_v51, 3  ;;  %v3747_v38 = vld [vmem:[%s4372_s2 + $0x100] sm:$0xff]  }
  0x1a   : > { %3432 = vmatpush3.bf16.msra.mxu1 %v3707_v10  ;;  %3437 = vmatprep.subr.bf16.mxu0 %v3711_v16  ;;  %v771_v50 = vsel %vm764_vm4, %v767_v45, %v770_v46  ;;  %v1062_v62 = vrot.slane %v1060_v56, 2  ;;  %v1065_v63 = vrot.slane %v1063_v57, 3  ;;  %v4011_v10 = vld [vmem:[%s3998_s22 + $0x4] sm:$0xf] }
  0x1b   : > { %3449 = vmatprep.subr.bf16.mxu1 %v3712_v20  ;;  %v1058_v7 = vor.u32 %v1057_v61, %v1054_v60  ;;  %v960_v12 = vsel %vm957_vm5, %v958_v2, %v959_v6  ;;  %v4032_v17 = vcombine.low %v1242_v9, %v4011_v10  ;;  %v3751_v49 = vld [vmem:[%s4373_s3 + $0x20] sm:$0xff]   ;;  %v3754_v60 = vld [vmem:[%s4373_s3 + $0x58] sm:$0xff]  }
  0x1c   : > { %3422 = vmatmul.mubr.msk.bf16.vlgmr.msra.gmra.mxu0 %vm434_vm0, %v409_v24  ;;  %v1066_v8 = vor.u32 %v1065_v63, %v1062_v62  ;;  %v3738_v24 = vld [vmem:[%s4372_s2 + $0x118] sm:$0xff]  }
  0x1d   : > { %3434 = vmatmul.mubr.msk.bf16.vlgmr.msra.gmra.mxu1 %vm434_vm0, %v2981_v23  ;;  %3438 = vmatpush3.bf16.msra.mxu0 %v3711_v16  ;;  %v4027_v16 = vld [vmem:[%s3998_s22 + $0x8] sm:$0xf]  ;;  %v1339_v21 = vshll.u32 %v4032_v17, 16  ;;  %v1158_v23 = vrot.slane %v3958_v48, 3  ;;  %v1337_v27 = vshrl.u32 %v4032_v17, 16 }
  0x1e   : > { %3450 = vmatpush3.bf16.msra.mxu1 %v3712_v20  ;;  %3439 = vmatprep.subr.bf16.mxu0 %v3713_v25  ;;  %v1067_v13 = vsel %vm1051_vm6, %v1058_v7, %v1066_v8  ;;  %v4036_v18 = vcombine.low %v4027_v16, %v4021_v14  ;;  %v3736_v20 = vld [vmem:[%s4372_s2 + $0xe0] sm:$0xff]   ;;  %v4106_v51 = vcombine.low %v4011_v10, %v4027_v16  ;;  %v3758_v10 = vld [vmem:[%s4373_s3 + $0x68] sm:$0xff]  }
  0x1f   : > { %3451 = vmatprep.subr.bf16.mxu1 %v3714_v28  ;;  %3445 = vmatprep.mubr.msk.bf16.mxu0 %vm434_vm0, %v579_v32  ;;  %v1341_v30 = vrot.slane %v1339_v21, 1  ;;  %v3740_v32 = vld [vmem:[%s4372_s2 + $0x110] sm:$0xff]  }
  0x20   : > { %3457 = vmatprep.mubr.msk.bf16.mxu1 %vm434_vm0, %v673_v34  ;;  %v1344_v22 = vshll.u32 %v4036_v18, 16  ;;  %v3742_v34 = vld [vmem:[%s4372_s2 + $0x108] sm:$0xff]   ;;  %v1426_v45 = vrot.slane %v4036_v18, 1  ;;  %v1816_v63 = vshrl.u32 %v4106_v51, 16 }
  0x21   : > { %3440 = vmatpush3.bf16.msra.mxu0 %v3713_v25  ;;  %v3739_v25 = vld [vmem:[%s4373_s3 + $0x8] sm:$0xff]   ;;  %v1342_v40 = vor.u32 %v1341_v30, %v1337_v27  ;;  %v3769_v30 = vld [vmem:[%s4375_s5] sm:$0xff]  }
  0x22   : > { %3452 = vmatpush3.bf16.msra.mxu1 %v3714_v28  ;;  %3441 = vmatprep.subr.bf16.mxu0 %v3715_v33  ;;  %v1348_v28 = vshrl.u32 %v4036_v18, 16  ;;  %v1583_v55 = vrot.slane %v1344_v22, 4 }
  0x23   : > { %3453 = vmatprep.subr.bf16.mxu1 %v3716_v35 }
  0x24   : > { %v1582_v54 = vrot.slane %v1348_v28, 3 }
  0x25   : > { %3442 = vmatpush3.bf16.msra.mxu0 %v3715_v33  ;;  %v3741_v33 = vld [vmem:[%s4373_s3] sm:$0xff]  }
  0x26   : > { %3454 = vmatpush3.bf16.msra.mxu1 %v3716_v35  ;;  %3443 = vmatprep.subr.bf16.mxu0 %v3717_v36  ;;  %v3746_v35 = vld [vmem:[%s4373_s3 + $0x18] sm:$0xff]   ;;  %v1584_v62 = vor.u32 %v1583_v55, %v1582_v54 }
  0x27   : > { %3455 = vmatprep.subr.bf16.mxu1 %v3718_v37 }
  0x29   : > { %3444 = vmatpush3.bf16.msra.mxu0 %v3717_v36  ;;  %v1160_v36 = vsel %vm670_vm3, %v1158_v23, %v1159_v26 }
  0x2a   : > { %3456 = vmatpush3.bf16.msra.mxu1 %v3718_v37  ;;  %3461 = vmatprep.subr.bf16.mxu0 %v3719_v42  ;;  %v3090_v37 = vcombine.low %v4027_v16, %v4027_v16 }
  0x2b   : > { %3473 = vmatprep.subr.bf16.mxu1 %v3720_v43 }
  0x2c   : > { %3446 = vmatmul.mubr.msk.bf16.vlgmr.msra.gmra.mxu0 %vm434_vm0, %v578_v29  ;;  %v1425_v29 = vrot.slane %v4032_v17, 1 }
  0x2d   : > { %3458 = vmatmul.mubr.msk.bf16.vlgmr.msra.gmra.mxu1 %vm434_vm0, %v672_v31  ;;  %3462 = vmatpush3.bf16.msra.mxu0 %v3719_v42  ;;  %v1346_v31 = vrot.slane %v1344_v22, 1  ;;  %v3749_v42 = vld [vmem:[%s4373_s3 + $0x28] sm:$0xff]   ;;  %v1906_v22 = vrot.slane %v4106_v51, 3 }
  0x2e   : > { %3474 = vmatpush3.bf16.msra.mxu1 %v3720_v43  ;;  %3463 = vmatprep.subr.bf16.mxu0 %v3721_v44  ;;  %v3750_v43 = vld [vmem:[%s4373_s3 + $0x38] sm:$0xff]   ;;  %v1427_v56 = vsel %vm576_vm1, %v1425_v29, %v1426_v45  ;;  %v3768_v29 = vld [vmem:[%s4375_s5 + $0x28] sm:$0xff]  }
  0x2f   : > { %3475 = vmatprep.subr.bf16.mxu1 %v3722_v47  ;;  %3469 = vmatprep.mubr.msk.bf16.mxu0 %vm434_vm0, %v771_v50  ;;  %v1347_v41 = vsel %vm394_vm2, %v1342_v40, %v1346_v31  ;;  %v3752_v50 = vld [vmem:[%s4373_s3 + $0x30] sm:$0xff]  }
  0x30   : > { %3481 = vmatprep.mubr.msk.bf16.mxu1 %vm434_vm0, %v3958_v48  ;;  %v1246_v48 = vld [vmem:[%s3998_s22 + $0x10] sm:$0x7] }
  0x31   : > { %3464 = vmatpush3.bf16.msra.mxu0 %v3721_v44  ;;  %v1350_v44 = vor.u32 %v1348_v28, %v1346_v31  ;;  %v3767_v28 = vld [vmem:[%s4375_s5 + $0x8] sm:$0xff]   ;;  %v3771_v31 = vld [vmem:[%s4375_s5 + $0x20] sm:$0xff]  }
  0x32   : > { %3476 = vmatpush3.bf16.msra.mxu1 %v3722_v47  ;;  %3465 = vmatprep.subr.bf16.mxu0 %v3723_v52  ;;  %v1503_v47 = vrot.slane %v4036_v18, 3  ;;  %v3761_v18 = vld [vmem:[%s4373_s3 + $0x60] sm:$0xff]  }
  0x33   : > { %3477 = vmatprep.subr.bf16.mxu1 %v3724_v53 }
  0x35   : > { %3466 = vmatpush3.bf16.msra.mxu0 %v3723_v52  ;;  %v1579_v52 = vrot.slane %v1337_v27, 3  ;;  %v3766_v27 = vld [vmem:[%s4375_s5 + $0x10] sm:$0xff]  }
  0x36   : > { %3478 = vmatpush3.bf16.msra.mxu1 %v3724_v53  ;;  %3467 = vmatprep.subr.bf16.mxu0 %v3725_v58  ;;  %v1580_v53 = vrot.slane %v1339_v21, 4  ;;  %v3764_v21 = vld [vmem:[%s4373_s3 + $0x88] sm:$0xff]  }
  0x37   : > { %3479 = vmatprep.subr.bf16.mxu1 %v3726_v59 }
  0x38   : > { %v1581_v61 = vor.u32 %v1580_v53, %v1579_v52 }
  0x39   : > { %3468 = vmatpush3.bf16.msra.mxu0 %v3725_v58  ;;  %v4115_v58 = vcombine.low %v4021_v14, %v1246_v48 }
  0x3a   : > { %3480 = vmatpush3.bf16.msra.mxu1 %v3726_v59  ;;  %3485 = vmatprep.subr.bf16.mxu0 %v3728_v0  ;;  %v3753_v59 = vld [vmem:[%s4373_s3 + $0x48] sm:$0xff]  }
  0x3b   : > { %3497 = vmatprep.subr.bf16.mxu1 %v3730_v1  ;;  %v1827_v2 = vshll.u32 %v4115_v58, 16  ;;  %v1907_v23 = vrot.slane %v4115_v58, 3 }
  0x3c   : > { %3470 = vmatmul.mubr.msk.bf16.vlgmr.msra.gmra.mxu0 %vm434_vm0, %v770_v46  ;;  %v1502_v46 = vrot.slane %v4032_v17, 3 }
  0x3d   : > { %3482 = vmatmul.mubr.msk.bf16.vlgmr.msra.gmra.mxu1 %vm434_vm0, %v3039_v3  ;;  %3486 = vmatpush3.bf16.msra.mxu0 %v3728_v0  ;;  %v1819_v0 = vshll.u32 %v4106_v51, 16  ;;  %v3755_v3 = vld [vmem:[%s4373_s3 + $0x40] sm:$0xff]   ;;  %v1829_v9 = vrot.slane %v1827_v2, 3 }
  0x3e   : > { %3498 = vmatpush3.bf16.msra.mxu1 %v3730_v1  ;;  %3487 = vmatprep.subr.bf16.mxu0 %v3731_v4  ;;  %v1504_v57 = vsel %vm670_vm3, %v1502_v46, %v1503_v47  ;;  %v1824_v1 = vshrl.u32 %v4115_v58, 16 }
  0x3f   : > { %3499 = vmatprep.subr.bf16.mxu1 %v3732_v5  ;;  %3493 = vmatprep.mubr.msk.bf16.mxu0 %vm434_vm0, %v960_v12  ;;  %v1821_v7 = vrot.slane %v1819_v0, 3  ;;  %v3133_v12 = vcombine.low %v4021_v14, %v4021_v14 }
  0x40   : > { %3505 = vmatprep.mubr.msk.bf16.mxu1 %vm434_vm0, %v1067_v13  ;;  %v1739_v13 = vrot.slane %v4106_v51, 2 }
  0x41   : > { %3488 = vmatpush3.bf16.msra.mxu0 %v3731_v4  ;;  %v3756_v4 = vld [vmem:[%s4373_s3 + $0x50] sm:$0xff]  }
  0x42   : > { %3500 = vmatpush3.bf16.msra.mxu1 %v3732_v5  ;;  %3489 = vmatprep.subr.bf16.mxu0 %v3733_v11  ;;  %v1585_v5 = vsel %vm764_vm4, %v1581_v61, %v1584_v62 }
  0x43   : > { %3501 = vmatprep.subr.bf16.mxu1 %v3734_v15 }
  0x45   : > { %3490 = vmatpush3.bf16.msra.mxu0 %v3733_v11  ;;  %v3760_v11 = vld [vmem:[%s4373_s3 + $0x78] sm:$0xff]  }
  0x46   : > { %3502 = vmatpush3.bf16.msra.mxu1 %v3734_v15  ;;  %3491 = vmatprep.subr.bf16.mxu0 %v3735_v19  ;;  %v1740_v15 = vrot.slane %v4115_v58, 2 }
  0x47   : > { %3503 = vmatprep.subr.bf16.mxu1 %v3736_v20 }
  0x48   : > { %v1741_v14 = vsel %vm957_vm5, %v1739_v13, %v1740_v15  ;;  %v307_v13 = vlaneseq }
  0x49   : > { %3492 = vmatpush3.bf16.msra.mxu0 %v3735_v19  ;;  %v3762_v19 = vld [vmem:[%s4373_s3 + $0x70] sm:$0xff]  }
  0x4a   : > { %3504 = vmatpush3.bf16.msra.mxu1 %v3736_v20  ;;  %3509 = vmatprep.subr.bf16.mxu0 %v3738_v24 }
  0x4b   : > { %3521 = vmatprep.subr.bf16.mxu1 %v3739_v25 }
  0x4c   : > { %3494 = vmatmul.mubr.msk.bf16.vlgmr.msra.gmra.mxu0 %vm434_vm0, %v959_v6  ;;  %v1818_v6 = vrot.slane %v1816_v63, 2 }
  0x4d   : > { %3506 = vmatmul.mubr.msk.bf16.vlgmr.msra.gmra.mxu1 %vm434_vm0, %v1066_v8  ;;  %3510 = vmatpush3.bf16.msra.mxu0 %v3738_v24  ;;  %v1826_v8 = vrot.slane %v1824_v1, 2  ;;  %v3765_v24 = vld [vmem:[%s4373_s3 + $0x80] sm:$0xff]  }
  0x4e   : > { %3522 = vmatpush3.bf16.msra.mxu1 %v3739_v25  ;;  %3511 = vmatprep.subr.bf16.mxu0 %v3740_v32  ;;  %v1822_v16 = vor.u32 %v1821_v7, %v1818_v6  ;;  %v1908_v25 = vsel %vm670_vm3, %v1906_v22, %v1907_v23 }
  0x4f   : > { %3523 = vmatprep.subr.bf16.mxu1 %v3741_v33  ;;  %3525 = vmatprep.mubr.msk.bf16.mxu1 %vm1271_vm7, %v4032_v17  ;;  %v1830_v17 = vor.u32 %v1829_v9, %v1826_v8 }
  0x50   : > { %3517 = vmatprep.mubr.msk.bf16.mxu0 %vm434_vm0, %v1160_v36 }
  0x51   : > { %3512 = vmatpush3.bf16.msra.mxu0 %v3740_v32  ;;  %v1831_v20 = vsel %vm1051_vm6, %v1822_v16, %v1830_v17  ;;  %v4198_v32 = vld [vmem:[%s4375_s5 + $0x58] sm:$0xff]  }
  0x52   : > { %3524 = vmatpush3.bf16.msra.mxu1 %v3741_v33  ;;  %3513 = vmatprep.subr.bf16.mxu0 %v3742_v34 }
  0x53   : > { %3529 = vmatprep.subr.bf16.mxu1 %v3746_v35 }
  0x55   : > { %3526 = vmatmul.mubr.msk.bf16.vlgmr.msra.gmra.mxu1 %vm1271_vm7, %v3090_v37  ;;  %3514 = vmatpush3.bf16.msra.mxu0 %v3742_v34 }
  0x56   : > { %3530 = vmatpush3.bf16.msra.mxu1 %v3746_v35  ;;  %3515 = vmatprep.subr.bf16.mxu0 %v3747_v38 }
  0x57   : > { %3531 = vmatprep.subr.bf16.mxu1 %v3748_v39  ;;  %3533 = vmatprep.mubr.msk.bf16.mxu1 %vm1271_vm7, %v1347_v41  ;;  %v3774_v41 = vld [vmem:[%s4375_s5 + $0x18] sm:$0xff]  }
  0x59   : > { %3516 = vmatpush3.bf16.msra.mxu0 %v3747_v38 }
  0x5a   : > { %3532 = vmatpush3.bf16.msra.mxu1 %v3748_v39  ;;  %3537 = vmatprep.subr.bf16.mxu0 %v3749_v42 }
  0x5b   : > { %3545 = vmatprep.subr.bf16.mxu1 %v3750_v43 }
  0x5c   : > { %3518 = vmatmul.mubr.msk.bf16.vlgmr.msra.gmra.mxu0 %vm434_vm0, %v1159_v26  ;;  %v3807_v26 = vmov 0  }
  0x5d   : > { %3534 = vmatmul.mubr.msk.bf16.vlgmr.msra.gmra.mxu1 %vm1271_vm7, %v1350_v44  ;;  %3538 = vmatpush3.bf16.msra.mxu0 %v3749_v42  ;;  %304 = vst.msk [vmem:[#allocation2 + $0xc] sm:$0xf] %vm300_vm8, %v3807_v26  ;;  %301 = vst.msk [vmem:[#allocation2] sm:$0xf] %vm300_vm8, %v3807_v26  ;;  %v4207_v42 = vld [vmem:[%s4375_s5 + $0x40] sm:$0xff]  }
  0x5e   : > { %3546 = vmatpush3.bf16.msra.mxu1 %v3750_v43  ;;  %3539 = vmatprep.subr.bf16.mxu0 %v3751_v49  ;;  %306 = vst.msk [vmem:[#allocation2 + $0x10] sm:$0x7] %vm305_vm9, %v3807_v26 }
  0x5f   : > { %3547 = vmatprep.subr.bf16.mxu1 %v3752_v50  ;;  %3541 = vmatprep.mubr.msk.bf16.mxu0 %vm1271_vm7, %v1427_v56  ;;  %302 = vst.msk [vmem:[#allocation2 + $0x4] sm:$0xf] %vm300_vm8, %v3807_v26  ;;  %303 = vst.msk [vmem:[#allocation2 + $0x8] sm:$0xf] %vm300_vm8, %v3807_v26 }
  0x60   : > { %3549 = vmatprep.mubr.msk.bf16.mxu1 %vm1271_vm7, %v1504_v57 }
  0x61   : > { %3540 = vmatpush3.bf16.msra.mxu0 %v3751_v49 }
  0x62   : > { %3548 = vmatpush3.bf16.msra.mxu1 %v3752_v50  ;;  %3553 = vmatprep.subr.bf16.mxu0 %v3753_v59 }
  0x63   : > { %3561 = vmatprep.subr.bf16.mxu1 %v3754_v60 }
  0x64   : > { %3542 = vmatmul.mubr.msk.bf16.vlgmr.msra.gmra.mxu0 %vm1271_vm7, %v1426_v45 }
  0x65   : > { %3550 = vmatmul.mubr.msk.bf16.vlgmr.msra.gmra.mxu1 %vm1271_vm7, %v1503_v47  ;;  %3554 = vmatpush3.bf16.msra.mxu0 %v3753_v59 }
  0x66   : > { %3562 = vmatpush3.bf16.msra.mxu1 %v3754_v60  ;;  %3555 = vmatprep.subr.bf16.mxu0 %v3755_v3 }
  0x67   : > { %3563 = vmatprep.subr.bf16.mxu1 %v3756_v4  ;;  %3557 = vmatprep.mubr.msk.bf16.mxu0 %vm1271_vm7, %v1585_v5 }
  0x68   : > { %3565 = vmatprep.mubr.msk.bf16.mxu1 %vm1271_vm7, %v4106_v51 }
  0x69   : > { %3556 = vmatpush3.bf16.msra.mxu0 %v3755_v3 }
  0x6a   : > { %3564 = vmatpush3.bf16.msra.mxu1 %v3756_v4  ;;  %3569 = vmatprep.subr.bf16.mxu0 %v3758_v10 }
  0x6b   : > { %3577 = vmatprep.subr.bf16.mxu1 %v3760_v11 }
  0x6c   : > { %3558 = vmatmul.mubr.msk.bf16.vlgmr.msra.gmra.mxu0 %vm1271_vm7, %v1584_v62 }
  0x6d   : > { %3566 = vmatmul.mubr.msk.bf16.vlgmr.msra.gmra.mxu1 %vm1271_vm7, %v3133_v12  ;;  %3570 = vmatpush3.bf16.msra.mxu0 %v3758_v10 }
  0x6e   : > { %3578 = vmatpush3.bf16.msra.mxu1 %v3760_v11  ;;  %3571 = vmatprep.subr.bf16.mxu0 %v3761_v18 }
  0x6f   : > { %3579 = vmatprep.subr.bf16.mxu1 %v3762_v19  ;;  %3573 = vmatprep.mubr.msk.bf16.mxu0 %vm1271_vm7, %v1741_v14 }
  0x70   : > { %3581 = vmatprep.mubr.msk.bf16.mxu1 %vm1271_vm7, %v1831_v20  ;;  %v4210_v20 = vshrl.u32 %v307_v13, 7 }
  0x71   : > { %3572 = vmatpush3.bf16.msra.mxu0 %v3761_v18 }
  0x72   : > { %3580 = vmatpush3.bf16.msra.mxu1 %v3762_v19  ;;  %3585 = vmatprep.subr.bf16.mxu0 %v3764_v21 }
  0x73   : > { %3593 = vmatprep.subr.bf16.mxu1 %v3768_v29 }
  0x74   : > { %3574 = vmatmul.mubr.msk.bf16.vlgmr.msra.gmra.mxu0 %vm1271_vm7, %v1740_v15 }
  0x75   : > { %3582 = vmatmul.mubr.msk.bf16.vlgmr.msra.gmra.mxu1 %vm1271_vm7, %v1830_v17  ;;  %3586 = vmatpush3.bf16.msra.mxu0 %v3764_v21 }
  0x76   : > { %3589 = vmatprep.mubr.msk.bf16.mxu0 %vm1271_vm7, %v1908_v25  ;;  %3587 = vmatprep.subr.bf16.mxu0 %v3765_v24 }
  0x77   : > { %3594 = vmatpush3.bf16.msra.mxu1 %v3768_v29  ;;  %v310_v29 = vadd.s32 16, %v4210_v20 }
  0x78   : > { %3595 = vmatprep.subr.bf16.mxu1 %v3771_v31 }
  0x79   : > { %3588 = vmatpush3.bf16.msra.mxu0 %v3765_v24 }
  0x7a   : > { %3603 = vmatprep.subr.bf16.mxu0 %v3766_v27 }
  0x7b   : > { %3596 = vmatpush3.bf16.msra.mxu1 %v3771_v31 }
  0x7c   : > { %3590 = vmatmul.mubr.msk.bf16.vlgmr.msra.gmra.mxu0 %vm1271_vm7, %v1907_v23  ;;  %3597 = vmatprep.subr.bf16.mxu1 %v3774_v41 }
  0x7d   : > { %3604 = vmatpush3.bf16.msra.mxu0 %v3766_v27 }
  0x7e   : > { %3605 = vmatprep.subr.bf16.mxu0 %v3767_v28 }
  0x7f   : > { %3598 = vmatpush3.bf16.msra.mxu1 %v3774_v41 }
  0x80   : > { %3613 = vmatprep.subr.bf16.mxu1 %v4207_v42 }
  0x81   : > { %3606 = vmatpush3.bf16.msra.mxu0 %v3767_v28 }
  0x82   : > { %3607 = vmatprep.subr.bf16.mxu0 %v3769_v30 }
  0x85   : > { %3608 = vmatpush3.bf16.msra.mxu0 %v3769_v30 }
  0x86   : > { %3623 = vmatprep.subr.bf16.mxu0 %v4198_v32 }
  0xdc   : > { %v3423_v33 = vpop.f32.mrf.mxu0 }
  0xdd   : > { %v3435_v34 = vpop.f32.mrf.mxu1 }
  0xde   : > { %v562_v35 = vadd.f32 %v3435_v34, %v3423_v33  ;;  %v475_v36 = vpop.f32.mrf.mxu0 }
  0xdf   : > { %v553_v37 = vpop.f32.mrf.mxu1 }
  0xe0   : > { %v554_v38 = vadd.f32 %v553_v37, %v475_v36  ;;  %v3424_v39 = vpop.f32.mrf.mxu0 }
  0xe1   : > { %v3436_v40 = vpop.f32.mrf.mxu1 }
  0xe2   : > { %v478_v43 = vpop.f32.mrf.mxu0  ;;  %v4213_v40 = vmul.u32.u64.low 2863311531, %v310_v29  ;;  %v4214_v41 = vmul.u32.u64.high 2863311531, %v310_v29, %v4213_v40 }
  0xe3   : > { %v556_v44 = vpop.f32.mrf.mxu1 }
  0xe4   : > { %v557_v6 = vadd.f32 %v556_v44, %v478_v43 }
  0xec   : > { %v3447_v45 = vpop.f32.mrf.mxu0 }
  0xed   : > { %v3459_v46 = vpop.f32.mrf.mxu1  ;;  %v660_v1 = vadd.f32 %v3447_v45, %v562_v35 }
  0xee   : > { %v644_v47 = vpop.f32.mrf.mxu0 }
  0xef   : > { %v738_v48 = vpop.f32.mrf.mxu1  ;;  %v658_v4 = vadd.f32 %v644_v47, %v554_v38  ;;  %v754_v7 = vadd.f32 %v3459_v46, %v660_v1  ;;  %v309_v46 = vadd.s32 8, %v4210_v20 }
  0xf0   : > { %v3448_v49 = vpop.f32.mrf.mxu0 }
  0xf1   : > { %v3460_v50 = vpop.f32.mrf.mxu1  ;;  %v752_v9 = vadd.f32 %v738_v48, %v658_v4 }
  0xf2   : > { %v647_v51 = vpop.f32.mrf.mxu0  ;;  %v4218_v49 = vmul.u32.u64.low 2863311531, %v4210_v20  ;;  %v4219_v50 = vmul.u32.u64.high 2863311531, %v4210_v20, %v4218_v49 }
  0xf3   : > { %v741_v52 = vpop.f32.mrf.mxu1  ;;  %v659_v10 = vadd.f32 %v647_v51, %v557_v6 }
  0xf5   : > { %v753_v17 = vadd.f32 %v741_v52, %v659_v10 }
  0xfc   : > { %v3471_v53 = vpop.f32.mrf.mxu0 }
  0xfd   : > { %v3483_v54 = vpop.f32.mrf.mxu1  ;;  %v852_v11 = vadd.f32 %v3471_v53, %v754_v7 }
  0xfe   : > { %v836_v55 = vpop.f32.mrf.mxu0 }
  0xff   : > { %v928_v56 = vpop.f32.mrf.mxu1  ;;  %v850_v15 = vadd.f32 %v836_v55, %v752_v9  ;;  %v944_v18 = vadd.f32 %v3483_v54, %v852_v11 }
 0x100   : > { %v3472_v57 = vpop.f32.mrf.mxu0 }
 0x101   : > { %v3484_v58 = vpop.f32.mrf.mxu1  ;;  %v942_v21 = vadd.f32 %v928_v56, %v850_v15 }
 0x102   : > { %v839_v59 = vpop.f32.mrf.mxu0  ;;  %v4221_v57 = vmul.u32.u64.low 2863311531, %v309_v46  ;;  %v4222_v58 = vmul.u32.u64.high 2863311531, %v309_v46, %v4221_v57 }
 0x103   : > { %v931_v60 = vpop.f32.mrf.mxu1  ;;  %v851_v22 = vadd.f32 %v839_v59, %v753_v17 }
 0x104   : > { %v328_v13 = vshrl.u32 %v4222_v58, 2 }
 0x105   : > { %v943_v30 = vadd.f32 %v931_v60, %v851_v22 }
 0x10c   : > { %v3495_v61 = vpop.f32.mrf.mxu0 }
 0x10d   : > { %v3507_v62 = vpop.f32.mrf.mxu1  ;;  %v1041_v23 = vadd.f32 %v3495_v61, %v944_v18 }
 0x10e   : > { %v1025_v63 = vpop.f32.mrf.mxu0 }
 0x10f   : > { %v1132_v0 = vpop.f32.mrf.mxu1  ;;  %v1039_v26 = vadd.f32 %v1025_v63, %v942_v21  ;;  %v1148_v31 = vadd.f32 %v3507_v62, %v1041_v23  ;;  %v339_v62 = vshrl.u32 %v4214_v41, 2 }
 0x110   : > { %v3496_v2 = vpop.f32.mrf.mxu0 }
 0x111   : > { %v3508_v3 = vpop.f32.mrf.mxu1  ;;  %v1146_v35 = vadd.f32 %v1132_v0, %v1039_v26 }
 0x112   : > { %v1028_v19 = vpop.f32.mrf.mxu0 }
 0x113   : > { %v1135_v5 = vpop.f32.mrf.mxu1  ;;  %v1040_v36 = vadd.f32 %v1028_v19, %v943_v30 }
 0x115   : > { %v3527_v8 = vpop.f32.mrf.mxu1  ;;  %v1147_v47 = vadd.f32 %v1135_v5, %v1040_v36  ;;  %v317_v5 = vshrl.u32 %v4219_v50, 2 }
 0x117   : > { %v1312_v12 = vpop.f32.mrf.mxu1  ;;  %v318_v18 = vmul.u32 6, %v317_v5 }
 0x119   : > { %v3528_v16 = vpop.f32.mrf.mxu1 }
 0x11b   : > { %v1315_v14 = vpop.f32.mrf.mxu1 }
 0x11c   : > { %v3519_v24 = vpop.f32.mrf.mxu0 }
 0x11d   : > { %v3535_v25 = vpop.f32.mrf.mxu1  ;;  %v1241_v37 = vadd.f32 %v3519_v24, %v1148_v31 }
 0x11e   : > { %v1225_v27 = vpop.f32.mrf.mxu0 }
 0x11f   : > { %v1403_v28 = vpop.f32.mrf.mxu1  ;;  %v1239_v43 = vadd.f32 %v1225_v27, %v1146_v35  ;;  %v1328_v48 = vadd.f32 %v3527_v8, %v1241_v37  ;;  %v340_v8 = vmul.u32 6, %v339_v62 }
 0x120   : > { %v3520_v33 = vpop.f32.mrf.mxu0 }
 0x121   : > { %v3536_v34 = vpop.f32.mrf.mxu1  ;;  %v1326_v53 = vadd.f32 %v1312_v12, %v1239_v43  ;;  %v1419_v59 = vadd.f32 %v3535_v25, %v1328_v48  ;;  %v341_v21 = vsub.s32 %v310_v29, %v340_v8  ;;  %v329_v25 = vmul.u32 6, %v328_v13 }
 0x122   : > { %v1228_v38 = vpop.f32.mrf.mxu0 }
 0x123   : > { %v1406_v39 = vpop.f32.mrf.mxu1  ;;  %v1240_v54 = vadd.f32 %v1228_v38, %v1147_v47  ;;  %v1417_v63 = vadd.f32 %v1403_v28, %v1326_v53  ;;  %v319_v28 = vsub.s32 %v4210_v20, %v318_v18  ;;  %vm346_vm10 = vcmp.ne.s32.totalorder %v341_v21, 0  ;;  %v3163_v47 = vld [vmem:[%s4374_s4] ss:$0 sm:$0xff] }
 0x124   : > { %v3543_v44 = vpop.f32.mrf.mxu0  ;;  %vm349_vm11 = vcmp.lt.s32.totalorder %v341_v21, 0  ;;  %v330_v38 = vsub.s32 %v309_v46, %v329_v25  ;;  %v355_v29 = vadd.s32 6, %v341_v21 }
 0x125   : > { %v3551_v45 = vpop.f32.mrf.mxu1  ;;  %v1327_v0 = vadd.f32 %v1315_v14, %v1240_v54  ;;  %v1496_v1 = vadd.f32 %v3543_v44, %v1419_v59  ;;  %vm344_vm12 = vcmp.ne.s32.totalorder %v319_v28, 0  ;;  %vm347_vm13 = vcmp.lt.s32.totalorder %v319_v28, 0  ;;  %vm4228_vm14 = vmand %vm349_vm11, %vm346_vm10 }
 0x126   : > { %v1480_v51 = vpop.f32.mrf.mxu0  ;;  %v353_v44 = vadd.s32 6, %v319_v28  ;;  %vm4235_vm15 = vmand %vm347_vm13, %vm344_vm12  ;;  %vm345_vm0 = vcmp.ne.s32.totalorder %v330_v38, 0  ;;  %vm348_vm7 = vcmp.lt.s32.totalorder %v330_v38, 0  ;;  %v358_v50 = vsel %vm4228_vm14, %v355_v29, %v341_v21 }
 0x127   : > { %v1557_v52 = vpop.f32.mrf.mxu1  ;;  %v1494_v4 = vadd.f32 %v1480_v51, %v1417_v63  ;;  %v1418_v9 = vadd.f32 %v1406_v39, %v1327_v0  ;;  %v1573_v10 = vadd.f32 %v3551_v45, %v1496_v1  ;;  %v354_v53 = vadd.s32 6, %v330_v38  ;;  %vm4243_vm9 = vmand %vm348_vm7, %vm345_vm0 }
 0x128   : > { %v3544_v55 = vpop.f32.mrf.mxu0  ;;  %vm361_vm10 = vcmp.lt.s32.totalorder %v358_v50, 4  ;;  %vm2046_vm12 = vcmask 388099   ;;  %vm2047_vm14 = vsmask.f32 7950  ;;  %vm2011_vm7 = vsmask.f32 7440 }
 0x129   : > { %v3552_v56 = vpop.f32.mrf.mxu1  ;;  %v1571_v15 = vadd.f32 %v1557_v52, %v1494_v4  ;;  %v356_v55 = vsel %vm4235_vm15, %v353_v44, %v319_v28  ;;  %v357_v63 = vsel %vm4243_vm9, %v354_v53, %v330_v38  ;;  %vm2010_vm15 = vsmask.f32 3328  ;;  %vm2048_vm0 = vmand %vm2046_vm12, %vm2047_vm14 }
 0x12a   : > { %v1483_v60 = vpop.f32.mrf.mxu0  ;;  %vm359_vm11 = vcmp.lt.s32.totalorder %v356_v55, 4  ;;  %vm360_vm13 = vcmp.lt.s32.totalorder %v357_v63, 4  ;;  %vm2055_vm9 = vmand %vm300_vm8, %vm2010_vm15 }
 0x12b   : > { %v1560_v61 = vpop.f32.mrf.mxu1  ;;  %v1495_v16 = vadd.f32 %v1483_v60, %v1418_v9 }
 0x12c   : > { %v3559_v2 = vpop.f32.mrf.mxu0 }
 0x12d   : > { %v3567_v3 = vpop.f32.mrf.mxu1  ;;  %v1654_v17 = vadd.f32 %v3559_v2, %v1573_v10  ;;  %v1572_v26 = vadd.f32 %v1560_v61, %v1495_v16  ;;  %v2049_v16 = vld [vmem:[#allocation2] sm:$0x8] }
 0x12e   : > { %v1638_v6 = vpop.f32.mrf.mxu0 }
 0x12f   : > { %v1714_v7 = vpop.f32.mrf.mxu1  ;;  %v1652_v22 = vadd.f32 %v1638_v6, %v1571_v15  ;;  %v1730_v27 = vadd.f32 %v3567_v3, %v1654_v17 }
 0x130   : > { %v3560_v11 = vpop.f32.mrf.mxu0 }
 0x131   : > { %v3568_v12 = vpop.f32.mrf.mxu1  ;;  %v1728_v33 = vadd.f32 %v1714_v7, %v1652_v22  ;;  %v2056_v22 = vld [vmem:[#allocation2 + $0xc] sm:$0xf] }
 0x132   : > { %v1641_v19 = vpop.f32.mrf.mxu0 }
 0x133   : > { %v1717_v14 = vpop.f32.mrf.mxu1  ;;  %v1653_v34 = vadd.f32 %v1641_v19, %v1572_v26 }
 0x134   : > { %v3575_v23 = vpop.f32.mrf.mxu0 }
 0x135   : > { %v3583_v24 = vpop.f32.mrf.mxu1  ;;  %v1810_v35 = vadd.f32 %v3575_v23, %v1730_v27  ;;  %v1729_v20 = vadd.f32 %v1717_v14, %v1653_v34 }
 0x136   : > { %v1794_v30 = vpop.f32.mrf.mxu0 }
 0x137   : > { %v1884_v31 = vpop.f32.mrf.mxu1  ;;  %v1808_v39 = vadd.f32 %v1794_v30, %v1728_v33  ;;  %v1900_v43 = vadd.f32 %v3583_v24, %v1810_v35 }
 0x138   : > { %v3576_v36 = vpop.f32.mrf.mxu0 }
 0x139   : > { %v3584_v37 = vpop.f32.mrf.mxu1  ;;  %v1898_v46 = vadd.f32 %v1884_v31, %v1808_v39 }
 0x13a   : > { %v1797_v40 = vpop.f32.mrf.mxu0 }
 0x13b   : > { %v1809_v49 = vadd.f32 %v1797_v40, %v1729_v20  ;;  %v1887_v58 = vpop.f32.mrf.mxu1 }
 0x13c   : > { %v3591_v45 = vpop.f32.mrf.mxu0 }
 0x13d   : > { %v1977_v51 = vadd.f32 %v3591_v45, %v1900_v43  ;;  %v1899_v60 = vadd.f32 %v1887_v58, %v1809_v49  ;;  %v3775_v45 = vld [vmem:[%s4375_s5 + $0x50] sm:$0xff]  }
 0x13e   : > { %v1961_v52 = vpop.f32.mrf.mxu0 }
 0x13f   : > { %v1987_v54 = vadd.f32 %v3163_v47, %v1977_v51  ;;  %v1975_v56 = vadd.f32 %v1961_v52, %v1898_v46 }
 0x140   : > { %v3592_v59 = vpop.f32.mrf.mxu0 }
 0x141   : > { %v1990_v61 = vmax.f32 %v1987_v54, 0.0  ;;  %v1985_v62 = vadd.f32 %v3163_v47, %v1975_v56  ;;  %v3778_v56 = vld [vmem:[%s4375_s5 + $0x48] sm:$0xff]  }
 0x142   : > { %v1964_v0 = vpop.f32.mrf.mxu0 }
 0x143   : > { %v1999_v1 = vsel %vm361_vm10, %v1990_v61, 0.0  ;;  %v1988_v2 = vmax.f32 %v1985_v62, 0.0  ;;  %v1976_v3 = vadd.f32 %v1964_v0, %v1899_v60  ;;  %vm2012_vm10 = vmor %vm2010_vm15, %vm2011_vm7  ;;  %v3780_v61 = vld [vmem:[%s4375_s5 + $0x88] sm:$0xff]   ;;  %v2063_v62 = vld [vmem:[#allocation2 + $0x10] sm:$0x7] }
 0x144   : > { %v3274_v4 = vpack.c.bf16 %v1999_v1, %v1999_v1  ;;  %v3782_v0 = vld [vmem:[%s4375_s5 + $0x30] sm:$0xff]   ;;  %v3783_v1 = vld [vmem:[%s4375_s5 + $0x80] sm:$0xff]  }
 0x145   : > { %v1997_v5 = vsel %vm359_vm11, %v1988_v2, 0.0  ;;  %v1986_v6 = vadd.f32 %v3163_v47, %v1976_v3  ;;  %vm2120_vm11 = vcmask 392192  }
 0x146   : > { %v2033_v7 = vshll.u32 %v3274_v4, 16  ;;  %v2037_v8 = vshrl.u32 %v3274_v4, 16  ;;  %v3272_v9 = vpack.c.bf16 %v1997_v5, %v1997_v5  ;;  %v3784_v4 = vld [vmem:[%s4375_s5 + $0x70] sm:$0xff]  }
 0x147   : > { %v1989_v10 = vmax.f32 %v1986_v6, 0.0 }
 0x148   : > { %v2035_v11 = vrot.slane %v2033_v7, 5  ;;  %v2039_v12 = vrot.slane %v2037_v8, 4  ;;  %v2014_v13 = vshll.u32 %v3272_v9, 16  ;;  %v2017_v15 = vshrl.u32 %v3272_v9, 16 }
 0x149   : > { %v1998_v17 = vsel %vm360_vm13, %v1989_v10, 0.0  ;;  %v3785_v10 = vld [vmem:[%s4375_s5 + $0x78] sm:$0xff]  }
 0x14a   : > { %v2040_v18 = vor.u32 %v2039_v12, %v2035_v11  ;;  %v2016_v19 = vrot.slane %v2014_v13, 5  ;;  %v2019_v14 = vrot.slane %v2017_v15, 4  ;;  %v3273_v21 = vpack.c.bf16 %v1998_v17, %v1998_v17  ;;  %v3786_v15 = vld [vmem:[%s4375_s5 + $0x68] sm:$0xff]  }
 0x14c   : > { %v2041_v23 = vrot.slane %v2040_v18, 4  ;;  %v2020_v24 = vor.u32 %v2019_v14, %v2016_v19  ;;  %v2050_v25 = vsel %vm2048_vm0, %v2016_v19, %v2049_v16  ;;  %v2023_v26 = vshll.u32 %v3273_v21, 16  ;;  %v3788_v19 = vld [vmem:[%s4375_s5 + $0xb8] sm:$0xff]  }
 0x14d   : > { %2051 = vst [vmem:[#allocation2] sm:$0x8] %v2050_v25  ;;  %v2027_v27 = vshrl.u32 %v3273_v21, 16 }
 0x14e   : > { %v2057_v28 = vsel %vm2055_vm9, %v2041_v23, %v2056_v22  ;;  %v2021_v30 = vrot.slane %v2020_v24, 4  ;;  %v2025_v31 = vrot.slane %v2023_v26, 5  ;;  %v3790_v23 = vld [vmem:[%s4375_s5 + $0x60] sm:$0xff]   ;;  %v3791_v26 = vld [vmem:[%s4375_s5 + $0xb0] sm:$0xff]  }
 0x14f   : > { %2058 = vst [vmem:[#allocation2 + $0xc] sm:$0xf] %v2057_v28  ;;  %v2029_v33 = vrot.slane %v2027_v27, 4  ;;  %v3792_v28 = vld [vmem:[%s4375_s5 + $0xa0] sm:$0xff]  }
 0x150   : > { %v2026_v34 = vsel %vm2012_vm10, %v2021_v30, %v2025_v31 }
 0x151   : > { %v2030_v35 = vor.u32 %v2029_v33, %v2025_v31  ;;  %2052 = vst.msk [vmem:[#allocation2 + $0x4] sm:$0xf] %vm300_vm8, %v2026_v34  ;;  %v3793_v31 = vld [vmem:[%s4375_s5 + $0xa8] sm:$0xff]   ;;  %v3794_v34 = vld [vmem:[%s4375_s5 + $0x98] sm:$0xff]  }
 0x153   : > { %v2031_v36 = vrot.slane %v2030_v35, 4 }
 0x154   : > { %v2059_v38 = vld [vmem:[#allocation2] sm:$0xf] }
 0x155   : > { %v2036_v37 = vsel %vm2012_vm10, %v2031_v36, %v2035_v11  ;;  %v3795_v36 = vld [vmem:[%s4375_s5 + $0x90] sm:$0xff]  }
 0x156   : > { %2053 = vst.msk [vmem:[#allocation2 + $0x8] sm:$0xf] %vm300_vm8, %v2036_v37  ;;  %v4255_v20 = vld [vmem:[#allocation2 + $0xc] sm:$0xf]  ;;  %v3796_v37 = vld [vmem:[%s4375_s5 + $0xd0] sm:$0xff]  }
 0x157   : > { %v3226_v24 = vcombine.low %v4255_v20, %v4255_v20 }
 0x158   : > { %v2060_v39 = vld [vmem:[#allocation2 + $0x4] sm:$0xf] }
 0x159   : > { %v3173_v29 = vcombine.low %v2059_v38, %v2060_v39 }
 0x15b   : > { %3609 = vmatprep.mubr.msk.bf16.mxu0 %vm2120_vm11, %v3173_v29  ;;  %v2090_v40 = vshll.u32 %v3173_v29, 16  ;;  %v2088_v48 = vshrl.u32 %v3173_v29, 16  ;;  %v2339_v46 = vrot.slane %v3173_v29, 3  ;;  %v2254_v59 = vrot.slane %v3173_v29, 1  ;;  %v3797_v29 = vld [vmem:[%s4375_s5 + $0xc8] sm:$0xff]  }
 0x15d   : > { %v2061_v41 = vld [vmem:[#allocation2 + $0x8] sm:$0xf]  ;;  %v2092_v43 = vrot.slane %v2090_v40, 1  ;;  %v2424_v5 = vrot.slane %v2088_v48, 3  ;;  %v2425_v6 = vrot.slane %v2090_v40, 4 }
 0x15e   : > { %v3180_v44 = vcombine.low %v2061_v41, %v2061_v41  ;;  %v3174_v47 = vcombine.low %v2061_v41, %v4255_v20  ;;  %v4280_v63 = vcombine.low %v2060_v39, %v2061_v41  ;;  %v3798_v41 = vld [vmem:[%s4375_s5 + $0xc0] sm:$0xff]  }
 0x15f   : > { %v2093_v51 = vor.u32 %v2092_v43, %v2088_v48  ;;  %v2426_v13 = vor.u32 %v2425_v6, %v2424_v5 }
 0x160   : > { %3610 = vmatmul.mubr.msk.bf16.vlgmr.msra.gmra.mxu0 %vm2120_vm11, %v3180_v44  ;;  %v2340_v49 = vrot.slane %v3174_v47, 3  ;;  %v2095_v50 = vshll.u32 %v3174_v47, 16  ;;  %v2099_v54 = vshrl.u32 %v3174_v47, 16  ;;  %v2255_v55 = vrot.slane %v3174_v47, 1 }
 0x161   : > { %3624 = vmatpush3.bf16.msra.mxu0 %v4198_v32  ;;  %v3779_v32 = vld [vmem:[%s4375_s5 + $0x38] sm:$0xff]   ;;  %v2685_v7 = vshrl.u32 %v4280_v63, 16  ;;  %v2688_v8 = vshll.u32 %v4280_v63, 16  ;;  %v2600_v30 = vrot.slane %v4280_v63, 2  ;;  %v2783_v38 = vrot.slane %v4280_v63, 3 }
 0x162   : > { %3625 = vmatprep.subr.bf16.mxu0 %v3775_v45  ;;  %v2341_v52 = vsel %vm670_vm3, %v2339_v46, %v2340_v49  ;;  %v2097_v53 = vrot.slane %v2095_v50, 1  ;;  %v2256_v60 = vsel %vm576_vm1, %v2254_v59, %v2255_v55  ;;  %v2427_v2 = vrot.slane %v2099_v54, 3 }
 0x163   : > { %3629 = vmatprep.mubr.msk.bf16.mxu0 %vm2120_vm11, %v2341_v52  ;;  %v2428_v3 = vrot.slane %v2095_v50, 4  ;;  %v2687_v16 = vrot.slane %v2685_v7, 2  ;;  %v2690_v17 = vrot.slane %v2688_v8, 3 }
 0x164   : > { %v2098_v57 = vsel %vm394_vm2, %v2093_v51, %v2097_v53  ;;  %v2101_v58 = vor.u32 %v2099_v54, %v2097_v53 }
 0x165   : > { %3626 = vmatpush3.bf16.msra.mxu0 %v3775_v45  ;;  %3599 = vmatprep.mubr.msk.bf16.mxu1 %vm2120_vm11, %v2098_v57  ;;  %v2429_v9 = vor.u32 %v2428_v3, %v2427_v2  ;;  %v2691_v22 = vor.u32 %v2690_v17, %v2687_v16 }
 0x166   : > { %3600 = vmatmul.mubr.msk.bf16.vlgmr.msra.gmra.mxu1 %vm2120_vm11, %v2101_v58  ;;  %3627 = vmatprep.subr.bf16.mxu0 %v3778_v56 }
 0x167   : > { %3614 = vmatpush3.bf16.msra.mxu1 %v4207_v42  ;;  %3619 = vmatprep.mubr.msk.bf16.mxu1 %vm2120_vm11, %v2256_v60  ;;  %v4289_v42 = vcombine.low %v4255_v20, %v2063_v62  ;;  %v2430_v18 = vsel %vm764_vm4, %v2426_v13, %v2429_v9 }
 0x168   : > { %3615 = vmatprep.subr.bf16.mxu1 %v3779_v32 }
 0x169   : > { %3628 = vmatpush3.bf16.msra.mxu0 %v3778_v56  ;;  %v2693_v11 = vshrl.u32 %v4289_v42, 16  ;;  %v2696_v12 = vshll.u32 %v4289_v42, 16  ;;  %v2601_v33 = vrot.slane %v4289_v42, 2  ;;  %v2784_v39 = vrot.slane %v4289_v42, 3 }
 0x16a   : > { %3643 = vmatprep.subr.bf16.mxu0 %v3780_v61 }
 0x16b   : > { %3616 = vmatpush3.bf16.msra.mxu1 %v3779_v32  ;;  %v2695_v14 = vrot.slane %v2693_v11, 2  ;;  %v2698_v21 = vrot.slane %v2696_v12, 3  ;;  %v2602_v35 = vsel %vm957_vm5, %v2600_v30, %v2601_v33  ;;  %v2785_v40 = vsel %vm670_vm3, %v2783_v38, %v2784_v39 }
 0x16c   : > { %3630 = vmatmul.mubr.msk.bf16.vlgmr.msra.gmra.mxu0 %vm2120_vm11, %v2340_v49  ;;  %3617 = vmatprep.subr.bf16.mxu1 %v3782_v0 }
 0x16d   : > { %3644 = vmatpush3.bf16.msra.mxu0 %v3780_v61  ;;  %3649 = vmatprep.mubr.msk.bf16.mxu0 %vm2120_vm11, %v4280_v63  ;;  %v2699_v25 = vor.u32 %v2698_v21, %v2695_v14 }
 0x16e   : > { %3645 = vmatprep.subr.bf16.mxu0 %v3783_v1 }
 0x16f   : > { %3618 = vmatpush3.bf16.msra.mxu1 %v3782_v0  ;;  %v2700_v27 = vsel %vm1051_vm6, %v2691_v22, %v2699_v25 }
 0x170   : > { %3633 = vmatprep.subr.bf16.mxu1 %v3784_v4 }
 0x171   : > { %3646 = vmatpush3.bf16.msra.mxu0 %v3783_v1 }
 0x172   : > { %3620 = vmatmul.mubr.msk.bf16.vlgmr.msra.gmra.mxu1 %vm2120_vm11, %v2255_v55  ;;  %3647 = vmatprep.subr.bf16.mxu0 %v3785_v10 }
 0x173   : > { %3634 = vmatpush3.bf16.msra.mxu1 %v3784_v4  ;;  %3639 = vmatprep.mubr.msk.bf16.mxu1 %vm2120_vm11, %v2430_v18 }
 0x174   : > { %3635 = vmatprep.subr.bf16.mxu1 %v3786_v15 }
 0x175   : > { %3648 = vmatpush3.bf16.msra.mxu0 %v3785_v10 }
 0x176   : > { %3663 = vmatprep.subr.bf16.mxu0 %v3788_v19 }
 0x177   : > { %3636 = vmatpush3.bf16.msra.mxu1 %v3786_v15 }
 0x178   : > { %3650 = vmatmul.mubr.msk.bf16.vlgmr.msra.gmra.mxu0 %vm2120_vm11, %v3226_v24  ;;  %3637 = vmatprep.subr.bf16.mxu1 %v3790_v23 }
 0x179   : > { %3664 = vmatpush3.bf16.msra.mxu0 %v3788_v19  ;;  %3669 = vmatprep.mubr.msk.bf16.mxu0 %vm2120_vm11, %v2700_v27  ;;  %v3266_v27 = vld [vmem:[%s4376_s6] ss:$0 sm:$0xff] }
 0x17a   : > { %3665 = vmatprep.subr.bf16.mxu0 %v3791_v26 }
 0x17b   : > { %3638 = vmatpush3.bf16.msra.mxu1 %v3790_v23 }
 0x17c   : > { %3653 = vmatprep.subr.bf16.mxu1 %v3792_v28 }
 0x17d   : > { %3666 = vmatpush3.bf16.msra.mxu0 %v3791_v26 }
 0x17e   : > { %3640 = vmatmul.mubr.msk.bf16.vlgmr.msra.gmra.mxu1 %vm2120_vm11, %v2429_v9  ;;  %3667 = vmatprep.subr.bf16.mxu0 %v3793_v31 }
 0x17f   : > { %3654 = vmatpush3.bf16.msra.mxu1 %v3792_v28  ;;  %3659 = vmatprep.mubr.msk.bf16.mxu1 %vm2120_vm11, %v2602_v35 }
 0x180   : > { %3655 = vmatprep.subr.bf16.mxu1 %v3794_v34 }
 0x181   : > { %3668 = vmatpush3.bf16.msra.mxu0 %v3793_v31 }
 0x183   : > { %3656 = vmatpush3.bf16.msra.mxu1 %v3794_v34 }
 0x184   : > { %3670 = vmatmul.mubr.msk.bf16.vlgmr.msra.gmra.mxu0 %vm2120_vm11, %v2699_v25  ;;  %3657 = vmatprep.subr.bf16.mxu1 %v3795_v36 }
 0x187   : > { %3658 = vmatpush3.bf16.msra.mxu1 %v3795_v36 }
 0x188   : > { %3673 = vmatprep.subr.bf16.mxu1 %v3796_v37 }
 0x18a   : > { %3660 = vmatmul.mubr.msk.bf16.vlgmr.msra.gmra.mxu1 %vm2120_vm11, %v2601_v33 }
 0x18b   : > { %3674 = vmatpush3.bf16.msra.mxu1 %v3796_v37  ;;  %3679 = vmatprep.mubr.msk.bf16.mxu1 %vm2120_vm11, %v2785_v40 }
 0x18c   : > { %3675 = vmatprep.subr.bf16.mxu1 %v3797_v29 }
 0x18f   : > { %3676 = vmatpush3.bf16.msra.mxu1 %v3797_v29 }
 0x190   : > { %3677 = vmatprep.subr.bf16.mxu1 %v3798_v41 }
 0x193   : > { %3678 = vmatpush3.bf16.msra.mxu1 %v3798_v41 }
 0x196   : > { %3680 = vmatmul.mubr.msk.bf16.vlgmr.msra.gmra.mxu1 %vm2120_vm11, %v2784_v39 }
 0x220   : > { %v3611_v20 = vpop.f32.mrf.mxu0 }
 0x222   : > { %v2233_v43 = vpop.f32.mrf.mxu0 }
 0x224   : > { %v3612_v44 = vpop.f32.mrf.mxu0 }
 0x226   : > { %v3601_v45 = vpop.f32.mrf.mxu1  ;;  %v2236_v48 = vpop.f32.mrf.mxu0 }
 0x227   : > { %v2242_v0 = vadd.f32 %v3611_v20, %v3601_v45 }
 0x228   : > { %v2161_v47 = vpop.f32.mrf.mxu1 }
 0x229   : > { %v2234_v2 = vadd.f32 %v2233_v43, %v2161_v47 }
 0x22a   : > { %v3602_v46 = vpop.f32.mrf.mxu1 }
 0x22c   : > { %v3631_v49 = vpop.f32.mrf.mxu0  ;;  %v2164_v51 = vpop.f32.mrf.mxu1 }
 0x22d   : > { %v2237_v7 = vadd.f32 %v2236_v48, %v2164_v51 }
 0x22e   : > { %v2400_v50 = vpop.f32.mrf.mxu0 }
 0x230   : > { %v3632_v52 = vpop.f32.mrf.mxu0 }
 0x232   : > { %v3621_v53 = vpop.f32.mrf.mxu1  ;;  %v2403_v55 = vpop.f32.mrf.mxu0 }
 0x233   : > { %v2331_v3 = vadd.f32 %v3621_v53, %v2242_v0 }
 0x234   : > { %v2315_v54 = vpop.f32.mrf.mxu1 }
 0x235   : > { %v2329_v4 = vadd.f32 %v2315_v54, %v2234_v2  ;;  %v2416_v8 = vadd.f32 %v3631_v49, %v2331_v3 }
 0x236   : > { %v3622_v56 = vpop.f32.mrf.mxu1 }
 0x237   : > { %v2414_v12 = vadd.f32 %v2400_v50, %v2329_v4 }
 0x238   : > { %v3651_v57 = vpop.f32.mrf.mxu0  ;;  %v2318_v59 = vpop.f32.mrf.mxu1 }
 0x239   : > { %v2330_v10 = vadd.f32 %v2318_v59, %v2237_v7 }
 0x23a   : > { %v2573_v58 = vpop.f32.mrf.mxu0 }
 0x23b   : > { %v2415_v17 = vadd.f32 %v2403_v55, %v2330_v10 }
 0x23c   : > { %v3652_v32 = vpop.f32.mrf.mxu0 }
 0x23e   : > { %v3641_v60 = vpop.f32.mrf.mxu1  ;;  %v2576_v62 = vpop.f32.mrf.mxu0 }
 0x23f   : > { %v2505_v11 = vadd.f32 %v3641_v60, %v2416_v8 }
 0x240   : > { %v2489_v61 = vpop.f32.mrf.mxu1 }
 0x241   : > { %v2503_v15 = vadd.f32 %v2489_v61, %v2414_v12  ;;  %v2589_v18 = vadd.f32 %v3651_v57, %v2505_v11 }
 0x242   : > { %v3642_v63 = vpop.f32.mrf.mxu1 }
 0x243   : > { %v2587_v21 = vadd.f32 %v2573_v58, %v2503_v15 }
 0x244   : > { %v3671_v1 = vpop.f32.mrf.mxu0  ;;  %v2492_v5 = vpop.f32.mrf.mxu1 }
 0x245   : > { %v2504_v19 = vadd.f32 %v2492_v5, %v2415_v17 }
 0x246   : > { %v2759_v42 = vpop.f32.mrf.mxu0 }
 0x247   : > { %v2588_v24 = vadd.f32 %v2576_v62, %v2504_v19 }
 0x248   : > { %v3672_v6 = vpop.f32.mrf.mxu0 }
 0x24a   : > { %v3661_v9 = vpop.f32.mrf.mxu1  ;;  %v2762_v36 = vpop.f32.mrf.mxu0 }
 0x24b   : > { %v2677_v14 = vadd.f32 %v3661_v9, %v2589_v18 }
 0x24c   : > { %v2661_v13 = vpop.f32.mrf.mxu1 }
 0x24d   : > { %v2675_v22 = vadd.f32 %v2661_v13, %v2587_v21  ;;  %v2775_v25 = vadd.f32 %v3671_v1, %v2677_v14 }
 0x24e   : > { %v3662_v16 = vpop.f32.mrf.mxu1 }
 0x24f   : > { %v2773_v31 = vadd.f32 %v2759_v42, %v2675_v22 }
 0x250   : > { %v2664_v23 = vpop.f32.mrf.mxu1 }
 0x251   : > { %v2676_v28 = vadd.f32 %v2664_v23, %v2588_v24 }
 0x253   : > { %v2774_v29 = vadd.f32 %v2762_v36, %v2676_v28 }
 0x256   : > { %v3681_v26 = vpop.f32.mrf.mxu1 }
 0x257   : > { %v2860_v30 = vadd.f32 %v3681_v26, %v2775_v25 }
 0x258   : > { %v2844_v33 = vpop.f32.mrf.mxu1 }
 0x259   : > { %v2870_v34 = vadd.f32 %v3266_v27, %v2860_v30  ;;  %v2858_v35 = vadd.f32 %v2844_v33, %v2773_v31 }
 0x25a   : > { %v3682_v37 = vpop.f32.mrf.mxu1 }
 0x25b   : > { %v2873_v38 = vmax.f32 %v2870_v34, 0.0  ;;  %v2868_v39 = vadd.f32 %v3266_v27, %v2858_v35 }
 0x25c   : > { %v2847_v40 = vpop.f32.mrf.mxu1 }
 0x25d   : > { %v3277_v41 = vpack.c.bf16 %v2873_v38, %v2873_v38  ;;  %v2871_v20 = vmax.f32 %v2868_v39, 0.0  ;;  %v2859_v43 = vadd.f32 %v2847_v40, %v2774_v29 }
 0x25f   : > { %2889 = vst.msk [vmem:[%s298_s14 + $0x8] sm:$0xf] %vm300_vm8, %v3277_v41  ;;  %v3275_v44 = vpack.c.bf16 %v2871_v20, %v2871_v20  ;;  %v2869_v45 = vadd.f32 %v3266_v27, %v2859_v43 }
 0x261   : > { %2887 = vst.msk [vmem:[%s298_s14] sm:$0xf] %vm300_vm8, %v3275_v44  ;;  %v2872_v47 = vmax.f32 %v2869_v45, 0.0 }
 0x263   : > { %v3276_v48 = vpack.c.bf16 %v2872_v47, %v2872_v47 }
 0x265   : > { %2888 = vst.msk [vmem:[%s298_s14 + $0x4] sm:$0xf] %vm300_vm8, %v3276_v48 }
 0x266 PF: > { %s17_s24 = sadd.s32 1, %s3805_s24  }
 0x267   : > { %p14_p4 = scmp.ge.s32.totalorder %s17_s24, 4  }
 0x269   :  { %16 = sbr.rel (!%p14_p4) target bundleno = 1 (0x1), region = 105 }

// kernel: geopose_unet_forward.9
= control target key start
LH: loop header
LB: loop body
LE: loop exit
PB: predicated region body
PF: predicated region fallthrough
CT: control target
= control target key end

     0   :  { %s7893_s11 = smov 0   ;;  %s10634_s0 = inlined_call_operand.vmem [shape: bf16[2,102,48], index: 0, kind: input, shape index: {}]   ;;  %s10635_s1 = inlined_call_operand.vmem [shape: bf16[2,102,16], index: 1, kind: input, shape index: {}]   ;;  %s10636_s2 = inlined_call_operand.vmem [shape: bf16[9,48,24], index: 2, kind: input, shape index: {}]   ;;  %s10637_s3 = inlined_call_operand.vmem [shape: bf16[9,16,24], index: 3, kind: input, shape index: {}]   ;;  %s10638_s4 = inlined_call_operand.vmem [shape: f32[1,24], index: 4, kind: input, shape index: {}]   ;;  %s10639_s5 = inlined_call_operand.vmem [shape: bf16[9,24,24], index: 5, kind: input, shape index: {}]   ;;  %s10640_s6 = inlined_call_operand.vmem [shape: f32[1,24], index: 6, kind: input, shape index: {}]   ;;  %s10641_s7 = inlined_call_operand.vmem [shape: bf16[9,24,1], index: 7, kind: input, shape index: {}]   ;;  %s10642_s8 = inlined_call_operand.<no memory space> [shape: f32[1,1], index: 8, kind: input, shape index: {}]   ;;  %s10643_s9 = inlined_call_operand.vmem [shape: f32[2,80,1], index: 9, kind: output, shape index: {}]  }
   0x1   :  { %v14_v0 = vstv %s10642_s8 }
   0x2   :  { %15 = vst [vmem:[#allocation4] sm:$0x1] %v14_v0 }
   0x3 LB: > { %s6082_s12 = sadd.s32 4294967295, %s7835_s11   ;;  %p6086_p0 = scmp.ge.s32.totalorder %s7835_s11, 1  ;;  %s7835_s11 = sphi %s7893_s11, %s21_s11  }
   0x4   : > { %p299_p1 = scmp.lt.s32.totalorder %s7835_s11, 3 }
   0x6   : > { %p300_p2 = pnand %p6086_p0, %p299_p1 }
   0x7   : > { %p340_p3 = scmp.lt.s32.totalorder (!%p300_p2), %s6082_s12, 1 }
   0x8   : > { %303 = sbr.rel (%p300_p2) target bundleno = 1375 (0x55f), region = 56 }
   0xd   : > { %v7704_v1 = vld [vmem:[%s10636_s2 + $0x10] sm:$0xff]   ;;  %v7837_v2 = vmov 0.0   ;;  %v7705_v3 = vld [vmem:[%s10636_s2 + $0x28] sm:$0xff]   ;;  %vm10650_vm0 = vmmov 0   ;;  %v7707_v5 = vld [vmem:[%s10636_s2 + $0x20] sm:$0xff]   ;;  %s10902_s12 = smov (!%p340_p3, %s6082_s12), 1 }
   0xe   : > { %6833 = vmatprep.subr.bf16.mxu1 %v7837_v2  ;;  %6807 = vmatprep.subr.bf16.mxu0 %v7837_v2  ;;  %v7706_v4 = vld [vmem:[%s10636_s2 + $0x8] sm:$0xff]   ;;  %v7708_v6 = vld [vmem:[%s10636_s2] sm:$0xff]   ;;  %v7709_v7 = vld [vmem:[%s10636_s2 + $0x18] sm:$0xff]   ;;  %s7671_s24 = smul.u32 52, %s10902_s12  ;;  %vm682_vm1 = vcmask 392192   ;;  %vm10646_vm4 = vcmask 1045504  }
   0xf   : > { %6834 = vmatpush3.bf16.msra.mxu1 %v7704_v1  ;;  %6839 = vmatprep.mubr.msk.bf16.mxu1 %vm10650_vm0, %v7837_v2  ;;  %v7716_v8 = vld [vmem:[%s10636_s2 + $0x58] sm:$0xff]   ;;  %vm10649_vm2 = vsmask.f32 7424  ;;  %v7719_v22 = vld [vmem:[%s10636_s2 + $0x50] sm:$0xff]   ;;  %v7715_v24 = vld [vmem:[%s10636_s2 + $0x40] sm:$0xff]   ;;  %vm10648_vm5 = vcmask 1046528  }
  0x10   : > { %6808 = vmatpush3.bf16.msra.mxu0 %v7705_v3  ;;  %6835 = vmatprep.subr.bf16.mxu1 %v7837_v2  ;;  %s7937_s27 = scalar_lea.vmem %s10634_s0, %s7671_s24  ;;  %v7722_v31 = vld [vmem:[%s10636_s2 + $0x48] sm:$0xff]   ;;  %v7717_v37 = vld [vmem:[%s10636_s2 + $0x38] sm:$0xff]   ;;  %v7721_v41 = vld [vmem:[%s10636_s2 + $0x30] sm:$0xff]   ;;  %vm10647_vm3 = vsmask.f32 5376  ;;  %vm10645_vm6 = vcmask 1044480   ;;  %s8131_s25 = scalar_lea.vmem %s10635_s1, %s7671_s24 }
  0x11   : > { %6809 = vmatprep.subr.bf16.mxu0 %v7837_v2  ;;  %6813 = vmatprep.mubr.msk.bf16.mxu0 %vm10650_vm0, %v7837_v2  ;;  %v565_v9 = vld [vmem:[%s7937_s27] sm:$0xf]  ;;  %v7944_v10 = vld [vmem:[%s7937_s27 + $0x4] sm:$0xf]  ;;  %v7947_v11 = vld [vmem:[%s7937_s27 + $0x8] sm:$0xf] }
  0x12   : > { %v7950_v12 = vld [vmem:[%s7937_s27 + $0xc] sm:$0xf]  ;;  %v7953_v13 = vld [vmem:[%s7937_s27 + $0x10] sm:$0xf]  ;;  %v7956_v14 = vld [vmem:[%s7937_s27 + $0x14] sm:$0xf]  ;;  %v7959_v15 = vcombine.low %v565_v9, %v7944_v10  ;;  %v8054_v55 = vcombine.low %v7944_v10, %v7947_v11 }
  0x13   : > { %6836 = vmatpush3.bf16.msra.mxu1 %v7706_v4  ;;  %v7963_v16 = vcombine.low %v7947_v11, %v7950_v12  ;;  %v7968_v17 = vcombine.low %v7953_v13, %v7956_v14  ;;  %v7986_v25 = vld [vmem:[%s7937_s27 + $0x18] sm:$0xf]  ;;  %v7991_v29 = vld [vmem:[%s7937_s27 + $0x1c] sm:$0xf]  ;;  %v7998_v32 = vld [vmem:[%s7937_s27 + $0x28] sm:$0xf]  ;;  %v8068_v60 = vcombine.low %v7950_v12, %v7953_v13 }
  0x14   : > { %6810 = vmatpush3.bf16.msra.mxu0 %v7707_v5  ;;  %6837 = vmatprep.subr.bf16.mxu1 %v7837_v2  ;;  %v621_v18 = vshrl.u32 %v7959_v15, 16  ;;  %v623_v19 = vshll.u32 %v7959_v15, 16  ;;  %v8003_v33 = vcombine.low %v7986_v25, %v7991_v29  ;;  %v8007_v34 = vld [vmem:[%s7937_s27 + $0x2c] sm:$0xf]  ;;  %v8031_v43 = vld [vmem:[%s7937_s27 + $0x20] sm:$0xf]  ;;  %v8059_v56 = vcombine.low %v7998_v32, %v7998_v32 }
  0x15   : > { %6811 = vmatprep.subr.bf16.mxu0 %v7837_v2  ;;  %v628_v20 = vshll.u32 %v7963_v16, 16  ;;  %v632_v27 = vshrl.u32 %v7963_v16, 16  ;;  %v636_v28 = vshll.u32 %v7968_v17, 16  ;;  %v8016_v38 = vcombine.low %v7998_v32, %v8007_v34  ;;  %v8034_v44 = vld [vmem:[%s7937_s27 + $0x24] sm:$0xf]  ;;  %s7672_s29 = smul.u32 80, %s10902_s12 }
  0x16   : > { %v625_v21 = vrot.slane %v623_v19, 1  ;;  %v640_v39 = vshrl.u32 %v7968_v17, 16  ;;  %v644_v40 = vshll.u32 %v8003_v33, 16  ;;  %v8042_v47 = vcombine.low %v8031_v43, %v8034_v44 }
  0x17   : > { %6838 = vmatpush3.bf16.msra.mxu1 %v7708_v6  ;;  %v630_v23 = vrot.slane %v628_v20, 1  ;;  %v638_v36 = vrot.slane %v636_v28, 1  ;;  %v648_v49 = vshrl.u32 %v8003_v33, 16  ;;  %v1608_v51 = vrot.slane %v628_v20, 3  ;;  %s10585_s13 = scalar_lea.vmem %s10643_s9, %s7672_s29 }
  0x18   : > { %6812 = vmatpush3.bf16.msra.mxu0 %v7709_v7  ;;  %6885 = vmatprep.subr.bf16.mxu1 %v7837_v2  ;;  %v626_v26 = vor.u32 %v625_v21, %v621_v18  ;;  %v646_v46 = vrot.slane %v644_v40, 1  ;;  %v652_v50 = vshll.u32 %v8042_v47, 16  ;;  %v1607_v52 = vrot.slane %v632_v27, 2  ;;  %v8087_v20 = vld [vmem:[%s7937_s27 + $0x30] ss:$0 sps:$4 sm:$0x77]  }
  0x19   : > { %6859 = vmatprep.subr.bf16.mxu0 %v7837_v2  ;;  %v634_v35 = vor.u32 %v632_v27, %v630_v23  ;;  %v642_v45 = vor.u32 %v640_v39, %v638_v36  ;;  %v1611_v53 = vrot.slane %v636_v28, 3  ;;  %v1610_v54 = vrot.slane %v640_v39, 2 }
  0x1a   : > { %6840 = vmatmul.mubr.msk.bf16.vlgmr.msra.gmra.mxu1 %vm682_vm1, %v7959_v15  ;;  %v631_v30 = vsel %vm10649_vm2, %v626_v26, %v630_v23  ;;  %v650_v57 = vor.u32 %v648_v49, %v646_v46  ;;  %v654_v58 = vrot.slane %v652_v50, 1  ;;  %v656_v59 = vshrl.u32 %v8042_v47, 16 }
  0x1b   : > { %6886 = vmatpush3.bf16.msra.mxu1 %v7716_v8  ;;  %6843 = vmatprep.mubr.msk.bf16.mxu1 %vm10650_vm0, %v7837_v2  ;;  %v639_v42 = vsel %vm10649_vm2, %v634_v35, %v638_v36  ;;  %v647_v48 = vsel %vm10649_vm2, %v642_v45, %v646_v46  ;;  %v1609_v61 = vor.u32 %v1608_v51, %v1607_v52  ;;  %v660_v63 = vshll.u32 %v8059_v56, 16 }
  0x1c   : > { %6887 = vmatprep.subr.bf16.mxu1 %v7837_v2  ;;  %6814 = vmatmul.mubr.msk.bf16.vlgmr.msra.gmra.mxu0 %vm682_vm1, %v631_v30  ;;  %v1612_v62 = vor.u32 %v1611_v53, %v1610_v54  ;;  %v1022_v0 = vrot.slane %v8054_v55, 1  ;;  %v1472_v1 = vrot.slane %v7963_v16, 2  ;;  %v1473_v3 = vrot.slane %v7968_v17, 2 }
  0x1d   : > { %6860 = vmatpush3.bf16.msra.mxu0 %v7715_v24  ;;  %6817 = vmatprep.mubr.msk.bf16.mxu0 %vm10650_vm0, %v7837_v2  ;;  %v655_v4 = vsel %vm10649_vm2, %v650_v57, %v654_v58  ;;  %v1614_v6 = vrot.slane %v648_v49, 2  ;;  %v1615_v7 = vrot.slane %v644_v40, 3  ;;  %v658_v8 = vor.u32 %v656_v59, %v654_v58  ;;  %v7727_v49 = vld [vmem:[%s10636_s2 + $0x88] sm:$0xff]  }
  0x1e   : > { %6861 = vmatprep.subr.bf16.mxu0 %v7837_v2  ;;  %v8078_v5 = vsel %vm10647_vm3, %v1609_v61, %v1612_v62  ;;  %v8081_v9 = vsel %vm10646_vm4, %v1472_v1, %v1473_v3  ;;  %v1475_v10 = vrot.slane %v8003_v33, 2  ;;  %v1618_v11 = vrot.slane %v656_v59, 2 }
  0x1f   : > { %6888 = vmatpush3.bf16.msra.mxu1 %v7719_v22  ;;  %v1616_v12 = vor.u32 %v1615_v7, %v1614_v6  ;;  %v1619_v13 = vrot.slane %v652_v50, 3  ;;  %v1477_v18 = vrot.slane %v8042_v47, 2  ;;  %v1623_v19 = vshrl.u32 %v8016_v38, 16  ;;  %v7734_v7 = vld [vmem:[%s10636_s2 + $0x78] sm:$0xff]  }
  0x20   : > { %6889 = vmatprep.subr.bf16.mxu1 %v7837_v2  ;;  %v662_v21 = vrot.slane %v660_v63, 1  ;;  %v8091_v22 = vsel %vm10646_vm4, %v1473_v3, %v1475_v10  ;;  %v1626_v23 = vshll.u32 %v8016_v38, 16  ;;  %v1479_v24 = vrot.slane %v8016_v38, 2  ;;  %v8156_v63 = vld [vmem:[%s8131_s25 + $0x4] sm:$0xf] }
  0x21   : > { %6862 = vmatpush3.bf16.msra.mxu0 %v7717_v37  ;;  %v8098_v26 = vsel %vm10647_vm3, %v1612_v62, %v1616_v12  ;;  %v1620_v27 = vor.u32 %v1619_v13, %v1618_v11  ;;  %v8101_v28 = vsel %vm10646_vm4, %v1475_v10, %v1477_v18  ;;  %v1625_v30 = vrot.slane %v1623_v19, 2 }
  0x22   : > { %6844 = vmatmul.mubr.msk.bf16.gmra.mxu1 %vm682_vm1, %v7963_v16  ;;  %6863 = vmatprep.subr.bf16.mxu0 %v7837_v2  ;;  %v8106_v35 = vsel %vm10646_vm4, %v1477_v18, %v1479_v24  ;;  %v1632_v36 = vshrl.u32 %v8087_v20, 16  ;;  %v1635_v37 = vshll.u32 %v8087_v20, 16  ;;  %v1023_v39 = vrot.slane %v8068_v60, 1 }
  0x23   : > { %6847 = vmatprep.mubr.msk.bf16.mxu1 %vm10650_vm0, %v7837_v2  ;;  %6890 = vmatpush3.bf16.msra.mxu1 %v7722_v31  ;;  %v1628_v31 = vrot.slane %v1626_v23, 3  ;;  %v8114_v40 = vsel %vm10647_vm3, %v1616_v12, %v1620_v27  ;;  %v1764_v51 = vrot.slane %v7963_v16, 3  ;;  %v1765_v52 = vrot.slane %v7968_v17, 3  ;;  %v7730_v12 = vld [vmem:[%s10636_s2 + $0x68] sm:$0xff]  }
  0x24   : > { %6937 = vmatprep.subr.bf16.mxu1 %v7837_v2  ;;  %6818 = vmatmul.mubr.msk.bf16.gmra.mxu0 %vm682_vm1, %v639_v42  ;;  %v1634_v45 = vrot.slane %v1632_v36, 2  ;;  %v1637_v46 = vrot.slane %v1635_v37, 3  ;;  %v8135_v53 = vcombine.low %v7956_v14, %v7986_v25  ;;  %v1024_v58 = vsel %vm10648_vm5, %v1022_v0, %v1023_v39  ;;  %v7731_v25 = vld [vmem:[%s10636_s2 + $0x80] sm:$0xff]   ;;  %v8159_v0 = vld [vmem:[%s8131_s25 + $0x8] sm:$0xf] }
  0x25   : > { %6821 = vmatprep.mubr.msk.bf16.mxu0 %vm10650_vm0, %v7837_v2  ;;  %6864 = vmatpush3.bf16.msra.mxu0 %v7721_v41  ;;  %v1481_v41 = vrot.slane %v8087_v20, 2  ;;  %v1629_v42 = vor.u32 %v1628_v31, %v1625_v30  ;;  %v8142_v59 = vsel %vm10645_vm6, %v1764_v51, %v1765_v52  ;;  %v880_v61 = vrot.slane %v7959_v15, 1 }
  0x26   : > { %6911 = vmatprep.subr.bf16.mxu0 %v7837_v2  ;;  %v1638_v57 = vor.u32 %v1637_v46, %v1634_v45  ;;  %v881_v14 = vrot.slane %v7963_v16, 1  ;;  %v1025_v15 = vrot.slane %v8135_v53, 1  ;;  %v8165_v1 = vcombine.low %v8156_v63, %v8159_v0  ;;  %v7726_v16 = vld [vmem:[%s10636_s2 + $0x70] sm:$0xff]  }
  0x27   : > { %v8122_v50 = vsel %vm10646_vm4, %v1479_v24, %v1481_v41  ;;  %v8138_v54 = vsel %vm10647_vm3, %v1620_v27, %v1629_v42  ;;  %v1767_v3 = vrot.slane %v8003_v33, 3  ;;  %v883_v11 = vrot.slane %v7968_v17, 1 }
  0x28   : > { %v8147_v62 = vsel %vm10647_vm3, %v1629_v42, %v1638_v57  ;;  %v882_v6 = vsel %vm10648_vm5, %v880_v61, %v881_v14  ;;  %v1026_v10 = vsel %vm10648_vm5, %v1023_v39, %v1025_v15  ;;  %v8210_v19 = vcombine.low %v8034_v44, %v7998_v32  ;;  %v7736_v61 = vld [vmem:[%s10636_s2 + $0xb8] sm:$0xff]  }
  0x29   : > { %v884_v18 = vsel %vm10648_vm5, %v881_v14, %v883_v11  ;;  %v885_v23 = vrot.slane %v8003_v33, 1  ;;  %v1771_v32 = vrot.slane %v8016_v38, 3  ;;  %v8231_v30 = vcombine.low %v8007_v34, %v8007_v34 }
  0x2a   : > { %6848 = vmatmul.mubr.msk.bf16.gmra.mxu1 %vm682_vm1, %v7968_v17  ;;  %v7732_v17 = vld [vmem:[%s10636_s2 + $0x60] sm:$0xff]   ;;  %v1029_v24 = vrot.slane %v8210_v19, 1  ;;  %v887_v38 = vrot.slane %v8042_v47, 1  ;;  %v1773_v37 = vrot.slane %v8087_v20, 3  ;;  %v1158_v41 = vshrl.u32 %v8054_v55, 16 }
  0x2b   : > { %6851 = vmatprep.mubr.msk.bf16.mxu1 %vm10650_vm0, %v7837_v2  ;;  %v1031_v31 = vrot.slane %v8231_v30, 1  ;;  %v1161_v42 = vshll.u32 %v8054_v55, 16  ;;  %v1166_v45 = vshrl.u32 %v8068_v60, 16  ;;  %v1169_v20 = vshll.u32 %v8068_v60, 16 }
  0x2c   : > { %6822 = vmatmul.mubr.msk.bf16.gmra.mxu0 %vm682_vm1, %v647_v48  ;;  %v663_v48 = vsel %vm10649_vm2, %v658_v8, %v662_v21  ;;  %v8183_v8 = vcombine.low %v7991_v29, %v8031_v43  ;;  %v1769_v43 = vrot.slane %v8042_v47, 3  ;;  %v888_v36 = vsel %vm10648_vm5, %v885_v23, %v887_v38 }
  0x2d   : > { %6825 = vmatprep.mubr.msk.bf16.mxu0 %vm10650_vm0, %v7837_v2  ;;  %v1032_v34 = vsel %vm10648_vm5, %v1029_v24, %v1031_v31  ;;  %v8245_v39 = vsel %vm10645_vm6, %v1771_v32, %v1773_v37  ;;  %v1334_v46 = vrot.slane %v8054_v55, 2  ;;  %v1163_v51 = vrot.slane %v1161_v42, 2 }
  0x2e   : > { %v1027_v29 = vrot.slane %v8183_v8, 1  ;;  %v8205_v13 = vsel %vm10645_vm6, %v1767_v3, %v1769_v43  ;;  %v8225_v44 = vsel %vm10645_vm6, %v1769_v43, %v1771_v32  ;;  %v1171_v57 = vrot.slane %v1169_v20, 2 }
  0x2f   : > { %v1175_v14 = vshrl.u32 %v8135_v53, 16  ;;  %vm10644_vm7 = vsmask.f32 6400  ;;  %v1187_v32 = vshll.u32 %v8183_v8, 16  ;;  %vm1937_vm8 = vcmask 130048  }
  0x30   : > { %v1028_v21 = vsel %vm10648_vm5, %v1025_v15, %v1027_v29  ;;  %v1030_v27 = vsel %vm10648_vm5, %v1027_v29, %v1029_v24  ;;  %v8272_v15 = vld [vmem:[%s8131_s25 + $0xc] sm:$0xf]  ;;  %v7737_v24 = vld [vmem:[%s10636_s2 + $0x98] sm:$0xff]   ;;  %vm10652_vm9 = vcmask 191488   ;;  %vm10653_vm10 = vcmask 1043456  }
  0x31   : > { %v7740_v29 = vld [vmem:[%s10636_s2 + $0xa8] sm:$0xff]   ;;  %vm369_vm11 = vcmask 190464  }
  0x32   : > { %6852 = vmatmul.mubr.msk.bf16.gmra.mxu1 %vm682_vm1, %v8003_v33  ;;  %v886_v33 = vsel %vm10648_vm5, %v883_v11, %v885_v23 }
  0x33   : > { %6855 = vmatprep.mubr.msk.bf16.mxu1 %vm10650_vm0, %v7837_v2 }
  0x34   : > { %6826 = vmatmul.mubr.msk.bf16.gmra.mxu0 %vm682_vm1, %v655_v4  ;;  %v8175_v4 = vsel %vm10645_vm6, %v1765_v52, %v1767_v3  ;;  %v1168_v52 = vrot.slane %v1166_v45, 1  ;;  %v1337_v3 = vrot.slane %v8135_v53, 2 }
  0x35   : > { %6829 = vmatprep.mubr.msk.bf16.mxu0 %vm10650_vm0, %v7837_v2 }
  0x3a   : > { %6856 = vmatmul.mubr.msk.bf16.gmra.mxu1 %vm682_vm1, %v8042_v47  ;;  %v889_v47 = vrot.slane %v8059_v56, 1  ;;  %v1335_v56 = vrot.slane %v8068_v60, 2  ;;  %v1172_v60 = vor.u32 %v1171_v57, %v1168_v52 }
  0x3b   : > { %6891 = vmatprep.mubr.msk.bf16.mxu1 %vm10650_vm0, %v7837_v2 }
  0x3c   : > { %6830 = vmatmul.mubr.msk.bf16.gmra.mxu0 %vm682_vm1, %v663_v48  ;;  %v890_v48 = vsel %vm10648_vm5, %v887_v38, %v889_v47  ;;  %v1339_v38 = vrot.slane %v8183_v8, 2  ;;  %v1189_v47 = vrot.slane %v1187_v32, 2 }
  0x3d   : > { %6865 = vmatprep.mubr.msk.bf16.mxu0 %vm10650_vm0, %v7837_v2 }
  0x3e   : > { %v1340_v42 = vsel %vm10646_vm4, %v1337_v3, %v1339_v38 }
  0x42   : > { %6892 = vmatmul.mubr.msk.bf16.vlgmr.msra.gmra.mxu1 %vm682_vm1, %v1024_v58  ;;  %v1336_v58 = vsel %vm10646_vm4, %v1334_v46, %v1335_v56 }
  0x43   : > { %6938 = vmatpush3.bf16.msra.mxu1 %v7727_v49  ;;  %6895 = vmatprep.mubr.msk.bf16.mxu1 %vm10650_vm0, %v7837_v2  ;;  %v1160_v49 = vrot.slane %v1158_v41, 1  ;;  %v7739_v41 = vld [vmem:[%s10636_s2 + $0x90] sm:$0xff]  }
  0x44   : > { %6939 = vmatprep.subr.bf16.mxu1 %v7837_v2  ;;  %6866 = vmatmul.mubr.msk.bf16.vlgmr.msra.gmra.mxu0 %vm682_vm1, %v882_v6 }
  0x45   : > { %6912 = vmatpush3.bf16.msra.mxu0 %v7726_v16  ;;  %6869 = vmatprep.mubr.msk.bf16.mxu0 %vm10650_vm0, %v7837_v2  ;;  %v1164_v55 = vor.u32 %v1163_v51, %v1160_v49  ;;  %v7738_v16 = vld [vmem:[%s10636_s2 + $0xb0] sm:$0xff]   ;;  %v1341_v51 = vrot.slane %v8210_v19, 2 }
  0x46   : > { %6913 = vmatprep.subr.bf16.mxu0 %v7837_v2 }
  0x47   : > { %6940 = vmatpush3.bf16.msra.mxu1 %v7731_v25  ;;  %v1178_v25 = vshll.u32 %v8135_v53, 16  ;;  %v1173_v6 = vsel %vm10644_vm7, %v1164_v55, %v1172_v60  ;;  %v1338_v53 = vsel %vm10646_vm4, %v1335_v56, %v1337_v3  ;;  %v1193_v56 = vshrl.u32 %v8210_v19, 16 }
  0x48   : > { %6941 = vmatprep.subr.bf16.mxu1 %v7837_v2  ;;  %v1342_v55 = vsel %vm10646_vm4, %v1339_v38, %v1341_v51  ;;  %v1343_v3 = vrot.slane %v8231_v30, 2 }
  0x49   : > { %6914 = vmatpush3.bf16.msra.mxu0 %v7730_v12  ;;  %v1180_v11 = vrot.slane %v1178_v25, 2  ;;  %v8287_v12 = vcombine.low %v8159_v0, %v8272_v15  ;;  %v8300_v0 = vld [vmem:[%s8131_s25 + $0x14] sm:$0xf] }
  0x4a   : > { %6896 = vmatmul.mubr.msk.bf16.gmra.mxu1 %vm682_vm1, %v1026_v10  ;;  %6915 = vmatprep.subr.bf16.mxu0 %v7837_v2  ;;  %v1177_v10 = vrot.slane %v1175_v14, 1  ;;  %v1205_v14 = vshll.u32 %v8231_v30, 16 }
  0x4b   : > { %6899 = vmatprep.mubr.msk.bf16.mxu1 %vm10650_vm0, %v7837_v2  ;;  %6942 = vmatpush3.bf16.msra.mxu1 %v7734_v7  ;;  %v7735_v7 = vld [vmem:[%s10636_s2 + $0xa0] sm:$0xff]   ;;  %v2048_v43 = vshll.u32 %v8287_v12, 16 }
  0x4c   : > { %6989 = vmatprep.subr.bf16.mxu1 %v7837_v2  ;;  %6870 = vmatmul.mubr.msk.bf16.gmra.mxu0 %vm682_vm1, %v884_v18  ;;  %v1184_v18 = vshrl.u32 %v8183_v8, 16  ;;  %v1181_v23 = vor.u32 %v1180_v11, %v1177_v10  ;;  %v2433_v10 = vshrl.u32 %v8165_v1, 16  ;;  %v2436_v11 = vshll.u32 %v8165_v1, 16 }
  0x4d   : > { %6873 = vmatprep.mubr.msk.bf16.mxu0 %vm10650_vm0, %v7837_v2  ;;  %6916 = vmatpush3.bf16.msra.mxu0 %v7732_v17  ;;  %v2052_v17 = vshrl.u32 %v8287_v12, 16 }
  0x4e   : > { %6963 = vmatprep.subr.bf16.mxu0 %v7837_v2  ;;  %v1182_v37 = vsel %vm10644_vm7, %v1172_v60, %v1181_v23  ;;  %v1202_v60 = vshrl.u32 %v8231_v30, 16  ;;  %v2438_v30 = vrot.slane %v2436_v11, 2  ;;  %v8434_v11 = vld [vmem:[%s8131_s25 + $0x28] sm:$0xf] }
  0x52   : > { %6900 = vmatmul.mubr.msk.bf16.gmra.mxu1 %vm682_vm1, %v1028_v21  ;;  %v1895_v21 = vld [vmem:[%s8131_s25 + $0x10] sm:$0xf] }
  0x53   : > { %6903 = vmatprep.mubr.msk.bf16.mxu1 %vm10650_vm0, %v7837_v2  ;;  %v8322_v31 = vcombine.low %v1895_v21, %v8300_v0 }
  0x54   : > { %6874 = vmatmul.mubr.msk.bf16.gmra.mxu0 %vm682_vm1, %v886_v33  ;;  %v8310_v33 = vrot.slane %v2052_v17, 2 }
  0x55   : > { %6877 = vmatprep.mubr.msk.bf16.mxu0 %vm10650_vm0, %v7837_v2  ;;  %v2055_v8 = vshll.u32 %v8322_v31, 16  ;;  %v2059_v20 = vshrl.u32 %v8322_v31, 16 }
  0x57   : > { %v2836_v45 = vrot.slane %v2055_v8, 3  ;;  %v2835_v49 = vrot.slane %v2059_v20, 2 }
  0x59   : > { %v8349_v52 = vor.u32 %v2836_v45, %v2835_v49 }
  0x5a   : > { %6904 = vmatmul.mubr.msk.bf16.gmra.mxu1 %vm682_vm1, %v1030_v27  ;;  %v8314_v27 = vrot.slane %v2048_v43, 3 }
  0x5b   : > { %6907 = vmatprep.mubr.msk.bf16.mxu1 %vm10650_vm0, %v7837_v2 }
  0x5c   : > { %6878 = vmatmul.mubr.msk.bf16.gmra.mxu0 %vm682_vm1, %v888_v36  ;;  %v2834_v36 = vor.u32 %v8314_v27, %v8310_v33 }
  0x5d   : > { %6881 = vmatprep.mubr.msk.bf16.mxu0 %vm10650_vm0, %v7837_v2 }
  0x62   : > { %6908 = vmatmul.mubr.msk.bf16.gmra.mxu1 %vm682_vm1, %v1032_v34  ;;  %v1186_v34 = vrot.slane %v1184_v18, 1  ;;  %v2435_v18 = vrot.slane %v2433_v10, 1  ;;  %v8431_v10 = vld [vmem:[%s8131_s25 + $0x24] sm:$0xf] }
  0x63   : > { %6943 = vmatprep.mubr.msk.bf16.mxu1 %vm10650_vm0, %v7837_v2 }
  0x64   : > { %6882 = vmatmul.mubr.msk.bf16.gmra.mxu0 %vm682_vm1, %v890_v48  ;;  %v1190_v46 = vor.u32 %v1189_v47, %v1186_v34  ;;  %v1196_v48 = vshll.u32 %v8210_v19, 16  ;;  %v8360_v19 = vcombine.low %v8272_v15, %v1895_v21 }
  0x65   : > { %6917 = vmatprep.mubr.msk.bf16.mxu0 %vm10650_vm0, %v7837_v2 }
  0x66   : > { %v1191_v57 = vsel %vm10644_vm7, %v1181_v23, %v1190_v46  ;;  %v2444_v15 = vshll.u32 %v8360_v19, 16  ;;  %v8373_v23 = vld [vmem:[%s8131_s25 + $0x18] sm:$0xf] }
  0x67   : > { %v8379_v32 = vcombine.low %v8300_v0, %v8373_v23  ;;  %v2315_v0 = vrot.slane %v8360_v19, 1 }
  0x68   : > { %v2446_v38 = vrot.slane %v2444_v15, 2  ;;  %v7744_v15 = vld [vmem:[%s10636_s2 + $0xc0] sm:$0xff]  }
  0x69   : > { %v2450_v45 = vshrl.u32 %v8379_v32, 16 }
  0x6a   : > { %6944 = vmatmul.mubr.msk.bf16.vlgmr.msra.gmra.mxu1 %vm682_vm1, %v1336_v58  ;;  %v1195_v58 = vrot.slane %v1193_v56, 1  ;;  %v7742_v56 = vld [vmem:[%s10637_s3] sm:$0xff]  }
  0x6b   : > { %6990 = vmatpush3.bf16.msra.mxu1 %v7736_v61  ;;  %6947 = vmatprep.mubr.msk.bf16.mxu1 %vm10650_vm0, %v7837_v2  ;;  %v1198_v61 = vrot.slane %v1196_v48, 2  ;;  %v2452_v49 = vrot.slane %v2450_v45, 1 }
  0x6c   : > { %6991 = vmatprep.subr.bf16.mxu1 %v7837_v2  ;;  %6918 = vmatmul.mubr.msk.bf16.vlgmr.msra.gmra.mxu0 %vm682_vm1, %v1173_v6  ;;  %v1207_v6 = vrot.slane %v1205_v14, 2  ;;  %v7741_v14 = vld [vmem:[%s10636_s2 + $0xd0] sm:$0xff]  }
  0x6d   : > { %6964 = vmatpush3.bf16.msra.mxu0 %v7735_v7  ;;  %6921 = vmatprep.mubr.msk.bf16.mxu0 %vm10650_vm0, %v7837_v2  ;;  %v1199_v25 = vor.u32 %v1198_v61, %v1195_v58 }
  0x6e   : > { %6965 = vmatprep.subr.bf16.mxu0 %v7837_v2 }
  0x6f   : > { %6992 = vmatpush3.bf16.msra.mxu1 %v7738_v16  ;;  %v1204_v16 = vrot.slane %v1202_v60, 1  ;;  %v1200_v7 = vsel %vm10644_vm7, %v1190_v46, %v1199_v25  ;;  %v2453_v46 = vshll.u32 %v8379_v32, 16 }
  0x70   : > { %6993 = vmatprep.subr.bf16.mxu1 %v7837_v2 }
  0x71   : > { %6966 = vmatpush3.bf16.msra.mxu0 %v7737_v24  ;;  %v1208_v21 = vor.u32 %v1207_v6, %v1204_v16  ;;  %v2455_v58 = vrot.slane %v2453_v46, 2 }
  0x72   : > { %6948 = vmatmul.mubr.msk.bf16.gmra.mxu1 %vm682_vm1, %v1338_v53  ;;  %6967 = vmatprep.subr.bf16.mxu0 %v7837_v2  ;;  %v2441_v53 = vshrl.u32 %v8360_v19, 16 }
  0x73   : > { %6951 = vmatprep.mubr.msk.bf16.mxu1 %vm10650_vm0, %v7837_v2  ;;  %6994 = vmatpush3.bf16.msra.mxu1 %v7740_v29  ;;  %v1344_v29 = vsel %vm10646_vm4, %v1341_v51, %v1343_v3  ;;  %v1209_v47 = vsel %vm10644_vm7, %v1199_v25, %v1208_v21  ;;  %v8400_v51 = vld [vmem:[%s8131_s25 + $0x1c] sm:$0xf]  ;;  %v2317_v25 = vrot.slane %v8379_v32, 1 }
  0x74   : > { %7041 = vmatprep.subr.bf16.mxu1 %v7837_v2  ;;  %6922 = vmatmul.mubr.msk.bf16.gmra.mxu0 %vm682_vm1, %v1182_v37  ;;  %v2443_v24 = vrot.slane %v2441_v53, 1  ;;  %v2439_v37 = vor.u32 %v2438_v30, %v2435_v18  ;;  %v7743_v53 = vld [vmem:[%s10636_s2 + $0xc8] sm:$0xff]  }
  0x75   : > { %6925 = vmatprep.mubr.msk.bf16.mxu0 %vm10650_vm0, %v7837_v2  ;;  %6968 = vmatpush3.bf16.msra.mxu0 %v7739_v41  ;;  %v8426_v16 = vsel %vm10648_vm5, %v2315_v0, %v2317_v25 }
  0x76   : > { %7015 = vmatprep.subr.bf16.mxu0 %v7837_v2  ;;  %v2447_v34 = vor.u32 %v2446_v38, %v2443_v24 }
  0x78   : > { %v8386_v41 = vsel %vm10644_vm7, %v2439_v37, %v2447_v34 }
  0x7a   : > { %6952 = vmatmul.mubr.msk.bf16.gmra.mxu1 %vm682_vm1, %v1340_v42  ;;  %v2314_v42 = vrot.slane %v8165_v1, 1 }
  0x7b   : > { %6955 = vmatprep.mubr.msk.bf16.mxu1 %vm10650_vm0, %v7837_v2 }
  0x7c   : > { %6926 = vmatmul.mubr.msk.bf16.gmra.mxu0 %vm682_vm1, %v1191_v57  ;;  %v8396_v48 = vsel %vm10648_vm5, %v2314_v42, %v2315_v0  ;;  %v8403_v57 = vld [vmem:[%s8131_s25 + $0x20] sm:$0xf] }
  0x7d   : > { %6929 = vmatprep.mubr.msk.bf16.mxu0 %vm10650_vm0, %v7837_v2  ;;  %v8409_v61 = vcombine.low %v8400_v51, %v8403_v57 }
  0x7f   : > { %v2459_v3 = vshrl.u32 %v8409_v61, 16  ;;  %v2319_v21 = vrot.slane %v8409_v61, 1 }
  0x81   : > { %v2461_v6 = vrot.slane %v2459_v3, 1 }
  0x82   : > { %6956 = vmatmul.mubr.msk.bf16.gmra.mxu1 %vm682_vm1, %v1342_v55  ;;  %v2456_v55 = vor.u32 %v2455_v58, %v2452_v49  ;;  %v2189_v49 = vrot.slane %v8287_v12, 1 }
  0x83   : > { %6959 = vmatprep.mubr.msk.bf16.mxu1 %vm10650_vm0, %v7837_v2 }
  0x84   : > { %6930 = vmatmul.mubr.msk.bf16.gmra.mxu0 %vm682_vm1, %v1200_v7  ;;  %v8417_v60 = vsel %vm10644_vm7, %v2447_v34, %v2456_v55 }
  0x85   : > { %6933 = vmatprep.mubr.msk.bf16.mxu0 %vm10650_vm0, %v7837_v2 }
  0x8a   : > { %6960 = vmatmul.mubr.msk.bf16.gmra.mxu1 %vm682_vm1, %v1344_v29  ;;  %v8443_v29 = vcombine.low %v8431_v10, %v8434_v11 }
  0x8b   : > { %6995 = vmatprep.mubr.msk.bf16.mxu1 %vm10650_vm0, %v7837_v2 }
  0x8c   : > { %6934 = vmatmul.mubr.msk.bf16.gmra.mxu0 %vm682_vm1, %v1209_v47  ;;  %v2468_v30 = vshrl.u32 %v8443_v29, 16  ;;  %v2471_v24 = vshll.u32 %v8443_v29, 16 }
  0x8d   : > { %6969 = vmatprep.mubr.msk.bf16.mxu0 %vm10650_vm0, %v7837_v2 }
  0x8e   : > { %v2470_v38 = vrot.slane %v2468_v30, 1  ;;  %v2473_v37 = vrot.slane %v2471_v24, 2  ;;  %v7757_v24 = vld [vmem:[%s10637_s3 + $0x18] sm:$0xff]  }
  0x90   : > { %v8467_v34 = vor.u32 %v2473_v37, %v2470_v38 }
  0x92   : > { %6996 = vmatmul.mubr.msk.bf16.vlgmr.msra.gmra.mxu1 %vm682_vm1, %v8078_v5  ;;  %v2462_v5 = vshll.u32 %v8409_v61, 16 }
  0x93   : > { %7042 = vmatpush3.bf16.msra.mxu1 %v7742_v56  ;;  %6999 = vmatprep.mubr.msk.bf16.mxu1 %vm10650_vm0, %v7837_v2 }
  0x94   : > { %7085 = vmatprep.subr.bf16.mxu1 %v7837_v2  ;;  %v2464_v7 = vrot.slane %v2462_v5, 2  ;;  %6970 = vmatmul.mubr.msk.bf16.vlgmr.msra.gmra.mxu0 %vm682_vm1, %v8081_v9 }
  0x95   : > { %7016 = vmatpush3.bf16.msra.mxu0 %v7741_v14  ;;  %6973 = vmatprep.mubr.msk.bf16.mxu0 %vm10650_vm0, %v7837_v2 }
  0x96   : > { %v2465_v18 = vor.u32 %v2464_v7, %v2461_v6  ;;  %7017 = vmatprep.subr.bf16.mxu0 %v7837_v2 }
  0x98   : > { %v8451_v9 = vsel %vm10644_vm7, %v2456_v55, %v2465_v18  ;;  %v8476_v47 = vsel %vm10644_vm7, %v2465_v18, %v8467_v34  ;;  %v7758_v55 = vld [vmem:[%s10637_s3 + $0x20] sm:$0xff]  }
  0x99   : > { %7018 = vmatpush3.bf16.msra.mxu0 %v7743_v53 }
  0x9a   : > { %7000 = vmatmul.mubr.msk.bf16.gmra.mxu1 %vm682_vm1, %v8098_v26  ;;  %7019 = vmatprep.subr.bf16.mxu0 %v7837_v2  ;;  %v8461_v26 = vsel %vm10648_vm5, %v2317_v25, %v2319_v21  ;;  %v8587_v25 = vsel %vm10647_vm3, %v2834_v36, %v8349_v52 }
  0x9b   : > { %7003 = vmatprep.mubr.msk.bf16.mxu1 %vm10650_vm0, %v7837_v2 }
  0x9c   : > { %6974 = vmatmul.mubr.msk.bf16.gmra.mxu0 %vm682_vm1, %v8091_v22  ;;  %v2321_v22 = vrot.slane %v8443_v29, 1 }
  0x9d   : > { %6977 = vmatprep.mubr.msk.bf16.mxu0 %vm10650_vm0, %v7837_v2  ;;  %7020 = vmatpush3.bf16.msra.mxu0 %v7744_v15 }
  0x9e   : > { %7063 = vmatprep.subr.bf16.mxu0 %v7837_v2  ;;  %v8482_v42 = vsel %vm10648_vm5, %v2319_v21, %v2321_v22 }
  0xa2   : > { %7004 = vmatmul.mubr.msk.bf16.gmra.mxu1 %vm682_vm1, %v8114_v40  ;;  %v2592_v40 = vrot.slane %v8165_v1, 2 }
  0xa3   : > { %7007 = vmatprep.mubr.msk.bf16.mxu1 %vm10650_vm0, %v7837_v2 }
  0xa4   : > { %6978 = vmatmul.mubr.msk.bf16.gmra.mxu0 %vm682_vm1, %v8101_v28  ;;  %v1891_v28 = vld [vmem:[%s8131_s25] sm:$0xf] }
  0xa5   : > { %6981 = vmatprep.mubr.msk.bf16.mxu0 %vm10650_vm0, %v7837_v2  ;;  %v6224_v0 = vcombine.low %v1891_v28, %v8156_v63  ;;  %v2595_v63 = vrot.slane %v8379_v32, 2  ;;  %v8549_v32 = vcombine.low %v8373_v23, %v8400_v51 }
  0xa7   : > { %v2044_v23 = vshll.u32 %v6224_v0, 16  ;;  %v2188_v56 = vrot.slane %v6224_v0, 1  ;;  %v2062_v14 = vshll.u32 %v8549_v32, 16  ;;  %v2066_v53 = vshrl.u32 %v8549_v32, 16 }
  0xa9   : > { %v2046_v58 = vrot.slane %v2044_v23, 1  ;;  %v2840_v33 = vrot.slane %v2062_v14, 3  ;;  %v2839_v18 = vrot.slane %v2066_v53, 2 }
  0xaa   : > { %7008 = vmatmul.mubr.msk.bf16.gmra.mxu1 %vm682_vm1, %v8138_v54  ;;  %v2593_v54 = vrot.slane %v8360_v19, 2 }
  0xab   : > { %7011 = vmatprep.mubr.msk.bf16.mxu1 %vm10650_vm0, %v7837_v2  ;;  %v8611_v38 = vor.u32 %v2840_v33, %v2839_v18 }
  0xac   : > { %6982 = vmatmul.mubr.msk.bf16.gmra.mxu0 %vm682_vm1, %v8106_v35  ;;  %v7748_v35 = vld [vmem:[%s10637_s3 + $0x10] sm:$0xff]   ;;  %v8508_v45 = vsel %vm10646_vm4, %v2592_v40, %v2593_v54  ;;  %v8523_v1 = vsel %vm10646_vm4, %v2593_v54, %v2595_v63 }
  0xad   : > { %6985 = vmatprep.mubr.msk.bf16.mxu0 %vm10650_vm0, %v7837_v2  ;;  %v8617_v54 = vsel %vm10647_vm3, %v8349_v52, %v8611_v38  ;;  %v2193_v52 = vrot.slane %v8549_v32, 1 }
  0xb2   : > { %7012 = vmatmul.mubr.msk.bf16.gmra.mxu1 %vm682_vm1, %v8147_v62  ;;  %v7747_v62 = vld [vmem:[%s10637_s3 + $0x8] sm:$0xff]  }
  0xb3   : > { %7043 = vmatprep.mubr.msk.bf16.mxu1 %vm10650_vm0, %v7837_v2 }
  0xb4   : > { %6986 = vmatmul.mubr.msk.bf16.gmra.mxu0 %vm682_vm1, %v8122_v50  ;;  %v2597_v50 = vrot.slane %v8409_v61, 2 }
  0xb5   : > { %7021 = vmatprep.mubr.msk.bf16.mxu0 %vm10650_vm0, %v7837_v2 }
  0xb6   : > { %v8536_v19 = vsel %vm10646_vm4, %v2595_v63, %v2597_v50 }
  0xba   : > { %7044 = vmatmul.mubr.msk.bf16.vlgmr.msra.gmra.mxu1 %vm1937_vm8, %v6224_v0 }
  0xbb   : > { %7086 = vmatpush3.bf16.msra.mxu1 %v7748_v35  ;;  %7047 = vmatprep.mubr.msk.bf16.mxu1 %vm10650_vm0, %v7837_v2 }
  0xbc   : > { %7129 = vmatprep.subr.bf16.mxu1 %v7837_v2  ;;  %7022 = vmatmul.mubr.msk.bf16.vlgmr.msra.gmra.mxu0 %vm682_vm1, %v8142_v59  ;;  %v2599_v59 = vrot.slane %v8443_v29, 2  ;;  %v2975_v29 = vrot.slane %v8549_v32, 3 }
  0xbd   : > { %7064 = vmatpush3.bf16.msra.mxu0 %v7747_v62  ;;  %7025 = vmatprep.mubr.msk.bf16.mxu0 %vm10650_vm0, %v7837_v2 }
  0xbe   : > { %7107 = vmatprep.subr.bf16.mxu0 %v7837_v2  ;;  %v8554_v46 = vsel %vm10646_vm4, %v2597_v50, %v2599_v59  ;;  %v2057_v50 = vrot.slane %v2055_v8, 1 }
  0xc2   : > { %7048 = vmatmul.mubr.msk.bf16.gmra.mxu1 %vm1937_vm8, %v8287_v12 }
  0xc3   : > { %7051 = vmatprep.mubr.msk.bf16.mxu1 %vm10650_vm0, %v7837_v2 }
  0xc4   : > { %7026 = vmatmul.mubr.msk.bf16.gmra.mxu0 %vm682_vm1, %v8175_v4  ;;  %v8566_v4 = vcombine.low %v8403_v57, %v8431_v10  ;;  %v2042_v57 = vshrl.u32 %v6224_v0, 16  ;;  %v2050_v10 = vrot.slane %v2048_v43, 1 }
  0xc5   : > { %7029 = vmatprep.mubr.msk.bf16.mxu0 %vm10650_vm0, %v7837_v2 }
  0xc6   : > { %v2047_v6 = vor.u32 %v2046_v58, %v2042_v57  ;;  %v2054_v63 = vor.u32 %v2052_v17, %v2050_v10  ;;  %v2195_v33 = vrot.slane %v8566_v4, 1 }
  0xc8   : > { %v2051_v30 = vsel %vm10649_vm2, %v2047_v6, %v2050_v10  ;;  %v2058_v17 = vsel %vm10649_vm2, %v2054_v63, %v2057_v50 }
  0xca   : > { %7052 = vmatmul.mubr.msk.bf16.gmra.mxu1 %vm1937_vm8, %v8322_v31 }
  0xcb   : > { %7055 = vmatprep.mubr.msk.bf16.mxu1 %vm10650_vm0, %v7837_v2 }
  0xcc   : > { %7030 = vmatmul.mubr.msk.bf16.gmra.mxu0 %vm682_vm1, %v8205_v13 }
  0xcd   : > { %7033 = vmatprep.mubr.msk.bf16.mxu0 %vm10650_vm0, %v7837_v2 }
  0xd2   : > { %7056 = vmatmul.mubr.msk.bf16.gmra.mxu1 %vm1937_vm8, %v8549_v32 }
  0xd3   : > { %7059 = vmatprep.mubr.msk.bf16.mxu1 %vm10650_vm0, %v7837_v2 }
  0xd4   : > { %7034 = vmatmul.mubr.msk.bf16.gmra.mxu0 %vm682_vm1, %v8225_v44  ;;  %v2190_v44 = vsel %vm10648_vm5, %v2188_v56, %v2189_v49 }
  0xd5   : > { %7037 = vmatprep.mubr.msk.bf16.mxu0 %vm10650_vm0, %v7837_v2 }
  0xda   : > { %v833_v13 = vpop.f32.mrf.mxu1  ;;  %7060 = vmatmul.mubr.msk.bf16.gmra.mxu1 %vm1937_vm8, %v8566_v4 }
  0xdb   : > { %7087 = vmatprep.mubr.msk.bf16.mxu1 %vm10650_vm0, %v7837_v2 }
  0xdc   : > { %v6841_v51 = vpop.f32.mrf.mxu1  ;;  %v732_v3 = vpop.f32.mrf.mxu0  ;;  %7038 = vmatmul.mubr.msk.bf16.gmra.mxu0 %vm682_vm1, %v8245_v39  ;;  %v2191_v39 = vrot.slane %v8322_v31, 1 }
  0xdd   : > { %v8591_v7 = vadd.f32 %v833_v13, %v732_v3  ;;  %7065 = vmatprep.mubr.msk.bf16.mxu0 %vm10650_vm0, %v7837_v2  ;;  %v2061_v3 = vor.u32 %v2059_v20, %v2057_v50 }
  0xde   : > { %v836_v61 = vpop.f32.mrf.mxu1  ;;  %v6815_v27 = vpop.f32.mrf.mxu0  ;;  %v2192_v40 = vsel %vm10648_vm5, %v2189_v49, %v2191_v39  ;;  %v2194_v8 = vsel %vm10648_vm5, %v2191_v39, %v2193_v52 }
  0xe0   : > { %v6842_v5 = vpop.f32.mrf.mxu1  ;;  %v735_v15 = vpop.f32.mrf.mxu0 }
  0xe1   : > { %v8605_v43 = vadd.f32 %v836_v61, %v735_v15  ;;  %v2064_v5 = vrot.slane %v2062_v14, 1  ;;  %v2069_v15 = vshll.u32 %v8566_v4, 16  ;;  %v2196_v14 = vsel %vm10648_vm5, %v2193_v52, %v2195_v33 }
  0xe2   : > { %v841_v36 = vpop.f32.mrf.mxu1  ;;  %7088 = vmatmul.mubr.msk.bf16.vlgmr.msra.gmra.mxu1 %vm1937_vm8, %v2190_v44  ;;  %v6816_v37 = vpop.f32.mrf.mxu0 }
  0xe3   : > { %7130 = vmatpush3.bf16.msra.mxu1 %v7758_v55  ;;  %7091 = vmatprep.mubr.msk.bf16.mxu1 %vm10650_vm0, %v7837_v2  ;;  %v2065_v18 = vsel %vm10649_vm2, %v2061_v3, %v2064_v5 }
  0xe4   : > { %v6845_v21 = vpop.f32.mrf.mxu1  ;;  %7173 = vmatprep.subr.bf16.mxu1 %v7837_v2  ;;  %v740_v0 = vpop.f32.mrf.mxu0  ;;  %7066 = vmatmul.mubr.msk.bf16.vlgmr.msra.gmra.mxu0 %vm1937_vm8, %v2051_v30  ;;  %v6237_v30 = vcombine.low %v8434_v11, %v8434_v11 }
  0xe5   : > { %v8620_v62 = vadd.f32 %v841_v36, %v740_v0  ;;  %7108 = vmatpush3.bf16.msra.mxu0 %v7757_v24  ;;  %7069 = vmatprep.mubr.msk.bf16.mxu0 %vm10650_vm0, %v7837_v2  ;;  %v2071_v0 = vrot.slane %v2069_v15, 1 }
  0xe6   : > { %v844_v28 = vpop.f32.mrf.mxu1  ;;  %v6819_v23 = vpop.f32.mrf.mxu0  ;;  %7151 = vmatprep.subr.bf16.mxu0 %v7837_v2  ;;  %v2197_v50 = vrot.slane %v6237_v30, 1 }
  0xe8   : > { %v6846_v35 = vpop.f32.mrf.mxu1  ;;  %v743_v56 = vpop.f32.mrf.mxu0 }
  0xe9   : > { %v8633_v51 = vadd.f32 %v844_v28, %v743_v56  ;;  %v2073_v56 = vshrl.u32 %v8566_v4, 16 }
  0xea   : > { %v849_v13 = vpop.f32.mrf.mxu1  ;;  %7092 = vmatmul.mubr.msk.bf16.gmra.mxu1 %vm1937_vm8, %v2192_v40  ;;  %v6820_v57 = vpop.f32.mrf.mxu0  ;;  %v2068_v40 = vor.u32 %v2066_v53, %v2064_v5 }
  0xeb   : > { %7095 = vmatprep.mubr.msk.bf16.mxu1 %vm10650_vm0, %v7837_v2  ;;  %v2075_v3 = vor.u32 %v2073_v56, %v2071_v0 }
  0xec   : > { %v6849_v49 = vpop.f32.mrf.mxu1  ;;  %v748_v61 = vpop.f32.mrf.mxu0  ;;  %7070 = vmatmul.mubr.msk.bf16.gmra.mxu0 %vm1937_vm8, %v2058_v17  ;;  %v2072_v53 = vsel %vm10649_vm2, %v2068_v40, %v2071_v0 }
  0xed   : > { %v8638_v55 = vadd.f32 %v849_v13, %v748_v61  ;;  %7073 = vmatprep.mubr.msk.bf16.mxu0 %vm10650_vm0, %v7837_v2  ;;  %v2077_v49 = vshll.u32 %v6237_v30, 16 }
  0xee   : > { %v852_v58 = vpop.f32.mrf.mxu1  ;;  %v6823_v6 = vpop.f32.mrf.mxu0 }
  0xef   : > { %v2079_v5 = vrot.slane %v2077_v49, 1 }
  0xf0   : > { %v6850_v44 = vpop.f32.mrf.mxu1  ;;  %v751_v27 = vpop.f32.mrf.mxu0 }
  0xf1   : > { %v8648_v39 = vadd.f32 %v852_v58, %v751_v27  ;;  %v2198_v58 = vsel %vm10648_vm5, %v2195_v33, %v2197_v50 }
  0xf2   : > { %v857_v10 = vpop.f32.mrf.mxu1  ;;  %7096 = vmatmul.mubr.msk.bf16.gmra.mxu1 %vm1937_vm8, %v2194_v8  ;;  %v6824_v21 = vpop.f32.mrf.mxu0 }
  0xf3   : > { %7099 = vmatprep.mubr.msk.bf16.mxu1 %vm10650_vm0, %v7837_v2 }
  0xf4   : > { %v6853_v36 = vpop.f32.mrf.mxu1  ;;  %v756_v24 = vpop.f32.mrf.mxu0  ;;  %7074 = vmatmul.mubr.msk.bf16.gmra.mxu0 %vm1937_vm8, %v2065_v18  ;;  %v2080_v18 = vsel %vm10649_vm2, %v2075_v3, %v2079_v5  ;;  %vm10654_vm2 = vsmask.f32 1280 }
  0xf5   : > { %v8656_v28 = vadd.f32 %v857_v10, %v756_v24  ;;  %7077 = vmatprep.mubr.msk.bf16.mxu0 %vm10650_vm0, %v7837_v2 }
  0xf6   : > { %v860_v20 = vpop.f32.mrf.mxu1  ;;  %v6827_v35 = vpop.f32.mrf.mxu0 }
  0xf8   : > { %v6854_v37 = vpop.f32.mrf.mxu1  ;;  %v759_v23 = vpop.f32.mrf.mxu0 }
  0xf9   : > { %v8667_v52 = vadd.f32 %v860_v20, %v759_v23  ;;  %v7763_v23 = vld [vmem:[%s10637_s3 + $0x28] sm:$0xff]  }
  0xfa   : > { %v865_v63 = vpop.f32.mrf.mxu1  ;;  %7100 = vmatmul.mubr.msk.bf16.gmra.mxu1 %vm1937_vm8, %v2196_v14  ;;  %v6828_v17 = vpop.f32.mrf.mxu0  ;;  %v7764_v14 = vld [vmem:[%s10637_s3 + $0x30] sm:$0xff]  }
  0xfb   : > { %7103 = vmatprep.mubr.msk.bf16.mxu1 %vm10650_vm0, %v7837_v2 }
  0xfc   : > { %v6857_v13 = vpop.f32.mrf.mxu1  ;;  %v764_v8 = vpop.f32.mrf.mxu0  ;;  %7078 = vmatmul.mubr.msk.bf16.gmra.mxu0 %vm1937_vm8, %v2072_v53 }
  0xfd   : > { %v8673_v44 = vadd.f32 %v865_v63, %v764_v8  ;;  %7081 = vmatprep.mubr.msk.bf16.mxu0 %vm10650_vm0, %v7837_v2 }
  0xfe   : > { %v868_v57 = vpop.f32.mrf.mxu1  ;;  %v6831_v6 = vpop.f32.mrf.mxu0 }
 0x100   : > { %v6858_v61 = vpop.f32.mrf.mxu1  ;;  %v767_v33 = vpop.f32.mrf.mxu0 }
 0x101   : > { %v8682_v36 = vadd.f32 %v868_v57, %v767_v33 }
 0x102   : > { %v1100_v10 = vpop.f32.mrf.mxu1  ;;  %7104 = vmatmul.mubr.msk.bf16.gmra.mxu1 %vm1937_vm8, %v2198_v58  ;;  %v6832_v21 = vpop.f32.mrf.mxu0 }
 0x103   : > { %7131 = vmatprep.mubr.msk.bf16.mxu1 %vm10650_vm0, %v7837_v2 }
 0x104   : > { %v6893_v27 = vpop.f32.mrf.mxu1  ;;  %v958_v30 = vpop.f32.mrf.mxu0  ;;  %7082 = vmatmul.mubr.msk.bf16.gmra.mxu0 %vm1937_vm8, %v2080_v18 }
 0x105   : > { %v997_v37 = vadd.f32 %v958_v30, %v8591_v7  ;;  %7109 = vmatprep.mubr.msk.bf16.mxu0 %vm10650_vm0, %v7837_v2 }
 0x106   : > { %v1103_v20 = vpop.f32.mrf.mxu1  ;;  %v6867_v40 = vpop.f32.mrf.mxu0 }
 0x107   : > { %v8696_v35 = vadd.f32 %v1100_v10, %v997_v37 }
 0x108   : > { %v6894_v24 = vpop.f32.mrf.mxu1  ;;  %v961_v63 = vpop.f32.mrf.mxu0 }
 0x109   : > { %v998_v7 = vadd.f32 %v961_v63, %v8605_v43 }
 0x10a   : > { %v1108_v0 = vpop.f32.mrf.mxu1  ;;  %7132 = vmatmul.mubr.msk.bf16.vlgmr.msra.gmra.mxu1 %vm1937_vm8, %v8386_v41  ;;  %v6868_v13 = vpop.f32.mrf.mxu0 }
 0x10b   : > { %7174 = vmatpush3.bf16.msra.mxu1 %v7764_v14  ;;  %7135 = vmatprep.mubr.msk.bf16.mxu1 %vm10650_vm0, %v7837_v2  ;;  %v8703_v41 = vadd.f32 %v1103_v20, %v998_v7 }
 0x10c   : > { %v6897_v50 = vpop.f32.mrf.mxu1  ;;  %7217 = vmatprep.subr.bf16.mxu1 %v7837_v2  ;;  %v966_v49 = vpop.f32.mrf.mxu0  ;;  %7110 = vmatmul.mubr.msk.bf16.vlgmr.msra.gmra.mxu0 %vm1937_vm8, %v8396_v48  ;;  %v8718_v48 = vld [vmem:[%s8131_s25 + $0x2c] sm:$0xf] }
 0x10d   : > { %v999_v57 = vadd.f32 %v966_v49, %v8620_v62  ;;  %7152 = vmatpush3.bf16.msra.mxu0 %v7763_v23  ;;  %7113 = vmatprep.mubr.msk.bf16.mxu0 %vm10650_vm0, %v7837_v2  ;;  %v8723_v10 = vcombine.low %v8718_v48, %v8718_v48 }
 0x10e   : > { %v1111_v53 = vpop.f32.mrf.mxu1  ;;  %v6871_v43 = vpop.f32.mrf.mxu0  ;;  %7195 = vmatprep.subr.bf16.mxu0 %v7837_v2 }
 0x10f   : > { %v8715_v8 = vadd.f32 %v1108_v0, %v999_v57  ;;  %v2477_v20 = vshrl.u32 %v8723_v10, 16  ;;  %v2480_v14 = vshll.u32 %v8723_v10, 16 }
 0x110   : > { %v6898_v17 = vpop.f32.mrf.mxu1  ;;  %v969_v61 = vpop.f32.mrf.mxu0 }
 0x111   : > { %v1000_v3 = vadd.f32 %v969_v61, %v8633_v51  ;;  %v2479_v0 = vrot.slane %v2477_v20, 1  ;;  %v2482_v63 = vrot.slane %v2480_v14, 2 }
 0x112   : > { %v1116_v58 = vpop.f32.mrf.mxu1  ;;  %7136 = vmatmul.mubr.msk.bf16.gmra.mxu1 %vm1937_vm8, %v8417_v60  ;;  %v6872_v5 = vpop.f32.mrf.mxu0 }
 0x113   : > { %7139 = vmatprep.mubr.msk.bf16.mxu1 %vm10650_vm0, %v7837_v2  ;;  %v8725_v60 = vadd.f32 %v1111_v53, %v1000_v3  ;;  %v2323_v5 = vrot.slane %v8723_v10, 1 }
 0x114   : > { %v6901_v62 = vpop.f32.mrf.mxu1  ;;  %v974_v33 = vpop.f32.mrf.mxu0  ;;  %7114 = vmatmul.mubr.msk.bf16.gmra.mxu0 %vm1937_vm8, %v8426_v16 }
 0x115   : > { %v1001_v18 = vadd.f32 %v974_v33, %v8638_v55  ;;  %7117 = vmatprep.mubr.msk.bf16.mxu0 %vm10650_vm0, %v7837_v2  ;;  %v2715_v33 = vrot.slane %v8322_v31, 2 }
 0x116   : > { %v1119_v6 = vpop.f32.mrf.mxu1  ;;  %v6875_v21 = vpop.f32.mrf.mxu0 }
 0x117   : > { %v8738_v30 = vadd.f32 %v1116_v58, %v1001_v18  ;;  %v2324_v21 = vsel %vm10648_vm5, %v2321_v22, %v2323_v5 }
 0x118   : > { %v6902_v27 = vpop.f32.mrf.mxu1  ;;  %v977_v16 = vpop.f32.mrf.mxu0 }
 0x119   : > { %v1002_v55 = vadd.f32 %v977_v16, %v8648_v39  ;;  %v2483_v39 = vor.u32 %v2482_v63, %v2479_v0  ;;  %v7766_v16 = vld [vmem:[%s10637_s3 + $0x40] sm:$0xff]   ;;  %v2717_v0 = vrot.slane %v8549_v32, 2 }
 0x11a   : > { %v1124_v51 = vpop.f32.mrf.mxu1  ;;  %7140 = vmatmul.mubr.msk.bf16.gmra.mxu1 %vm1937_vm8, %v8451_v9  ;;  %v6876_v37 = vpop.f32.mrf.mxu0 }
 0x11b   : > { %7143 = vmatprep.mubr.msk.bf16.mxu1 %vm10650_vm0, %v7837_v2  ;;  %v8741_v50 = vadd.f32 %v1119_v6, %v1002_v55  ;;  %v2484_v58 = vsel %vm10644_vm7, %v8467_v34, %v2483_v39  ;;  %v2714_v34 = vrot.slane %v8287_v12, 2  ;;  %v2718_v39 = vsel %vm10646_vm4, %v2715_v33, %v2717_v0 }
 0x11c   : > { %v6905_v24 = vpop.f32.mrf.mxu1  ;;  %v982_v9 = vpop.f32.mrf.mxu0  ;;  %7118 = vmatmul.mubr.msk.bf16.gmra.mxu0 %vm1937_vm8, %v8461_v26 }
 0x11d   : > { %v1003_v23 = vadd.f32 %v982_v9, %v8656_v28  ;;  %7121 = vmatprep.mubr.msk.bf16.mxu0 %vm10650_vm0, %v7837_v2  ;;  %v2716_v14 = vsel %vm10646_vm4, %v2714_v34, %v2715_v33 }
 0x11e   : > { %v1127_v40 = vpop.f32.mrf.mxu1  ;;  %v6879_v13 = vpop.f32.mrf.mxu0 }
 0x11f   : > { %v8752_v49 = vadd.f32 %v1124_v51, %v1003_v23  ;;  %v7765_v23 = vld [vmem:[%s10637_s3 + $0x38] sm:$0xff]  }
 0x120   : > { %v6906_v7 = vpop.f32.mrf.mxu1  ;;  %v985_v17 = vpop.f32.mrf.mxu0 }
 0x121   : > { %v1004_v26 = vadd.f32 %v985_v17, %v8667_v52 }
 0x122   : > { %v1132_v53 = vpop.f32.mrf.mxu1  ;;  %7144 = vmatmul.mubr.msk.bf16.gmra.mxu1 %vm1937_vm8, %v8476_v47  ;;  %v6880_v43 = vpop.f32.mrf.mxu0 }
 0x123   : > { %7147 = vmatprep.mubr.msk.bf16.mxu1 %vm10650_vm0, %v7837_v2  ;;  %v8757_v61 = vadd.f32 %v1127_v40, %v1004_v26 }
 0x124   : > { %v6909_v57 = vpop.f32.mrf.mxu1  ;;  %v990_v62 = vpop.f32.mrf.mxu0  ;;  %7122 = vmatmul.mubr.msk.bf16.gmra.mxu0 %vm1937_vm8, %v8482_v42 }
 0x125   : > { %v1005_v3 = vadd.f32 %v990_v62, %v8673_v44  ;;  %7125 = vmatprep.mubr.msk.bf16.mxu0 %vm10650_vm0, %v7837_v2 }
 0x126   : > { %v1135_v28 = vpop.f32.mrf.mxu1  ;;  %v6883_v52 = vpop.f32.mrf.mxu0 }
 0x127   : > { %v8770_v42 = vadd.f32 %v1132_v53, %v1005_v3  ;;  %v8815_v52 = vcombine.low %v8434_v11, %v8718_v48 }
 0x128   : > { %v6910_v47 = vpop.f32.mrf.mxu1  ;;  %v993_v27 = vpop.f32.mrf.mxu0 }
 0x129   : > { %v1006_v18 = vadd.f32 %v993_v27, %v8682_v36  ;;  %v2721_v11 = vrot.slane %v8815_v52, 2 }
 0x12a   : > { %v1412_v6 = vpop.f32.mrf.mxu1  ;;  %7148 = vmatmul.mubr.msk.bf16.gmra.mxu1 %vm1937_vm8, %v2484_v58  ;;  %v6884_v51 = vpop.f32.mrf.mxu0  ;;  %v2719_v58 = vrot.slane %v8566_v4, 2 }
 0x12b   : > { %7175 = vmatprep.mubr.msk.bf16.mxu1 %vm10650_vm0, %v7837_v2  ;;  %v8780_v24 = vadd.f32 %v1135_v28, %v1006_v18 }
 0x12c   : > { %v6945_v44 = vpop.f32.mrf.mxu1  ;;  %v1277_v55 = vpop.f32.mrf.mxu0  ;;  %7126 = vmatmul.mubr.msk.bf16.gmra.mxu0 %vm1937_vm8, %v2324_v21 }
 0x12d   : > { %v1316_v36 = vadd.f32 %v1277_v55, %v8696_v35  ;;  %7153 = vmatprep.mubr.msk.bf16.mxu0 %vm10650_vm0, %v7837_v2 }
 0x12e   : > { %v1415_v20 = vpop.f32.mrf.mxu1  ;;  %v6919_v22 = vpop.f32.mrf.mxu0 }
 0x12f   : > { %v8790_v63 = vadd.f32 %v1412_v6, %v1316_v36  ;;  %v2720_v6 = vsel %vm10646_vm4, %v2717_v0, %v2719_v58 }
 0x130   : > { %v6946_v37 = vpop.f32.mrf.mxu1  ;;  %v1280_v9 = vpop.f32.mrf.mxu0 }
 0x131   : > { %v1317_v35 = vadd.f32 %v1280_v9, %v8703_v41 }
 0x132   : > { %v1420_v40 = vpop.f32.mrf.mxu1  ;;  %7176 = vmatmul.mubr.msk.bf16.vlgmr.msra.gmra.mxu1 %vm1937_vm8, %v2716_v14  ;;  %v6920_v13 = vpop.f32.mrf.mxu0  ;;  %v2722_v14 = vsel %vm10646_vm4, %v2719_v58, %v2721_v11  ;;  %v2973_v58 = vrot.slane %v8322_v31, 3 }
 0x133   : > { %7218 = vmatpush3.bf16.msra.mxu1 %v7766_v16  ;;  %7179 = vmatprep.mubr.msk.bf16.mxu1 %vm10650_vm0, %v7837_v2  ;;  %v8798_v17 = vadd.f32 %v1415_v20, %v1317_v35  ;;  %v8834_v16 = vld [vmem:[%s8131_s25 + $0x30] ss:$0 sps:$4 sm:$0x77]  }
 0x134   : > { %v6949_v7 = vpop.f32.mrf.mxu1  ;;  %7263 = vmatprep.subr.bf16.mxu1 %v7837_v2  ;;  %v1285_v57 = vpop.f32.mrf.mxu0  ;;  %7154 = vmatmul.mubr.msk.bf16.vlgmr.msra.gmra.mxu0 %vm1937_vm8, %v8508_v45  ;;  %v2723_v0 = vrot.slane %v8834_v16, 2 }
 0x135   : > { %v1318_v43 = vadd.f32 %v1285_v57, %v8715_v8  ;;  %7196 = vmatpush3.bf16.msra.mxu0 %v7765_v23  ;;  %7157 = vmatprep.mubr.msk.bf16.mxu0 %vm10650_vm0, %v7837_v2 }
 0x136   : > { %v1423_v53 = vpop.f32.mrf.mxu1  ;;  %v6923_v41 = vpop.f32.mrf.mxu0  ;;  %7239 = vmatprep.subr.bf16.mxu0 %v7837_v2  ;;  %v2724_v13 = vsel %vm10646_vm4, %v2721_v11, %v2723_v0 }
 0x137   : > { %v8810_v62 = vadd.f32 %v1420_v40, %v1318_v43  ;;  %v2601_v43 = vrot.slane %v8723_v10, 2 }
 0x138   : > { %v6950_v26 = vpop.f32.mrf.mxu1  ;;  %v1288_v45 = vpop.f32.mrf.mxu0 }
 0x139   : > { %v1319_v8 = vadd.f32 %v1288_v45, %v8725_v60  ;;  %v2602_v10 = vsel %vm10646_vm4, %v2599_v59, %v2601_v43 }
 0x13a   : > { %v1428_v28 = vpop.f32.mrf.mxu1  ;;  %7180 = vmatmul.mubr.msk.bf16.gmra.mxu1 %vm1937_vm8, %v2718_v39  ;;  %v6924_v3 = vpop.f32.mrf.mxu0 }
 0x13b   : > { %7183 = vmatprep.mubr.msk.bf16.mxu1 %vm10650_vm0, %v7837_v2  ;;  %v8818_v34 = vadd.f32 %v1423_v53, %v1319_v8 }
 0x13c   : > { %v6953_v47 = vpop.f32.mrf.mxu1  ;;  %v1293_v33 = vpop.f32.mrf.mxu0  ;;  %7158 = vmatmul.mubr.msk.bf16.gmra.mxu0 %vm1937_vm8, %v8523_v1 }
 0x13d   : > { %v1320_v44 = vadd.f32 %v1293_v33, %v8738_v30  ;;  %7161 = vmatprep.mubr.msk.bf16.mxu0 %vm10650_vm0, %v7837_v2 }
 0x13e   : > { %v1431_v5 = vpop.f32.mrf.mxu1  ;;  %v6927_v60 = vpop.f32.mrf.mxu0 }
 0x13f   : > { %v8829_v48 = vadd.f32 %v1428_v28, %v1320_v44  ;;  %v2972_v28 = vrot.slane %v8287_v12, 3 }
 0x140   : > { %v6954_v27 = vpop.f32.mrf.mxu1  ;;  %v1296_v21 = vpop.f32.mrf.mxu0 }
 0x141   : > { %v1321_v51 = vadd.f32 %v1296_v21, %v8741_v50  ;;  %v2976_v21 = vsel %vm10645_vm6, %v2973_v58, %v2975_v29 }
 0x142   : > { %v1436_v18 = vpop.f32.mrf.mxu1  ;;  %7184 = vmatmul.mubr.msk.bf16.gmra.mxu1 %vm1937_vm8, %v2720_v6  ;;  %v6928_v20 = vpop.f32.mrf.mxu0 }
 0x143   : > { %7187 = vmatprep.mubr.msk.bf16.mxu1 %vm10650_vm0, %v7837_v2  ;;  %v8836_v55 = vadd.f32 %v1431_v5, %v1321_v51  ;;  %v2974_v5 = vsel %vm10645_vm6, %v2972_v28, %v2973_v58 }
 0x144   : > { %v6957_v1 = vpop.f32.mrf.mxu1  ;;  %v1301_v37 = vpop.f32.mrf.mxu0  ;;  %7162 = vmatmul.mubr.msk.bf16.gmra.mxu0 %vm1937_vm8, %v8536_v19 }
 0x145   : > { %v1322_v22 = vadd.f32 %v1301_v37, %v8752_v49  ;;  %7165 = vmatprep.mubr.msk.bf16.mxu0 %vm10650_vm0, %v7837_v2 }
 0x146   : > { %v1439_v30 = vpop.f32.mrf.mxu1  ;;  %v6931_v40 = vpop.f32.mrf.mxu0 }
 0x147   : > { %v8847_v9 = vadd.f32 %v1436_v18, %v1322_v22  ;;  %v2844_v40 = vrot.slane %v2069_v15, 3  ;;  %v2851_v15 = vshll.u32 %v8815_v52, 16 }
 0x148   : > { %v6958_v36 = vpop.f32.mrf.mxu1  ;;  %v1304_v7 = vpop.f32.mrf.mxu0 }
 0x149   : > { %v1323_v19 = vadd.f32 %v1304_v7, %v8757_v61 }
 0x14a   : > { %v1444_v50 = vpop.f32.mrf.mxu1  ;;  %7188 = vmatmul.mubr.msk.bf16.gmra.mxu1 %vm1937_vm8, %v2722_v14  ;;  %v6932_v23 = vpop.f32.mrf.mxu0 }
 0x14b   : > { %7191 = vmatprep.mubr.msk.bf16.mxu1 %vm10650_vm0, %v7837_v2  ;;  %v8851_v53 = vadd.f32 %v1439_v30, %v1323_v19 }
 0x14c   : > { %v6961_v35 = vpop.f32.mrf.mxu1  ;;  %v1309_v39 = vpop.f32.mrf.mxu0  ;;  %7166 = vmatmul.mubr.msk.bf16.gmra.mxu0 %vm1937_vm8, %v8554_v46 }
 0x14d   : > { %v1324_v26 = vadd.f32 %v1309_v39, %v8770_v42  ;;  %7169 = vmatprep.mubr.msk.bf16.mxu0 %vm10650_vm0, %v7837_v2 }
 0x14e   : > { %v1447_v49 = vpop.f32.mrf.mxu1  ;;  %v6935_v41 = vpop.f32.mrf.mxu0 }
 0x14f   : > { %v8864_v46 = vadd.f32 %v1444_v50, %v1324_v26 }
 0x150   : > { %v6962_v57 = vpop.f32.mrf.mxu1  ;;  %v1312_v45 = vpop.f32.mrf.mxu0 }
 0x151   : > { %v1325_v47 = vadd.f32 %v1312_v45, %v8780_v24 }
 0x152   : > { %v1707_v61 = vpop.f32.mrf.mxu1  ;;  %7192 = vmatmul.mubr.msk.bf16.gmra.mxu1 %vm1937_vm8, %v2724_v13  ;;  %v6936_v8 = vpop.f32.mrf.mxu0 }
 0x153   : > { %7219 = vmatprep.mubr.msk.bf16.mxu1 %vm10650_vm0, %v7837_v2  ;;  %v8871_v6 = vadd.f32 %v1447_v49, %v1325_v47  ;;  %v2860_v8 = vshll.u32 %v8834_v16, 16 }
 0x154   : > { %v6997_v42 = vpop.f32.mrf.mxu1  ;;  %v1550_v33 = vpop.f32.mrf.mxu0  ;;  %7170 = vmatmul.mubr.msk.bf16.gmra.mxu0 %vm1937_vm8, %v2602_v10 }
 0x155   : > { %v1589_v31 = vadd.f32 %v1550_v33, %v8790_v63  ;;  %7197 = vmatprep.mubr.msk.bf16.mxu0 %vm10650_vm0, %v7837_v2  ;;  %v2981_v33 = vrot.slane %v8834_v16, 3 }
 0x156   : > { %v1710_v3 = vpop.f32.mrf.mxu1  ;;  %v6971_v24 = vpop.f32.mrf.mxu0 }
 0x157   : > { %v8881_v59 = vadd.f32 %v1707_v61, %v1589_v31  ;;  %v2853_v61 = vrot.slane %v2851_v15, 3 }
 0x158   : > { %v6998_v12 = vpop.f32.mrf.mxu1  ;;  %v1553_v44 = vpop.f32.mrf.mxu0 }
 0x159   : > { %v1590_v18 = vadd.f32 %v1553_v44, %v8798_v17  ;;  %v2977_v17 = vrot.slane %v8566_v4, 3  ;;  %v2848_v4 = vshrl.u32 %v8815_v52, 16  ;;  %v2862_v44 = vrot.slane %v2860_v8, 3 }
 0x15a   : > { %v1715_v27 = vpop.f32.mrf.mxu1  ;;  %7220 = vmatmul.mubr.msk.bf16.vlgmr.msra.gmra.mxu1 %vm1937_vm8, %v2974_v5  ;;  %v6972_v11 = vpop.f32.mrf.mxu0 }
 0x15b   : > { %7223 = vmatprep.mubr.msk.bf16.mxu1 %vm10650_vm0, %v7837_v2  ;;  %v8885_v1 = vadd.f32 %v1710_v3, %v1590_v18  ;;  %v2978_v7 = vsel %vm10645_vm6, %v2975_v29, %v2977_v17  ;;  %v2850_v41 = vrot.slane %v2848_v4, 2 }
 0x15c   : > { %v7001_v60 = vpop.f32.mrf.mxu1  ;;  %v1558_v51 = vpop.f32.mrf.mxu0  ;;  %7198 = vmatmul.mubr.msk.bf16.vlgmr.msra.gmra.mxu0 %vm1937_vm8, %v8587_v25 }
 0x15d   : > { %v1591_v30 = vadd.f32 %v1558_v51, %v8810_v62  ;;  %7201 = vmatprep.mubr.msk.bf16.mxu0 %vm10650_vm0, %v7837_v2  ;;  %v2843_v62 = vrot.slane %v2073_v56, 2 }
 0x15e   : > { %v1718_v63 = vpop.f32.mrf.mxu1  ;;  %v6975_v32 = vpop.f32.mrf.mxu0 }
 0x15f   : > { %v8896_v37 = vadd.f32 %v1715_v27, %v1591_v30  ;;  %v2845_v56 = vor.u32 %v2844_v40, %v2843_v62 }
 0x160   : > { %v7002_v20 = vpop.f32.mrf.mxu1  ;;  %v1561_v36 = vpop.f32.mrf.mxu0 }
 0x161   : > { %v1592_v25 = vadd.f32 %v1561_v36, %v8818_v34  ;;  %v2846_v43 = vsel %vm10647_vm3, %v8611_v38, %v2845_v56  ;;  %v2857_v38 = vshrl.u32 %v8834_v16, 16 }
 0x162   : > { %v1723_v14 = vpop.f32.mrf.mxu1  ;;  %7224 = vmatmul.mubr.msk.bf16.gmra.mxu1 %vm1937_vm8, %v2976_v21  ;;  %v6976_v50 = vpop.f32.mrf.mxu0 }
 0x163   : > { %7227 = vmatprep.mubr.msk.bf16.mxu1 %vm10650_vm0, %v7837_v2  ;;  %v8904_v35 = vadd.f32 %v1718_v63, %v1592_v25  ;;  %v2859_v29 = vrot.slane %v2857_v38, 2 }
 0x164   : > { %v7005_v22 = vpop.f32.mrf.mxu1  ;;  %v1566_v19 = vpop.f32.mrf.mxu0  ;;  %7202 = vmatmul.mubr.msk.bf16.gmra.mxu0 %vm1937_vm8, %v8617_v54  ;;  %v2979_v54 = vrot.slane %v8815_v52, 3 }
 0x165   : > { %v1593_v49 = vadd.f32 %v1566_v19, %v8829_v48  ;;  %7205 = vmatprep.mubr.msk.bf16.mxu0 %vm10650_vm0, %v7837_v2 }
 0x166   : > { %v1726_v0 = vpop.f32.mrf.mxu1  ;;  %v6979_v34 = vpop.f32.mrf.mxu0  ;;  %v2980_v45 = vsel %vm10645_vm6, %v2977_v17, %v2979_v54  ;;  %v2982_v11 = vsel %vm10645_vm6, %v2979_v54, %v2981_v33 }
 0x167   : > { %v8917_v39 = vadd.f32 %v1723_v14, %v1593_v49 }
 0x168   : > { %v7006_v23 = vpop.f32.mrf.mxu1  ;;  %v1569_v48 = vpop.f32.mrf.mxu0 }
 0x169   : > { %v1594_v26 = vadd.f32 %v1569_v48, %v8836_v55  ;;  %v2854_v55 = vor.u32 %v2853_v61, %v2850_v41 }
 0x16a   : > { %v1731_v13 = vpop.f32.mrf.mxu1  ;;  %7228 = vmatmul.mubr.msk.bf16.gmra.mxu1 %vm1937_vm8, %v2978_v7  ;;  %v6980_v28 = vpop.f32.mrf.mxu0 }
 0x16b   : > { %7231 = vmatprep.mubr.msk.bf16.mxu1 %vm10650_vm0, %v7837_v2  ;;  %v8923_v42 = vadd.f32 %v1726_v0, %v1594_v26  ;;  %v2855_v27 = vsel %vm10647_vm3, %v2845_v56, %v2854_v55 }
 0x16c   : > { %v7009_v57 = vpop.f32.mrf.mxu1  ;;  %v1574_v47 = vpop.f32.mrf.mxu0  ;;  %7206 = vmatmul.mubr.msk.bf16.gmra.mxu0 %vm1937_vm8, %v2846_v43 }
 0x16d   : > { %v1595_v10 = vadd.f32 %v1574_v47, %v8847_v9  ;;  %7209 = vmatprep.mubr.msk.bf16.mxu0 %vm10650_vm0, %v7837_v2 }
 0x16e   : > { %v1734_v58 = vpop.f32.mrf.mxu1  ;;  %v6983_v3 = vpop.f32.mrf.mxu0 }
 0x16f   : > { %v8935_v12 = vadd.f32 %v1731_v13, %v1595_v10 }
 0x170   : > { %v7010_v52 = vpop.f32.mrf.mxu1  ;;  %v1577_v9 = vpop.f32.mrf.mxu0 }
 0x171   : > { %v1596_v24 = vadd.f32 %v1577_v9, %v8851_v53  ;;  %v2863_v53 = vor.u32 %v2862_v44, %v2859_v29 }
 0x172   : > { %v1739_v5 = vpop.f32.mrf.mxu1  ;;  %7232 = vmatmul.mubr.msk.bf16.gmra.mxu1 %vm1937_vm8, %v2980_v45  ;;  %v6984_v60 = vpop.f32.mrf.mxu0 }
 0x173   : > { %7235 = vmatprep.mubr.msk.bf16.mxu1 %vm10650_vm0, %v7837_v2  ;;  %v8940_v63 = vadd.f32 %v1734_v58, %v1596_v24  ;;  %v2864_v22 = vsel %vm10647_vm3, %v2854_v55, %v2863_v53 }
 0x174   : > { %v7013_v31 = vpop.f32.mrf.mxu1  ;;  %v1582_v21 = vpop.f32.mrf.mxu0  ;;  %7210 = vmatmul.mubr.msk.bf16.gmra.mxu0 %vm1937_vm8, %v2855_v27 }
 0x175   : > { %v1597_v51 = vadd.f32 %v1582_v21, %v8864_v46  ;;  %7213 = vmatprep.mubr.msk.bf16.mxu0 %vm10650_vm0, %v7837_v2 }
 0x176   : > { %v1742_v18 = vpop.f32.mrf.mxu1  ;;  %v6987_v20 = vpop.f32.mrf.mxu0 }
 0x177   : > { %v8947_v32 = vadd.f32 %v1739_v5, %v1597_v51 }
 0x178   : > { %v7014_v16 = vpop.f32.mrf.mxu1  ;;  %v1585_v14 = vpop.f32.mrf.mxu0 }
 0x179   : > { %v1598_v36 = vadd.f32 %v1585_v14, %v8871_v6  ;;  %v7839_v16 = vmov 0  }
 0x17a   : > { %v1987_v30 = vpop.f32.mrf.mxu1  ;;  %7236 = vmatmul.mubr.msk.bf16.gmra.mxu1 %vm1937_vm8, %v2982_v11  ;;  %v6988_v46 = vpop.f32.mrf.mxu0  ;;  %358 = vst.msk [vmem:[#allocation2 + $0x4] sm:$0xf] %vm10652_vm9, %v7839_v16  ;;  %357 = vst.msk [vmem:[#allocation2] sm:$0xf] %vm10652_vm9, %v7839_v16 }
 0x17b   : > { %7267 = vmatprep.mubr.msk.bf16.mxu1 %vm10650_vm0, %v7837_v2  ;;  %v8953_v62 = vadd.f32 %v1742_v18, %v1598_v36  ;;  %359 = vst.msk [vmem:[#allocation2 + $0x8] sm:$0xf] %vm10652_vm9, %v7839_v16  ;;  %360 = vst.msk [vmem:[#allocation2 + $0xc] sm:$0xf] %vm10652_vm9, %v7839_v16 }
 0x17c   : > { %v7045_v17 = vpop.f32.mrf.mxu1  ;;  %v1842_v40 = vpop.f32.mrf.mxu0  ;;  %7214 = vmatmul.mubr.msk.bf16.gmra.mxu0 %vm1937_vm8, %v2864_v22  ;;  %361 = vst.msk [vmem:[#allocation2 + $0x10] sm:$0xf] %vm10652_vm9, %v7839_v16  ;;  %362 = vst.msk [vmem:[#allocation2 + $0x14] sm:$0xf] %vm10652_vm9, %v7839_v16 }
 0x17d   : > { %v1881_v0 = vadd.f32 %v1842_v40, %v8881_v59  ;;  %7243 = vmatprep.mubr.msk.bf16.mxu0 %vm10650_vm0, %v7837_v2  ;;  %363 = vst.msk [vmem:[#allocation2 + $0x18] sm:$0xf] %vm10652_vm9, %v7839_v16  ;;  %364 = vst.msk [vmem:[#allocation2 + $0x1c] sm:$0xf] %vm10652_vm9, %v7839_v16  ;;  %vm3175_vm0 = vsmask.f32 5392 }
 0x17e   : > { %v1990_v25 = vpop.f32.mrf.mxu1  ;;  %v7023_v7 = vpop.f32.mrf.mxu0  ;;  %365 = vst.msk [vmem:[#allocation2 + $0x20] sm:$0xf] %vm10652_vm9, %v7839_v16  ;;  %366 = vst.msk [vmem:[#allocation2 + $0x24] sm:$0xf] %vm10652_vm9, %v7839_v16 }
 0x17f   : > { %v8959_v23 = vadd.f32 %v1987_v30, %v1881_v0  ;;  %367 = vst.msk [vmem:[#allocation2 + $0x28] sm:$0xf] %vm10652_vm9, %v7839_v16  ;;  %368 = vst.msk [vmem:[#allocation2 + $0x2c] sm:$0xf] %vm10652_vm9, %v7839_v16 }
 0x180   : > { %v7046_v50 = vpop.f32.mrf.mxu1  ;;  %v1845_v6 = vpop.f32.mrf.mxu0  ;;  %371 = vst.msk [vmem:[#allocation3] sm:$0xf] %vm10652_vm9, %v7839_v16  ;;  %372 = vst.msk [vmem:[#allocation3 + $0x4] sm:$0xf] %vm10652_vm9, %v7839_v16 }
 0x181   : > { %v1882_v56 = vadd.f32 %v1845_v6, %v8885_v1  ;;  %373 = vst.msk [vmem:[#allocation3 + $0x8] sm:$0xf] %vm10652_vm9, %v7839_v16  ;;  %374 = vst.msk [vmem:[#allocation3 + $0xc] sm:$0xf] %vm10652_vm9, %v7839_v16 }
 0x182   : > { %v1995_v19 = vpop.f32.mrf.mxu1  ;;  %v7024_v4 = vpop.f32.mrf.mxu0  ;;  %375 = vst.msk [vmem:[#allocation3 + $0x10] sm:$0xf] %vm10652_vm9, %v7839_v16  ;;  %376 = vst.msk [vmem:[#allocation3 + $0x14] sm:$0xf] %vm10652_vm9, %v7839_v16 }
 0x183   : > { %v8962_v34 = vadd.f32 %v1990_v25, %v1882_v56  ;;  %377 = vst.msk [vmem:[#allocation3 + $0x18] sm:$0xf] %vm10652_vm9, %v7839_v16  ;;  %378 = vst.msk [vmem:[#allocation3 + $0x1c] sm:$0xf] %vm10652_vm9, %v7839_v16 }
 0x184   : > { %v7049_v49 = vpop.f32.mrf.mxu1  ;;  %v1850_v13 = vpop.f32.mrf.mxu0  ;;  %379 = vst.msk [vmem:[#allocation3 + $0x20] sm:$0xf] %vm10652_vm9, %v7839_v16  ;;  %380 = vst.msk [vmem:[#allocation3 + $0x24] sm:$0xf] %vm10652_vm9, %v7839_v16 }
 0x185   : > { %v1883_v48 = vadd.f32 %v1850_v13, %v8896_v37  ;;  %381 = vst.msk [vmem:[#allocation3 + $0x28] sm:$0xf] %vm10652_vm9, %v7839_v16  ;;  %382 = vst.msk [vmem:[#allocation3 + $0x2c] sm:$0xf] %vm10652_vm9, %v7839_v16 }
 0x186   : > { %v1998_v15 = vpop.f32.mrf.mxu1  ;;  %v7027_v59 = vpop.f32.mrf.mxu0  ;;  %370 = vst.msk [vmem:[#allocation2 + $0x30] sm:$0x7] %vm369_vm11, %v7839_v16  ;;  %383 = vst.msk [vmem:[#allocation3 + $0x30] sm:$0x7] %vm369_vm11, %v7839_v16 }
 0x187   : > { %v8965_v26 = vadd.f32 %v1995_v19, %v1883_v48 }
 0x188   : > { %v7050_v54 = vpop.f32.mrf.mxu1  ;;  %v1853_v43 = vpop.f32.mrf.mxu0 }
 0x189   : > { %v1884_v61 = vadd.f32 %v1853_v43, %v8904_v35 }
 0x18a   : > { %v2003_v57 = vpop.f32.mrf.mxu1  ;;  %v7028_v28 = vpop.f32.mrf.mxu0 }
 0x18b   : > { %v8968_v45 = vadd.f32 %v1998_v15, %v1884_v61 }
 0x18c   : > { %v7053_v41 = vpop.f32.mrf.mxu1  ;;  %v1858_v1 = vpop.f32.mrf.mxu0 }
 0x18d   : > { %v1885_v52 = vadd.f32 %v1858_v1, %v8917_v39 }
 0x18e   : > { %v2006_v58 = vpop.f32.mrf.mxu1  ;;  %v7031_v10 = vpop.f32.mrf.mxu0 }
 0x18f   : > { %v8971_v38 = vadd.f32 %v2003_v57, %v1885_v52 }
 0x190   : > { %v7054_v47 = vpop.f32.mrf.mxu1  ;;  %v1861_v37 = vpop.f32.mrf.mxu0 }
 0x191   : > { %v1886_v3 = vadd.f32 %v1861_v37, %v8923_v42 }
 0x192   : > { %v2011_v55 = vpop.f32.mrf.mxu1  ;;  %v7032_v5 = vpop.f32.mrf.mxu0 }
 0x193   : > { %v8974_v9 = vadd.f32 %v2006_v58, %v1886_v3  ;;  %v7770_v58 = vld [vmem:[%s10639_s5 + $0x8] ss:$0 sps:$4 sm:$0xff]   ;;  %v7771_v3 = vld [vmem:[%s10639_s5] sm:$0xff]  }
 0x194   : > { %v7057_v8 = vpop.f32.mrf.mxu1  ;;  %v1866_v35 = vpop.f32.mrf.mxu0  ;;  %v3521_v52 = vsel %vm10653_vm10, %v7770_v58, 0 }
 0x195   : > { %v1887_v24 = vadd.f32 %v1866_v35, %v8935_v12  ;;  %7264 = vmatpush3.bf16.msra.mxu1 %v3521_v52 }
 0x196   : > { %v2014_v33 = vpop.f32.mrf.mxu1  ;;  %v7035_v27 = vpop.f32.mrf.mxu0  ;;  %7265 = vmatprep.subr.bf16.mxu1 %v7837_v2 }
 0x197   : > { %v8977_v44 = vadd.f32 %v2011_v55, %v1887_v24 }
 0x198   : > { %v7058_v31 = vpop.f32.mrf.mxu1  ;;  %v1869_v39 = vpop.f32.mrf.mxu0 }
 0x199   : > { %v1888_v18 = vadd.f32 %v1869_v39, %v8940_v63  ;;  %7266 = vmatpush3.bf16.msra.mxu1 %v7771_v3 }
 0x19a   : > { %v2019_v29 = vpop.f32.mrf.mxu1  ;;  %v7036_v11 = vpop.f32.mrf.mxu0  ;;  %7311 = vmatprep.subr.bf16.mxu1 %v7837_v2 }
 0x19b   : > { %v8980_v42 = vadd.f32 %v2014_v33, %v1888_v18 }
 0x19c   : > { %v7061_v60 = vpop.f32.mrf.mxu1  ;;  %v1874_v12 = vpop.f32.mrf.mxu0 }
 0x19d   : > { %v1889_v51 = vadd.f32 %v1874_v12, %v8947_v32 }
 0x19e   : > { %v2022_v21 = vpop.f32.mrf.mxu1  ;;  %v7039_v53 = vpop.f32.mrf.mxu0 }
 0x19f   : > { %v9031_v30 = vadd.f32 %v2019_v29, %v1889_v51 }
 0x1a0   : > { %v7062_v63 = vpop.f32.mrf.mxu1  ;;  %v1877_v14 = vpop.f32.mrf.mxu0 }
 0x1a1   : > { %v1890_v36 = vadd.f32 %v1877_v14, %v8953_v62 }
 0x1a2   : > { %v2254_v20 = vpop.f32.mrf.mxu1  ;;  %v7040_v22 = vpop.f32.mrf.mxu0 }
 0x1a3   : > { %v9034_v25 = vadd.f32 %v2022_v21, %v1890_v36 }
 0x1a4   : > { %v7089_v17 = vpop.f32.mrf.mxu1  ;;  %v2136_v40 = vpop.f32.mrf.mxu0 }
 0x1a5   : > { %v2175_v0 = vadd.f32 %v2136_v40, %v8959_v23  ;;  %v7768_v23 = vld [vmem:[%s10639_s5 + $0x14] ss:$0 sps:$4 sm:$0xff]  }
 0x1a6   : > { %v2257_v46 = vpop.f32.mrf.mxu1  ;;  %v7067_v7 = vpop.f32.mrf.mxu0  ;;  %v3426_v28 = vsel %vm10653_vm10, %v7768_v23, 0 }
 0x1a7   : > { %v9037_v6 = vadd.f32 %v2254_v20, %v2175_v0  ;;  %7240 = vmatpush3.bf16.msra.mxu0 %v3426_v28 }
 0x1a8   : > { %v7090_v50 = vpop.f32.mrf.mxu1  ;;  %v2139_v32 = vpop.f32.mrf.mxu0  ;;  %7241 = vmatprep.subr.bf16.mxu0 %v7837_v2 }
 0x1a9   : > { %v2176_v56 = vadd.f32 %v2139_v32, %v8962_v34 }
 0x1aa   : > { %v2262_v19 = vpop.f32.mrf.mxu1  ;;  %v7068_v4 = vpop.f32.mrf.mxu0 }
 0x1ab   : > { %v9040_v13 = vadd.f32 %v2257_v46, %v2176_v56 }
 0x1ac   : > { %v7093_v49 = vpop.f32.mrf.mxu1  ;;  %v2144_v62 = vpop.f32.mrf.mxu0 }
 0x1ad   : > { %v2177_v48 = vadd.f32 %v2144_v62, %v8965_v26 }
 0x1ae   : > { %v2265_v15 = vpop.f32.mrf.mxu1  ;;  %v7071_v59 = vpop.f32.mrf.mxu0 }
 0x1af   : > { %v9043_v43 = vadd.f32 %v2262_v19, %v2177_v48 }
 0x1b0   : > { %v7094_v54 = vpop.f32.mrf.mxu1  ;;  %v2147_v41 = vpop.f32.mrf.mxu0 }
 0x1b1   : > { %v2178_v34 = vadd.f32 %v2147_v41, %v8968_v45 }
 0x1b2   : > { %v2270_v57 = vpop.f32.mrf.mxu1  ;;  %v7072_v26 = vpop.f32.mrf.mxu0 }
 0x1b3   : > { %v9053_v47 = vadd.f32 %v2265_v15, %v2178_v34 }
 0x1b4   : > { %v7097_v61 = vpop.f32.mrf.mxu1  ;;  %v2152_v10 = vpop.f32.mrf.mxu0 }
 0x1b5   : > { %v2179_v45 = vadd.f32 %v2152_v10, %v8971_v38 }
 0x1b6   : > { %v2273_v1 = vpop.f32.mrf.mxu1  ;;  %v7075_v37 = vpop.f32.mrf.mxu0 }
 0x1b7   : > { %v2297_v5 = vadd.f32 %v2270_v57, %v2179_v45 }
 0x1b8   : > { %v7098_v55 = vpop.f32.mrf.mxu1  ;;  %v2155_v33 = vpop.f32.mrf.mxu0 }
 0x1b9   : > { %v2180_v31 = vadd.f32 %v2155_v33, %v8974_v9  ;;  %v7769_v9 = vld [vmem:[%s10639_s5 + $0xc] sm:$0xff]  }
 0x1ba   : > { %v2278_v8 = vpop.f32.mrf.mxu1  ;;  %v7076_v24 = vpop.f32.mrf.mxu0  ;;  %7242 = vmatpush3.bf16.msra.mxu0 %v7769_v9 }
 0x1bb   : > { %v2298_v29 = vadd.f32 %v2273_v1, %v2180_v31  ;;  %7287 = vmatprep.subr.bf16.mxu0 %v7837_v2 }
 0x1bc   : > { %v7101_v35 = vpop.f32.mrf.mxu1  ;;  %v2160_v38 = vpop.f32.mrf.mxu0 }
 0x1bd   : > { %v2181_v60 = vadd.f32 %v2160_v38, %v8977_v44 }
 0x1be   : > { %v2281_v27 = vpop.f32.mrf.mxu1  ;;  %v7079_v18 = vpop.f32.mrf.mxu0 }
 0x1bf   : > { %v2299_v21 = vadd.f32 %v2278_v8, %v2181_v60 }
 0x1c0   : > { %v7102_v39 = vpop.f32.mrf.mxu1  ;;  %v2163_v12 = vpop.f32.mrf.mxu0 }
 0x1c1   : > { %v2182_v51 = vadd.f32 %v2163_v12, %v8980_v42 }
 0x1c2   : > { %v2286_v11 = vpop.f32.mrf.mxu1  ;;  %v7080_v53 = vpop.f32.mrf.mxu0 }
 0x1c3   : > { %v2300_v14 = vadd.f32 %v2281_v27, %v2182_v51 }
 0x1c4   : > { %v7105_v63 = vpop.f32.mrf.mxu1  ;;  %v2168_v17 = vpop.f32.mrf.mxu0 }
 0x1c5   : > { %v2183_v22 = vadd.f32 %v2168_v17, %v9031_v30 }
 0x1c6   : > { %v2289_v20 = vpop.f32.mrf.mxu1  ;;  %v7083_v44 = vpop.f32.mrf.mxu0 }
 0x1c7   : > { %v2301_v40 = vadd.f32 %v2286_v11, %v2183_v22 }
 0x1c8   : > { %v7106_v36 = vpop.f32.mrf.mxu1  ;;  %v2171_v50 = vpop.f32.mrf.mxu0 }
 0x1c9   : > { %v2184_v42 = vadd.f32 %v2171_v50, %v9034_v25 }
 0x1ca   : > { %v2540_v46 = vpop.f32.mrf.mxu1  ;;  %v7084_v7 = vpop.f32.mrf.mxu0 }
 0x1cb   : > { %v2302_v32 = vadd.f32 %v2289_v20, %v2184_v42 }
 0x1cc   : > { %v7133_v0 = vpop.f32.mrf.mxu1  ;;  %v2380_v49 = vpop.f32.mrf.mxu0 }
 0x1cd   : > { %v2419_v4 = vadd.f32 %v2380_v49, %v9037_v6 }
 0x1ce   : > { %v2543_v19 = vpop.f32.mrf.mxu1  ;;  %v7111_v15 = vpop.f32.mrf.mxu0 }
 0x1cf   : > { %v9073_v30 = vadd.f32 %v2540_v46, %v2419_v4 }
 0x1d0   : > { %v7134_v56 = vpop.f32.mrf.mxu1  ;;  %v2383_v54 = vpop.f32.mrf.mxu0 }
 0x1d1   : > { %v2420_v59 = vadd.f32 %v2383_v54, %v9040_v13 }
 0x1d2   : > { %v2548_v62 = vpop.f32.mrf.mxu1  ;;  %v7112_v57 = vpop.f32.mrf.mxu0 }
 0x1d3   : > { %v9076_v41 = vadd.f32 %v2543_v19, %v2420_v59 }
 0x1d4   : > { %v7137_v48 = vpop.f32.mrf.mxu1  ;;  %v2388_v25 = vpop.f32.mrf.mxu0 }
 0x1d5   : > { %v2421_v34 = vadd.f32 %v2388_v25, %v9043_v43 }
 0x1d6   : > { %v2551_v23 = vpop.f32.mrf.mxu1  ;;  %v7115_v28 = vpop.f32.mrf.mxu0 }
 0x1d7   : > { %v9079_v26 = vadd.f32 %v2548_v62, %v2421_v34 }
 0x1d8   : > { %v7138_v61 = vpop.f32.mrf.mxu1  ;;  %v2391_v6 = vpop.f32.mrf.mxu0 }
 0x1d9   : > { %v2422_v52 = vadd.f32 %v2391_v6, %v9053_v47 }
 0x1da   : > { %v2556_v58 = vpop.f32.mrf.mxu1  ;;  %v7116_v10 = vpop.f32.mrf.mxu0 }
 0x1db   : > { %v9082_v45 = vadd.f32 %v2551_v23, %v2422_v52 }
 0x1dc   : > { %v7141_v1 = vpop.f32.mrf.mxu1  ;;  %v2396_v13 = vpop.f32.mrf.mxu0 }
 0x1dd   : > { %v2423_v8 = vadd.f32 %v2396_v13, %v2297_v5 }
 0x1de   : > { %v2559_v55 = vpop.f32.mrf.mxu1  ;;  %v7119_v3 = vpop.f32.mrf.mxu0 }
 0x1df   : > { %v9084_v35 = vadd.f32 %v2556_v58, %v2423_v8 }
 0x1e0   : > { %v7142_v37 = vpop.f32.mrf.mxu1  ;;  %v2399_v43 = vpop.f32.mrf.mxu0 }
 0x1e1   : > { %v2424_v24 = vadd.f32 %v2399_v43, %v2298_v29 }
 0x1e2   : > { %v2564_v33 = vpop.f32.mrf.mxu1  ;;  %v7120_v27 = vpop.f32.mrf.mxu0 }
 0x1e3   : > { %v9086_v39 = vadd.f32 %v2559_v55, %v2424_v24 }
 0x1e4   : > { %v7145_v31 = vpop.f32.mrf.mxu1  ;;  %v2404_v60 = vpop.f32.mrf.mxu0 }
 0x1e5   : > { %v2425_v18 = vadd.f32 %v2404_v60, %v2299_v21 }
 0x1e6   : > { %v2567_v38 = vpop.f32.mrf.mxu1  ;;  %v7123_v11 = vpop.f32.mrf.mxu0 }
 0x1e7   : > { %v9088_v63 = vadd.f32 %v2564_v33, %v2425_v18 }
 0x1e8   : > { %v7146_v47 = vpop.f32.mrf.mxu1  ;;  %v2407_v51 = vpop.f32.mrf.mxu0 }
 0x1e9   : > { %v2426_v53 = vadd.f32 %v2407_v51, %v2300_v14 }
 0x1ea   : > { %v2572_v12 = vpop.f32.mrf.mxu1  ;;  %v7124_v20 = vpop.f32.mrf.mxu0 }
 0x1eb   : > { %v9090_v17 = vadd.f32 %v2567_v38, %v2426_v53 }
 0x1ec   : > { %v7149_v5 = vpop.f32.mrf.mxu1  ;;  %v2412_v36 = vpop.f32.mrf.mxu0 }
 0x1ed   : > { %v2427_v22 = vadd.f32 %v2412_v36, %v2301_v40  ;;  %v384_v40 = vlaneseq }
 0x1ee   : > { %v2575_v9 = vpop.f32.mrf.mxu1  ;;  %v7127_v44 = vpop.f32.mrf.mxu0 }
 0x1ef   : > { %v9094_v50 = vadd.f32 %v2572_v12, %v2427_v22 }
 0x1f0   : > { %v7150_v29 = vpop.f32.mrf.mxu1  ;;  %v2415_v21 = vpop.f32.mrf.mxu0 }
 0x1f1   : > { %v2428_v42 = vadd.f32 %v2415_v21, %v2302_v32  ;;  %v9110_v32 = vshrl.u32 %v384_v40, 7 }
 0x1f2   : > { %v9092_v46 = vpop.f32.mrf.mxu1  ;;  %v7128_v7 = vpop.f32.mrf.mxu0 }
 0x1f3   : > { %v9098_v49 = vadd.f32 %v2575_v9, %v2428_v42  ;;  %v386_v25 = vadd.s32 8, %v9110_v32  ;;  %v9118_v28 = vmul.u32.u64.low 3435973837, %v9110_v32  ;;  %v9119_v58 = vmul.u32.u64.high 3435973837, %v9110_v32, %v9118_v28 }
 0x1f4   : > { %v7177_v0 = vpop.f32.mrf.mxu1  ;;  %v9100_v14 = vpop.f32.mrf.mxu0  ;;  %v387_v6 = vadd.s32 16, %v9110_v32  ;;  %v388_v1 = vadd.s32 24, %v9110_v32  ;;  %v9141_v60 = vadd.s32 32, %v9110_v32  ;;  %v9147_v12 = vadd.s32 40, %v9110_v32 }
 0x1f5   : > { %v9125_v10 = vmul.u32.u64.low 3435973837, %v386_v25  ;;  %v9126_v55 = vmul.u32.u64.high 3435973837, %v386_v25, %v9125_v10  ;;  %v401_v47 = vshrl.u32 %v9119_v58, 3  ;;  %v9157_v36 = vadd.s32 48, %v9110_v32 }
 0x1f6   : > { %v9096_v19 = vpop.f32.mrf.mxu1  ;;  %v7155_v4 = vpop.f32.mrf.mxu0  ;;  %v9130_v8 = vmul.u32.u64.low 3435973837, %v387_v6  ;;  %v9131_v3 = vmul.u32.u64.high 3435973837, %v387_v6, %v9130_v8  ;;  %v9133_v33 = vmul.u32.u64.low 3435973837, %v388_v1  ;;  %v9134_v43 = vmul.u32.u64.high 3435973837, %v388_v1, %v9133_v33 }
 0x1f7   : > { %v412_v51 = vshrl.u32 %v9126_v55, 3  ;;  %v9153_v20 = vmul.u32.u64.low 3435973837, %v9141_v60  ;;  %v9154_v9 = vmul.u32.u64.high 3435973837, %v9141_v60, %v9153_v20  ;;  %v402_v29 = vmul.u32 10, %v401_v47 }
 0x1f8   : > { %v7178_v56 = vpop.f32.mrf.mxu1  ;;  %v9104_v62 = vpop.f32.mrf.mxu0  ;;  %v423_v22 = vshrl.u32 %v9131_v3, 3  ;;  %v434_v44 = vshrl.u32 %v9134_v43, 3  ;;  %v9164_v42 = vmul.u32.u64.low 3435973837, %v9147_v12  ;;  %v9165_v7 = vmul.u32.u64.high 3435973837, %v9147_v12, %v9164_v42 }
 0x1f9   : > { %v9168_v56 = vadd.s32 56, %v9110_v32  ;;  %v9171_v4 = vadd.s32 64, %v9110_v32  ;;  %v413_v40 = vmul.u32 10, %v412_v51  ;;  %v403_v28 = vsub.s32 %v9110_v32, %v402_v29 }
 0x1fa   : > { %v9102_v15 = vpop.f32.mrf.mxu1  ;;  %v7156_v48 = vpop.f32.mrf.mxu0  ;;  %v424_v58 = vmul.u32 10, %v423_v22  ;;  %v445_v47 = vshrl.u32 %v9154_v9, 3  ;;  %v456_v29 = vshrl.u32 %v9165_v7, 3  ;;  %v2697_v7 = vadd.f32 %v9100_v14, %v9073_v30 }
 0x1fb   : > { %v9187_v3 = vmul.u32.u64.low 3435973837, %v9171_v4  ;;  %v9188_v33 = vmul.u32.u64.high 3435973837, %v9171_v4, %v9187_v3  ;;  %v414_v43 = vsub.s32 %v386_v25, %v413_v40  ;;  %vm505_vm12 = vcmp.ne.s32.totalorder %v403_v28, 0 }
 0x1fc   : > { %v7181_v54 = vpop.f32.mrf.mxu1  ;;  %v9112_v57 = vpop.f32.mrf.mxu0  ;;  %vm515_vm13 = vcmp.lt.s32.totalorder %v403_v28, 0  ;;  %v535_v22 = vadd.s32 10, %v403_v28  ;;  %v9201_v25 = vadd.s32 72, %v9110_v32 }
 0x1fd   : > { %vm506_vm14 = vcmp.ne.s32.totalorder %v414_v43, 0  ;;  %vm516_vm15 = vcmp.lt.s32.totalorder %v414_v43, 0  ;;  %vm9204_vm1 = vmand %vm515_vm13, %vm505_vm12  ;;  %v489_v30 = vshrl.u32 %v9188_v33, 3 }
 0x1fe   : > { %v9106_v59 = vpop.f32.mrf.mxu1  ;;  %v7159_v61 = vpop.f32.mrf.mxu0  ;;  %vm9217_vm12 = vmand %vm516_vm15, %vm506_vm14  ;;  %v545_v14 = vsel %vm9204_vm1, %v535_v22, %v403_v28  ;;  %v2698_v28 = vadd.f32 %v9104_v62, %v9076_v41 }
 0x1ff   : > { %v490_v41 = vmul.u32 10, %v489_v30  ;;  %vm9257_vm1 = vcmp.lt.s32.totalorder %v545_v14, 8 }
 0x200   : > { %v7182_v23 = vpop.f32.mrf.mxu1  ;;  %v9123_v52 = vpop.f32.mrf.mxu0  ;;  %v2820_v30 = vadd.f32 %v9096_v19, %v2698_v28 }
 0x201   : > { %v9176_v23 = vmul.u32.u64.low 3435973837, %v9157_v36  ;;  %v9177_v61 = vmul.u32.u64.high 3435973837, %v9157_v36, %v9176_v23 }
 0x202   : > { %v9115_v34 = vpop.f32.mrf.mxu1  ;;  %v7160_v13 = vpop.f32.mrf.mxu0  ;;  %v457_v23 = vmul.u32 10, %v456_v29 }
 0x203   : > { %v9183_v13 = vmul.u32.u64.low 3435973837, %v9168_v56  ;;  %v9184_v8 = vmul.u32.u64.high 3435973837, %v9168_v56, %v9183_v13  ;;  %v467_v42 = vshrl.u32 %v9177_v61, 3 }
 0x204   : > { %v7185_v16 = vpop.f32.mrf.mxu1  ;;  %v9136_v31 = vpop.f32.mrf.mxu0  ;;  %v9255_v9 = vsub.s32 %v9147_v12, %v457_v23  ;;  %v2699_v23 = vadd.f32 %v9112_v57, %v9079_v26 }
 0x205   : > { %v435_v16 = vmul.u32 10, %v434_v44  ;;  %v478_v61 = vshrl.u32 %v9184_v8, 3  ;;  %v468_v33 = vmul.u32 10, %v467_v42 }
 0x206   : > { %v9128_v37 = vpop.f32.mrf.mxu1  ;;  %v7163_v27 = vpop.f32.mrf.mxu0 }
 0x207   : > { %v9195_v51 = vsub.s32 %v388_v1, %v435_v16  ;;  %v446_v1 = vmul.u32 10, %v445_v47 }
 0x208   : > { %v7186_v24 = vpop.f32.mrf.mxu1  ;;  %v9144_v18 = vpop.f32.mrf.mxu0 }
 0x209   : > { %vm508_vm7 = vcmp.ne.s32.totalorder %v9195_v51, 0  ;;  %vm518_vm13 = vcmp.lt.s32.totalorder %v9195_v51, 0  ;;  %v9236_v47 = vadd.s32 10, %v9195_v51  ;;  %v9239_v8 = vsub.s32 %v9141_v60, %v446_v1 }
 0x20a   : > { %v9138_v38 = vpop.f32.mrf.mxu1  ;;  %v7164_v5 = vpop.f32.mrf.mxu0  ;;  %vm9250_vm15 = vmand %vm518_vm13, %vm508_vm7  ;;  %v479_v1 = vmul.u32 10, %v478_v61  ;;  %vm3288_vm13 = vsmask.f32 7942 }
 0x20c   : > { %v7189_v11 = vpop.f32.mrf.mxu1  ;;  %v9161_v21 = vpop.f32.mrf.mxu0 }
 0x20d   : > { %v9193_v11 = vsub.s32 %v387_v6, %v424_v58  ;;  %v536_v6 = vadd.s32 10, %v414_v43  ;;  %v9227_v58 = vmul.u32.u64.low 3435973837, %v9201_v25  ;;  %v9228_v16 = vmul.u32.u64.high 3435973837, %v9201_v25, %v9227_v58 }
 0x20e   : > { %v9150_v53 = vpop.f32.mrf.mxu1  ;;  %v7167_v54 = vpop.f32.mrf.mxu0  ;;  %v539_v58 = vadd.s32 10, %v9239_v8 }
 0x20f   : > { %vm507_vm8 = vcmp.ne.s32.totalorder %v9193_v11, 0  ;;  %vm517_vm11 = vcmp.lt.s32.totalorder %v9193_v11, 0  ;;  %v546_v29 = vsel %vm9217_vm12, %v536_v6, %v414_v43  ;;  %v9264_v43 = vld [vmem:[%s10638_s4] ss:$0 sm:$0xff]  ;;  %v9279_v54 = vsub.s32 %v9157_v36, %v468_v33 }
 0x210   : > { %v7190_v0 = vpop.f32.mrf.mxu1  ;;  %v9180_v10 = vpop.f32.mrf.mxu0  ;;  %vm9230_vm14 = vmand %vm517_vm11, %vm507_vm8  ;;  %vm9266_vm7 = vcmp.lt.s32.totalorder %v546_v29, 8  ;;  %vm509_vm8 = vcmp.ne.s32.totalorder %v9239_v8, 0  ;;  %vm519_vm11 = vcmp.lt.s32.totalorder %v9239_v8, 0  ;;  %v9291_v36 = vsub.s32 %v9171_v4, %v490_v41 }
 0x211   : > { %v500_v19 = vshrl.u32 %v9228_v16, 3  ;;  %vm511_vm4 = vcmp.ne.s32.totalorder %v9279_v54, 0  ;;  %vm521_vm3 = vcmp.lt.s32.totalorder %v9279_v54, 0  ;;  %v2700_v4 = vadd.f32 %v9123_v52, %v9082_v45  ;;  %vm9315_vm5 = vmand %vm519_vm11, %vm509_vm8 }
 0x212   : > { %v9173_v48 = vpop.f32.mrf.mxu1  ;;  %v7168_v24 = vpop.f32.mrf.mxu0  ;;  %v2821_v33 = vadd.f32 %v9102_v15, %v2699_v23  ;;  %vm513_vm8 = vcmp.ne.s32.totalorder %v9291_v36, 0  ;;  %vm523_vm11 = vcmp.lt.s32.totalorder %v9291_v36, 0  ;;  %v9353_v23 = vadd.s32 10, %v9291_v36 }
 0x213   : > { %v537_v24 = vadd.s32 10, %v9193_v11 }
 0x214   : > { %v7193_v55 = vpop.f32.mrf.mxu1  ;;  %v9197_v5 = vpop.f32.mrf.mxu0 }
 0x215   : > { %v547_v12 = vsel %vm9230_vm14, %v537_v24, %v9193_v11  ;;  %vm510_vm14 = vcmp.ne.s32.totalorder %v9255_v9, 0  ;;  %v9301_v24 = vadd.s32 10, %v9255_v9 }
 0x216   : > { %v9190_v27 = vpop.f32.mrf.mxu1  ;;  %v7171_v44 = vpop.f32.mrf.mxu0  ;;  %vm9296_vm6 = vcmp.lt.s32.totalorder %v547_v12, 8 }
 0x218   : > { %v7194_v20 = vpop.f32.mrf.mxu1  ;;  %v9214_v32 = vpop.f32.mrf.mxu0 }
 0x219   : > { %v2819_v20 = vadd.f32 %v9092_v46, %v2697_v7 }
 0x21a   : > { %v3038_v0 = vpop.f32.mrf.mxu1  ;;  %v7172_v55 = vpop.f32.mrf.mxu0 }
 0x21c   : > { %v7221_v40 = vpop.f32.mrf.mxu1  ;;  %v2920_v44 = vpop.f32.mrf.mxu0 }
 0x21d   : > { %v2959_v62 = vadd.f32 %v2920_v44, %v2819_v20  ;;  %v548_v40 = vsel %vm9250_vm15, %v9236_v47, %v9195_v51  ;;  %v9288_v51 = vsub.s32 %v9168_v56, %v479_v1  ;;  %vm520_vm15 = vcmp.lt.s32.totalorder %v9255_v9, 0 }
 0x21e   : > { %v3041_v13 = vpop.f32.mrf.mxu1  ;;  %v7199_v6 = vpop.f32.mrf.mxu0  ;;  %v9306_v56 = vadd.s32 10, %v9279_v54  ;;  %vm9323_vm9 = vmand %vm520_vm15, %vm510_vm14  ;;  %v501_v44 = vmul.u32 10, %v500_v19  ;;  %vm9342_vm15 = vcmp.lt.s32.totalorder %v548_v40, 8  ;;  %v2822_v40 = vadd.f32 %v9106_v59, %v2700_v4 }
 0x21f   : > { %v3077_v61 = vadd.f32 %v3038_v0, %v2959_v62  ;;  %vm512_vm10 = vcmp.ne.s32.totalorder %v9288_v51, 0  ;;  %vm522_vm12 = vcmp.lt.s32.totalorder %v9288_v51, 0  ;;  %vm9338_vm14 = vmand %vm521_vm3, %vm511_vm4  ;;  %v549_v6 = vsel %vm9315_vm5, %v539_v58, %v9239_v8 }
 0x220   : > { %v7222_v60 = vpop.f32.mrf.mxu1  ;;  %v2923_v11 = vpop.f32.mrf.mxu0  ;;  %v9350_v12 = vadd.s32 10, %v9288_v51  ;;  %vm9362_vm3 = vmand %vm522_vm12, %vm512_vm10  ;;  %v551_v59 = vsel %vm9338_vm14, %v9306_v56, %v9279_v54  ;;  %vm9388_vm5 = vcmp.lt.s32.totalorder %v549_v6, 8  ;;  %v7780_v6 = vld [vmem:[%s10639_s5 + $0x2c] ss:$0 sps:$4 sm:$0xff]   ;;  %vm10655_vm12 = vcmask 195584  }
 0x221   : > { %v3094_v26 = vadd.f32 %v9264_v43, %v3077_v61  ;;  %v2960_v57 = vadd.f32 %v2923_v11, %v2820_v30  ;;  %v2701_v61 = vadd.f32 %v9136_v31, %v9084_v35  ;;  %v550_v35 = vsel %vm9323_vm9, %v9301_v24, %v9255_v9  ;;  %vm9378_vm4 = vmand %vm523_vm11, %vm513_vm8 }
 0x222   : > { %v3046_v7 = vpop.f32.mrf.mxu1  ;;  %v7200_v0 = vpop.f32.mrf.mxu0  ;;  %v9386_v9 = vsub.s32 %v9201_v25, %v501_v44  ;;  %vm10689_vm9 = vcmask 191489   ;;  %v3290_v25 = vld [vmem:[#allocation2 + $0x4] sm:$0xe]  ;;  %vm9428_vm11 = vmor %vm10654_vm2, %vm3175_vm0  ;;  %vm9432_vm14 = vcmp.lt.s32.totalorder %v550_v35, 8  ;;  %vm9443_vm0 = vcmp.lt.s32.totalorder %v551_v59, 8 }
 0x223   : > { %v3104_v16 = vmax.f32 %v3094_v26, 0.0  ;;  %v3078_v47 = vadd.f32 %v3041_v13, %v2960_v57  ;;  %vm9398_vm10 = vmand %vm10689_vm9, %vm3288_vm13  ;;  %v2823_v45 = vadd.f32 %v9115_v34, %v2701_v61  ;;  %vm10696_vm9 = vcmask 1043456  }
 0x224   : > { %v7225_v14 = vpop.f32.mrf.mxu1  ;;  %v2928_v20 = vpop.f32.mrf.mxu0  ;;  %vm514_vm13 = vcmp.ne.s32.totalorder %v9386_v9, 0  ;;  %vm524_vm8 = vcmp.lt.s32.totalorder %v9386_v9, 0 }
 0x225   : > { %v3134_v15 = vsel %vm9257_vm1, %v3104_v16, 0.0  ;;  %v3095_v52 = vadd.f32 %v9264_v43, %v3078_v47  ;;  %v2961_v13 = vadd.f32 %v2928_v20, %v2821_v33  ;;  %v552_v33 = vsel %vm9362_vm3, %v9350_v12, %v9288_v51 }
 0x226   : > { %v3049_v3 = vpop.f32.mrf.mxu1  ;;  %v6535_v60 = vpack.c.bf16 %v3134_v15, %v3134_v15  ;;  %v7203_v1 = vpop.f32.mrf.mxu0  ;;  %v553_v15 = vsel %vm9378_vm4, %v9353_v23, %v9291_v36  ;;  %vm9471_vm2 = vcmp.lt.s32.totalorder %v552_v33, 8  ;;  %v10704_v33 = vmov 0 }
 0x227   : > { %v3105_v30 = vmax.f32 %v3095_v52, 0.0  ;;  %v3079_v11 = vadd.f32 %v3046_v7, %v2961_v13  ;;  %v2702_v52 = vadd.f32 %v9144_v18, %v9086_v39  ;;  %v2703_v39 = vadd.f32 %v9161_v21, %v9088_v63 }
 0x228   : > { %v7226_v29 = vpop.f32.mrf.mxu1  ;;  %v3178_v8 = vshrl.u32 %v6535_v60, 16  ;;  %v3181_v58 = vshll.u32 %v6535_v60, 16  ;;  %v2931_v26 = vpop.f32.mrf.mxu0  ;;  %vm9492_vm3 = vcmp.lt.s32.totalorder %v553_v15, 8 }
 0x229   : > { %v3135_v7 = vsel %vm9266_vm7, %v3105_v30, 0.0  ;;  %v3096_v19 = vadd.f32 %v9264_v43, %v3079_v11  ;;  %v2962_v0 = vadd.f32 %v2931_v26, %v2822_v40  ;;  %v9416_v30 = vadd.s32 10, %v9386_v9 }
 0x22a   : > { %v3054_v62 = vpop.f32.mrf.mxu1  ;;  %v3180_v24 = vrot.slane %v3178_v8, 6  ;;  %v3183_v4 = vrot.slane %v3181_v58, 7  ;;  %v6536_v54 = vpack.c.bf16 %v3135_v7, %v3135_v7  ;;  %v7204_v56 = vpop.f32.mrf.mxu0  ;;  %v2704_v26 = vadd.f32 %v9180_v10, %v9090_v17 }
 0x22b   : > { %v3106_v20 = vmax.f32 %v3096_v19, 0.0  ;;  %v3080_v29 = vadd.f32 %v3049_v3, %v2962_v0  ;;  %v3769_v10 = vsel %vm10696_vm9, %v7780_v6, 0  ;;  %vm10699_vm9 = vcmask 191488  }
 0x22c   : > { %v7229_v57 = vpop.f32.mrf.mxu1  ;;  %v3184_v13 = vor.u32 %v3183_v4, %v3180_v24  ;;  %v3187_v22 = vshrl.u32 %v6536_v54, 16  ;;  %v3190_v44 = vshll.u32 %v6536_v54, 16  ;;  %v2936_v60 = vpop.f32.mrf.mxu0  ;;  %v2824_v4 = vadd.f32 %v9128_v37, %v2702_v52 }
 0x22d   : > { %v3136_v34 = vsel %vm9296_vm6, %v3106_v20, 0.0  ;;  %v3097_v3 = vadd.f32 %v9264_v43, %v3080_v29  ;;  %v2963_v61 = vadd.f32 %v2936_v60, %v2823_v45  ;;  %v2825_v37 = vadd.f32 %v9138_v38, %v2703_v39 }
 0x22e   : > { %v3057_v47 = vpop.f32.mrf.mxu1  ;;  %v3291_v18 = vsel %vm9398_vm10, %v3184_v13, %v3290_v25  ;;  %v3189_v11 = vrot.slane %v3187_v22, 6  ;;  %v3192_v40 = vrot.slane %v3190_v44, 7  ;;  %v7207_v8 = vpop.f32.mrf.mxu0  ;;  %v6537_v21 = vpack.c.bf16 %v3136_v34, %v3136_v34 }
 0x22f   : > { %3292 = vst [vmem:[#allocation2 + $0x4] sm:$0xe] %v3291_v18  ;;  %v3107_v57 = vmax.f32 %v3097_v3, 0.0  ;;  %v3081_v7 = vadd.f32 %v3054_v62, %v2963_v61  ;;  %v3185_v19 = vrot.slane %v3184_v13, 4  ;;  %v10697_v22 = vmov 0 }
 0x230   : > { %v7230_v1 = vpop.f32.mrf.mxu1  ;;  %v3193_v0 = vor.u32 %v3192_v40, %v3189_v11  ;;  %v2939_v54 = vpop.f32.mrf.mxu0  ;;  %v3197_v56 = vshrl.u32 %v6537_v21, 16  ;;  %v3200_v25 = vshll.u32 %v6537_v21, 16  ;;  %v10698_v22 = vsel %vm9443_vm0, 4294967295, %v10697_v22  ;;  %v3307_v40 = vld [vmem:[#allocation2] sm:$0xf] }
 0x231   : > { %v3137_v20 = vsel %vm9342_vm15, %v3107_v57, 0.0  ;;  %v3098_v29 = vadd.f32 %v9264_v43, %v3081_v7  ;;  %v2964_v45 = vadd.f32 %v2939_v54, %v2824_v4  ;;  %v2826_v6 = vadd.f32 %v9150_v53, %v2704_v26 }
 0x232   : > { %v3062_v58 = vpop.f32.mrf.mxu1  ;;  %v3194_v62 = vsel %vm9428_vm11, %v3185_v19, %v3193_v0  ;;  %v6538_v35 = vpack.c.bf16 %v3137_v20, %v3137_v20  ;;  %v7208_v13 = vpop.f32.mrf.mxu0  ;;  %v3199_v44 = vrot.slane %v3197_v56, 6  ;;  %v3202_v60 = vrot.slane %v3200_v25, 7 }
 0x233   : > { %3293 = vst.msk [vmem:[#allocation2 + $0x8] sm:$0xf] %vm10699_vm9, %v3194_v62  ;;  %v3108_v1 = vmax.f32 %v3098_v29, 0.0  ;;  %v2705_v34 = vadd.f32 %v9197_v5, %v9094_v50  ;;  %v3082_v18 = vadd.f32 %v3057_v47, %v2964_v45  ;;  %v3195_v8 = vrot.slane %v3193_v0, 4 }
 0x234   : > { %v7233_v17 = vpop.f32.mrf.mxu1  ;;  %v3207_v3 = vshrl.u32 %v6538_v35, 16  ;;  %v3210_v61 = vshll.u32 %v6538_v35, 16  ;;  %v2944_v59 = vpop.f32.mrf.mxu0  ;;  %v3203_v21 = vor.u32 %v3202_v60, %v3199_v44  ;;  %v2706_v35 = vadd.f32 %v9214_v32, %v9098_v49  ;;  %v7781_v60 = vld [vmem:[%s10639_s5 + $0x24] sm:$0xff]  }
 0x235   : > { %v3138_v38 = vsel %vm9388_vm5, %v3108_v1, 0.0  ;;  %v2965_v39 = vadd.f32 %v2944_v59, %v2825_v37  ;;  %v3099_v53 = vadd.f32 %v9264_v43, %v3082_v18  ;;  %v10705_v33 = vsel %vm9492_vm3, 4294967295, %v10704_v33 }
 0x236   : > { %v3065_v52 = vpop.f32.mrf.mxu1  ;;  %v3209_v57 = vrot.slane %v3207_v3, 6  ;;  %v3212_v7 = vrot.slane %v3210_v61, 7  ;;  %v6539_v19 = vpack.c.bf16 %v3138_v38, %v3138_v38  ;;  %v7211_v26 = vpop.f32.mrf.mxu0  ;;  %v9455_v50 = vld [vmem:[#allocation2 + $0x4] sm:$0xf]  ;;  %v3204_v5 = vsel %vm9428_vm11, %v3195_v8, %v3203_v21 }
 0x237   : > { %v3205_v47 = vrot.slane %v3203_v21, 4  ;;  %v3083_v54 = vadd.f32 %v3062_v58, %v2965_v39  ;;  %v9460_v0 = vcombine.low %v3307_v40, %v9455_v50  ;;  %3294 = vst.msk [vmem:[#allocation2 + $0xc] sm:$0xf] %vm10699_vm9, %v3204_v5  ;;  %v3109_v20 = vmax.f32 %v3099_v53, 0.0  ;;  %vm9481_vm9 = vmand %vm524_vm8, %vm514_vm13 }
 0x238   : > { %v7234_v11 = vpop.f32.mrf.mxu1  ;;  %v3213_v17 = vor.u32 %v3212_v7, %v3209_v57  ;;  %v3217_v56 = vshrl.u32 %v6539_v19, 16  ;;  %v3220_v25 = vshll.u32 %v6539_v19, 16  ;;  %v2947_v29 = vpop.f32.mrf.mxu0  ;;  %v10700_v58 = vmov 0 }
 0x239   : > { %v3100_v45 = vadd.f32 %v9264_v43, %v3083_v54  ;;  %v10701_v58 = vsel %vm9471_vm2, 4294967295, %v10700_v58  ;;  %v2966_v13 = vadd.f32 %v2947_v29, %v2826_v6  ;;  %7268 = vmatmul.mubr.msk.bf16.vlgmr.msra.gmra.mxu1 %vm10655_vm12, %v9460_v0  ;;  %v2827_v37 = vadd.f32 %v9173_v48, %v2705_v34 }
 0x23a   : > { %v3070_v4 = vpop.f32.mrf.mxu1  ;;  %v3214_v32 = vsel %vm9428_vm11, %v3205_v47, %v3213_v17  ;;  %v3219_v51 = vrot.slane %v3217_v56, 6  ;;  %v3222_v12 = vrot.slane %v3220_v25, 7  ;;  %v7212_v14 = vpop.f32.mrf.mxu0  ;;  %vm10706_vm13 = vmmov 0   ;;  %7312 = vmatpush3.bf16.msra.mxu1 %v3769_v10  ;;  %v9521_v57 = vld [vmem:[#allocation2 + $0x8] sm:$0xf] }
 0x23b   : > { %7271 = vmatprep.mubr.msk.bf16.mxu1 %vm10706_vm13, %v7837_v2  ;;  %vm10707_vm8 = vcmask 191488   ;;  %v3139_v36 = vsel %vm9432_vm14, %v3109_v20, 0.0  ;;  %v3110_v23 = vmax.f32 %v3100_v45, 0.0  ;;  %v3084_v31 = vadd.f32 %v3065_v52, %v2966_v13  ;;  %7313 = vmatprep.subr.bf16.mxu1 %v7837_v2  ;;  %v7774_v13 = vld [vmem:[%s10639_s5 + $0x20] ss:$0 sps:$4 sm:$0xff]  }
 0x23c   : > { %v7237_v62 = vpop.f32.mrf.mxu1  ;;  %3295 = vst.msk [vmem:[#allocation2 + $0x10] sm:$0xf] %vm10707_vm8, %v3214_v32  ;;  %v3358_v15 = vshll.u32 %v9460_v0, 16  ;;  %v3215_v48 = vrot.slane %v3213_v17, 4  ;;  %v3223_v1 = vor.u32 %v3222_v12, %v3219_v51  ;;  %v6540_v6 = vpack.c.bf16 %v3139_v36, %v3139_v36  ;;  %v2952_v34 = vpop.f32.mrf.mxu0  ;;  %vm10708_vm4 = vmmov %vm10707_vm8 }
 0x23d   : > { %v554_v3 = vsel %vm9481_vm9, %v9416_v30, %v9386_v9  ;;  %v3140_v61 = vsel %vm9443_vm0, %v3110_v23, 0.0  ;;  %v3101_v18 = vadd.f32 %v9264_v43, %v3084_v31  ;;  %v2967_v52 = vadd.f32 %v2952_v34, %v2827_v37  ;;  %vm10711_vm8 = vmmov %vm10708_vm4 }
 0x23e   : > { %v9497_v44 = vpop.f32.mrf.mxu1  ;;  %v2828_v59 = vadd.f32 %v9190_v27, %v2706_v35  ;;  %v3224_v11 = vsel %vm9428_vm11, %v3215_v48, %v3223_v1  ;;  %v3227_v40 = vshrl.u32 %v6540_v6, 16  ;;  %v3230_v8 = vshll.u32 %v6540_v6, 16  ;;  %v7215_v21 = vpop.f32.mrf.mxu0  ;;  %7314 = vmatpush3.bf16.msra.mxu1 %v7781_v60  ;;  %v9523_v7 = vld [vmem:[#allocation2 + $0xc] sm:$0xf] }
 0x23f   : > { %v3356_v38 = vshrl.u32 %v9460_v0, 16  ;;  %3296 = vst.msk [vmem:[#allocation2 + $0x14] sm:$0xf] %vm10708_vm4, %v3224_v11  ;;  %v6541_v9 = vpack.c.bf16 %v3140_v61, %v3140_v61  ;;  %v3111_v30 = vmax.f32 %v3101_v18, 0.0  ;;  %v3085_v39 = vadd.f32 %v3070_v4, %v2967_v52  ;;  %7359 = vmatprep.subr.bf16.mxu1 %v7837_v2 }
 0x240   : > { %v7238_v10 = vpop.f32.mrf.mxu1  ;;  %v3360_v19 = vrot.slane %v3358_v15, 1  ;;  %v3225_v27 = vrot.slane %v3223_v1, 4  ;;  %v3229_v53 = vrot.slane %v3227_v40, 6  ;;  %v3232_v26 = vrot.slane %v3230_v8, 7  ;;  %v2955_v47 = vpop.f32.mrf.mxu0 }
 0x241   : > { %vm9526_vm9 = vcmp.lt.s32.totalorder %v554_v3, 8  ;;  %v10709_v5 = vmov 0  ;;  %v9532_v54 = vcombine.low %v9521_v57, %v9523_v7  ;;  %v3237_v4 = vshrl.u32 %v6541_v9, 16 }
 0x242   : > { %v10710_v5 = vsel %vm9526_vm9, 4294967295, %v10709_v5  ;;  %v3240_v17 = vshll.u32 %v6541_v9, 16  ;;  %v3141_v56 = vsel %vm9471_vm2, %v3111_v30, 0.0  ;;  %v3102_v25 = vadd.f32 %v9264_v43, %v3085_v39  ;;  %v7216_v35 = vpop.f32.mrf.mxu0 }
 0x243   : > { %v3233_v20 = vor.u32 %v3232_v26, %v3229_v53  ;;  %v6542_v29 = vpack.c.bf16 %v3141_v56, %v3141_v56  ;;  %v2968_v62 = vadd.f32 %v2955_v47, %v2828_v59  ;;  %7272 = vmatmul.mubr.msk.bf16.gmra.mxu1 %vm10655_vm12, %v9532_v54  ;;  %v3363_v45 = vshll.u32 %v9532_v54, 16  ;;  %v9560_v11 = vld [vmem:[#allocation2 + $0x10] sm:$0xf] }
 0x244   : > { %v3239_v49 = vrot.slane %v3237_v4, 6  ;;  %v3242_v32 = vrot.slane %v3240_v17, 7  ;;  %v3112_v51 = vmax.f32 %v3102_v25, 0.0  ;;  %v3361_v12 = vor.u32 %v3360_v19, %v3356_v38  ;;  %7275 = vmatprep.mubr.msk.bf16.mxu1 %vm10706_vm13, %v7837_v2 }
 0x245   : > { %v3234_v14 = vsel %vm9428_vm11, %v3225_v27, %v3233_v20  ;;  %v3235_v37 = vrot.slane %v3233_v20, 4  ;;  %v3247_v60 = vshrl.u32 %v6542_v29, 16  ;;  %v3250_v36 = vshll.u32 %v6542_v29, 16 }
 0x246   : > { %3297 = vst.msk [vmem:[#allocation2 + $0x18] sm:$0xf] %vm10711_vm8, %v3234_v14  ;;  %v3243_v23 = vor.u32 %v3242_v32, %v3239_v49  ;;  %v3142_v31 = vsel %vm9492_vm3, %v3112_v51, 0.0  ;;  %v3086_v15 = vadd.f32 %v9497_v44, %v2968_v62  ;;  %v3365_v48 = vrot.slane %v3363_v45, 1  ;;  %v9554_v3 = vld [vmem:[#allocation2 + $0x14] sm:$0xf] }
 0x247   : > { %v3249_v1 = vrot.slane %v3247_v60, 6  ;;  %v3252_v6 = vrot.slane %v3250_v36, 7  ;;  %v6543_v34 = vpack.c.bf16 %v3142_v31, %v3142_v31  ;;  %vm10712_vm4 = vcmask 1043456  }
 0x248   : > { %v3636_v10 = vsel %vm10712_vm4, %v7774_v13, 0  ;;  %v3244_v61 = vsel %vm9428_vm11, %v3235_v37, %v3243_v23  ;;  %v3245_v18 = vrot.slane %v3243_v23, 4  ;;  %v3103_v52 = vadd.f32 %v9264_v43, %v3086_v15  ;;  %v7779_v43 = vld [vmem:[%s10639_s5 + $0x18] sm:$0xff]   ;;  %v3304_v23 = vld [vmem:[#allocation2 + $0x2c] sm:$0x3] }
 0x249   : > { %vm10713_vm8 = vsmask.f32 7424  ;;  %vm10714_vm12 = vcmask 191488   ;;  %v3253_v44 = vor.u32 %v3252_v6, %v3249_v1  ;;  %v3257_v40 = vshrl.u32 %v6543_v34, 16 }
 0x24a   : > { %v3366_v59 = vsel %vm10713_vm8, %v3361_v12, %v3365_v48  ;;  %3298 = vst.msk [vmem:[#allocation2 + $0x1c] sm:$0xf] %vm10714_vm12, %v3244_v61  ;;  %v3260_v8 = vshll.u32 %v6543_v34, 16  ;;  %vm10715_vm3 = vcmask 195584   ;;  %v9566_v21 = vcombine.low %v9560_v11, %v9554_v3 }
 0x24b   : > { %7244 = vmatmul.mubr.msk.bf16.vlgmr.msra.gmra.mxu0 %vm10715_vm3, %v3366_v59  ;;  %v3113_v38 = vmax.f32 %v3103_v52, 0.0  ;;  %v3254_v9 = vsel %vm9428_vm11, %v3245_v18, %v3253_v44  ;;  %v3259_v30 = vrot.slane %v3257_v40, 6  ;;  %vm10716_vm12 = vmmov %vm10715_vm3  ;;  %vm10717_vm3 = vcmask 191488  }
 0x24c   : > { %7288 = vmatpush3.bf16.msra.mxu0 %v3636_v10  ;;  %7247 = vmatprep.mubr.msk.bf16.mxu0 %vm10706_vm13, %v7837_v2  ;;  %v3262_v39 = vrot.slane %v3260_v8, 7  ;;  %3299 = vst.msk [vmem:[#allocation2 + $0x20] sm:$0xf] %vm10717_vm3, %v3254_v9  ;;  %v3367_v27 = vshrl.u32 %v9532_v54, 16  ;;  %v3371_v53 = vshll.u32 %v9566_v21, 16  ;;  %v3255_v26 = vrot.slane %v3253_v44, 4  ;;  %vm10718_vm4 = vmmov %vm10717_vm3 }
 0x24d   : > { %7276 = vmatmul.mubr.msk.bf16.gmra.mxu1 %vm10716_vm12, %v9566_v21  ;;  %7289 = vmatprep.subr.bf16.mxu0 %v7837_v2  ;;  %v3143_v19 = vsel %vm9526_vm9, %v3113_v38, 0.0  ;;  %v3313_v35 = vld [vmem:[#allocation2 + $0x18] sm:$0xf]  ;;  %vm3302_vm12 = vcmask 189440   ;;  %vm10719_vm3 = vcmask 195584   ;;  %v3375_v37 = vshrl.u32 %v9566_v21, 16 }
 0x24e   : > { %7279 = vmatprep.mubr.msk.bf16.mxu1 %vm10706_vm13, %v7837_v2  ;;  %v3263_v47 = vor.u32 %v3262_v39, %v3259_v30  ;;  %v6544_v4 = vpack.c.bf16 %v3143_v19, %v3143_v19  ;;  %v3369_v17 = vor.u32 %v3367_v27, %v3365_v48  ;;  %v3373_v56 = vrot.slane %v3371_v53, 1  ;;  %v7790_v39 = vld [vmem:[%s10639_s5 + $0x44] ss:$0 sps:$4 sm:$0xff]  }
 0x24f   : > { %v10722_v36 = vmov 0  ;;  %v4283_v52 = vrot.slane %v3371_v53, 3  ;;  %v4282_v59 = vrot.slane %v3375_v37, 2  ;;  %v9623_v44 = vcombine.low %v9523_v7, %v9560_v11 }
 0x250   : > { %7290 = vmatpush3.bf16.msra.mxu0 %v7779_v43  ;;  %v3264_v25 = vsel %vm9428_vm11, %v3255_v26, %v3263_v47  ;;  %v3267_v20 = vshrl.u32 %v6544_v4, 16  ;;  %v3270_v29 = vshll.u32 %v6544_v4, 16  ;;  %v3374_v62 = vsel %vm10713_vm8, %v3369_v17, %v3373_v56 }
 0x251   : > { %7335 = vmatprep.subr.bf16.mxu0 %v7837_v2  ;;  %3300 = vst.msk [vmem:[#allocation2 + $0x24] sm:$0xf] %vm10718_vm4, %v3264_v25  ;;  %v9590_v13 = vld [vmem:[#allocation2 + $0x1c] sm:$0xf]  ;;  %v3265_v12 = vrot.slane %v3263_v47, 4  ;;  %vm10720_vm4 = vmmov %vm10719_vm3  ;;  %v3377_v48 = vor.u32 %v3375_v37, %v3373_v56  ;;  %v4279_v38 = vrot.slane %v3367_v27, 2  ;;  %v9633_v43 = vcombine.low %v9455_v50, %v9521_v57 }
 0x252   : > { %v3269_v49 = vrot.slane %v3267_v20, 6  ;;  %v3272_v32 = vrot.slane %v3270_v29, 7  ;;  %v9594_v51 = vcombine.low %v3313_v35, %v9590_v13  ;;  %vm10721_vm8 = vsmask.f32 1280 }
 0x253   : > { %7248 = vmatmul.mubr.msk.bf16.gmra.mxu0 %vm10719_vm3, %v3374_v62  ;;  %vm9603_vm9 = vmand %vm3302_vm12, %vm10721_vm8  ;;  %vm10724_vm3 = vcmask 191488   ;;  %v3315_v10 = vld [vmem:[#allocation2 + $0x20] sm:$0xf]  ;;  %vm10726_vm12 = vcmask 195584   ;;  %v4280_v7 = vrot.slane %v3363_v45, 3  ;;  %v4284_v19 = vor.u32 %v4283_v52, %v4282_v59 }
 0x254   : > { %7251 = vmatprep.mubr.msk.bf16.mxu0 %vm10706_vm13, %v7837_v2  ;;  %v3273_v14 = vor.u32 %v3272_v32, %v3269_v49  ;;  %v3379_v60 = vshll.u32 %v9594_v51, 16  ;;  %v10723_v36 = vsel %vm9603_vm9, 4294967295, %v10722_v36  ;;  %v3383_v40 = vshrl.u32 %v9594_v51, 16  ;;  %vm10727_vm8 = vmmov %vm10726_vm12 }
 0x255   : > { %7280 = vmatmul.mubr.msk.bf16.gmra.mxu1 %vm10720_vm4, %v9594_v51  ;;  %vm10725_vm4 = vsmask.f32 7424  ;;  %v3734_v50 = vrot.slane %v9623_v44, 1  ;;  %v4281_v26 = vor.u32 %v4280_v7, %v4279_v38  ;;  %v3733_v45 = vrot.slane %v9633_v43, 1  ;;  %v7786_v7 = vld [vmem:[%s10639_s5 + $0x38] ss:$0 sps:$4 sm:$0xff]  }
 0x256   : > { %7283 = vmatprep.mubr.msk.bf16.mxu1 %vm10706_vm13, %v7837_v2  ;;  %v3274_v31 = vsel %vm9428_vm11, %v3265_v12, %v3273_v14  ;;  %v3275_v15 = vrot.slane %v3273_v14, 4  ;;  %v3381_v1 = vrot.slane %v3379_v60, 1  ;;  %v9660_v17 = vcombine.low %v9554_v3, %v3313_v35  ;;  %v7791_v3 = vld [vmem:[%s10639_s5 + $0x3c] sm:$0xff]  }
 0x257   : > { %3301 = vst.msk [vmem:[#allocation2 + $0x28] sm:$0xf] %vm10724_vm3, %v3274_v31  ;;  %vm10728_vm3 = vmmov %vm10725_vm4  ;;  %v4286_v29 = vrot.slane %v3383_v40, 2  ;;  %v4287_v32 = vrot.slane %v3379_v60, 3  ;;  %v4154_v14 = vrot.slane %v9532_v54, 2  ;;  %v4155_v37 = vrot.slane %v9566_v21, 2 }
 0x258   : > { %v3305_v6 = vsel %vm9603_vm9, %v3275_v15, %v3304_v23  ;;  %v3382_v34 = vsel %vm10725_vm4, %v3377_v48, %v3381_v1  ;;  %v9615_v61 = vld [vmem:[#allocation2 + $0x24] sm:$0xf]  ;;  %v3385_v9 = vor.u32 %v3383_v40, %v3381_v1  ;;  %vm10729_vm4 = vmmov %vm10727_vm8  ;;  %v3736_v35 = vrot.slane %v9660_v17, 1 }
 0x259   : > { %3306 = vst [vmem:[#allocation2 + $0x2c] sm:$0x3] %v3305_v6  ;;  %v9618_v18 = vcombine.low %v3315_v10, %v9615_v61  ;;  %v4288_v23 = vor.u32 %v4287_v32, %v4286_v29  ;;  %v4157_v6 = vrot.slane %v9594_v51, 2  ;;  %vm10737_vm9 = vsmask.f32 5376 }
 0x25a   : > { %v9696_v40 = vcombine.low %v9590_v13, %v3315_v10  ;;  %vm10748_vm0 = vcmask 195584  }
 0x25b   : > { %7252 = vmatmul.mubr.msk.bf16.gmra.mxu0 %vm10726_vm12, %v3382_v34  ;;  %v3387_v8 = vshll.u32 %v9618_v18, 16  ;;  %vm10730_vm12 = vcmask 1043456   ;;  %v3391_v20 = vshrl.u32 %v9618_v18, 16  ;;  %v9689_v34 = vsel %vm10737_vm9, %v4284_v19, %v4288_v23 }
 0x25c   : > { %7255 = vmatprep.mubr.msk.bf16.mxu0 %vm10706_vm13, %v7837_v2  ;;  %v4061_v56 = vsel %vm10730_vm12, %v7790_v39, 0  ;;  %vm10734_vm12 = vsmask.f32 7424 }
 0x25d   : > { %7284 = vmatmul.mubr.msk.bf16.gmra.mxu1 %vm10727_vm8, %v9618_v18  ;;  %v3389_v30 = vrot.slane %v3387_v8, 1  ;;  %vm10731_vm8 = vcmask 1046528   ;;  %v4290_v31 = vrot.slane %v3391_v20, 2  ;;  %v4291_v1 = vrot.slane %v3387_v8, 3 }
 0x25e   : > { %7315 = vmatprep.mubr.msk.bf16.mxu1 %vm10706_vm13, %v7837_v2  ;;  %v9639_v11 = vld [vmem:[#allocation2 + $0x28] sm:$0xf]  ;;  %v3735_v25 = vsel %vm10731_vm8, %v3733_v45, %v3734_v50  ;;  %vm10735_vm8 = vcmask 1045504   ;;  %v3600_v45 = vrot.slane %v9460_v0, 1 }
 0x25f   : > { %v3390_v27 = vsel %vm10728_vm3, %v3385_v9, %v3389_v30  ;;  %v9648_v57 = vcombine.low %v9639_v11, %v9639_v11  ;;  %vm10732_vm3 = vmmov %vm10729_vm4  ;;  %v3393_v12 = vor.u32 %v3391_v20, %v3389_v30  ;;  %v9682_v48 = vsel %vm10735_vm8, %v4154_v14, %v4155_v37 }
 0x260   : > { %v9650_v53 = vld [vmem:[#allocation2 + $0x2c] sm:$0xf]  ;;  %v4292_v8 = vor.u32 %v4291_v1, %v4290_v31  ;;  %v4159_v9 = vrot.slane %v9618_v18, 2  ;;  %v3601_v30 = vrot.slane %v9532_v54, 1  ;;  %v3738_v20 = vrot.slane %v9696_v40, 1 }
 0x261   : > { %v3395_v47 = vshll.u32 %v9648_v57, 16  ;;  %v9656_v4 = vcombine.low %v9639_v11, %v9650_v53  ;;  %v3603_v1 = vrot.slane %v9566_v21, 1 }
 0x262   : > { %v9711_v13 = vsel %vm10737_vm9, %v4288_v23, %v4292_v8  ;;  %v9753_v23 = vcombine.low %v9615_v61, %v9639_v11 }
 0x263   : > { %7256 = vmatmul.mubr.msk.bf16.gmra.mxu0 %vm10729_vm4, %v3390_v27  ;;  %v3397_v62 = vrot.slane %v3395_v47, 1  ;;  %vm10733_vm4 = vsmask.f32 5376  ;;  %v4295_v52 = vshrl.u32 %v9656_v4, 16  ;;  %v4298_v59 = vshll.u32 %v9656_v4, 16 }
 0x264   : > { %7259 = vmatprep.mubr.msk.bf16.mxu0 %vm10706_vm13, %v7837_v2  ;;  %v9676_v49 = vsel %vm10733_vm4, %v4281_v26, %v4284_v19  ;;  %vm10736_vm4 = vcmask 1046528   ;;  %v4161_v27 = vrot.slane %v9656_v4, 2  ;;  %v4427_v26 = vrot.slane %v9566_v21, 3 }
 0x265   : > { %7316 = vmatmul.mubr.msk.bf16.vlgmr.msra.gmra.mxu1 %vm10732_vm3, %v3735_v25  ;;  %v3398_v15 = vsel %vm10734_vm12, %v3393_v12, %v3397_v62  ;;  %v3737_v60 = vsel %vm10736_vm4, %v3734_v50, %v3736_v35  ;;  %vm10738_vm12 = vmmov %vm10735_vm8  ;;  %v4297_v39 = vrot.slane %v4295_v52, 2  ;;  %v4300_v19 = vrot.slane %v4298_v59, 3 }
 0x266   : > { %7319 = vmatprep.mubr.msk.bf16.mxu1 %vm10706_vm13, %v7837_v2  ;;  %7360 = vmatpush3.bf16.msra.mxu1 %v4061_v56  ;;  %v9699_v38 = vsel %vm10738_vm12, %v4155_v37, %v4157_v6  ;;  %vm10739_vm8 = vmmov %vm10732_vm3  ;;  %v4426_v50 = vrot.slane %v9532_v54, 3  ;;  %v4429_v25 = vrot.slane %v9594_v51, 3  ;;  %v4431_v54 = vrot.slane %v9618_v18, 3 }
 0x267   : > { %7361 = vmatprep.subr.bf16.mxu1 %v7837_v2  ;;  %v9719_v47 = vor.u32 %v4300_v19, %v4297_v39  ;;  %v4433_v62 = vrot.slane %v9656_v4, 3  ;;  %v3740_v61 = vrot.slane %v9753_v23, 1  ;;  %v9775_v21 = vcombine.low %v9650_v53, %v9650_v53 }
 0x268   : > { %v3607_v53 = vrot.slane %v9618_v18, 1  ;;  %v3609_v18 = vrot.slane %v9648_v57, 1  ;;  %v3867_v19 = vshrl.u32 %v9623_v44, 16  ;;  %v3862_v57 = vshll.u32 %v9633_v43, 16 }
 0x26a   : > { %7362 = vmatpush3.bf16.msra.mxu1 %v7791_v3  ;;  %v9736_v3 = vsel %vm10737_vm9, %v4292_v8, %v9719_v47  ;;  %v4026_v8 = vrot.slane %v9623_v44, 2 }
 0x26b   : > { %7260 = vmatmul.mubr.msk.bf16.gmra.mxu0 %vm10732_vm3, %v3398_v15  ;;  %7407 = vmatprep.subr.bf16.mxu1 %v7837_v2  ;;  %vm10740_vm3 = vmmov %vm10738_vm12  ;;  %vm10742_vm12 = vcmask 1044480   ;;  %v7789_v15 = vld [vmem:[%s10639_s5 + $0x30] sm:$0xff]  }
 0x26c   : > { %7291 = vmatprep.mubr.msk.bf16.mxu0 %vm10706_vm13, %v7837_v2  ;;  %v9714_v10 = vsel %vm10740_vm3, %v4157_v6, %v4159_v9  ;;  %vm10741_vm4 = vmmov %vm10740_vm3  ;;  %v9729_v29 = vsel %vm10742_vm12, %v4426_v50, %v4427_v26  ;;  %v3605_v6 = vrot.slane %v9594_v51, 1  ;;  %v7794_v51 = vld [vmem:[%s10639_s5 + $0x5c] ss:$0 sps:$4 sm:$0xff]   ;;  %v3870_v50 = vshll.u32 %v9623_v44, 16 }
 0x26d   : > { %7320 = vmatmul.mubr.msk.bf16.gmra.mxu1 %vm10739_vm8, %v3737_v60  ;;  %v9724_v56 = vsel %vm10741_vm4, %v4159_v9, %v4161_v27  ;;  %vm10743_vm8 = vcmask 1043456   ;;  %vm10744_vm3 = vmmov %vm10742_vm12  ;;  %vm10745_vm4 = vcmask 1046528   ;;  %v3742_v60 = vrot.slane %v9775_v21, 1 }
 0x26e   : > { %7323 = vmatprep.mubr.msk.bf16.mxu1 %vm10706_vm13, %v7837_v2  ;;  %v3936_v0 = vsel %vm10743_vm8, %v7786_v7, 0  ;;  %v9739_v32 = vsel %vm10744_vm3, %v4427_v26, %v4429_v25  ;;  %v3602_v12 = vsel %vm10745_vm4, %v3600_v45, %v3601_v30  ;;  %vm10746_vm2 = vmmov %vm10744_vm3  ;;  %v7795_v26 = vld [vmem:[%s10639_s5 + $0x54] sm:$0xff]   ;;  %v4028_v45 = vrot.slane %v9660_v17, 2 }
 0x26f   : > { %v9743_v14 = vsel %vm10746_vm2, %v4429_v25, %v4431_v54  ;;  %vm10747_vm12 = vmmov %vm10746_vm2  ;;  %v3859_v25 = vshrl.u32 %v9633_v43, 16 }
 0x270   : > { %v9748_v37 = vsel %vm10747_vm12, %v4431_v54, %v4433_v62  ;;  %vm10749_vm8 = vmmov %vm10745_vm4  ;;  %v3869_v54 = vrot.slane %v3867_v19, 1 }
 0x271   : > { %v3739_v31 = vsel %vm10749_vm8, %v3736_v35, %v3738_v20  ;;  %vm10750_vm2 = vmmov %vm10748_vm0 }
 0x272   : > { %vm10752_vm9 = vmmov %vm10750_vm2 }
 0x273   : > { %7292 = vmatmul.mubr.msk.bf16.vlgmr.msra.gmra.mxu0 %vm10748_vm0, %v3602_v12  ;;  %vm10751_vm0 = vmmov %vm10745_vm4  ;;  %v3861_v12 = vrot.slane %v3859_v25, 1 }
 0x274   : > { %7336 = vmatpush3.bf16.msra.mxu0 %v3936_v0  ;;  %7295 = vmatprep.mubr.msk.bf16.mxu0 %vm10706_vm13, %v7837_v2  ;;  %v3604_v11 = vsel %vm10751_vm0, %v3601_v30, %v3603_v1  ;;  %vm10753_vm3 = vmmov %vm10751_vm0  ;;  %v4025_v30 = vrot.slane %v9633_v43, 2  ;;  %v3872_v0 = vrot.slane %v3870_v50, 2  ;;  %v7792_v43 = vld [vmem:[%s10639_s5 + $0x50] ss:$0 sps:$4 sm:$0xff]  }
 0x275   : > { %7324 = vmatmul.mubr.msk.bf16.gmra.mxu1 %vm10750_vm2, %v3739_v31  ;;  %7337 = vmatprep.subr.bf16.mxu0 %v7837_v2  ;;  %v3741_v35 = vsel %vm10753_vm3, %v3738_v20, %v3740_v61  ;;  %vm10754_vm4 = vmmov %vm10750_vm2  ;;  %v3864_v31 = vrot.slane %v3862_v57, 2 }
 0x276   : > { %7327 = vmatprep.mubr.msk.bf16.mxu1 %vm10706_vm13, %v7837_v2  ;;  %vm10755_vm12 = vmmov %vm10751_vm0 }
 0x277   : > { %v3606_v52 = vsel %vm10755_vm12, %v3603_v1, %v3605_v6  ;;  %vm10756_vm8 = vmmov %vm10750_vm2  ;;  %vm10762_vm12 = vcmask 1045504   ;;  %v3876_v1 = vshrl.u32 %v9660_v17, 16 }
 0x278   : > { %7338 = vmatpush3.bf16.msra.mxu0 %v7789_v15  ;;  %vm10757_vm2 = vmmov %vm10751_vm0  ;;  %v4027_v39 = vsel %vm10762_vm12, %v4025_v30, %v4026_v8  ;;  %v3873_v15 = vor.u32 %v3872_v0, %v3869_v54  ;;  %v4032_v30 = vrot.slane %v9753_v23, 2 }
 0x279   : > { %7383 = vmatprep.subr.bf16.mxu0 %v7837_v2  ;;  %v3743_v59 = vsel %vm10757_vm2, %v3740_v61, %v3742_v60  ;;  %vm10758_vm0 = vmmov %vm10754_vm4  ;;  %v3610_v20 = vsel %vm10757_vm2, %v3607_v53, %v3609_v18  ;;  %v3879_v61 = vshll.u32 %v9660_v17, 16  ;;  %v7793_v17 = vld [vmem:[%s10639_s5 + $0x48] sm:$0xff]  }
 0x27a   : > { %vm10760_vm3 = vmmov %vm10758_vm0 }
 0x27b   : > { %7296 = vmatmul.mubr.msk.bf16.gmra.mxu0 %vm10752_vm9, %v3604_v11  ;;  %vm10759_vm9 = vmmov %vm10757_vm2  ;;  %v3865_v11 = vor.u32 %v3864_v31, %v3861_v12 }
 0x27c   : > { %7299 = vmatprep.mubr.msk.bf16.mxu0 %vm10706_vm13, %v7837_v2  ;;  %v3608_v9 = vsel %vm10759_vm9, %v3605_v6, %v3607_v53  ;;  %vm10764_vm9 = vmmov %vm10762_vm12  ;;  %vm10766_vm12 = vsmask.f32 6400 }
 0x27d   : > { %7328 = vmatmul.mubr.msk.bf16.gmra.mxu1 %vm10754_vm4, %v3741_v35  ;;  %vm10761_vm4 = vcmask 1043456   ;;  %v4029_v44 = vsel %vm10764_vm9, %v4026_v8, %v4028_v45  ;;  %v4030_v35 = vrot.slane %v9696_v40, 2  ;;  %v3874_v60 = vsel %vm10766_vm12, %v3865_v11, %v3873_v15  ;;  %vm10768_vm2 = vmmov %vm10764_vm9 }
 0x27e   : > { %7331 = vmatprep.mubr.msk.bf16.mxu1 %vm10706_vm13, %v7837_v2  ;;  %v4337_v7 = vsel %vm10761_vm4, %v7794_v51, 0  ;;  %v4190_v6 = vsel %vm10761_vm4, %v7792_v43, 0  ;;  %v3885_v8 = vshrl.u32 %v9696_v40, 16  ;;  %vm10769_vm9 = vmmov %vm10766_vm12 }
 0x27f   : > { %v4031_v53 = vsel %vm10768_vm2, %v4028_v45, %v4030_v35  ;;  %vm10771_vm4 = vmmov %vm10768_vm2  ;;  %v4034_v45 = vrot.slane %v9775_v21, 2 }
 0x280   : > { %v4033_v19 = vsel %vm10771_vm4, %v4030_v35, %v4032_v30  ;;  %vm10772_vm12 = vmmov %vm10758_vm0 }
 0x281   : > { %vm10774_vm2 = vmmov %vm10758_vm0 }
 0x283   : > { %7300 = vmatmul.mubr.msk.bf16.gmra.mxu0 %vm10756_vm8, %v3606_v52  ;;  %vm10763_vm8 = vmmov %vm10758_vm0  ;;  %v3878_v52 = vrot.slane %v3876_v1, 1 }
 0x284   : > { %7303 = vmatprep.mubr.msk.bf16.mxu0 %vm10706_vm13, %v7837_v2 }
 0x285   : > { %7332 = vmatmul.mubr.msk.bf16.gmra.mxu1 %vm10758_vm0, %v3743_v59  ;;  %v3881_v59 = vrot.slane %v3879_v61, 2  ;;  %v7797_v61 = vld [vmem:[#allocation2 + $0x30] ss:$0 sps:$4 sm:$0x77]  }
 0x286   : > { %7363 = vmatprep.mubr.msk.bf16.mxu1 %vm10706_vm13, %v7837_v2  ;;  %v4304_v11 = vshrl.u32 %v7797_v61, 16  ;;  %v4307_v35 = vshll.u32 %v7797_v61, 16 }
 0x287   : > { %v3882_v51 = vor.u32 %v3881_v59, %v3878_v52 }
 0x28b   : > { %7304 = vmatmul.mubr.msk.bf16.gmra.mxu0 %vm10760_vm3, %v3608_v9  ;;  %vm10765_vm3 = vmmov %vm10758_vm0  ;;  %v3888_v9 = vshll.u32 %v9696_v40, 16  ;;  %v3894_v40 = vshrl.u32 %v9753_v23, 16 }
 0x28c   : > { %7307 = vmatprep.mubr.msk.bf16.mxu0 %vm10706_vm13, %v7837_v2 }
 0x28d   : > { %7364 = vmatmul.mubr.msk.bf16.vlgmr.msra.gmra.mxu1 %vm10763_vm8, %v4027_v39  ;;  %vm10767_vm8 = vmmov %vm10758_vm0  ;;  %v3887_v39 = vrot.slane %v3885_v8, 1  ;;  %v3890_v18 = vrot.slane %v3888_v9, 2  ;;  %v3896_v57 = vrot.slane %v3894_v40, 1 }
 0x28e   : > { %7367 = vmatprep.mubr.msk.bf16.mxu1 %vm10706_vm13, %v7837_v2  ;;  %7408 = vmatpush3.bf16.msra.mxu1 %v4337_v7  ;;  %v3883_v7 = vsel %vm10769_vm9, %v3873_v15, %v3882_v51 }
 0x28f   : > { %7409 = vmatprep.subr.bf16.mxu1 %v7837_v2  ;;  %v3891_v50 = vor.u32 %v3890_v18, %v3887_v39 }
 0x292   : > { %7410 = vmatpush3.bf16.msra.mxu1 %v7795_v26  ;;  %v3897_v26 = vshll.u32 %v9753_v23, 16  ;;  %v3903_v23 = vshrl.u32 %v9775_v21, 16 }
 0x293   : > { %7308 = vmatmul.mubr.msk.bf16.gmra.mxu0 %vm10758_vm0, %v3610_v20  ;;  %7455 = vmatprep.subr.bf16.mxu1 %v7837_v2 }
 0x294   : > { %7339 = vmatprep.mubr.msk.bf16.mxu0 %vm10706_vm13, %v7837_v2  ;;  %v3899_v20 = vrot.slane %v3897_v26, 2  ;;  %v3905_v31 = vrot.slane %v3903_v23, 1 }
 0x295   : > { %7368 = vmatmul.mubr.msk.bf16.gmra.mxu1 %vm10765_vm3, %v4029_v44  ;;  %vm10770_vm3 = vmmov %vm10758_vm0  ;;  %v3906_v44 = vshll.u32 %v9775_v21, 16  ;;  %v7796_v21 = vld [vmem:[%s10639_s5 + $0x68] ss:$0 sps:$4 sm:$0xff]  }
 0x296   : > { %7371 = vmatprep.mubr.msk.bf16.mxu1 %vm10706_vm13, %v7837_v2  ;;  %v3900_v0 = vor.u32 %v3899_v20, %v3896_v57 }
 0x297   : > { %v3908_v43 = vrot.slane %v3906_v44, 2 }
 0x299   : > { %v3909_v15 = vor.u32 %v3908_v43, %v3905_v31 }
 0x29b   : > { %7340 = vmatmul.mubr.msk.bf16.vlgmr.msra.gmra.mxu0 %vm10767_vm8, %v3874_v60  ;;  %vm10773_vm8 = vmmov %vm10769_vm9 }
 0x29c   : > { %7384 = vmatpush3.bf16.msra.mxu0 %v4190_v6  ;;  %7343 = vmatprep.mubr.msk.bf16.mxu0 %vm10706_vm13, %v7837_v2  ;;  %v3892_v25 = vsel %vm10773_vm8, %v3882_v51, %v3891_v50  ;;  %vm10776_vm9 = vmmov %vm10774_vm2  ;;  %v4309_v6 = vrot.slane %v4307_v35, 3 }
 0x29d   : > { %7372 = vmatmul.mubr.msk.bf16.gmra.mxu1 %vm10758_vm0, %v4031_v53  ;;  %7385 = vmatprep.subr.bf16.mxu0 %v7837_v2  ;;  %vm10775_vm0 = vmmov %vm10771_vm4 }
 0x29e   : > { %7375 = vmatprep.mubr.msk.bf16.mxu1 %vm10706_vm13, %v7837_v2  ;;  %v4035_v54 = vsel %vm10775_vm0, %v4032_v30, %v4034_v45  ;;  %vm10778_vm4 = vmmov %vm10774_vm2 }
 0x29f   : > { %vm10781_vm0 = vmmov %vm10774_vm2 }
 0x2a0   : > { %7386 = vmatpush3.bf16.msra.mxu0 %v7793_v17 }
 0x2a1   : > { %7431 = vmatprep.subr.bf16.mxu0 %v7837_v2 }
 0x2a3   : > { %7344 = vmatmul.mubr.msk.bf16.gmra.mxu0 %vm10770_vm3, %v3883_v7  ;;  %vm10777_vm3 = vmmov %vm10773_vm8 }
 0x2a4   : > { %7347 = vmatprep.mubr.msk.bf16.mxu0 %vm10706_vm13, %v7837_v2  ;;  %v3901_v12 = vsel %vm10777_vm3, %v3891_v50, %v3900_v0  ;;  %vm10780_vm8 = vmmov %vm10777_vm3 }
 0x2a5   : > { %7376 = vmatmul.mubr.msk.bf16.gmra.mxu1 %vm10772_vm12, %v4033_v19  ;;  %vm10779_vm12 = vmmov %vm10774_vm2  ;;  %v3910_v1 = vsel %vm10780_vm8, %v3900_v0, %v3909_v15 }
 0x2a6   : > { %7379 = vmatprep.mubr.msk.bf16.mxu1 %vm10706_vm13, %v7837_v2  ;;  %vm10783_vm3 = vmmov %vm10781_vm0 }
 0x2a7   : > { %vm10786_vm8 = vmmov %vm10781_vm0 }
 0x2ab   : > { %7348 = vmatmul.mubr.msk.bf16.gmra.mxu0 %vm10774_vm2, %v3892_v25 }
 0x2ac   : > { %7351 = vmatprep.mubr.msk.bf16.mxu0 %vm10706_vm13, %v7837_v2 }
 0x2ad   : > { %7380 = vmatmul.mubr.msk.bf16.gmra.mxu1 %vm10776_vm9, %v4035_v54  ;;  %vm10782_vm9 = vcmask 1043456  }
 0x2ae   : > { %7411 = vmatprep.mubr.msk.bf16.mxu1 %vm10706_vm13, %v7837_v2 }
 0x2b3   : > { %7352 = vmatmul.mubr.msk.bf16.gmra.mxu0 %vm10778_vm4, %v3901_v12  ;;  %vm10784_vm4 = vmmov %vm10781_vm0 }
 0x2b4   : > { %7355 = vmatprep.mubr.msk.bf16.mxu0 %vm10706_vm13, %v7837_v2 }
 0x2b5   : > { %7412 = vmatmul.mubr.msk.bf16.vlgmr.msra.gmra.mxu1 %vm10779_vm12, %v9676_v49  ;;  %v4462_v49 = vsel %vm10782_vm9, %v7796_v21, 0  ;;  %vm10785_vm12 = vmmov %vm10781_vm0 }
 0x2b6   : > { %7415 = vmatprep.mubr.msk.bf16.mxu1 %vm10706_vm13, %v7837_v2 }
 0x2bb   : > { %7356 = vmatmul.mubr.msk.bf16.gmra.mxu0 %vm10774_vm2, %v3910_v1  ;;  %vm10787_vm2 = vmmov %vm10781_vm0 }
 0x2bc   : > { %7387 = vmatprep.mubr.msk.bf16.mxu0 %vm10706_vm13, %v7837_v2  ;;  %vm10789_vm9 = vmmov %vm10787_vm2 }
 0x2bd   : > { %7416 = vmatmul.mubr.msk.bf16.gmra.mxu1 %vm10781_vm0, %v9689_v34  ;;  %v7798_v34 = vld [vmem:[%s10639_s5 + $0x60] sm:$0xff]   ;;  %vm10788_vm0 = vsmask.f32 5376 }
 0x2be   : > { %7419 = vmatprep.mubr.msk.bf16.mxu1 %vm10706_vm13, %v7837_v2 }
 0x2c3   : > { %7388 = vmatmul.mubr.msk.bf16.vlgmr.msra.gmra.mxu0 %vm10783_vm3, %v9682_v48  ;;  %v4306_v48 = vrot.slane %v4304_v11, 2  ;;  %vm10790_vm3 = vmmov %vm10787_vm2 }
 0x2c4   : > { %7432 = vmatpush3.bf16.msra.mxu0 %v4462_v49  ;;  %7391 = vmatprep.mubr.msk.bf16.mxu0 %vm10706_vm13, %v7837_v2 }
 0x2c5   : > { %7420 = vmatmul.mubr.msk.bf16.gmra.mxu1 %vm10784_vm4, %v9711_v13  ;;  %7433 = vmatprep.subr.bf16.mxu0 %v7837_v2  ;;  %v4310_v13 = vor.u32 %v4309_v6, %v4306_v48  ;;  %vm10791_vm4 = vcmask 1045504  }
 0x2c6   : > { %7423 = vmatprep.mubr.msk.bf16.mxu1 %vm10706_vm13, %v7837_v2 }
 0x2c7   : > { %v4311_v60 = vsel %vm10788_vm0, %v9719_v47, %v4310_v13  ;;  %vm10794_vm0 = vmmov %vm10787_vm2 }
 0x2c8   : > { %7434 = vmatpush3.bf16.msra.mxu0 %v7798_v34 }
 0x2c9   : > { %7479 = vmatprep.subr.bf16.mxu0 %v7837_v2 }
 0x2cb   : > { %7392 = vmatmul.mubr.msk.bf16.gmra.mxu0 %vm10785_vm12, %v9699_v38  ;;  %v4163_v38 = vrot.slane %v7797_v61, 2  ;;  %vm10792_vm12 = vmmov %vm10787_vm2 }
 0x2cc   : > { %7395 = vmatprep.mubr.msk.bf16.mxu0 %vm10706_vm13, %v7837_v2 }
 0x2cd   : > { %7424 = vmatmul.mubr.msk.bf16.gmra.mxu1 %vm10786_vm8, %v9736_v3  ;;  %vm10793_vm8 = vmmov %vm10787_vm2 }
 0x2ce   : > { %7427 = vmatprep.mubr.msk.bf16.mxu1 %vm10706_vm13, %v7837_v2 }
 0x2d3   : > { %7396 = vmatmul.mubr.msk.bf16.gmra.mxu0 %vm10787_vm2, %v9714_v10  ;;  %v4164_v10 = vsel %vm10791_vm4, %v4161_v27, %v4163_v38  ;;  %vm10797_vm4 = vmmov %vm10794_vm0 }
 0x2d4   : > { %7399 = vmatprep.mubr.msk.bf16.mxu0 %vm10706_vm13, %v7837_v2 }
 0x2d5   : > { %7428 = vmatmul.mubr.msk.bf16.gmra.mxu1 %vm10789_vm9, %v4311_v60  ;;  %vm10795_vm9 = vmmov %vm10794_vm0 }
 0x2d6   : > { %7459 = vmatprep.mubr.msk.bf16.mxu1 %vm10706_vm13, %v7837_v2 }
 0x2db   : > { %7400 = vmatmul.mubr.msk.bf16.gmra.mxu0 %vm10790_vm3, %v9724_v56  ;;  %vm10796_vm3 = vcmask 1044480  }
 0x2dc   : > { %7403 = vmatprep.mubr.msk.bf16.mxu0 %vm10706_vm13, %v7837_v2 }
 0x2e3   : > { %7404 = vmatmul.mubr.msk.bf16.gmra.mxu0 %vm10792_vm12, %v4164_v10  ;;  %vm10798_vm12 = vcmask 1043456  }
 0x2e4   : > { %7435 = vmatprep.mubr.msk.bf16.mxu0 %vm10706_vm13, %v7837_v2 }
 0x2eb   : > { %7436 = vmatmul.mubr.msk.bf16.vlgmr.msra.gmra.mxu0 %vm10793_vm8, %v9729_v29  ;;  %vm10799_vm8 = vmmov %vm10798_vm12 }
 0x2ec   : > { %7439 = vmatprep.mubr.msk.bf16.mxu0 %vm10706_vm13, %v7837_v2 }
 0x2f3   : > { %7440 = vmatmul.mubr.msk.bf16.gmra.mxu0 %vm10787_vm2, %v9739_v32  ;;  %v4435_v32 = vrot.slane %v7797_v61, 3  ;;  %vm10807_vm2 = vnez %v10701_v58 }
 0x2f4   : > { %7443 = vmatprep.mubr.msk.bf16.mxu0 %vm10706_vm13, %v7837_v2 }
 0x2f9   : > { %v3557_v27 = vpop.f32.mrf.mxu1 }
 0x2fb   : > { %7444 = vmatmul.mubr.msk.bf16.gmra.mxu0 %vm10794_vm0, %v9743_v14  ;;  %v7269_v47 = vpop.f32.mrf.mxu1  ;;  %v4436_v14 = vsel %vm10796_vm3, %v4433_v62, %v4435_v32  ;;  %vm10809_vm3 = vnez %v10705_v33 }
 0x2fc   : > { %7447 = vmatprep.mubr.msk.bf16.mxu0 %vm10706_vm13, %v7837_v2 }
 0x2fd   : > { %v3560_v56 = vpop.f32.mrf.mxu1 }
 0x2ff   : > { %v7270_v3 = vpop.f32.mrf.mxu1 }
 0x303   : > { %7448 = vmatmul.mubr.msk.bf16.gmra.mxu0 %vm10795_vm9, %v9748_v37  ;;  %v3565_v29 = vpop.f32.mrf.mxu1 }
 0x304   : > { %7451 = vmatprep.mubr.msk.bf16.mxu0 %vm10706_vm13, %v7837_v2 }
 0x305   : > { %v7273_v52 = vpop.f32.mrf.mxu1 }
 0x307   : > { %v3568_v59 = vpop.f32.mrf.mxu1 }
 0x309   : > { %v7274_v17 = vpop.f32.mrf.mxu1 }
 0x30b   : > { %v3462_v53 = vpop.f32.mrf.mxu0  ;;  %7452 = vmatmul.mubr.msk.bf16.gmra.mxu0 %vm10797_vm4, %v4436_v14 }
 0x30c   : > { %v3558_v51 = vadd.f32 %v3557_v27, %v3462_v53  ;;  %7483 = vmatprep.mubr.msk.bf16.mxu0 %vm10706_vm13, %v7837_v2 }
 0x30d   : > { %v7245_v37 = vpop.f32.mrf.mxu0  ;;  %v3573_v8 = vpop.f32.mrf.mxu1 }
 0x30f   : > { %v3465_v9 = vpop.f32.mrf.mxu0  ;;  %v7277_v30 = vpop.f32.mrf.mxu1 }
 0x310   : > { %v3561_v7 = vadd.f32 %v3560_v56, %v3465_v9 }
 0x311   : > { %v7246_v39 = vpop.f32.mrf.mxu0  ;;  %v3576_v18 = vpop.f32.mrf.mxu1 }
 0x313   : > { %v3470_v19 = vpop.f32.mrf.mxu0  ;;  %v7278_v50 = vpop.f32.mrf.mxu1 }
 0x314   : > { %v3566_v4 = vadd.f32 %v3565_v29, %v3470_v19 }
 0x315   : > { %v7249_v40 = vpop.f32.mrf.mxu0  ;;  %v3581_v62 = vpop.f32.mrf.mxu1 }
 0x317   : > { %v3473_v26 = vpop.f32.mrf.mxu0  ;;  %v7281_v45 = vpop.f32.mrf.mxu1 }
 0x318   : > { %v3569_v25 = vadd.f32 %v3568_v59, %v3473_v26 }
 0x319   : > { %v7250_v57 = vpop.f32.mrf.mxu0  ;;  %v3584_v20 = vpop.f32.mrf.mxu1 }
 0x31b   : > { %v3478_v54 = vpop.f32.mrf.mxu0  ;;  %v7282_v0 = vpop.f32.mrf.mxu1 }
 0x31c   : > { %v3574_v23 = vadd.f32 %v3573_v8, %v3478_v54 }
 0x31d   : > { %v7253_v44 = vpop.f32.mrf.mxu0  ;;  %v3589_v12 = vpop.f32.mrf.mxu1 }
 0x31f   : > { %v3481_v31 = vpop.f32.mrf.mxu0  ;;  %v7285_v43 = vpop.f32.mrf.mxu1 }
 0x320   : > { %v3577_v15 = vadd.f32 %v3576_v18, %v3481_v31 }
 0x321   : > { %v7254_v1 = vpop.f32.mrf.mxu0  ;;  %v3592_v21 = vpop.f32.mrf.mxu1 }
 0x323   : > { %v3486_v49 = vpop.f32.mrf.mxu0  ;;  %v7286_v61 = vpop.f32.mrf.mxu1 }
 0x324   : > { %v3582_v34 = vadd.f32 %v3581_v62, %v3486_v49 }
 0x325   : > { %v7257_v11 = vpop.f32.mrf.mxu0  ;;  %v3805_v35 = vpop.f32.mrf.mxu1 }
 0x327   : > { %v3489_v48 = vpop.f32.mrf.mxu0  ;;  %v7317_v6 = vpop.f32.mrf.mxu1 }
 0x328   : > { %v3585_v13 = vadd.f32 %v3584_v20, %v3489_v48  ;;  %v7799_v20 = vld [vmem:[%s10641_s7 + $0x14] ss:$0 sps:$4 sm:$0xff]  }
 0x329   : > { %v7258_v60 = vpop.f32.mrf.mxu0  ;;  %v3808_v38 = vpop.f32.mrf.mxu1  ;;  %v4856_v44 = vsel %vm10798_vm12, %v7799_v20, 0 }
 0x32a   : > { %7456 = vmatpush3.bf16.msra.mxu1 %v4856_v44 }
 0x32b   : > { %v3494_v10 = vpop.f32.mrf.mxu0  ;;  %v7318_v27 = vpop.f32.mrf.mxu1  ;;  %7457 = vmatprep.subr.bf16.mxu1 %v7837_v2 }
 0x32c   : > { %v9950_v47 = vadd.f32 %v3589_v12, %v3494_v10 }
 0x32d   : > { %v7261_v56 = vpop.f32.mrf.mxu0  ;;  %v3813_v3 = vpop.f32.mrf.mxu1 }
 0x32f   : > { %v3497_v29 = vpop.f32.mrf.mxu0  ;;  %v7321_v32 = vpop.f32.mrf.mxu1 }
 0x330   : > { %v9952_v52 = vadd.f32 %v3592_v21, %v3497_v29 }
 0x331   : > { %v7262_v59 = vpop.f32.mrf.mxu0  ;;  %v3816_v14 = vpop.f32.mrf.mxu1 }
 0x333   : > { %v3672_v53 = vpop.f32.mrf.mxu0  ;;  %v7322_v17 = vpop.f32.mrf.mxu1 }
 0x334   : > { %v3711_v37 = vadd.f32 %v3672_v53, %v3558_v51 }
 0x335   : > { %v7293_v8 = vpop.f32.mrf.mxu0  ;;  %v3821_v9 = vpop.f32.mrf.mxu1 }
 0x336   : > { %v9954_v30 = vadd.f32 %v3805_v35, %v3711_v37 }
 0x337   : > { %v3675_v39 = vpop.f32.mrf.mxu0  ;;  %v7325_v18 = vpop.f32.mrf.mxu1 }
 0x338   : > { %v3712_v19 = vadd.f32 %v3675_v39, %v3561_v7 }
 0x339   : > { %v7294_v50 = vpop.f32.mrf.mxu0  ;;  %v3824_v40 = vpop.f32.mrf.mxu1 }
 0x33a   : > { %v9956_v62 = vadd.f32 %v3808_v38, %v3712_v19 }
 0x33b   : > { %v3680_v26 = vpop.f32.mrf.mxu0  ;;  %v7326_v45 = vpop.f32.mrf.mxu1 }
 0x33c   : > { %v3713_v57 = vadd.f32 %v3680_v26, %v3566_v4 }
 0x33d   : > { %v7297_v54 = vpop.f32.mrf.mxu0  ;;  %v3829_v51 = vpop.f32.mrf.mxu1 }
 0x33e   : > { %v9961_v0 = vadd.f32 %v3813_v3, %v3713_v57 }
 0x33f   : > { %v3683_v12 = vpop.f32.mrf.mxu0  ;;  %v7329_v31 = vpop.f32.mrf.mxu1 }
 0x340   : > { %v3714_v7 = vadd.f32 %v3683_v12, %v3569_v25 }
 0x341   : > { %v7298_v43 = vpop.f32.mrf.mxu0  ;;  %v3832_v1 = vpop.f32.mrf.mxu1 }
 0x342   : > { %v9965_v21 = vadd.f32 %v3816_v14, %v3714_v7 }
 0x343   : > { %v3688_v4 = vpop.f32.mrf.mxu0  ;;  %v7330_v49 = vpop.f32.mrf.mxu1 }
 0x344   : > { %v3715_v61 = vadd.f32 %v3688_v4, %v3574_v23 }
 0x345   : > { %v7301_v11 = vpop.f32.mrf.mxu0  ;;  %v3837_v35 = vpop.f32.mrf.mxu1 }
 0x346   : > { %v9967_v48 = vadd.f32 %v3821_v9, %v3715_v61  ;;  %v7801_v9 = vld [vmem:[%s10641_s7 + $0x8] ss:$0 sps:$4 sm:$0xff]  }
 0x347   : > { %v3691_v6 = vpop.f32.mrf.mxu0  ;;  %v7333_v60 = vpop.f32.mrf.mxu1  ;;  %v4951_v19 = vsel %vm10799_vm8, %v7801_v9, 0 }
 0x348   : > { %v3716_v38 = vadd.f32 %v3691_v6, %v3577_v15  ;;  %v7800_v15 = vld [vmem:[%s10641_s7 + $0xc] sm:$0xff]   ;;  %7480 = vmatpush3.bf16.msra.mxu0 %v4951_v19 }
 0x349   : > { %v7302_v10 = vpop.f32.mrf.mxu0  ;;  %v3840_v27 = vpop.f32.mrf.mxu1  ;;  %7458 = vmatpush3.bf16.msra.mxu1 %v7800_v15  ;;  %7481 = vmatprep.subr.bf16.mxu0 %v7837_v2 }
 0x34a   : > { %v9969_v56 = vadd.f32 %v3824_v40, %v3716_v38  ;;  %7503 = vmatprep.subr.bf16.mxu1 %v7837_v2 }
 0x34b   : > { %v3696_v25 = vpop.f32.mrf.mxu0  ;;  %v7334_v3 = vpop.f32.mrf.mxu1 }
 0x34c   : > { %v3717_v29 = vadd.f32 %v3696_v25, %v3582_v34 }
 0x34d   : > { %v7305_v32 = vpop.f32.mrf.mxu0  ;;  %v4097_v59 = vpop.f32.mrf.mxu1 }
 0x34e   : > { %v9971_v14 = vadd.f32 %v3829_v51, %v3717_v29 }
 0x34f   : > { %v3699_v53 = vpop.f32.mrf.mxu0  ;;  %v7365_v23 = vpop.f32.mrf.mxu1 }
 0x350   : > { %v3718_v17 = vadd.f32 %v3699_v53, %v3585_v13  ;;  %v7802_v13 = vld [vmem:[%s10641_s7] sm:$0xff]  }
 0x351   : > { %v7306_v37 = vpop.f32.mrf.mxu0  ;;  %v4100_v8 = vpop.f32.mrf.mxu1  ;;  %7482 = vmatpush3.bf16.msra.mxu0 %v7802_v13 }
 0x352   : > { %v9979_v39 = vadd.f32 %v3832_v1, %v3718_v17  ;;  %7527 = vmatprep.subr.bf16.mxu0 %v7837_v2 }
 0x353   : > { %v3704_v34 = vpop.f32.mrf.mxu0  ;;  %v7366_v18 = vpop.f32.mrf.mxu1 }
 0x354   : > { %v3719_v50 = vadd.f32 %v3704_v34, %v9950_v47 }
 0x355   : > { %v7309_v40 = vpop.f32.mrf.mxu0  ;;  %v4105_v26 = vpop.f32.mrf.mxu1 }
 0x356   : > { %v3852_v45 = vadd.f32 %v3837_v35, %v3719_v50 }
 0x357   : > { %v3707_v57 = vpop.f32.mrf.mxu0  ;;  %v7369_v20 = vpop.f32.mrf.mxu1 }
 0x358   : > { %v3720_v54 = vadd.f32 %v3707_v57, %v9952_v52 }
 0x359   : > { %v7310_v51 = vpop.f32.mrf.mxu0  ;;  %v4108_v44 = vpop.f32.mrf.mxu1 }
 0x35a   : > { %v3853_v47 = vadd.f32 %v3840_v27, %v3720_v54 }
 0x35b   : > { %v3972_v12 = vpop.f32.mrf.mxu0  ;;  %v7370_v31 = vpop.f32.mrf.mxu1 }
 0x35c   : > { %v4011_v7 = vadd.f32 %v3972_v12, %v9954_v30 }
 0x35d   : > { %v7341_v43 = vpop.f32.mrf.mxu0  ;;  %v4113_v1 = vpop.f32.mrf.mxu1 }
 0x35e   : > { %v9991_v4 = vadd.f32 %v4097_v59, %v4011_v7 }
 0x35f   : > { %v3975_v49 = vpop.f32.mrf.mxu0  ;;  %v7373_v61 = vpop.f32.mrf.mxu1 }
 0x360   : > { %v4012_v11 = vadd.f32 %v3975_v49, %v9956_v62 }
 0x361   : > { %v7342_v35 = vpop.f32.mrf.mxu0  ;;  %v4116_v52 = vpop.f32.mrf.mxu1 }
 0x362   : > { %v9994_v6 = vadd.f32 %v4100_v8, %v4012_v11 }
 0x363   : > { %v3980_v60 = vpop.f32.mrf.mxu0  ;;  %v7374_v38 = vpop.f32.mrf.mxu1 }
 0x364   : > { %v4013_v10 = vadd.f32 %v3980_v60, %v9961_v0 }
 0x365   : > { %v7345_v27 = vpop.f32.mrf.mxu0  ;;  %v4121_v25 = vpop.f32.mrf.mxu1 }
 0x366   : > { %v9997_v3 = vadd.f32 %v4105_v26, %v4013_v10 }
 0x367   : > { %v3983_v30 = vpop.f32.mrf.mxu0  ;;  %v7377_v29 = vpop.f32.mrf.mxu1 }
 0x368   : > { %v4014_v32 = vadd.f32 %v3983_v30, %v9965_v21 }
 0x369   : > { %v7346_v59 = vpop.f32.mrf.mxu0  ;;  %v4124_v53 = vpop.f32.mrf.mxu1 }
 0x36a   : > { %v10000_v23 = vadd.f32 %v4108_v44, %v4014_v32 }
 0x36b   : > { %v3988_v62 = vpop.f32.mrf.mxu0  ;;  %v7378_v17 = vpop.f32.mrf.mxu1 }
 0x36c   : > { %v4015_v37 = vadd.f32 %v3988_v62, %v9967_v48 }
 0x36d   : > { %v7349_v8 = vpop.f32.mrf.mxu0  ;;  %v4129_v15 = vpop.f32.mrf.mxu1 }
 0x36e   : > { %v10003_v9 = vadd.f32 %v4113_v1, %v4015_v37 }
 0x36f   : > { %v3991_v0 = vpop.f32.mrf.mxu0  ;;  %v7381_v34 = vpop.f32.mrf.mxu1 }
 0x370   : > { %v4016_v18 = vadd.f32 %v3991_v0, %v9969_v56 }
 0x371   : > { %v7350_v19 = vpop.f32.mrf.mxu0  ;;  %v4132_v50 = vpop.f32.mrf.mxu1 }
 0x372   : > { %v10006_v13 = vadd.f32 %v4116_v52, %v4016_v18 }
 0x373   : > { %v3996_v21 = vpop.f32.mrf.mxu0  ;;  %v7382_v40 = vpop.f32.mrf.mxu1 }
 0x374   : > { %v4017_v26 = vadd.f32 %v3996_v21, %v9971_v14 }
 0x375   : > { %v7353_v57 = vpop.f32.mrf.mxu0  ;;  %v4373_v20 = vpop.f32.mrf.mxu1 }
 0x376   : > { %v10009_v54 = vadd.f32 %v4121_v25, %v4017_v26 }
 0x377   : > { %v3999_v48 = vpop.f32.mrf.mxu0  ;;  %v7413_v51 = vpop.f32.mrf.mxu1 }
 0x378   : > { %v4018_v44 = vadd.f32 %v3999_v48, %v9979_v39 }
 0x379   : > { %v7354_v12 = vpop.f32.mrf.mxu0  ;;  %v4376_v31 = vpop.f32.mrf.mxu1 }
 0x37a   : > { %v10012_v7 = vadd.f32 %v4124_v53, %v4018_v44 }
 0x37b   : > { %v4004_v56 = vpop.f32.mrf.mxu0  ;;  %v7414_v43 = vpop.f32.mrf.mxu1 }
 0x37c   : > { %v4019_v1 = vadd.f32 %v4004_v56, %v3852_v45 }
 0x37d   : > { %v7357_v49 = vpop.f32.mrf.mxu0  ;;  %v4381_v61 = vpop.f32.mrf.mxu1 }
 0x37e   : > { %v10014_v11 = vadd.f32 %v4129_v15, %v4019_v1 }
 0x37f   : > { %v4007_v14 = vpop.f32.mrf.mxu0  ;;  %v7417_v35 = vpop.f32.mrf.mxu1 }
 0x380   : > { %v4020_v52 = vadd.f32 %v4007_v14, %v3853_v47 }
 0x381   : > { %v7358_v60 = vpop.f32.mrf.mxu0  ;;  %v10016_v38 = vpop.f32.mrf.mxu1 }
 0x382   : > { %v10018_v10 = vadd.f32 %v4132_v50, %v4020_v52 }
 0x383   : > { %v4226_v39 = vpop.f32.mrf.mxu0  ;;  %v7418_v27 = vpop.f32.mrf.mxu1 }
 0x384   : > { %v4265_v49 = vadd.f32 %v4226_v39, %v9991_v4 }
 0x385   : > { %v7389_v25 = vpop.f32.mrf.mxu0  ;;  %v10020_v30 = vpop.f32.mrf.mxu1 }
 0x386   : > { %v4412_v60 = vadd.f32 %v4373_v20, %v4265_v49  ;;  %v10043_v25 = vld [vmem:[%s10640_s6] ss:$0 sm:$0xff] }
 0x387   : > { %v4229_v29 = vpop.f32.mrf.mxu0  ;;  %v7421_v32 = vpop.f32.mrf.mxu1 }
 0x388   : > { %v4266_v52 = vadd.f32 %v4229_v29, %v9994_v6 }
 0x389   : > { %v7390_v45 = vpop.f32.mrf.mxu0  ;;  %v10022_v59 = vpop.f32.mrf.mxu1 }
 0x38b   : > { %v4234_v53 = vpop.f32.mrf.mxu0  ;;  %v7422_v62 = vpop.f32.mrf.mxu1 }
 0x38c   : > { %v4267_v62 = vadd.f32 %v4234_v53, %v9997_v3 }
 0x38d   : > { %v7393_v17 = vpop.f32.mrf.mxu0  ;;  %v10024_v37 = vpop.f32.mrf.mxu1 }
 0x38f   : > { %v4237_v47 = vpop.f32.mrf.mxu0  ;;  %v7425_v8 = vpop.f32.mrf.mxu1 }
 0x390   : > { %v4413_v8 = vadd.f32 %v4376_v31, %v4266_v52  ;;  %v4268_v6 = vadd.f32 %v4237_v47, %v10000_v23  ;;  %v4724_v52 = vld [vmem:[#allocation3 + $0x4] sm:$0xe] }
 0x391   : > { %v7394_v15 = vpop.f32.mrf.mxu0  ;;  %v10026_v0 = vpop.f32.mrf.mxu1 }
 0x392   : > { %v4415_v46 = vadd.f32 %v10016_v38, %v4268_v6 }
 0x393   : > { %v4242_v34 = vpop.f32.mrf.mxu0  ;;  %v7426_v18 = vpop.f32.mrf.mxu1 }
 0x394   : > { %v4269_v31 = vadd.f32 %v4242_v34, %v10003_v9 }
 0x395   : > { %v7397_v19 = vpop.f32.mrf.mxu0  ;;  %v10028_v50 = vpop.f32.mrf.mxu1 }
 0x396   : > { %v4414_v19 = vadd.f32 %v4381_v61, %v4267_v62  ;;  %v4416_v38 = vadd.f32 %v10020_v30, %v4269_v31 }
 0x397   : > { %v4245_v21 = vpop.f32.mrf.mxu0  ;;  %v7429_v40 = vpop.f32.mrf.mxu1 }
 0x399   : > { %v7398_v26 = vpop.f32.mrf.mxu0  ;;  %v10030_v57 = vpop.f32.mrf.mxu1 }
 0x39b   : > { %v4250_v48 = vpop.f32.mrf.mxu0  ;;  %v7430_v51 = vpop.f32.mrf.mxu1 }
 0x39c   : > { %v4271_v55 = vadd.f32 %v4250_v48, %v10009_v54 }
 0x39d   : > { %v7401_v44 = vpop.f32.mrf.mxu0 }
 0x39f   : > { %v10032_v12 = vpop.f32.mrf.mxu0 }
 0x3a1   : > { %v7402_v56 = vpop.f32.mrf.mxu0 }
 0x3a3   : > { %v10034_v43 = vpop.f32.mrf.mxu0 }
 0x3a5   : > { %v7405_v1 = vpop.f32.mrf.mxu0 }
 0x3a7   : > { %v10037_v14 = vpop.f32.mrf.mxu0 }
 0x3a9   : > { %v7406_v35 = vpop.f32.mrf.mxu0 }
 0x3ab   : > { %v4498_v27 = vpop.f32.mrf.mxu0 }
 0x3ac   : > { %v4537_v32 = vadd.f32 %v4498_v27, %v4412_v60 }
 0x3ad   : > { %v7437_v45 = vpop.f32.mrf.mxu0 }
 0x3ae   : > { %v4554_v17 = vadd.f32 %v10043_v25, %v4537_v32  ;;  %v4270_v32 = vadd.f32 %v4245_v21, %v10006_v13  ;;  %v7810_v13 = vld [vmem:[%s10641_s7 + $0x2c] ss:$0 sps:$4 sm:$0xff]  }
 0x3af   : > { %v4501_v4 = vpop.f32.mrf.mxu0 }
 0x3b0   : > { %v4564_v39 = vmax.f32 %v4554_v17, 0.0  ;;  %v4538_v15 = vadd.f32 %v4501_v4, %v4413_v8  ;;  %v4417_v30 = vadd.f32 %v10022_v59, %v4270_v32 }
 0x3b1   : > { %v7438_v18 = vpop.f32.mrf.mxu0 }
 0x3b2   : > { %v4574_v20 = vsel %vm9257_vm1, %v4564_v39, 0.0  ;;  %v4555_v29 = vadd.f32 %v10043_v25, %v4538_v15  ;;  %vm10801_vm1 = vcmask 191488  }
 0x3b3   : > { %v6545_v40 = vpack.c.bf16 %v4574_v20, %v4574_v20  ;;  %v4506_v26 = vpop.f32.mrf.mxu0  ;;  %vm10808_vm9 = vmmov %vm10801_vm1 }
 0x3b4   : > { %v4565_v51 = vmax.f32 %v4555_v29, 0.0  ;;  %v4539_v44 = vadd.f32 %v4506_v26, %v4414_v19  ;;  %vm10811_vm12 = vmmov %vm10801_vm1 }
 0x3b5   : > { %v4615_v3 = vshrl.u32 %v6545_v40, 16  ;;  %v4618_v53 = vshll.u32 %v6545_v40, 16  ;;  %v7441_v56 = vpop.f32.mrf.mxu0 }
 0x3b6   : > { %v4575_v1 = vsel %vm9266_vm7, %v4565_v51, 0.0  ;;  %v4556_v23 = vadd.f32 %v10043_v25, %v4539_v44  ;;  %vm10802_vm7 = vmmov %vm10801_vm1 }
 0x3b7   : > { %v4617_v47 = vrot.slane %v4615_v3, 6  ;;  %v4620_v49 = vrot.slane %v4618_v53, 7  ;;  %v6546_v35 = vpack.c.bf16 %v4575_v1, %v4575_v1  ;;  %v4509_v61 = vpop.f32.mrf.mxu0  ;;  %v4272_v1 = vadd.f32 %v10032_v12, %v10012_v7 }
 0x3b8   : > { %v4566_v60 = vmax.f32 %v4556_v23, 0.0  ;;  %v4540_v27 = vadd.f32 %v4509_v61, %v4415_v46 }
 0x3b9   : > { %v4621_v45 = vor.u32 %v4620_v49, %v4617_v47  ;;  %v4624_v62 = vshrl.u32 %v6546_v35, 16  ;;  %v4627_v17 = vshll.u32 %v6546_v35, 16  ;;  %v7442_v9 = vpop.f32.mrf.mxu0  ;;  %v4418_v47 = vadd.f32 %v10024_v37, %v4271_v55 }
 0x3ba   : > { %v4576_v42 = vsel %vm9296_vm6, %v4566_v60, 0.0  ;;  %v4557_v34 = vadd.f32 %v10043_v25, %v4540_v27  ;;  %vm10800_vm6 = vmmov %vm10799_vm8  ;;  %v4739_v60 = vld [vmem:[#allocation3] sm:$0xf]  ;;  %v4273_v27 = vadd.f32 %v10034_v43, %v10014_v11  ;;  %vm10812_vm8 = vsmask.f32 7424 }
 0x3bb   : > { %v4725_v8 = vsel %vm9398_vm10, %v4621_v45, %v4724_v52  ;;  %v4626_v4 = vrot.slane %v4624_v62, 6  ;;  %v4629_v39 = vrot.slane %v4627_v17, 7  ;;  %v4514_v15 = vpop.f32.mrf.mxu0  ;;  %v6547_v21 = vpack.c.bf16 %v4576_v42, %v4576_v42  ;;  %vm10810_vm4 = vmmov %vm10800_vm6 }
 0x3bc   : > { %4726 = vst [vmem:[#allocation3 + $0x4] sm:$0xe] %v4725_v8  ;;  %v4567_v18 = vmax.f32 %v4557_v34, 0.0  ;;  %v4541_v6 = vadd.f32 %v4514_v15, %v4416_v38  ;;  %v4622_v20 = vrot.slane %v4621_v45, 4  ;;  %v5199_v56 = vsel %vm10800_vm6, %v7810_v13, 0  ;;  %vm10813_vm6 = vmmov %vm10794_vm0 }
 0x3bd   : > { %v4630_v29 = vor.u32 %v4629_v39, %v4626_v4  ;;  %v7445_v19 = vpop.f32.mrf.mxu0  ;;  %v4634_v28 = vshrl.u32 %v6547_v21, 16  ;;  %v4637_v40 = vshll.u32 %v6547_v21, 16  ;;  %v4419_v39 = vadd.f32 %v10026_v0, %v4272_v1 }
 0x3be   : > { %v4577_v26 = vsel %vm9342_vm15, %v4567_v18, 0.0  ;;  %v4558_v51 = vadd.f32 %v10043_v25, %v4541_v6  ;;  %v4274_v15 = vadd.f32 %v10037_v14, %v10018_v10  ;;  %vm10803_vm15 = vmmov %vm10794_vm0  ;;  %v7811_v10 = vld [vmem:[%s10641_s7 + $0x24] sm:$0xff]   ;;  %v4420_v19 = vadd.f32 %v10028_v50, %v4273_v27 }
 0x3bf   : > { %v4631_v44 = vsel %vm9428_vm11, %v4622_v20, %v4630_v29  ;;  %v6548_v3 = vpack.c.bf16 %v4577_v26, %v4577_v26  ;;  %v4517_v53 = vpop.f32.mrf.mxu0  ;;  %v4636_v54 = vrot.slane %v4634_v28, 6  ;;  %v4639_v48 = vrot.slane %v4637_v40, 7 }
 0x3c0   : > { %4727 = vst.msk [vmem:[#allocation3 + $0x8] sm:$0xf] %vm10801_vm1, %v4631_v44  ;;  %v4568_v31 = vmax.f32 %v4558_v51, 0.0  ;;  %v4542_v59 = vadd.f32 %v4517_v53, %v4417_v30  ;;  %v4632_v49 = vrot.slane %v4630_v29, 4  ;;  %vm10805_vm10 = vnez %v10698_v22 }
 0x3c1   : > { %v4644_v41 = vshrl.u32 %v6548_v3, 16  ;;  %v4647_v23 = vshll.u32 %v6548_v3, 16  ;;  %v7446_v46 = vpop.f32.mrf.mxu0  ;;  %v4640_v35 = vor.u32 %v4639_v48, %v4636_v54  ;;  %v4421_v50 = vadd.f32 %v10030_v57, %v4274_v15 }
 0x3c2   : > { %v4578_v61 = vsel %vm9388_vm5, %v4568_v31, 0.0  ;;  %v4559_v52 = vadd.f32 %v10043_v25, %v4542_v59  ;;  %vm10804_vm5 = vmmov %vm10801_vm1 }
 0x3c3   : > { %v4646_v32 = vrot.slane %v4644_v41, 6  ;;  %v4649_v45 = vrot.slane %v4647_v23, 7  ;;  %v6549_v62 = vpack.c.bf16 %v4578_v61, %v4578_v61  ;;  %v4522_v7 = vpop.f32.mrf.mxu0  ;;  %v10083_v12 = vld [vmem:[#allocation3 + $0x4] sm:$0xf]  ;;  %v4641_v37 = vsel %vm9428_vm11, %v4632_v49, %v4640_v35 }
 0x3c4   : > { %v4642_v17 = vrot.slane %v4640_v35, 4  ;;  %v4569_v9 = vmax.f32 %v4559_v52, 0.0  ;;  %v4543_v42 = vadd.f32 %v4522_v7, %v4418_v47  ;;  %4728 = vst.msk [vmem:[#allocation3 + $0xc] sm:$0xf] %vm10802_vm7, %v4641_v37  ;;  %v10089_v11 = vcombine.low %v4739_v60, %v10083_v12  ;;  %v7805_v60 = vld [vmem:[%s10641_s7 + $0x20] ss:$0 sps:$4 sm:$0xff]   ;;  %vm10815_vm7 = vmmov %vm10794_vm0 }
 0x3c5   : > { %v4650_v16 = vor.u32 %v4649_v45, %v4646_v32  ;;  %v4654_v34 = vshrl.u32 %v6549_v62, 16  ;;  %v4657_v38 = vshll.u32 %v6549_v62, 16  ;;  %v7449_v8 = vpop.f32.mrf.mxu0  ;;  %v5066_v15 = vsel %vm10810_vm4, %v7805_v60, 0 }
 0x3c6   : > { %v4579_v43 = vsel %vm9432_vm14, %v4569_v9, 0.0  ;;  %v4560_v4 = vadd.f32 %v10043_v25, %v4543_v42  ;;  %7484 = vmatmul.mubr.msk.bf16.vlgmr.msra.gmra.mxu0 %vm10803_vm15, %v10089_v11  ;;  %v4790_v30 = vshll.u32 %v10089_v11, 16  ;;  %v4788_v54 = vshrl.u32 %v10089_v11, 16  ;;  %vm10806_vm14 = vmmov %vm10801_vm1 }
 0x3c7   : > { %v4651_v13 = vsel %vm9428_vm11, %v4642_v17, %v4650_v16  ;;  %v4656_v21 = vrot.slane %v4654_v34, 6  ;;  %v4659_v18 = vrot.slane %v4657_v38, 7  ;;  %v4525_v6 = vpop.f32.mrf.mxu0  ;;  %v6550_v24 = vpack.c.bf16 %v4579_v43, %v4579_v43  ;;  %7487 = vmatprep.mubr.msk.bf16.mxu0 %vm10706_vm13, %v7837_v2  ;;  %7528 = vmatpush3.bf16.msra.mxu0 %v5199_v56  ;;  %v10115_v56 = vld [vmem:[#allocation3 + $0x8] sm:$0xf]  ;;  %vm10816_vm15 = vmmov %vm10804_vm5 }
 0x3c8   : > { %4729 = vst.msk [vmem:[#allocation3 + $0x10] sm:$0xf] %vm10804_vm5, %v4651_v13  ;;  %v4570_v55 = vmax.f32 %v4560_v4, 0.0  ;;  %v4544_v20 = vadd.f32 %v4525_v6, %v4419_v39  ;;  %v4652_v0 = vrot.slane %v4650_v16, 4  ;;  %7529 = vmatprep.subr.bf16.mxu0 %v7837_v2  ;;  %v4792_v52 = vrot.slane %v4790_v30, 1  ;;  %vm10817_vm5 = vmmov %vm10812_vm8 }
 0x3c9   : > { %v4660_v14 = vor.u32 %v4659_v18, %v4656_v21  ;;  %v7450_v29 = vpop.f32.mrf.mxu0  ;;  %v4664_v28 = vshrl.u32 %v6550_v24, 16  ;;  %v4667_v40 = vshll.u32 %v6550_v24, 16  ;;  %vm10814_vm1 = vnez %v10710_v5 }
 0x3ca   : > { %v4580_v26 = vsel %vm10805_vm10, %v4570_v55, 0.0  ;;  %v4561_v51 = vadd.f32 %v10043_v25, %v4544_v20  ;;  %v4793_v39 = vor.u32 %v4792_v52, %v4788_v54  ;;  %vm10818_vm10 = vmmov %vm10808_vm9  ;;  %v4736_v52 = vld [vmem:[#allocation3 + $0x2c] sm:$0x3] }
 0x3cb   : > { %v4661_v44 = vsel %vm9428_vm11, %v4652_v0, %v4660_v14  ;;  %v6551_v3 = vpack.c.bf16 %v4580_v26, %v4580_v26  ;;  %v4530_v53 = vpop.f32.mrf.mxu0  ;;  %v4666_v48 = vrot.slane %v4664_v28, 6  ;;  %v4669_v31 = vrot.slane %v4667_v40, 7  ;;  %v10120_v1 = vld [vmem:[#allocation3 + $0xc] sm:$0xf]  ;;  %7530 = vmatpush3.bf16.msra.mxu0 %v7811_v10  ;;  %v7809_v40 = vld [vmem:[%s10641_s7 + $0x18] sm:$0xff]  }
 0x3cc   : > { %4730 = vst.msk [vmem:[#allocation3 + $0x14] sm:$0xf] %vm10806_vm14, %v4661_v44  ;;  %v4571_v59 = vmax.f32 %v4561_v51, 0.0  ;;  %v4545_v22 = vadd.f32 %v4530_v53, %v4420_v19  ;;  %v4662_v41 = vrot.slane %v4660_v14, 4  ;;  %v10124_v49 = vcombine.low %v10115_v56, %v10120_v1  ;;  %7575 = vmatprep.subr.bf16.mxu0 %v7837_v2  ;;  %vm10819_vm14 = vmmov %vm10794_vm0 }
 0x3cd   : > { %v4674_v23 = vshrl.u32 %v6551_v3, 16  ;;  %v4677_v46 = vshll.u32 %v6551_v3, 16  ;;  %v7453_v47 = vpop.f32.mrf.mxu0  ;;  %v4670_v57 = vor.u32 %v4669_v31, %v4666_v48 }
 0x3ce   : > { %v4581_v35 = vsel %vm10807_vm2, %v4571_v59, 0.0  ;;  %v4562_v61 = vadd.f32 %v10043_v25, %v4545_v22  ;;  %7488 = vmatmul.mubr.msk.bf16.gmra.mxu0 %vm10794_vm0, %v10124_v49  ;;  %v4795_v7 = vshll.u32 %v10124_v49, 16  ;;  %v4799_v14 = vshrl.u32 %v10124_v49, 16  ;;  %vm10820_vm2 = vmmov %vm10794_vm0 }
 0x3cf   : > { %v4676_v27 = vrot.slane %v4674_v23, 6  ;;  %v4679_v32 = vrot.slane %v4677_v46, 7  ;;  %v6552_v45 = vpack.c.bf16 %v4581_v35, %v4581_v35  ;;  %v4533_v62 = vpop.f32.mrf.mxu0  ;;  %v4671_v58 = vsel %vm9428_vm11, %v4662_v41, %v4670_v57  ;;  %7491 = vmatprep.mubr.msk.bf16.mxu0 %vm10706_vm13, %v7837_v2  ;;  %v10149_v6 = vld [vmem:[#allocation3 + $0x10] sm:$0xf]  ;;  %vm10821_vm0 = vmmov %vm10808_vm9 }
 0x3d0   : > { %v4672_v37 = vrot.slane %v4670_v57, 4  ;;  %v4572_v17 = vmax.f32 %v4562_v61, 0.0  ;;  %v4546_v9 = vadd.f32 %v4533_v62, %v4421_v50  ;;  %4731 = vst.msk [vmem:[#allocation3 + $0x18] sm:$0xf] %vm10808_vm9, %v4671_v58  ;;  %v4797_v8 = vrot.slane %v4795_v7, 1  ;;  %vm10825_vm4 = vmmov %vm10820_vm2 }
 0x3d1   : > { %v4680_v42 = vor.u32 %v4679_v32, %v4676_v27  ;;  %v4684_v16 = vshrl.u32 %v6552_v45, 16  ;;  %v4687_v34 = vshll.u32 %v6552_v45, 16  ;;  %v7454_v38 = vpop.f32.mrf.mxu0  ;;  %vm10822_vm9 = vnez %v10723_v36 }
 0x3d2   : > { %v4582_v43 = vsel %vm10809_vm3, %v4572_v17, 0.0  ;;  %v4563_v4 = vadd.f32 %v10043_v25, %v4546_v9  ;;  %v4798_v33 = vsel %vm10812_vm8, %v4793_v39, %v4797_v8  ;;  %v4801_v3 = vor.u32 %v4799_v14, %v4797_v8  ;;  %vm10823_vm3 = vmmov %vm10817_vm5 }
 0x3d3   : > { %v4681_v13 = vsel %vm9428_vm11, %v4672_v37, %v4680_v42  ;;  %v4686_v21 = vrot.slane %v4684_v16, 6  ;;  %v4689_v18 = vrot.slane %v4687_v34, 7  ;;  %v10151_v24 = vld [vmem:[#allocation3 + $0x14] sm:$0xf]  ;;  %v6553_v55 = vpack.c.bf16 %v4582_v43, %v4582_v43  ;;  %7460 = vmatmul.mubr.msk.bf16.vlgmr.msra.gmra.mxu1 %vm10813_vm6, %v4798_v33  ;;  %vm10827_vm8 = vmmov %vm10820_vm2 }
 0x3d4   : > { %4732 = vst.msk [vmem:[#allocation3 + $0x1c] sm:$0xf] %vm10811_vm12, %v4681_v13  ;;  %v4573_v20 = vmax.f32 %v4563_v4, 0.0  ;;  %v10157_v25 = vcombine.low %v10149_v6, %v10151_v24  ;;  %v4682_v10 = vrot.slane %v4680_v42, 4  ;;  %7504 = vmatpush3.bf16.msra.mxu1 %v5066_v15  ;;  %7463 = vmatprep.mubr.msk.bf16.mxu1 %vm10706_vm13, %v7837_v2  ;;  %v10214_v16 = vcombine.low %v10120_v1, %v10149_v6  ;;  %vm10826_vm12 = vmmov %vm10823_vm3 }
 0x3d5   : > { %v4690_v0 = vor.u32 %v4689_v18, %v4686_v21  ;;  %v4694_v29 = vshrl.u32 %v6553_v55, 16  ;;  %v4697_v19 = vshll.u32 %v6553_v55, 16  ;;  %7505 = vmatprep.subr.bf16.mxu1 %v7837_v2  ;;  %v10220_v36 = vcombine.low %v10083_v12, %v10115_v56  ;;  %v7820_v56 = vld [vmem:[%s10641_s7 + $0x44] ss:$0 sps:$4 sm:$0xff]  }
 0x3d6   : > { %v4583_v30 = vsel %vm10814_vm1, %v4573_v20, 0.0  ;;  %v4803_v28 = vshll.u32 %v10157_v25, 16  ;;  %7492 = vmatmul.mubr.msk.bf16.gmra.mxu0 %vm10815_vm7, %v10157_v25  ;;  %v4807_v60 = vshrl.u32 %v10157_v25, 16  ;;  %v5164_v39 = vrot.slane %v10214_v16, 1  ;;  %vm10830_vm7 = vmmov %vm10820_vm2 }
 0x3d7   : > { %v4691_v26 = vsel %vm9428_vm11, %v4682_v10, %v4690_v0  ;;  %v6554_v51 = vpack.c.bf16 %v4583_v30, %v4583_v30  ;;  %v4696_v5 = vrot.slane %v4694_v29, 6  ;;  %v4699_v44 = vrot.slane %v4697_v19, 7  ;;  %7495 = vmatprep.mubr.msk.bf16.mxu0 %vm10706_vm13, %v7837_v2  ;;  %v4745_v23 = vld [vmem:[#allocation3 + $0x18] sm:$0xf]  ;;  %v7821_v30 = vld [vmem:[%s10641_s7 + $0x3c] sm:$0xff]  }
 0x3d8   : > { %4733 = vst.msk [vmem:[#allocation3 + $0x20] sm:$0xf] %vm10816_vm15, %v4691_v26  ;;  %v4805_v53 = vrot.slane %v4803_v28, 1  ;;  %v4692_v48 = vrot.slane %v4690_v0, 4  ;;  %7506 = vmatpush3.bf16.msra.mxu1 %v7809_v40  ;;  %v5709_v13 = vrot.slane %v4799_v14, 2  ;;  %v5163_v18 = vrot.slane %v10220_v36, 1 }
 0x3d9   : > { %v4704_v50 = vshrl.u32 %v6554_v51, 16  ;;  %v4707_v54 = vshll.u32 %v6554_v51, 16  ;;  %v4700_v31 = vor.u32 %v4699_v44, %v4696_v5  ;;  %7551 = vmatprep.subr.bf16.mxu1 %v7837_v2  ;;  %v5710_v6 = vrot.slane %v4795_v7, 3 }
 0x3da   : > { %v4806_v59 = vsel %vm10817_vm5, %v4801_v3, %v4805_v53  ;;  %v4809_v62 = vor.u32 %v4807_v60, %v4805_v53  ;;  %v5713_v55 = vrot.slane %v4803_v28, 3  ;;  %v5712_v20 = vrot.slane %v4807_v60, 2  ;;  %vm10832_vm5 = vmmov %vm10823_vm3 }
 0x3db   : > { %v4706_v22 = vrot.slane %v4704_v50, 6  ;;  %v4709_v41 = vrot.slane %v4707_v54, 7  ;;  %v10182_v46 = vld [vmem:[#allocation3 + $0x1c] sm:$0xf]  ;;  %v4701_v47 = vsel %vm9428_vm11, %v4692_v48, %v4700_v31  ;;  %v4702_v35 = vrot.slane %v4700_v31, 4  ;;  %7464 = vmatmul.mubr.msk.bf16.gmra.mxu1 %vm10819_vm14, %v4806_v59  ;;  %vm10834_vm14 = vmmov %vm10820_vm2 }
 0x3dc   : > { %v10188_v57 = vcombine.low %v4745_v23, %v10182_v46  ;;  %4734 = vst.msk [vmem:[#allocation3 + $0x24] sm:$0xf] %vm10818_vm10, %v4701_v47  ;;  %7467 = vmatprep.mubr.msk.bf16.mxu1 %vm10706_vm13, %v7837_v2  ;;  %v10254_v10 = vcombine.low %v10151_v24, %v4745_v23  ;;  %vm10828_vm6 = vcmask 1043456   ;;  %vm10829_vm1 = vcmask 1046528  }
 0x3dd   : > { %v4710_v61 = vor.u32 %v4709_v41, %v4706_v22  ;;  %v5491_v0 = vsel %vm10828_vm6, %v7820_v56, 0  ;;  %v5165_v14 = vsel %vm10829_vm1, %v5163_v18, %v5164_v39  ;;  %v5711_v29 = vor.u32 %v5710_v6, %v5709_v13  ;;  %vm10833_vm10 = vmmov %vm10829_vm1 }
 0x3de   : > { %v4811_v27 = vshll.u32 %v10188_v57, 16  ;;  %7496 = vmatmul.mubr.msk.bf16.gmra.mxu0 %vm10820_vm2, %v10188_v57  ;;  %v4815_v34 = vshrl.u32 %v10188_v57, 16  ;;  %v5166_v24 = vrot.slane %v10254_v10, 1  ;;  %v5714_v28 = vor.u32 %v5713_v55, %v5712_v20 }
 0x3df   : > { %v4711_v32 = vsel %vm9428_vm11, %v4702_v35, %v4710_v61  ;;  %v4712_v45 = vrot.slane %v4710_v61, 4  ;;  %7499 = vmatprep.mubr.msk.bf16.mxu0 %vm10706_vm13, %v7837_v2  ;;  %v4747_v9 = vld [vmem:[#allocation3 + $0x20] sm:$0xf]  ;;  %vm10824_vm11 = vmmov %vm10820_vm2  ;;  %v5031_v5 = vrot.slane %v10124_v49, 1  ;;  %vm10831_vm15 = vsmask.f32 5376 }
 0x3e0   : > { %4735 = vst.msk [vmem:[#allocation3 + $0x28] sm:$0xf] %vm10821_vm0, %v4711_v32  ;;  %v4813_v58 = vrot.slane %v4811_v27, 1  ;;  %v5716_v40 = vrot.slane %v4815_v34, 2  ;;  %v5717_v26 = vrot.slane %v4811_v27, 3  ;;  %v10272_v44 = vsel %vm10831_vm15, %v5711_v29, %v5714_v28  ;;  %vm10835_vm2 = vmmov %vm10831_vm15 }
 0x3e1   : > { %v4737_v37 = vsel %vm10822_vm9, %v4712_v45, %v4736_v52  ;;  %v5584_v53 = vrot.slane %v10124_v49, 2  ;;  %v5585_v50 = vrot.slane %v10157_v25, 2  ;;  %v5167_v31 = vsel %vm10833_vm10, %v5164_v39, %v5166_v24  ;;  %v7816_v32 = vld [vmem:[%s10641_s7 + $0x38] ss:$0 sps:$4 sm:$0xff]  }
 0x3e2   : > { %4738 = vst [vmem:[#allocation3 + $0x2c] sm:$0x3] %v4737_v37  ;;  %v4814_v17 = vsel %vm10823_vm3, %v4809_v62, %v4813_v58  ;;  %v4817_v43 = vor.u32 %v4815_v34, %v4813_v58  ;;  %v5718_v3 = vor.u32 %v5717_v26, %v5716_v40  ;;  %v5587_v22 = vrot.slane %v10188_v57, 2  ;;  %vm10838_vm3 = vmmov %vm10825_vm4 }
 0x3e3   : > { %v10206_v63 = vld [vmem:[#allocation3 + $0x24] sm:$0xf]  ;;  %7468 = vmatmul.mubr.msk.bf16.gmra.mxu1 %vm10824_vm11, %v4814_v17  ;;  %vm10836_vm0 = vcmask 1045504   ;;  %v10292_v61 = vcombine.low %v10182_v46, %v4747_v9  ;;  %v5856_v37 = vrot.slane %v10124_v49, 3  ;;  %vm10839_vm11 = vmmov %vm10835_vm2  ;;  %v5859_v34 = vrot.slane %v10188_v57, 3 }
 0x3e4   : > { %v10210_v42 = vcombine.low %v4747_v9, %v10206_v63  ;;  %7471 = vmatprep.mubr.msk.bf16.mxu1 %vm10706_vm13, %v7837_v2  ;;  %v10282_v41 = vsel %vm10835_vm2, %v5714_v28, %v5718_v3  ;;  %v10285_v23 = vsel %vm10836_vm0, %v5584_v53, %v5585_v50  ;;  %vm10837_vm9 = vmmov %vm10836_vm0  ;;  %v5857_v9 = vrot.slane %v10157_v25, 3 }
 0x3e5   : > { %v10295_v60 = vsel %vm10837_vm9, %v5585_v50, %v5587_v22  ;;  %v5168_v56 = vrot.slane %v10292_v61, 1  ;;  %vm10844_vm1 = vcmask 1043456   ;;  %v5456_v40 = vrot.slane %v10214_v16, 2 }
 0x3e6   : > { %7500 = vmatmul.mubr.msk.bf16.gmra.mxu0 %vm10825_vm4, %v10210_v42  ;;  %v4819_v38 = vshll.u32 %v10210_v42, 16  ;;  %v4823_v7 = vshrl.u32 %v10210_v42, 16  ;;  %v5589_v27 = vrot.slane %v10210_v42, 2  ;;  %vm10840_vm4 = vmmov %vm10836_vm0  ;;  %v5297_v53 = vshrl.u32 %v10214_v16, 16 }
 0x3e7   : > { %v10226_v8 = vld [vmem:[#allocation3 + $0x28] sm:$0xf]  ;;  %7531 = vmatprep.mubr.msk.bf16.mxu0 %vm10706_vm13, %v7837_v2  ;;  %v5300_v50 = vshll.u32 %v10214_v16, 16 }
 0x3e8   : > { %v10232_v1 = vcombine.low %v10226_v8, %v10226_v8  ;;  %v4821_v4 = vrot.slane %v4819_v38, 1  ;;  %v5720_v54 = vrot.slane %v4823_v7, 2  ;;  %v5721_v59 = vrot.slane %v4819_v38, 3 }
 0x3e9   : > { %v10234_v12 = vld [vmem:[#allocation3 + $0x2c] sm:$0xf]  ;;  %v10310_v17 = vsel %vm10840_vm4, %v5587_v22, %v5589_v27  ;;  %v5030_v38 = vrot.slane %v10089_v11, 1  ;;  %v5366_v11 = vsel %vm10844_vm1, %v7816_v32, 0  ;;  %v5299_v22 = vrot.slane %v5297_v53, 1 }
 0x3ea   : > { %v10242_v15 = vcombine.low %v10226_v8, %v10234_v12  ;;  %v4822_v21 = vsel %vm10826_vm12, %v4817_v43, %v4821_v4  ;;  %v4827_v33 = vshll.u32 %v10232_v1, 16  ;;  %v4825_v51 = vor.u32 %v4823_v7, %v4821_v4  ;;  %vm10841_vm12 = vmmov %vm10836_vm0 }
 0x3eb   : > { %7472 = vmatmul.mubr.msk.bf16.gmra.mxu1 %vm10827_vm8, %v4822_v21  ;;  %v5722_v52 = vor.u32 %v5721_v59, %v5720_v54  ;;  %v5861_v4 = vrot.slane %v10210_v42, 3  ;;  %vm10842_vm8 = vcmask 1044480   ;;  %vm10851_vm0 = vmmov %vm10838_vm3  ;;  %v5033_v7 = vrot.slane %v10157_v25, 1  ;;  %v7825_v54 = vld [vmem:[%s10641_s7 + $0x54] sm:$0xff]  }
 0x3ec   : > { %7475 = vmatprep.mubr.msk.bf16.mxu1 %vm10706_vm13, %v7837_v2  ;;  %v4829_v19 = vrot.slane %v4827_v33, 1  ;;  %v5725_v47 = vshrl.u32 %v10242_v15, 16  ;;  %v5728_v35 = vshll.u32 %v10242_v15, 16  ;;  %v5591_v58 = vrot.slane %v10242_v15, 2  ;;  %vm10843_vm6 = vmmov %vm10842_vm8 }
 0x3ed   : > { %v10307_v46 = vsel %vm10839_vm11, %v5718_v3, %v5722_v52  ;;  %v10325_v39 = vsel %vm10842_vm8, %v5856_v37, %v5857_v9  ;;  %v10328_v13 = vsel %vm10843_vm6, %v5857_v9, %v5859_v34  ;;  %v5863_v21 = vrot.slane %v10242_v15, 3  ;;  %vm10846_vm15 = vmmov %vm10843_vm6 }
 0x3ee   : > { %7532 = vmatmul.mubr.msk.bf16.vlgmr.msra.gmra.mxu0 %vm10830_vm7, %v5165_v14  ;;  %v4830_v48 = vsel %vm10832_vm5, %v4825_v51, %v4829_v19  ;;  %v5727_v45 = vrot.slane %v5725_v47, 2  ;;  %v5730_v62 = vrot.slane %v5728_v35, 3  ;;  %v10320_v49 = vsel %vm10841_vm12, %v5589_v27, %v5591_v58  ;;  %vm10845_vm7 = vmmov %vm10835_vm2  ;;  %v7819_v14 = vld [vmem:[%s10641_s7 + $0x30] sm:$0xff]  }
 0x3ef   : > { %7535 = vmatprep.mubr.msk.bf16.mxu0 %vm10706_vm13, %v7837_v2  ;;  %7576 = vmatpush3.bf16.msra.mxu0 %v5491_v0  ;;  %v10337_v6 = vsel %vm10846_vm15, %v5859_v34, %v5861_v4  ;;  %vm10847_vm5 = vmmov %vm10833_vm10  ;;  %v10348_v33 = vcombine.low %v10206_v63, %v10226_v8  ;;  %v10370_v25 = vcombine.low %v10234_v12, %v10234_v12  ;;  %v5035_v19 = vrot.slane %v10188_v57, 1  ;;  %v7824_v57 = vld [vmem:[%s10641_s7 + $0x5c] ss:$0 sps:$4 sm:$0xff]  }
 0x3f0   : > { %7577 = vmatprep.subr.bf16.mxu0 %v7837_v2  ;;  %v10315_v43 = vor.u32 %v5730_v62, %v5727_v45  ;;  %v5032_v55 = vsel %vm10847_vm5, %v5030_v38, %v5031_v5  ;;  %vm10848_vm10 = vmmov %vm10843_vm6  ;;  %v5037_v12 = vrot.slane %v10210_v42, 1  ;;  %v5455_v51 = vrot.slane %v10220_v36, 2 }
 0x3f1   : > { %v10343_v20 = vsel %vm10848_vm10, %v5861_v4, %v5863_v21  ;;  %vm10850_vm2 = vmmov %vm10847_vm5  ;;  %v5170_v63 = vrot.slane %v10348_v33, 1  ;;  %vm10862_vm5 = vcmask 1043456   ;;  %vm10863_vm10 = vcmask 1045504  }
 0x3f2   : > { %v10334_v18 = vsel %vm10845_vm7, %v5722_v52, %v10315_v43  ;;  %v5169_v0 = vsel %vm10850_vm2, %v5166_v24, %v5168_v56  ;;  %vm10852_vm9 = vmmov %vm10850_vm2  ;;  %v5172_v24 = vrot.slane %v10370_v25, 1  ;;  %v5457_v3 = vsel %vm10863_vm10, %v5455_v51, %v5456_v40 }
 0x3f3   : > { %7578 = vmatpush3.bf16.msra.mxu0 %v7821_v30  ;;  %7476 = vmatmul.mubr.msk.bf16.gmra.mxu1 %vm10834_vm14, %v4830_v48  ;;  %vm10849_vm14 = vmmov %vm10838_vm3  ;;  %v5034_v8 = vsel %vm10852_vm9, %v5031_v5, %v5033_v7  ;;  %v5767_v5 = vsel %vm10862_vm5, %v7824_v57, 0  ;;  %v5039_v42 = vrot.slane %v10232_v1, 1  ;;  %v5458_v48 = vrot.slane %v10254_v10, 2 }
 0x3f4   : > { %7623 = vmatprep.subr.bf16.mxu0 %v7837_v2  ;;  %7507 = vmatprep.mubr.msk.bf16.mxu1 %vm10706_vm13, %v7837_v2  ;;  %vm10854_vm11 = vmmov %vm10850_vm2  ;;  %v5292_v1 = vshll.u32 %v10220_v36, 16  ;;  %v5302_v47 = vrot.slane %v5300_v50, 2  ;;  %v5306_v32 = vshrl.u32 %v10254_v10, 16  ;;  %v5309_v45 = vshll.u32 %v10254_v10, 16  ;;  %v7823_v10 = vld [vmem:[%s10641_s7 + $0x48] sm:$0xff]  }
 0x3f5   : > { %v5171_v29 = vsel %vm10854_vm11, %v5168_v56, %v5170_v63  ;;  %vm10855_vm4 = vmmov %vm10851_vm0  ;;  %v5040_v59 = vsel %vm10850_vm2, %v5037_v12, %v5039_v42  ;;  %v5460_v37 = vrot.slane %v10292_v61, 2  ;;  %v5336_v51 = vshll.u32 %v10370_v25, 16 }
 0x3f6   : > { %7536 = vmatmul.mubr.msk.bf16.gmra.mxu0 %vm10838_vm3, %v5167_v31  ;;  %vm10853_vm3 = vmmov %vm10851_vm0  ;;  %v5289_v31 = vshrl.u32 %v10220_v36, 16  ;;  %v5294_v52 = vrot.slane %v5292_v1, 2  ;;  %v7822_v36 = vld [vmem:[%s10641_s7 + $0x50] ss:$0 sps:$4 sm:$0xff]   ;;  %v5303_v27 = vor.u32 %v5302_v47, %v5299_v22  ;;  %v5308_v38 = vrot.slane %v5306_v32, 1 }
 0x3f7   : > { %7539 = vmatprep.mubr.msk.bf16.mxu0 %vm10706_vm13, %v7837_v2  ;;  %vm10856_vm12 = vmmov %vm10850_vm2  ;;  %v5311_v4 = vrot.slane %v5309_v45, 2  ;;  %v5338_v42 = vrot.slane %v5336_v51, 2 }
 0x3f8   : > { %v5036_v30 = vsel %vm10856_vm12, %v5033_v7, %v5035_v19  ;;  %vm10857_vm8 = vmmov %vm10851_vm0  ;;  %v5291_v35 = vrot.slane %v5289_v31, 1 }
 0x3f9   : > { %vm10858_vm6 = vmmov %vm10850_vm2 }
 0x3fa   : > { %v5173_v28 = vsel %vm10858_vm6, %v5170_v63, %v5172_v24  ;;  %vm10859_vm1 = vmmov %vm10851_vm0  ;;  %v5295_v62 = vor.u32 %v5294_v52, %v5291_v35  ;;  %v5327_v24 = vshll.u32 %v10348_v33, 16 }
 0x3fb   : > { %7508 = vmatmul.mubr.msk.bf16.vlgmr.msra.gmra.mxu1 %vm10849_vm14, %v5032_v55  ;;  %vm10860_vm7 = vmmov %vm10850_vm2  ;;  %v5315_v55 = vshrl.u32 %v10292_v61, 16 }
 0x3fc   : > { %7552 = vmatpush3.bf16.msra.mxu1 %v5366_v11  ;;  %7511 = vmatprep.mubr.msk.bf16.mxu1 %vm10706_vm13, %v7837_v2  ;;  %v5038_v26 = vsel %vm10860_vm7, %v5035_v19, %v5037_v12  ;;  %vm10861_vm15 = vmmov %vm10851_vm0  ;;  %v5312_v11 = vor.u32 %v5311_v4, %v5308_v38  ;;  %v5329_v57 = vrot.slane %v5327_v24, 2 }
 0x3fd   : > { %7553 = vmatprep.subr.bf16.mxu1 %v7837_v2  ;;  %vm10864_vm14 = vmmov %vm10851_vm0  ;;  %v5317_v63 = vrot.slane %v5315_v55, 1 }
 0x3fe   : > { %7540 = vmatmul.mubr.msk.bf16.gmra.mxu0 %vm10851_vm0, %v5169_v0  ;;  %vm10865_vm9 = vmmov %vm10863_vm10  ;;  %v5318_v0 = vshll.u32 %v10292_v61, 16  ;;  %v5324_v61 = vshrl.u32 %v10348_v33, 16 }
 0x3ff   : > { %7543 = vmatprep.mubr.msk.bf16.mxu0 %vm10706_vm13, %v7837_v2  ;;  %v5459_v16 = vsel %vm10865_vm9, %v5456_v40, %v5458_v48  ;;  %vm10867_vm11 = vmmov %vm10862_vm5 }
 0x400   : > { %7554 = vmatpush3.bf16.msra.mxu1 %v7819_v14  ;;  %v5620_v9 = vsel %vm10867_vm11, %v7822_v36, 0  ;;  %vm10869_vm12 = vmmov %vm10851_vm0  ;;  %v5462_v14 = vrot.slane %v10348_v33, 2  ;;  %v5326_v12 = vrot.slane %v5324_v61, 1  ;;  %v5333_v33 = vshrl.u32 %v10370_v25, 16 }
 0x401   : > { %7599 = vmatprep.subr.bf16.mxu1 %v7837_v2  ;;  %vm10871_vm6 = vmmov %vm10851_vm0 }
 0x402   : > { %vm10873_vm7 = vmmov %vm10851_vm0 }
 0x403   : > { %7512 = vmatmul.mubr.msk.bf16.gmra.mxu1 %vm10853_vm3, %v5034_v8  ;;  %vm10866_vm3 = vmmov %vm10851_vm0  ;;  %v5320_v8 = vrot.slane %v5318_v0, 2 }
 0x404   : > { %7515 = vmatprep.mubr.msk.bf16.mxu1 %vm10706_vm13, %v7837_v2  ;;  %vm10875_vm5 = vmmov %vm10851_vm0 }
 0x405   : > { %v5321_v19 = vor.u32 %v5320_v8, %v5317_v63  ;;  %vm10881_vm11 = vmmov %vm10851_vm0 }
 0x406   : > { %7544 = vmatmul.mubr.msk.bf16.gmra.mxu0 %vm10855_vm4, %v5171_v29  ;;  %vm10868_vm4 = vsmask.f32 6400 }
 0x407   : > { %7547 = vmatprep.mubr.msk.bf16.mxu0 %vm10706_vm13, %v7837_v2  ;;  %v5304_v34 = vsel %vm10868_vm4, %v5295_v62, %v5303_v27 }
 0x40b   : > { %7516 = vmatmul.mubr.msk.bf16.gmra.mxu1 %vm10857_vm8, %v5036_v30  ;;  %vm10870_vm8 = vmmov %vm10865_vm9  ;;  %v5464_v30 = vrot.slane %v10370_v25, 2  ;;  %v7826_v25 = vld [vmem:[%s10641_s7 + $0x68] ss:$0 sps:$4 sm:$0xff]  }
 0x40c   : > { %7519 = vmatprep.mubr.msk.bf16.mxu1 %vm10706_vm13, %v7837_v2  ;;  %v5461_v56 = vsel %vm10870_vm8, %v5458_v48, %v5460_v37  ;;  %vm10878_vm2 = vmmov %vm10870_vm8 }
 0x40d   : > { %v5465_v40 = vsel %vm10878_vm2, %v5462_v14, %v5464_v30  ;;  %vm10892_vm2 = vmmov %vm10851_vm0 }
 0x40e   : > { %7548 = vmatmul.mubr.msk.bf16.gmra.mxu0 %vm10859_vm1, %v5173_v28  ;;  %vm10872_vm1 = vmmov %vm10868_vm4 }
 0x40f   : > { %7579 = vmatprep.mubr.msk.bf16.mxu0 %vm10706_vm13, %v7837_v2  ;;  %v5313_v7 = vsel %vm10872_vm1, %v5303_v27, %v5312_v11  ;;  %vm10876_vm10 = vmmov %vm10872_vm1 }
 0x410   : > { %v5322_v28 = vsel %vm10876_vm10, %v5312_v11, %v5321_v19  ;;  %vm10879_vm9 = vmmov %vm10872_vm1 }
 0x411   : > { %vm10882_vm4 = vmmov %vm10872_vm1 }
 0x412   : > { %vm10886_vm1 = vmmov %vm10851_vm0 }
 0x413   : > { %7520 = vmatmul.mubr.msk.bf16.gmra.mxu1 %vm10861_vm15, %v5038_v26  ;;  %vm10874_vm15 = vmmov %vm10870_vm8  ;;  %v5330_v26 = vor.u32 %v5329_v57, %v5326_v12 }
 0x414   : > { %7523 = vmatprep.mubr.msk.bf16.mxu1 %vm10706_vm13, %v7837_v2  ;;  %v5463_v29 = vsel %vm10874_vm15, %v5460_v37, %v5462_v14  ;;  %vm10884_vm8 = vmmov %vm10851_vm0 }
 0x415   : > { %vm10888_vm15 = vmmov %vm10851_vm0 }
 0x416   : > { %7580 = vmatmul.mubr.msk.bf16.vlgmr.msra.gmra.mxu0 %vm10864_vm14, %v5457_v3  ;;  %vm10877_vm14 = vmmov %vm10851_vm0  ;;  %v5335_v3 = vrot.slane %v5333_v33, 1 }
 0x417   : > { %7583 = vmatprep.mubr.msk.bf16.mxu0 %vm10706_vm13, %v7837_v2  ;;  %7624 = vmatpush3.bf16.msra.mxu0 %v5767_v5  ;;  %v5331_v5 = vsel %vm10879_vm9, %v5321_v19, %v5330_v26  ;;  %vm10890_vm10 = vmmov %vm10851_vm0  ;;  %vm10893_vm9 = vcmask 1045504  }
 0x418   : > { %7625 = vmatprep.subr.bf16.mxu0 %v7837_v2  ;;  %v5339_v53 = vor.u32 %v5338_v42, %v5335_v3 }
 0x41a   : > { %v5340_v50 = vsel %vm10882_vm4, %v5330_v26, %v5339_v53  ;;  %vm10896_vm4 = vmmov %vm10851_vm0 }
 0x41b   : > { %7626 = vmatpush3.bf16.msra.mxu0 %v7825_v54  ;;  %7524 = vmatmul.mubr.msk.bf16.gmra.mxu1 %vm10851_vm0, %v5040_v59  ;;  %v7827_v54 = vld [vmem:[#allocation3 + $0x30] ss:$0 sps:$4 sm:$0x77]  }
 0x41c   : > { %7555 = vmatprep.mubr.msk.bf16.mxu1 %vm10706_vm13, %v7837_v2  ;;  %v5734_v48 = vshrl.u32 %v7827_v54, 16  ;;  %v5737_v31 = vshll.u32 %v7827_v54, 16 }
 0x41e   : > { %7584 = vmatmul.mubr.msk.bf16.gmra.mxu0 %vm10866_vm3, %v5459_v16  ;;  %vm10880_vm3 = vmmov %vm10851_vm0  ;;  %v5739_v1 = vrot.slane %v5737_v31, 3 }
 0x41f   : > { %7587 = vmatprep.mubr.msk.bf16.mxu0 %vm10706_vm13, %v7837_v2 }
 0x423   : > { %7556 = vmatmul.mubr.msk.bf16.vlgmr.msra.gmra.mxu1 %vm10869_vm12, %v5304_v34  ;;  %vm10883_vm12 = vmmov %vm10851_vm0 }
 0x424   : > { %7600 = vmatpush3.bf16.msra.mxu1 %v5620_v9  ;;  %7559 = vmatprep.mubr.msk.bf16.mxu1 %vm10706_vm13, %v7837_v2 }
 0x425   : > { %7601 = vmatprep.subr.bf16.mxu1 %v7837_v2 }
 0x426   : > { %7588 = vmatmul.mubr.msk.bf16.gmra.mxu0 %vm10871_vm6, %v5461_v56  ;;  %vm10885_vm6 = vcmask 1043456  }
 0x427   : > { %7591 = vmatprep.mubr.msk.bf16.mxu0 %vm10706_vm13, %v7837_v2 }
 0x428   : > { %7602 = vmatpush3.bf16.msra.mxu1 %v7823_v10 }
 0x429   : > { %7647 = vmatprep.subr.bf16.mxu1 %v7837_v2 }
 0x42b   : > { %7560 = vmatmul.mubr.msk.bf16.gmra.mxu1 %vm10873_vm7, %v5313_v7  ;;  %vm10887_vm7 = vmmov %vm10851_vm0 }
 0x42c   : > { %7563 = vmatprep.mubr.msk.bf16.mxu1 %vm10706_vm13, %v7837_v2 }
 0x42e   : > { %7592 = vmatmul.mubr.msk.bf16.gmra.mxu0 %vm10875_vm5, %v5463_v29  ;;  %vm10889_vm5 = vmmov %vm10851_vm0 }
 0x42f   : > { %7595 = vmatprep.mubr.msk.bf16.mxu0 %vm10706_vm13, %v7837_v2 }
 0x433   : > { %7564 = vmatmul.mubr.msk.bf16.gmra.mxu1 %vm10877_vm14, %v5322_v28  ;;  %vm10891_vm14 = vsmask.f32 5376 }
 0x434   : > { %7567 = vmatprep.mubr.msk.bf16.mxu1 %vm10706_vm13, %v7837_v2 }
 0x436   : > { %7596 = vmatmul.mubr.msk.bf16.gmra.mxu0 %vm10851_vm0, %v5465_v40 }
 0x437   : > { %7627 = vmatprep.mubr.msk.bf16.mxu0 %vm10706_vm13, %v7837_v2 }
 0x43b   : > { %7568 = vmatmul.mubr.msk.bf16.gmra.mxu1 %vm10880_vm3, %v5331_v5  ;;  %vm10894_vm3 = vmmov %vm10851_vm0 }
 0x43c   : > { %7571 = vmatprep.mubr.msk.bf16.mxu1 %vm10706_vm13, %v7837_v2 }
 0x43e   : > { %7628 = vmatmul.mubr.msk.bf16.vlgmr.msra.gmra.mxu0 %vm10881_vm11, %v10272_v44  ;;  %v5892_v44 = vsel %vm10885_vm6, %v7826_v25, 0  ;;  %vm10895_vm11 = vmmov %vm10851_vm0  ;;  %vm10899_vm6 = vcmask 1044480  }
 0x43f   : > { %7631 = vmatprep.mubr.msk.bf16.mxu0 %vm10706_vm13, %v7837_v2 }
 0x443   : > { %7572 = vmatmul.mubr.msk.bf16.gmra.mxu1 %vm10883_vm12, %v5340_v50  ;;  %vm10897_vm12 = vmmov %vm10851_vm0 }
 0x444   : > { %7603 = vmatprep.mubr.msk.bf16.mxu1 %vm10706_vm13, %v7837_v2 }
 0x446   : > { %7632 = vmatmul.mubr.msk.bf16.gmra.mxu0 %vm10884_vm8, %v10282_v41  ;;  %v7828_v41 = vld [vmem:[%s10641_s7 + $0x60] sm:$0xff]   ;;  %vm10898_vm8 = vmmov %vm10851_vm0 }
 0x447   : > { %7635 = vmatprep.mubr.msk.bf16.mxu0 %vm10706_vm13, %v7837_v2 }
 0x44b   : > { %7604 = vmatmul.mubr.msk.bf16.vlgmr.msra.gmra.mxu1 %vm10886_vm1, %v10285_v23  ;;  %v5736_v23 = vrot.slane %v5734_v48, 2  ;;  %vm10900_vm1 = vmmov %vm10851_vm0 }
 0x44c   : > { %7648 = vmatpush3.bf16.msra.mxu1 %v5892_v44  ;;  %7607 = vmatprep.mubr.msk.bf16.mxu1 %vm10706_vm13, %v7837_v2 }
 0x44d   : > { %7649 = vmatprep.subr.bf16.mxu1 %v7837_v2 }
 0x44e   : > { %7636 = vmatmul.mubr.msk.bf16.gmra.mxu0 %vm10887_vm7, %v10307_v46  ;;  %v5740_v46 = vor.u32 %v5739_v1, %v5736_v23 }
 0x44f   : > { %7639 = vmatprep.mubr.msk.bf16.mxu0 %vm10706_vm13, %v7837_v2 }
 0x450   : > { %7650 = vmatpush3.bf16.msra.mxu1 %v7828_v41  ;;  %v5741_v59 = vsel %vm10891_vm14, %v10315_v43, %v5740_v46 }
 0x453   : > { %7608 = vmatmul.mubr.msk.bf16.gmra.mxu1 %vm10888_vm15, %v10295_v60  ;;  %v5593_v60 = vrot.slane %v7827_v54, 2 }
 0x454   : > { %7611 = vmatprep.mubr.msk.bf16.mxu1 %vm10706_vm13, %v7837_v2 }
 0x456   : > { %7640 = vmatmul.mubr.msk.bf16.gmra.mxu0 %vm10889_vm5, %v10334_v18  ;;  %v5594_v18 = vsel %vm10893_vm9, %v5591_v58, %v5593_v60 }
 0x457   : > { %7643 = vmatprep.mubr.msk.bf16.mxu0 %vm10706_vm13, %v7837_v2 }
 0x45b   : > { %7612 = vmatmul.mubr.msk.bf16.gmra.mxu1 %vm10890_vm10, %v10310_v17 }
 0x45c   : > { %7615 = vmatprep.mubr.msk.bf16.mxu1 %vm10706_vm13, %v7837_v2 }
 0x45e   : > { %7644 = vmatmul.mubr.msk.bf16.gmra.mxu0 %vm10892_vm2, %v5741_v59 }
 0x463   : > { %7616 = vmatmul.mubr.msk.bf16.gmra.mxu1 %vm10851_vm0, %v10320_v49 }
 0x464   : > { %7619 = vmatprep.mubr.msk.bf16.mxu1 %vm10706_vm13, %v7837_v2 }
 0x46b   : > { %7620 = vmatmul.mubr.msk.bf16.gmra.mxu1 %vm10894_vm3, %v5594_v18 }
 0x46c   : > { %7651 = vmatprep.mubr.msk.bf16.mxu1 %vm10706_vm13, %v7837_v2 }
 0x473   : > { %7652 = vmatmul.mubr.msk.bf16.vlgmr.msra.gmra.mxu1 %vm10895_vm11, %v10325_v39 }
 0x474   : > { %7655 = vmatprep.mubr.msk.bf16.mxu1 %vm10706_vm13, %v7837_v2 }
 0x47b   : > { %7656 = vmatmul.mubr.msk.bf16.gmra.mxu1 %vm10896_vm4, %v10328_v13  ;;  %v5865_v13 = vrot.slane %v7827_v54, 3 }
 0x47c   : > { %7659 = vmatprep.mubr.msk.bf16.mxu1 %vm10706_vm13, %v7837_v2 }
 0x483   : > { %7660 = vmatmul.mubr.msk.bf16.gmra.mxu1 %vm10897_vm12, %v10337_v6  ;;  %v5866_v6 = vsel %vm10899_vm6, %v5863_v21, %v5865_v13 }
 0x484   : > { %7663 = vmatprep.mubr.msk.bf16.mxu1 %vm10706_vm13, %v7837_v2 }
 0x486   : > { %v4987_v58 = vpop.f32.mrf.mxu0 }
 0x488   : > { %v7485_v17 = vpop.f32.mrf.mxu0 }
 0x48a   : > { %v4990_v43 = vpop.f32.mrf.mxu0 }
 0x48b   : > { %7664 = vmatmul.mubr.msk.bf16.gmra.mxu1 %vm10898_vm8, %v10343_v20 }
 0x48c   : > { %v7486_v49 = vpop.f32.mrf.mxu0  ;;  %7667 = vmatprep.mubr.msk.bf16.mxu1 %vm10706_vm13, %v7837_v2  ;;  %vm6004_vm13 = vcmask 7168  }
 0x48e   : > { %v4995_v39 = vpop.f32.mrf.mxu0 }
 0x490   : > { %v7489_v22 = vpop.f32.mrf.mxu0 }
 0x492   : > { %v4998_v47 = vpop.f32.mrf.mxu0 }
 0x493   : > { %v4892_v16 = vpop.f32.mrf.mxu1  ;;  %7668 = vmatmul.mubr.msk.bf16.gmra.mxu1 %vm10900_vm1, %v5866_v6 }
 0x494   : > { %v7490_v35 = vpop.f32.mrf.mxu0  ;;  %v4988_v52 = vadd.f32 %v4987_v58, %v4892_v16 }
 0x495   : > { %v7461_v36 = vpop.f32.mrf.mxu1 }
 0x496   : > { %v5003_v27 = vpop.f32.mrf.mxu0 }
 0x497   : > { %v4895_v20 = vpop.f32.mrf.mxu1 }
 0x498   : > { %v7493_v32 = vpop.f32.mrf.mxu0  ;;  %v4991_v45 = vadd.f32 %v4990_v43, %v4895_v20 }
 0x499   : > { %v7462_v62 = vpop.f32.mrf.mxu1 }
 0x49a   : > { %v5006_v2 = vpop.f32.mrf.mxu0 }
 0x49b   : > { %v4900_v37 = vpop.f32.mrf.mxu1 }
 0x49c   : > { %v7494_v9 = vpop.f32.mrf.mxu0  ;;  %v4996_v34 = vadd.f32 %v4995_v39, %v4900_v37 }
 0x49d   : > { %v7465_v38 = vpop.f32.mrf.mxu1 }
 0x49e   : > { %v5011_v4 = vpop.f32.mrf.mxu0 }
 0x49f   : > { %v4903_v15 = vpop.f32.mrf.mxu1 }
 0x4a0   : > { %v7497_v56 = vpop.f32.mrf.mxu0  ;;  %v4999_v21 = vadd.f32 %v4998_v47, %v4903_v15 }
 0x4a1   : > { %v7466_v10 = vpop.f32.mrf.mxu1 }
 0x4a2   : > { %v5014_v11 = vpop.f32.mrf.mxu0 }
 0x4a3   : > { %v4908_v55 = vpop.f32.mrf.mxu1 }
 0x4a4   : > { %v7498_v0 = vpop.f32.mrf.mxu0  ;;  %v5004_v14 = vadd.f32 %v5003_v27, %v4908_v55 }
 0x4a5   : > { %v7469_v7 = vpop.f32.mrf.mxu1 }
 0x4a6   : > { %v5019_v63 = vpop.f32.mrf.mxu0 }
 0x4a7   : > { %v4911_v8 = vpop.f32.mrf.mxu1 }
 0x4a8   : > { %v7501_v29 = vpop.f32.mrf.mxu0  ;;  %v5007_v19 = vadd.f32 %v5006_v2, %v4911_v8 }
 0x4a9   : > { %v7470_v61 = vpop.f32.mrf.mxu1 }
 0x4aa   : > { %v5022_v24 = vpop.f32.mrf.mxu0 }
 0x4ab   : > { %v4916_v30 = vpop.f32.mrf.mxu1 }
 0x4ac   : > { %v7502_v28 = vpop.f32.mrf.mxu0  ;;  %v5012_v12 = vadd.f32 %v5011_v4, %v4916_v30 }
 0x4ad   : > { %v7473_v57 = vpop.f32.mrf.mxu1 }
 0x4ae   : > { %v5235_v40 = vpop.f32.mrf.mxu0 }
 0x4af   : > { %v4919_v26 = vpop.f32.mrf.mxu1 }
 0x4b0   : > { %v7533_v33 = vpop.f32.mrf.mxu0  ;;  %v5015_v51 = vadd.f32 %v5014_v11, %v4919_v26 }
 0x4b1   : > { %v7474_v5 = vpop.f32.mrf.mxu1 }
 0x4b2   : > { %v5238_v3 = vpop.f32.mrf.mxu0 }
 0x4b3   : > { %v4924_v42 = vpop.f32.mrf.mxu1 }
 0x4b4   : > { %v7534_v53 = vpop.f32.mrf.mxu0  ;;  %v5020_v50 = vadd.f32 %v5019_v63, %v4924_v42 }
 0x4b5   : > { %v7477_v25 = vpop.f32.mrf.mxu1 }
 0x4b6   : > { %v5243_v44 = vpop.f32.mrf.mxu0 }
 0x4b7   : > { %v4927_v54 = vpop.f32.mrf.mxu1 }
 0x4b8   : > { %v7537_v41 = vpop.f32.mrf.mxu0  ;;  %v5023_v48 = vadd.f32 %v5022_v24, %v4927_v54 }
 0x4b9   : > { %v7478_v31 = vpop.f32.mrf.mxu1 }
 0x4ba   : > { %v5246_v23 = vpop.f32.mrf.mxu0 }
 0x4bb   : > { %v5102_v1 = vpop.f32.mrf.mxu1 }
 0x4bc   : > { %v7538_v46 = vpop.f32.mrf.mxu0  ;;  %v5141_v59 = vadd.f32 %v5102_v1, %v4988_v52 }
 0x4bd   : > { %v7509_v60 = vpop.f32.mrf.mxu1 }
 0x4be   : > { %v5251_v18 = vpop.f32.mrf.mxu0  ;;  %v5274_v58 = vadd.f32 %v5235_v40, %v5141_v59 }
 0x4bf   : > { %v5105_v17 = vpop.f32.mrf.mxu1 }
 0x4c0   : > { %v7541_v43 = vpop.f32.mrf.mxu0  ;;  %v5142_v49 = vadd.f32 %v5105_v17, %v4991_v45 }
 0x4c1   : > { %v7510_v39 = vpop.f32.mrf.mxu1 }
 0x4c2   : > { %v5254_v13 = vpop.f32.mrf.mxu0  ;;  %v5275_v22 = vadd.f32 %v5238_v3, %v5142_v49 }
 0x4c3   : > { %v5110_v47 = vpop.f32.mrf.mxu1 }
 0x4c4   : > { %v7542_v6 = vpop.f32.mrf.mxu0  ;;  %v5143_v16 = vadd.f32 %v5110_v47, %v4996_v34 }
 0x4c5   : > { %v7513_v35 = vpop.f32.mrf.mxu1 }
 0x4c6   : > { %v5259_v36 = vpop.f32.mrf.mxu0  ;;  %v5276_v27 = vadd.f32 %v5243_v44, %v5143_v16 }
 0x4c7   : > { %v5113_v20 = vpop.f32.mrf.mxu1 }
 0x4c8   : > { %v7545_v32 = vpop.f32.mrf.mxu0  ;;  %v5144_v62 = vadd.f32 %v5113_v20, %v4999_v21 }
 0x4c9   : > { %v7514_v2 = vpop.f32.mrf.mxu1 }
 0x4ca   : > { %v5262_v52 = vpop.f32.mrf.mxu0  ;;  %v5277_v37 = vadd.f32 %v5246_v23, %v5144_v62 }
 0x4cb   : > { %v5118_v9 = vpop.f32.mrf.mxu1 }
 0x4cc   : > { %v7546_v38 = vpop.f32.mrf.mxu0  ;;  %v5145_v4 = vadd.f32 %v5118_v9, %v5004_v14 }
 0x4cd   : > { %v7517_v15 = vpop.f32.mrf.mxu1 }
 0x4ce   : > { %v5267_v45 = vpop.f32.mrf.mxu0  ;;  %v5278_v56 = vadd.f32 %v5251_v18, %v5145_v4 }
 0x4cf   : > { %v5121_v10 = vpop.f32.mrf.mxu1 }
 0x4d0   : > { %v7549_v11 = vpop.f32.mrf.mxu0  ;;  %v5146_v55 = vadd.f32 %v5121_v10, %v5007_v19 }
 0x4d1   : > { %v7518_v0 = vpop.f32.mrf.mxu1 }
 0x4d2   : > { %v5270_v34 = vpop.f32.mrf.mxu0  ;;  %v5279_v7 = vadd.f32 %v5254_v13, %v5146_v55 }
 0x4d3   : > { %v5126_v63 = vpop.f32.mrf.mxu1 }
 0x4d4   : > { %v7550_v8 = vpop.f32.mrf.mxu0  ;;  %v5147_v29 = vadd.f32 %v5126_v63, %v5012_v12 }
 0x4d5   : > { %v7521_v61 = vpop.f32.mrf.mxu1 }
 0x4d6   : > { %v5527_v21 = vpop.f32.mrf.mxu0  ;;  %v5280_v24 = vadd.f32 %v5259_v36, %v5147_v29 }
 0x4d7   : > { %v5129_v30 = vpop.f32.mrf.mxu1 }
 0x4d8   : > { %v7581_v28 = vpop.f32.mrf.mxu0  ;;  %v5148_v57 = vadd.f32 %v5129_v30, %v5015_v51 }
 0x4d9   : > { %v7522_v40 = vpop.f32.mrf.mxu1 }
 0x4da   : > { %v5530_v14 = vpop.f32.mrf.mxu0  ;;  %v5281_v26 = vadd.f32 %v5262_v52, %v5148_v57 }
 0x4db   : > { %v5134_v33 = vpop.f32.mrf.mxu1 }
 0x4dc   : > { %v7582_v5 = vpop.f32.mrf.mxu0  ;;  %v5149_v3 = vadd.f32 %v5134_v33, %v5020_v50 }
 0x4dd   : > { %v7525_v42 = vpop.f32.mrf.mxu1 }
 0x4de   : > { %v5535_v19 = vpop.f32.mrf.mxu0  ;;  %v5282_v53 = vadd.f32 %v5267_v45, %v5149_v3 }
 0x4df   : > { %v5137_v25 = vpop.f32.mrf.mxu1 }
 0x4e0   : > { %v7585_v44 = vpop.f32.mrf.mxu0  ;;  %v5150_v54 = vadd.f32 %v5137_v25, %v5023_v48 }
 0x4e1   : > { %v7526_v41 = vpop.f32.mrf.mxu1 }
 0x4e2   : > { %v5538_v12 = vpop.f32.mrf.mxu0  ;;  %v5283_v31 = vadd.f32 %v5270_v34, %v5150_v54 }
 0x4e3   : > { %v5402_v23 = vpop.f32.mrf.mxu1 }
 0x4e4   : > { %v7586_v1 = vpop.f32.mrf.mxu0  ;;  %v5441_v46 = vadd.f32 %v5402_v23, %v5274_v58 }
 0x4e5   : > { %v7557_v59 = vpop.f32.mrf.mxu1 }
 0x4e6   : > { %v5543_v51 = vpop.f32.mrf.mxu0  ;;  %v10539_v60 = vadd.f32 %v5527_v21, %v5441_v46 }
 0x4e7   : > { %v5405_v18 = vpop.f32.mrf.mxu1 }
 0x4e8   : > { %v7589_v17 = vpop.f32.mrf.mxu0  ;;  %v5442_v43 = vadd.f32 %v5405_v18, %v5275_v22 }
 0x4e9   : > { %v7558_v50 = vpop.f32.mrf.mxu1 }
 0x4ea   : > { %v5546_v49 = vpop.f32.mrf.mxu0  ;;  %v10541_v39 = vadd.f32 %v5530_v14, %v5442_v43 }
 0x4eb   : > { %v5410_v13 = vpop.f32.mrf.mxu1 }
 0x4ec   : > { %v7590_v47 = vpop.f32.mrf.mxu0  ;;  %v5443_v48 = vadd.f32 %v5410_v13, %v5276_v27 }
 0x4ed   : > { %v7561_v6 = vpop.f32.mrf.mxu1 }
 0x4ee   : > { %v5551_v16 = vpop.f32.mrf.mxu0  ;;  %v10543_v35 = vadd.f32 %v5535_v19, %v5443_v48 }
 0x4ef   : > { %v5413_v36 = vpop.f32.mrf.mxu1 }
 0x4f0   : > { %v7593_v58 = vpop.f32.mrf.mxu0  ;;  %v5444_v20 = vadd.f32 %v5413_v36, %v5277_v37 }
 0x4f1   : > { %v7562_v32 = vpop.f32.mrf.mxu1 }
 0x4f2   : > { %v5554_v62 = vpop.f32.mrf.mxu0  ;;  %v10545_v2 = vadd.f32 %v5538_v12, %v5444_v20 }
 0x4f3   : > { %v5418_v52 = vpop.f32.mrf.mxu1 }
 0x4f4   : > { %v7594_v22 = vpop.f32.mrf.mxu0  ;;  %v5445_v9 = vadd.f32 %v5418_v52, %v5278_v56 }
 0x4f5   : > { %v7565_v38 = vpop.f32.mrf.mxu1 }
 0x4f6   : > { %v5559_v4 = vpop.f32.mrf.mxu0  ;;  %v10547_v15 = vadd.f32 %v5543_v51, %v5445_v9 }
 0x4f7   : > { %v5421_v45 = vpop.f32.mrf.mxu1 }
 0x4f8   : > { %v7597_v27 = vpop.f32.mrf.mxu0  ;;  %v5446_v10 = vadd.f32 %v5421_v45, %v5279_v7 }
 0x4f9   : > { %v7566_v11 = vpop.f32.mrf.mxu1 }
 0x4fa   : > { %v5562_v55 = vpop.f32.mrf.mxu0  ;;  %v10549_v0 = vadd.f32 %v5546_v49, %v5446_v10 }
 0x4fb   : > { %v5426_v34 = vpop.f32.mrf.mxu1 }
 0x4fc   : > { %v7598_v37 = vpop.f32.mrf.mxu0  ;;  %v5447_v63 = vadd.f32 %v5426_v34, %v5280_v24 }
 0x4fd   : > { %v7569_v8 = vpop.f32.mrf.mxu1 }
 0x4fe   : > { %v5803_v29 = vpop.f32.mrf.mxu0  ;;  %v10551_v61 = vadd.f32 %v5551_v16, %v5447_v63  ;;  %v10578_v8 = vld [vmem:[#allocation4] ss:$0 sm:$0xff] }
 0x4ff   : > { %v5429_v21 = vpop.f32.mrf.mxu1 }
 0x500   : > { %v7629_v56 = vpop.f32.mrf.mxu0  ;;  %v5448_v30 = vadd.f32 %v5429_v21, %v5281_v26 }
 0x501   : > { %v7570_v28 = vpop.f32.mrf.mxu1 }
 0x502   : > { %v5806_v57 = vpop.f32.mrf.mxu0  ;;  %v10553_v40 = vadd.f32 %v5554_v62, %v5448_v30 }
 0x503   : > { %v5434_v14 = vpop.f32.mrf.mxu1 }
 0x504   : > { %v7630_v7 = vpop.f32.mrf.mxu0  ;;  %v5449_v33 = vadd.f32 %v5434_v14, %v5282_v53 }
 0x505   : > { %v7573_v5 = vpop.f32.mrf.mxu1 }
 0x506   : > { %v5811_v3 = vpop.f32.mrf.mxu0  ;;  %v10555_v42 = vadd.f32 %v5559_v4, %v5449_v33 }
 0x507   : > { %v5437_v19 = vpop.f32.mrf.mxu1 }
 0x508   : > { %v7633_v24 = vpop.f32.mrf.mxu0  ;;  %v5450_v25 = vadd.f32 %v5437_v19, %v5283_v31 }
 0x509   : > { %v7574_v44 = vpop.f32.mrf.mxu1 }
 0x50a   : > { %v10557_v54 = vpop.f32.mrf.mxu0  ;;  %v10559_v41 = vadd.f32 %v5562_v55, %v5450_v25 }
 0x50b   : > { %v5656_v26 = vpop.f32.mrf.mxu1 }
 0x50c   : > { %v7634_v12 = vpop.f32.mrf.mxu0  ;;  %v5695_v10 = vadd.f32 %v5656_v26, %v10539_v60 }
 0x50d   : > { %v7605_v23 = vpop.f32.mrf.mxu1 }
 0x50e   : > { %v10561_v1 = vpop.f32.mrf.mxu0  ;;  %v5842_v37 = vadd.f32 %v5803_v29, %v5695_v10 }
 0x50f   : > { %v5659_v46 = vpop.f32.mrf.mxu1 }
 0x510   : > { %v7637_v59 = vpop.f32.mrf.mxu0  ;;  %v5696_v34 = vadd.f32 %v5659_v46, %v10541_v39 }
 0x511   : > { %v7606_v53 = vpop.f32.mrf.mxu1 }
 0x512   : > { %v10563_v51 = vpop.f32.mrf.mxu0  ;;  %v5843_v14 = vadd.f32 %v5806_v57, %v5696_v34 }
 0x513   : > { %v5664_v18 = vpop.f32.mrf.mxu1 }
 0x514   : > { %v7638_v17 = vpop.f32.mrf.mxu0  ;;  %v5697_v30 = vadd.f32 %v5664_v18, %v10543_v35 }
 0x515   : > { %v7609_v43 = vpop.f32.mrf.mxu1 }
 0x516   : > { %v10565_v50 = vpop.f32.mrf.mxu0  ;;  %v5844_v57 = vadd.f32 %v5811_v3, %v5697_v30 }
 0x517   : > { %v5667_v31 = vpop.f32.mrf.mxu1 }
 0x518   : > { %v7641_v49 = vpop.f32.mrf.mxu0  ;;  %v5698_v33 = vadd.f32 %v5667_v31, %v10545_v2 }
 0x519   : > { %v7610_v13 = vpop.f32.mrf.mxu1 }
 0x51a   : > { %v10567_v47 = vpop.f32.mrf.mxu0  ;;  %v5845_v12 = vadd.f32 %v10557_v54, %v5698_v33 }
 0x51b   : > { %v5672_v48 = vpop.f32.mrf.mxu1 }
 0x51c   : > { %v7642_v6 = vpop.f32.mrf.mxu0  ;;  %v5699_v44 = vadd.f32 %v5672_v48, %v10547_v15 }
 0x51d   : > { %v7613_v16 = vpop.f32.mrf.mxu1 }
 0x51e   : > { %v10569_v36 = vpop.f32.mrf.mxu0  ;;  %v5846_v15 = vadd.f32 %v10561_v1, %v5699_v44 }
 0x51f   : > { %v5675_v58 = vpop.f32.mrf.mxu1 }
 0x520   : > { %v7645_v20 = vpop.f32.mrf.mxu0  ;;  %v5700_v53 = vadd.f32 %v5675_v58, %v10549_v0 }
 0x521   : > { %v7614_v32 = vpop.f32.mrf.mxu1 }
 0x522   : > { %v10571_v62 = vpop.f32.mrf.mxu0  ;;  %v5847_v0 = vadd.f32 %v10563_v51, %v5700_v53 }
 0x523   : > { %v5680_v52 = vpop.f32.mrf.mxu1 }
 0x524   : > { %v7646_v22 = vpop.f32.mrf.mxu0  ;;  %v5701_v49 = vadd.f32 %v5680_v52, %v10551_v61 }
 0x525   : > { %v7617_v9 = vpop.f32.mrf.mxu1 }
 0x526   : > { %v5848_v61 = vadd.f32 %v10565_v50, %v5701_v49 }
 0x527   : > { %v5683_v38 = vpop.f32.mrf.mxu1 }
 0x528   : > { %v5702_v58 = vadd.f32 %v5683_v38, %v10553_v40 }
 0x529   : > { %v7618_v4 = vpop.f32.mrf.mxu1 }
 0x52a   : > { %v5849_v40 = vadd.f32 %v10567_v47, %v5702_v58 }
 0x52b   : > { %v5688_v45 = vpop.f32.mrf.mxu1 }
 0x52c   : > { %v5703_v9 = vadd.f32 %v5688_v45, %v10555_v42 }
 0x52d   : > { %v7621_v27 = vpop.f32.mrf.mxu1 }
 0x52e   : > { %v5850_v42 = vadd.f32 %v10569_v36, %v5703_v9 }
 0x52f   : > { %v10574_v11 = vpop.f32.mrf.mxu1 }
 0x530   : > { %v5704_v50 = vadd.f32 %v10574_v11, %v10559_v41 }
 0x531   : > { %v7622_v55 = vpop.f32.mrf.mxu1 }
 0x533   : > { %v5928_v63 = vpop.f32.mrf.mxu1 }
 0x534   : > { %v5967_v21 = vadd.f32 %v5928_v63, %v5842_v37 }
 0x535   : > { %v7653_v56 = vpop.f32.mrf.mxu1 }
 0x536   : > { %v5984_v28 = vadd.f32 %v10578_v8, %v5967_v21  ;;  %v5851_v21 = vadd.f32 %v10571_v62, %v5704_v50 }
 0x537   : > { %v5931_v60 = vpop.f32.mrf.mxu1 }
 0x538   : > { %v5994_v39 = vmax.f32 %v5984_v28, 0.0  ;;  %v5968_v29 = vadd.f32 %v5931_v60, %v5843_v14 }
 0x539   : > { %v7654_v7 = vpop.f32.mrf.mxu1 }
 0x53a   : > { %6005 = vst.msk [vmem:[%s10585_s13] sm:$0xff] %vm6004_vm13, %v5994_v39  ;;  %v5985_v35 = vadd.f32 %v10578_v8, %v5968_v29 }
 0x53b   : > { %v5936_v5 = vpop.f32.mrf.mxu1 }
 0x53c   : > { %v5995_v19 = vmax.f32 %v5985_v35, 0.0  ;;  %v5969_v24 = vadd.f32 %v5936_v5, %v5844_v57 }
 0x53d   : > { %v7657_v25 = vpop.f32.mrf.mxu1 }
 0x53e   : > { %6006 = vst.msk [vmem:[%s10585_s13 + $0x8] sm:$0xff] %vm6004_vm13, %v5995_v19  ;;  %v5986_v26 = vadd.f32 %v10578_v8, %v5969_v24 }
 0x53f   : > { %v5939_v2 = vpop.f32.mrf.mxu1 }
 0x540   : > { %v5996_v23 = vmax.f32 %v5986_v26, 0.0  ;;  %v5970_v46 = vadd.f32 %v5939_v2, %v5845_v12 }
 0x541   : > { %v7658_v59 = vpop.f32.mrf.mxu1 }
 0x542   : > { %6007 = vst.msk [vmem:[%s10585_s13 + $0x10] sm:$0xff] %vm6004_vm13, %v5996_v23  ;;  %v5987_v3 = vadd.f32 %v10578_v8, %v5970_v46 }
 0x543   : > { %v5944_v18 = vpop.f32.mrf.mxu1 }
 0x544   : > { %v5997_v17 = vmax.f32 %v5987_v3, 0.0  ;;  %v5971_v43 = vadd.f32 %v5944_v18, %v5846_v15 }
 0x545   : > { %v7661_v31 = vpop.f32.mrf.mxu1 }
 0x546   : > { %6008 = vst.msk [vmem:[%s10585_s13 + $0x18] sm:$0xff] %vm6004_vm13, %v5997_v17  ;;  %v5988_v54 = vadd.f32 %v10578_v8, %v5971_v43 }
 0x547   : > { %v5947_v13 = vpop.f32.mrf.mxu1 }
 0x548   : > { %v5998_v48 = vmax.f32 %v5988_v54, 0.0  ;;  %v5972_v6 = vadd.f32 %v5947_v13, %v5847_v0 }
 0x549   : > { %v7662_v16 = vpop.f32.mrf.mxu1 }
 0x54a   : > { %6009 = vst.msk [vmem:[%s10585_s13 + $0x20] sm:$0xff] %vm6004_vm13, %v5998_v48  ;;  %v5989_v1 = vadd.f32 %v10578_v8, %v5972_v6 }
 0x54b   : > { %v5952_v20 = vpop.f32.mrf.mxu1 }
 0x54c   : > { %v5999_v32 = vmax.f32 %v5989_v1, 0.0  ;;  %v5973_v52 = vadd.f32 %v5952_v20, %v5848_v61 }
 0x54d   : > { %v7665_v22 = vpop.f32.mrf.mxu1 }
 0x54e   : > { %6010 = vst.msk [vmem:[%s10585_s13 + $0x28] sm:$0xff] %vm6004_vm13, %v5999_v32  ;;  %v5990_v51 = vadd.f32 %v10578_v8, %v5973_v52 }
 0x54f   : > { %v5955_v38 = vpop.f32.mrf.mxu1 }
 0x550   : > { %v6000_v4 = vmax.f32 %v5990_v51, 0.0  ;;  %v5974_v27 = vadd.f32 %v5955_v38, %v5849_v40 }
 0x551   : > { %v7666_v10 = vpop.f32.mrf.mxu1 }
 0x552   : > { %6011 = vst.msk [vmem:[%s10585_s13 + $0x30] sm:$0xff] %vm6004_vm13, %v6000_v4  ;;  %v5991_v55 = vadd.f32 %v10578_v8, %v5974_v27 }
 0x553   : > { %v5960_v45 = vpop.f32.mrf.mxu1 }
 0x554   : > { %v6001_v34 = vmax.f32 %v5991_v55, 0.0  ;;  %v5975_v37 = vadd.f32 %v5960_v45, %v5850_v42 }
 0x555   : > { %v7669_v63 = vpop.f32.mrf.mxu1 }
 0x556   : > { %6012 = vst.msk [vmem:[%s10585_s13 + $0x38] sm:$0xff] %vm6004_vm13, %v6001_v34  ;;  %v5992_v47 = vadd.f32 %v10578_v8, %v5975_v37 }
 0x557   : > { %v5963_v56 = vpop.f32.mrf.mxu1 }
 0x558   : > { %v6002_v30 = vmax.f32 %v5992_v47, 0.0  ;;  %v5976_v41 = vadd.f32 %v5963_v56, %v5851_v21 }
 0x559   : > { %v7670_v11 = vpop.f32.mrf.mxu1 }
 0x55a   : > { %6013 = vst.msk [vmem:[%s10585_s13 + $0x40] sm:$0xff] %vm6004_vm13, %v6002_v30  ;;  %v5993_v28 = vadd.f32 %v10578_v8, %v5976_v41 }
 0x55c   : > { %v6003_v14 = vmax.f32 %v5993_v28, 0.0 }
 0x55e   : > { %6014 = vst.msk [vmem:[%s10585_s13 + $0x48] sm:$0xff] %vm6004_vm13, %v6003_v14 }
 0x55f PF: > { %s21_s11 = sadd.s32 1, %s7835_s11  }
 0x560   : > { %p18_p4 = scmp.ge.s32.totalorder %s21_s11, 4  }
 0x562   :  { %20 = sbr.rel (!%p18_p4) target bundleno = 3 (0x3), region = 121 }

</bundles_post_ra>
